<compile_context>
chip_gen: v6e
topology: v6e:2x2x1
jax: 0.10.0
libtpu: 0.0.40
codegen_flags: <defaults>
</compile_context>

<pallas_src>
import functools

import numpy as np

import jax
import jax.numpy as jnp
from jax import lax
from jax.experimental import pallas as pl
from jax.experimental.pallas import tpu as pltpu

LEAKY_SLOPE = 0.1          # matches nn.LeakyReLU(0.1) in the PyTorch module
BN_EPS = 1e-5
LANES = 128                # uniform lane width for conv activations
HP = 128                   # LSTM hidden padded to 128 lanes per gate/direction
NEG_BIG = -1e30
VMEM_LIMIT = 32 * 1024 * 1024

_VMEM = pl.BlockSpec(memory_space=pltpu.MemorySpace.VMEM)


def _round_up(a, m):
    return ((a + m - 1) // m) * m


def _leaky(y):
    return jnp.where(y >= 0.0, y, LEAKY_SLOPE * y)


# ---------------------------------------------------------------------------
# Fused conv stack kernel (8 conv+BN+LeakyReLU layers + 3 maxpools, per batch)
# ---------------------------------------------------------------------------

def _wpool_pairs(y):
    # (rows, 128): pairwise max of adjacent lanes.  Valid pooled values end up
    # at even within-channel lane offsets; the decimation is folded into the
    # consumer's (band / LSTM input) weight, so no lane compaction is needed.
    ysh = jnp.concatenate([y[:, 1:], y[:, :1]], axis=1)
    return jnp.maximum(y, ysh)


def _hpool_compact(y):
    # (2*hq, 128) f32 -> (hq, 128) f32: pairwise max of adjacent rows, then
    # compact even rows with a tiny selection matmul (MXU slot; avoids strided
    # sublane relayouts).
    n = y.shape[0]
    hq = n // 2
    ysh = jnp.concatenate([y[1:, :], y[:1, :]], axis=0)
    m = jnp.maximum(y, ysh).astype(jnp.bfloat16)
    r = lax.broadcasted_iota(jnp.int32, (hq, n), 0)
    c = lax.broadcasted_iota(jnp.int32, (hq, n), 1)
    sel = (c == 2 * r).astype(jnp.bfloat16)
    return jnp.dot(sel, m, preferred_element_type=jnp.float32)


def _conv_stack_kernel(x_ref, wb_ref, sh_ref, o_ref, *scratch, row_cfg):
    # x_ref:  (H+2, 128) f32, rows 0 / H+1 zero (H padding), lanes = cin*W + w
    # wb_ref: (8, 3, 128, 128) bf16 band weights (BN scale folded in)
    # sh_ref: (8, 1, 128) f32 folded conv-bias / BN shift per output lane
    # o_ref:  (T, 128) bf16 final activations (lane layout consumed by the LSTM)
    # scratch: 7 f32 buffers (valid_rows_l + 2, 128) for inter-layer activations
    for s in scratch:
        s[...] = jnp.zeros_like(s)          # keeps the H-padding rows zero
    srcs = (x_ref,) + scratch
    n_layers = len(row_cfg)
    for l, (ho, pool) in enumerate(row_cfg):
        src = srcs[l]
        acc = jnp.dot(src[0:ho, :].astype(jnp.bfloat16), wb_ref[l, 0],
                      preferred_element_type=jnp.float32)
        acc = acc + jnp.dot(src[1:ho + 1, :].astype(jnp.bfloat16), wb_ref[l, 1],
                            preferred_element_type=jnp.float32)
        acc = acc + jnp.dot(src[2:ho + 2, :].astype(jnp.bfloat16), wb_ref[l, 2],
                            preferred_element_type=jnp.float32)
        y = _leaky(acc + sh_ref[l])
        h_out = ho
        if pool == 'hw':
            y = _wpool_pairs(y)
        if pool in ('h', 'hw'):
            y = _hpool_compact(y)
            h_out = ho // 2
        if l + 1 < n_layers:
            scratch[l][1:1 + h_out, :] = y
        else:
            o_ref[...] = y.astype(o_ref.dtype)


def _conv_row_cfg(H):
    pools = (None, 'h', None, None, 'hw', None, None, 'hw')
    cfg = []
    rows_after = []
    h = H
    for p in pools:
        cfg.append((h, p))
        if p in ('h', 'hw'):
            h //= 2
        rows_after.append(h)
    return tuple(cfg), rows_after


def conv_stack(xh, wband, shifts, H, T, Nb):
    row_cfg, rows_after = _conv_row_cfg(H)
    scratch_rows = [rows_after[l] + 2 for l in range(7)]
    return pl.pallas_call(
        functools.partial(_conv_stack_kernel, row_cfg=row_cfg),
        out_shape=jax.ShapeDtypeStruct((T, Nb * LANES), jnp.bfloat16),
        grid_spec=pltpu.PrefetchScalarGridSpec(
            num_scalar_prefetch=0,
            grid=(Nb,),
            in_specs=[pl.BlockSpec((None, H + 2, LANES), lambda n: (n, 0, 0)),
                      pl.BlockSpec((8, 3, LANES, LANES),
                                   lambda n: (0, 0, 0, 0)),
                      pl.BlockSpec((8, 1, LANES), lambda n: (0, 0, 0))],
            # Output is (T, Nb*128): per-batch 128-lane column block -> the
            # reshape to (T*Nb, 128) row-major is a free view for the LSTM.
            out_specs=pl.BlockSpec((T, LANES), lambda n: (0, n)),
            scratch_shapes=[pltpu.VMEM((r, LANES), jnp.float32)
                            for r in scratch_rows]),
        compiler_params=pltpu.CompilerParams(
            dimension_semantics=("parallel",),
            vmem_limit_bytes=VMEM_LIMIT),
    )(xh, wband, shifts)


# ---------------------------------------------------------------------------
# BiLSTM layer: gx projection + both directions' recurrence in one kernel
# ---------------------------------------------------------------------------

def _bilstm_kernel(x_ref, wcat_ref, bcat_ref, whh_ref, h0_ref, c0_ref, out_ref,
                   gxs, h_sc, c_sc, *, T, Nb):
    # x_ref:    (T*Nb, D) bf16, rows ordered (t, b)
    # wcat_ref: (D, 8*HP) bf16  [fwd i,f,g,o | rev i,f,g,o], stride HP per gate
    # bcat_ref: (1, 8*HP) f32   (b_ih + b_hh, zeros in padded lanes)
    # whh_ref:  (2*HP, 4*HP) bf16, rows [fwd h | rev h]
    # h0_ref:   (2*Nb, 2*HP) f32  fwd rows = [h_f, 0], rev rows = [0, h_r]
    # c0_ref:   (2*Nb, HP) f32
    # out_ref:  (T*Nb, 2*HP) bf16  [:, :HP]=fwd h, [:, HP:]=rev h (time order)
    g_all = jnp.dot(x_ref[...].astype(jnp.bfloat16), wcat_ref[...],
                    preferred_element_type=jnp.float32) + bcat_ref[...]
    # Scatter per-step gate blocks; the reverse direction is time-flipped here
    # so the recurrence below is a single uniform loop for both directions.
    for t in range(T):
        blk = g_all[t * Nb:(t + 1) * Nb, :]
        gxs[t, 0:Nb, :] = blk[:, 0:4 * HP]
        gxs[T - 1 - t, Nb:2 * Nb, :] = blk[:, 4 * HP:8 * HP]
    h_sc[...] = h0_ref[...]
    c_sc[...] = c0_ref[...]

    def step(t, carry):
        g = gxs[t] + jnp.dot(h_sc[...].astype(jnp.bfloat16), whh_ref[...],
                             preferred_element_type=jnp.float32)
        i = jax.nn.sigmoid(g[:, 0 * HP:1 * HP])
        f = jax.nn.sigmoid(g[:, 1 * HP:2 * HP])
        gg = jnp.tanh(g[:, 2 * HP:3 * HP])
        o = jax.nn.sigmoid(g[:, 3 * HP:4 * HP])
        c = f * c_sc[...] + i * gg
        hn = o * jnp.tanh(c)
        c_sc[...] = c
        # Static writebacks; the cross halves of h_sc stay permanently zero so
        # a single matmul against the stacked whh picks per-direction weights.
        h_sc[0:Nb, 0:HP] = hn[0:Nb, :]
        h_sc[Nb:2 * Nb, HP:2 * HP] = hn[Nb:2 * Nb, :]
        hb = hn.astype(out_ref.dtype)
        out_ref[pl.ds(t * Nb, Nb), 0:HP] = hb[0:Nb, :]
        out_ref[pl.ds((T - 1 - t) * Nb, Nb), HP:2 * HP] = hb[Nb:2 * Nb, :]
        return carry

    if T <= 8:                      # short static sequence: full unroll
        for t in range(T):
            step(t, 0)
    else:                           # cap unroll for long sequences
        lax.fori_loop(0, T, step, 0, unroll=4)


def bilstm_layer(x2d, wcat, bcat, whh, h_state0, c_state0, T, Nb):
    return pl.pallas_call(
        functools.partial(_bilstm_kernel, T=T, Nb=Nb),
        out_shape=jax.ShapeDtypeStruct((T * Nb, 2 * HP), jnp.bfloat16),
        in_specs=[_VMEM] * 6,
        out_specs=_VMEM,
        scratch_shapes=[pltpu.VMEM((T, 2 * Nb, 4 * HP), jnp.float32),
                        pltpu.VMEM((2 * Nb, 2 * HP), jnp.float32),
                        pltpu.VMEM((2 * Nb, HP), jnp.float32)],
        compiler_params=pltpu.CompilerParams(vmem_limit_bytes=VMEM_LIMIT),
    )(x2d, wcat, bcat, whh, h_state0, c_state0)


# ---------------------------------------------------------------------------
# Fused FC stack (4 linears + LeakyReLU + LogSoftmax), weights VMEM-resident
# ---------------------------------------------------------------------------

def _fc_stack_kernel(x_ref, w1_ref, b1_ref, w2_ref, b2_ref, w3_ref, b3_ref,
                     w4_ref, b4_ref, o_ref):
    y = jnp.dot(x_ref[...], w1_ref[...], preferred_element_type=jnp.float32)
    y = _leaky(y + b1_ref[...]).astype(jnp.bfloat16)
    y = jnp.dot(y, w2_ref[...], preferred_element_type=jnp.float32)
    y = _leaky(y + b2_ref[...]).astype(jnp.bfloat16)
    y = jnp.dot(y, w3_ref[...], preferred_element_type=jnp.float32)
    y = _leaky(y + b3_ref[...]).astype(jnp.bfloat16)
    y = jnp.dot(y, w4_ref[...], preferred_element_type=jnp.float32) + b4_ref[...]
    # Lane-dense (128) logsoftmax; padded columns carry -1e30 bias -> exp()=0.
    m = jnp.max(y, axis=-1, keepdims=True)
    z = y - m
    o_ref[...] = z - jnp.log(jnp.sum(jnp.exp(z), axis=-1, keepdims=True))


def fc_stack(x2d, fc_prep):
    M, D = x2d.shape
    tm = min(256, _round_up(M, 8))
    Mp = _round_up(M, tm)
    if Mp != M:
        x2d = jnp.pad(x2d, ((0, Mp - M), (0, 0)))
    w_specs = [pl.BlockSpec(a.shape, lambda i: (0, 0)) for a in fc_prep]
    out = pl.pallas_call(
        _fc_stack_kernel,
        out_shape=jax.ShapeDtypeStruct((Mp, LANES), jnp.float32),
        grid_spec=pltpu.PrefetchScalarGridSpec(
            num_scalar_prefetch=0,
            grid=(Mp // tm,),
            in_specs=[pl.BlockSpec((tm, D), lambda i: (i, 0))] + w_specs,
            out_specs=pl.BlockSpec((tm, LANES), lambda i: (i, 0))),
        compiler_params=pltpu.CompilerParams(
            dimension_semantics=("parallel",),
            vmem_limit_bytes=VMEM_LIMIT),
    )(x2d, *fc_prep)
    return out[:M]


# ---------------------------------------------------------------------------
# Host-side, one-time parameter preparation (BN folding, band weights, packing)
# ---------------------------------------------------------------------------

def _conv_lane_cfg(W, CH):
    chans = [(1 * CH, 8 * CH, 1, 0), (8 * CH, 8 * CH, 1, 0),
             (8 * CH, 16 * CH, 3, 1), (16 * CH, 16 * CH, 3, 1),
             (16 * CH, 16 * CH, 3, 1), (16 * CH, 32 * CH, 3, 1),
             (32 * CH, 32 * CH, 3, 1), (32 * CH, 32 * CH, 3, 1)]
    pools = (None, 'h', None, None, 'hw', None, None, 'hw')
    cfgs = []
    Ws, W_eff, step = W, W, 1
    for l in range(8):
        cin, cout, kw, pw = chans[l]
        cfgs.append(dict(Cin=cin, Cout=cout, KW=kw, pw=pw,
                         Ws=Ws, W_eff=W_eff, step=step, W_out=W_eff))
        Ws, W_eff, step = W_eff, W_eff, 1
        if pools[l] == 'hw':
            W_eff //= 2
            step = 2
    return cfgs, (Ws, W_eff, step)


def _band_weight(wt, Ws, W_eff, step, W_out, pw):
    # wt: (Cout, Cin, KH, KW) f32 (BN scale already folded in).
    # Input lane = cin*Ws + step*wi (valid wi in [0, W_eff)); output lane =
    # cout*W_out + wo.  W-padding and W-pool decimation handled via `sel`.
    Cout, Cin, KH, KW = wt.shape
    ws = np.arange(Ws)[:, None, None]
    wo = np.arange(W_out)[None, :, None]
    kw = np.arange(KW)[None, None, :]
    wi = wo + kw - pw
    sel = ((ws == step * wi) & (wi >= 0) & (wi < W_eff)).astype(np.float32)
    band = np.einsum('swk,dchk->hcsdw', sel, wt)
    return band.reshape(KH, Cin * Ws, Cout * W_out)


def prepare_params(params, cfg):
    H, W, CH = cfg['H'], cfg['W'], cfg['CH']
    nH, nLayer, nOut = cfg['nHidden'], cfg['nLayer'], cfg['nOut']
    assert H % 8 == 0 and W % 4 == 0 and CH * W <= 8, "unsupported geometry"

    lane_cfg, (Ws_f, W_f, step_f) = _conv_lane_cfg(W, CH)

    wb = np.zeros((8, 3, LANES, LANES), np.float32)
    sh = np.zeros((8, 1, LANES), np.float32)
    for l, lc in enumerate(lane_cfg):
        w, b, gamma, beta, mean, var = [np.asarray(a, np.float32)
                                        for a in params['conv'][l]]
        scale = gamma / np.sqrt(var + BN_EPS)
        band = _band_weight(w * scale[:, None, None, None],
                            lc['Ws'], lc['W_eff'], lc['step'], lc['W_out'],
                            lc['pw'])
        K, N = band.shape[1], band.shape[2]
        wb[l, :, :K, :N] = band
        sh[l, 0, :N] = np.repeat((b - mean) * scale + beta, lc['W_out'])

    prep = {'conv_wband': jnp.asarray(wb, jnp.bfloat16),
            'conv_shift': jnp.asarray(sh, jnp.float32)}

    # Logical CNN feature f = c*W_f + j lives at conv-output lane
    # c*Ws_f + step_f*j (final maxpool W-decimation folded here).
    C_f = lane_cfg[-1]['Cout']
    in_rows0 = np.array([c * Ws_f + step_f * j
                         for c in range(C_f) for j in range(W_f)], np.int64)
    assert len(in_rows0) == cfg['nIn']

    def pack_lstm(layer_params, in_rows, d_stored):
        wcat = np.zeros((d_stored, 8 * HP), np.float32)
        bcat = np.zeros((1, 8 * HP), np.float32)
        whh = np.zeros((2 * HP, 4 * HP), np.float32)
        for d, (w_ih, w_hh, b_ih, b_hh) in enumerate(layer_params):
            w_ih = np.asarray(w_ih, np.float32)
            w_hh = np.asarray(w_hh, np.float32)
            b_ih = np.asarray(b_ih, np.float32)
            b_hh = np.asarray(b_hh, np.float32)
            for g in range(4):
                c0 = d * 4 * HP + g * HP
                wcat[in_rows, c0:c0 + nH] = w_ih[g * nH:(g + 1) * nH, :].T
                bcat[0, c0:c0 + nH] = (b_ih[g * nH:(g + 1) * nH] +
                                       b_hh[g * nH:(g + 1) * nH])
                whh[d * HP:d * HP + nH, g * HP:g * HP + nH] = \
                    w_hh[g * nH:(g + 1) * nH, :].T
        return (jnp.asarray(wcat, jnp.bfloat16),
                jnp.asarray(bcat, jnp.float32),
                jnp.asarray(whh, jnp.bfloat16))

    in_rows_h = np.concatenate([np.arange(nH), HP + np.arange(nH)])
    lstm_prep = []
    for l in range(nLayer):
        if l == 0:
            lstm_prep.append(pack_lstm(params['lstm'][l], in_rows0, LANES))
        else:
            lstm_prep.append(pack_lstm(params['lstm'][l], in_rows_h, 2 * HP))
    prep['lstm'] = lstm_prep

    (w1, b1), (w2, b2), (w3, b3), (w4, b4) = params['fc']
    w1 = np.asarray(w1, np.float32); b1 = np.asarray(b1, np.float32)
    w2 = np.asarray(w2, np.float32); b2 = np.asarray(b2, np.float32)
    w3 = np.asarray(w3, np.float32); b3 = np.asarray(b3, np.float32)
    w4 = np.asarray(w4, np.float32); b4 = np.asarray(b4, np.float32)
    w1e = np.zeros((2 * HP, w1.shape[0]), np.float32)
    w1e[in_rows_h, :] = w1.T
    w4e = np.zeros((w4.shape[1], LANES), np.float32)
    w4e[:, :nOut] = w4.T
    b4e = np.full((1, LANES), NEG_BIG, np.float32)
    b4e[0, :nOut] = b4
    prep['fc'] = (jnp.asarray(w1e, jnp.bfloat16),
                  jnp.asarray(b1.reshape(1, -1), jnp.float32),
                  jnp.asarray(w2.T, jnp.bfloat16),
                  jnp.asarray(b2.reshape(1, -1), jnp.float32),
                  jnp.asarray(w3.T, jnp.bfloat16),
                  jnp.asarray(b3.reshape(1, -1), jnp.float32),
                  jnp.asarray(w4e, jnp.bfloat16),
                  jnp.asarray(b4e, jnp.float32))
    return prep


# ---------------------------------------------------------------------------
# Full model forward (3 pallas_calls for nLayer=1/2; tiny XLA glue only)
# ---------------------------------------------------------------------------

def _pack_state(h0f, h0r, c0f, c0r, Nb, nH):
    hs = jnp.zeros((2 * Nb, 2 * HP), jnp.float32)
    hs = hs.at[0:Nb, 0:nH].set(h0f.astype(jnp.float32))
    hs = hs.at[Nb:, HP:HP + nH].set(h0r.astype(jnp.float32))
    cs = jnp.zeros((2 * Nb, HP), jnp.float32)
    cs = cs.at[0:Nb, 0:nH].set(c0f.astype(jnp.float32))
    cs = cs.at[Nb:, 0:nH].set(c0r.astype(jnp.float32))
    return hs, cs


def model_forward(cfg, prep, x, h0, c0):
    H, W, CH = cfg['H'], cfg['W'], cfg['CH']
    nH, nLayer, nOut = cfg['nHidden'], cfg['nLayer'], cfg['nOut']
    Nb = x.shape[0]
    T = H // 8

    # NCHW -> (N, H, Cin*W) channel-major lanes; pad H by 1 and lanes to 128.
    xh = jnp.transpose(x, (0, 2, 1, 3)).reshape(Nb, H, CH * W)
    xh = jnp.pad(xh, ((0, 0), (1, 1), (0, LANES - CH * W))).astype(jnp.float32)

    conv_out = conv_stack(xh, prep['conv_wband'], prep['conv_shift'], H, T, Nb)
    seq = conv_out.reshape(T * Nb, LANES)          # free view, rows = (t, b)

    for l in range(nLayer):
        wcat, bcat, whh = prep['lstm'][l]
        hs, cs = _pack_state(h0[2 * l], h0[2 * l + 1],
                             c0[2 * l], c0[2 * l + 1], Nb, nH)
        seq = bilstm_layer(seq, wcat, bcat, whh, hs, cs, T, Nb)  # (T*Nb, 2*HP)

    y = fc_stack(seq, prep['fc'])                  # (T*Nb, 128) f32
    # TODO(synk): Dropout(p=0.5) is identity (eval); BatchNorm uses running
    # stats (eval) folded into the conv weights.
    return y[:, :nOut].reshape(T, Nb, nOut)


# ---------------------------------------------------------------------------
# Deterministic parameter init (shapes from the PyTorch module __init__)
# ---------------------------------------------------------------------------

def init_params(key, nIn, nHidden, nLayer, nOut, cnn_in):
    keys = iter(jax.random.split(key, 128))

    def nrm(shape, s=0.1):
        return (jax.random.normal(next(keys), shape) * s).astype(jnp.float32)

    conv_cfg = [(cnn_in, 8, 3, 1), (8, 8, 3, 1),
                (8, 16, 3, 3), (16, 16, 3, 3), (16, 16, 3, 3),
                (16, 32, 3, 3), (32, 32, 3, 3), (32, 32, 3, 3)]
    convs = []
    for (ci, co, kh, kw) in conv_cfg:
        w = nrm((co, ci, kh, kw))
        b = nrm((co,))
        gamma = jnp.ones((co,), jnp.float32) + nrm((co,), 0.01)
        beta = nrm((co,), 0.01)
        mean = jnp.zeros((co,), jnp.float32)
        var = jnp.ones((co,), jnp.float32)
        convs.append((w, b, gamma, beta, mean, var))

    lstm = []
    for l in range(nLayer):
        din = nIn if l == 0 else 2 * nHidden
        dirs = []
        for _ in range(2):
            dirs.append((nrm((4 * nHidden, din)), nrm((4 * nHidden, nHidden)),
                         nrm((4 * nHidden,)), nrm((4 * nHidden,))))
        lstm.append(tuple(dirs))

    fc = []
    for (di, do) in [(2 * nHidden, 512), (512, 512), (512, 256), (256, nOut)]:
        fc.append((nrm((do, di)), nrm((do,))))

    return {'conv': convs, 'lstm': lstm, 'fc': fc}


if __name__ == "__main__":
    # Small, consistent shapes:
    #   CNNinchannel = 1, input H=32, W=8 -> conv output (N, 32ch, H=4, W=2)
    #   seq len T = 4, nIn = 32 * 2 = 64, nHidden = 32, nLayer = 2, nOut = 16
    nHidden, nLayer, nOut, cnn_in = 32, 2, 16, 1
    N, H, W = 2, 32, 8
    nIn = 32 * cnn_in * (W // 4)       # CNN features per time step (= 64)

    key = jax.random.PRNGKey(0)
    kx, kh, kc, kp = jax.random.split(key, 4)
    x = jax.random.normal(kx, (N, cnn_in, H, W), jnp.float32)          # NCHW
    h0 = jax.random.normal(kh, (nLayer * 2, N, nHidden), jnp.float32)
    c0 = jax.random.normal(kc, (nLayer * 2, N, nHidden), jnp.float32)
    params = init_params(kp, nIn, nHidden, nLayer, nOut, cnn_in)

    cfg = dict(H=H, W=W, CH=cnn_in, nHidden=nHidden, nLayer=nLayer,
               nOut=nOut, nIn=nIn)
    prep = prepare_params(params, cfg)   # one-time host-side weight folding

    fwd = jax.jit(functools.partial(model_forward, cfg))
    out = fwd(prep, x, h0, c0)
    out = jax.block_until_ready(out)

    assert out.shape == (H // 8, N, nOut), out.shape
    assert bool(jnp.all(jnp.isfinite(out)))
    print("KERNEL_OK")
</pallas_src>

<mosaic_0001>
module attributes {stable_mosaic.version = 11 : i64} {
  func.func @_conv_stack_kernel(%arg0: i32, %arg1: memref<1x34x128xf32, #tpu.memory_space<vmem>>, %arg2: memref<8x3x128x128xbf16, #tpu.memory_space<vmem>>, %arg3: memref<8x1x128xf32, #tpu.memory_space<vmem>>, %arg4: memref<4x128xbf16, #tpu.memory_space<vmem>>, %arg5: memref<34x128xf32, #tpu.memory_space<vmem>>, %arg6: memref<18x128xf32, #tpu.memory_space<vmem>>, %arg7: memref<18x128xf32, #tpu.memory_space<vmem>>, %arg8: memref<18x128xf32, #tpu.memory_space<vmem>>, %arg9: memref<10x128xf32, #tpu.memory_space<vmem>>, %arg10: memref<10x128xf32, #tpu.memory_space<vmem>>, %arg11: memref<10x128xf32, #tpu.memory_space<vmem>>) attributes {dimension_semantics = [#tpu.dimension_semantics<parallel>], iteration_bounds = array<i64: 2>, scalar_prefetch = 0 : i64, scratch_operands = 7 : i64, tpu.core_type = #tpu.core_type<tc>, window_params = [{transform_indices = @transform_0, window_bounds = array<i64: 1, 34, 128>}, {pipeline_mode = #tpu.pipeline_mode<synchronous>, transform_indices = @transform_1, window_bounds = array<i64: 8, 3, 128, 128>}, {pipeline_mode = #tpu.pipeline_mode<synchronous>, transform_indices = @transform_2, window_bounds = array<i64: 8, 1, 128>}, {transform_indices = @transform_3, window_bounds = array<i64: 4, 128>}]} {
    %cst = arith.constant 0.000000e+00 : f32
    %0 = vector.broadcast %cst : f32 to vector<34x128xf32>
    %c0 = arith.constant 0 : index
    %c0_0 = arith.constant 0 : index
    %1 = vector.load %arg5[%c0, %c0_0] : memref<34x128xf32, #tpu.memory_space<vmem>>, vector<34x128xf32>
    tpu.vector_store %arg5[%c0, %c0_0], %0 {strides = array<i32>} : memref<34x128xf32, #tpu.memory_space<vmem>>, vector<34x128xf32>,
    %cst_1 = arith.constant 0.000000e+00 : f32
    %2 = vector.broadcast %cst_1 : f32 to vector<18x128xf32>
    %c0_2 = arith.constant 0 : index
    %c0_3 = arith.constant 0 : index
    %3 = vector.load %arg6[%c0_2, %c0_3] : memref<18x128xf32, #tpu.memory_space<vmem>>, vector<18x128xf32>
    tpu.vector_store %arg6[%c0_2, %c0_3], %2 {strides = array<i32>} : memref<18x128xf32, #tpu.memory_space<vmem>>, vector<18x128xf32>,
    %cst_4 = arith.constant 0.000000e+00 : f32
    %4 = vector.broadcast %cst_4 : f32 to vector<18x128xf32>
    %c0_5 = arith.constant 0 : index
    %c0_6 = arith.constant 0 : index
    %5 = vector.load %arg7[%c0_5, %c0_6] : memref<18x128xf32, #tpu.memory_space<vmem>>, vector<18x128xf32>
    tpu.vector_store %arg7[%c0_5, %c0_6], %4 {strides = array<i32>} : memref<18x128xf32, #tpu.memory_space<vmem>>, vector<18x128xf32>,
    %cst_7 = arith.constant 0.000000e+00 : f32
    %6 = vector.broadcast %cst_7 : f32 to vector<18x128xf32>
    %c0_8 = arith.constant 0 : index
    %c0_9 = arith.constant 0 : index
    %7 = vector.load %arg8[%c0_8, %c0_9] : memref<18x128xf32, #tpu.memory_space<vmem>>, vector<18x128xf32>
    tpu.vector_store %arg8[%c0_8, %c0_9], %6 {strides = array<i32>} : memref<18x128xf32, #tpu.memory_space<vmem>>, vector<18x128xf32>,
    %cst_10 = arith.constant 0.000000e+00 : f32
    %8 = vector.broadcast %cst_10 : f32 to vector<10x128xf32>
    %c0_11 = arith.constant 0 : index
    %c0_12 = arith.constant 0 : index
    %9 = vector.load %arg9[%c0_11, %c0_12] : memref<10x128xf32, #tpu.memory_space<vmem>>, vector<10x128xf32>
    tpu.vector_store %arg9[%c0_11, %c0_12], %8 {strides = array<i32>} : memref<10x128xf32, #tpu.memory_space<vmem>>, vector<10x128xf32>,
    %cst_13 = arith.constant 0.000000e+00 : f32
    %10 = vector.broadcast %cst_13 : f32 to vector<10x128xf32>
    %c0_14 = arith.constant 0 : index
    %c0_15 = arith.constant 0 : index
    %11 = vector.load %arg10[%c0_14, %c0_15] : memref<10x128xf32, #tpu.memory_space<vmem>>, vector<10x128xf32>
    tpu.vector_store %arg10[%c0_14, %c0_15], %10 {strides = array<i32>} : memref<10x128xf32, #tpu.memory_space<vmem>>, vector<10x128xf32>,
    %cst_16 = arith.constant 0.000000e+00 : f32
    %12 = vector.broadcast %cst_16 : f32 to vector<10x128xf32>
    %c0_17 = arith.constant 0 : index
    %c0_18 = arith.constant 0 : index
    %13 = vector.load %arg11[%c0_17, %c0_18] : memref<10x128xf32, #tpu.memory_space<vmem>>, vector<10x128xf32>
    tpu.vector_store %arg11[%c0_17, %c0_18], %12 {strides = array<i32>} : memref<10x128xf32, #tpu.memory_space<vmem>>, vector<10x128xf32>,
    %c0_19 = arith.constant 0 : index
    %c0_20 = arith.constant 0 : index
    %c0_21 = arith.constant 0 : index
    %14 = vector.load %arg1[%c0_19, %c0_20, %c0_21] : memref<1x34x128xf32, #tpu.memory_space<vmem>>, vector<1x32x128xf32>
    %15 = vector.shape_cast %14 : vector<1x32x128xf32> to vector<32x128xf32>
    %16 = arith.truncf %15 : vector<32x128xf32> to vector<32x128xbf16>
    %c0_22 = arith.constant 0 : index
    %c0_23 = arith.constant 0 : index
    %c0_24 = arith.constant 0 : index
    %c0_25 = arith.constant 0 : index
    %17 = vector.load %arg2[%c0_22, %c0_23, %c0_24, %c0_25] : memref<8x3x128x128xbf16, #tpu.memory_space<vmem>>, vector<1x1x128x128xbf16>
    %18 = vector.shape_cast %17 : vector<1x1x128x128xbf16> to vector<128x128xbf16>
    %cst_26 = arith.constant dense<0.000000e+00> : vector<32x128xf32>
    %19 = tpu.matmul %16, %18, %cst_26 {dimension_numbers = #tpu.dot_dimension_numbers<[1], [0], [0], [1], [0, 0, 1, 1], [], []>} : vector<32x128xbf16>, vector<128x128xbf16>, vector<32x128xf32> -> vector<32x128xf32>
    %c0_27 = arith.constant 0 : index
    %c1 = arith.constant 1 : index
    %c0_28 = arith.constant 0 : index
    %20 = vector.load %arg1[%c0_27, %c1, %c0_28] : memref<1x34x128xf32, #tpu.memory_space<vmem>>, vector<1x32x128xf32>
    %21 = vector.shape_cast %20 : vector<1x32x128xf32> to vector<32x128xf32>
    %22 = arith.truncf %21 : vector<32x128xf32> to vector<32x128xbf16>
    %c0_29 = arith.constant 0 : index
    %c1_30 = arith.constant 1 : index
    %c0_31 = arith.constant 0 : index
    %c0_32 = arith.constant 0 : index
    %23 = vector.load %arg2[%c0_29, %c1_30, %c0_31, %c0_32] : memref<8x3x128x128xbf16, #tpu.memory_space<vmem>>, vector<1x1x128x128xbf16>
    %24 = vector.shape_cast %23 : vector<1x1x128x128xbf16> to vector<128x128xbf16>
    %cst_33 = arith.constant dense<0.000000e+00> : vector<32x128xf32>
    %25 = tpu.matmul %22, %24, %cst_33 {dimension_numbers = #tpu.dot_dimension_numbers<[1], [0], [0], [1], [0, 0, 1, 1], [], []>} : vector<32x128xbf16>, vector<128x128xbf16>, vector<32x128xf32> -> vector<32x128xf32>
    %26 = arith.addf %19, %25 : vector<32x128xf32>
    %c0_34 = arith.constant 0 : index
    %c2 = arith.constant 2 : index
    %c0_35 = arith.constant 0 : index
    %27 = vector.load %arg1[%c0_34, %c2, %c0_35] : memref<1x34x128xf32, #tpu.memory_space<vmem>>, vector<1x32x128xf32>
    %28 = vector.shape_cast %27 : vector<1x32x128xf32> to vector<32x128xf32>
    %29 = arith.truncf %28 : vector<32x128xf32> to vector<32x128xbf16>
    %c0_36 = arith.constant 0 : index
    %c2_37 = arith.constant 2 : index
    %c0_38 = arith.constant 0 : index
    %c0_39 = arith.constant 0 : index
    %30 = vector.load %arg2[%c0_36, %c2_37, %c0_38, %c0_39] : memref<8x3x128x128xbf16, #tpu.memory_space<vmem>>, vector<1x1x128x128xbf16>
    %31 = vector.shape_cast %30 : vector<1x1x128x128xbf16> to vector<128x128xbf16>
    %cst_40 = arith.constant dense<0.000000e+00> : vector<32x128xf32>
    %32 = tpu.matmul %29, %31, %cst_40 {dimension_numbers = #tpu.dot_dimension_numbers<[1], [0], [0], [1], [0, 0, 1, 1], [], []>} : vector<32x128xbf16>, vector<128x128xbf16>, vector<32x128xf32> -> vector<32x128xf32>
    %33 = arith.addf %26, %32 : vector<32x128xf32>
    %c0_41 = arith.constant 0 : index
    %c0_42 = arith.constant 0 : index
    %c0_43 = arith.constant 0 : index
    %34 = vector.load %arg3[%c0_41, %c0_42, %c0_43] : memref<8x1x128xf32, #tpu.memory_space<vmem>>, vector<1x1x128xf32>
    %35 = vector.shape_cast %34 : vector<1x1x128xf32> to vector<1x128xf32>
    %36 = vector.broadcast %35 : vector<1x128xf32> to vector<32x128xf32>
    %37 = arith.addf %33, %36 : vector<32x128xf32>
    %cst_44 = arith.constant 0.000000e+00 : f32
    %38 = vector.broadcast %cst_44 : f32 to vector<32x128xf32>
    %39 = arith.cmpf oge, %37, %38 : vector<32x128xf32>
    %cst_45 = arith.constant 1.000000e-01 : f32
    %40 = vector.broadcast %cst_45 : f32 to vector<32x128xf32>
    %41 = arith.mulf %40, %37 : vector<32x128xf32>
    %42 = arith.select %39, %37, %41 : vector<32x128xi1>, vector<32x128xf32>
    %c1_46 = arith.constant 1 : index
    %c0_47 = arith.constant 0 : index
    %43 = vector.load %arg5[%c1_46, %c0_47] : memref<34x128xf32, #tpu.memory_space<vmem>>, vector<32x128xf32>
    tpu.vector_store %arg5[%c1_46, %c0_47], %42 {strides = array<i32>} : memref<34x128xf32, #tpu.memory_space<vmem>>, vector<32x128xf32>,
    %c0_48 = arith.constant 0 : index
    %c0_49 = arith.constant 0 : index
    %44 = vector.load %arg5[%c0_48, %c0_49] : memref<34x128xf32, #tpu.memory_space<vmem>>, vector<32x128xf32>
    %45 = arith.truncf %44 : vector<32x128xf32> to vector<32x128xbf16>
    %c1_50 = arith.constant 1 : index
    %c0_51 = arith.constant 0 : index
    %c0_52 = arith.constant 0 : index
    %c0_53 = arith.constant 0 : index
    %46 = vector.load %arg2[%c1_50, %c0_51, %c0_52, %c0_53] : memref<8x3x128x128xbf16, #tpu.memory_space<vmem>>, vector<1x1x128x128xbf16>
    %47 = vector.shape_cast %46 : vector<1x1x128x128xbf16> to vector<128x128xbf16>
    %cst_54 = arith.constant dense<0.000000e+00> : vector<32x128xf32>
    %48 = tpu.matmul %45, %47, %cst_54 {dimension_numbers = #tpu.dot_dimension_numbers<[1], [0], [0], [1], [0, 0, 1, 1], [], []>} : vector<32x128xbf16>, vector<128x128xbf16>, vector<32x128xf32> -> vector<32x128xf32>
    %c1_55 = arith.constant 1 : index
    %c0_56 = arith.constant 0 : index
    %49 = vector.load %arg5[%c1_55, %c0_56] : memref<34x128xf32, #tpu.memory_space<vmem>>, vector<32x128xf32>
    %50 = arith.truncf %49 : vector<32x128xf32> to vector<32x128xbf16>
    %c1_57 = arith.constant 1 : index
    %c1_58 = arith.constant 1 : index
    %c0_59 = arith.constant 0 : index
    %c0_60 = arith.constant 0 : index
    %51 = vector.load %arg2[%c1_57, %c1_58, %c0_59, %c0_60] : memref<8x3x128x128xbf16, #tpu.memory_space<vmem>>, vector<1x1x128x128xbf16>
    %52 = vector.shape_cast %51 : vector<1x1x128x128xbf16> to vector<128x128xbf16>
    %cst_61 = arith.constant dense<0.000000e+00> : vector<32x128xf32>
    %53 = tpu.matmul %50, %52, %cst_61 {dimension_numbers = #tpu.dot_dimension_numbers<[1], [0], [0], [1], [0, 0, 1, 1], [], []>} : vector<32x128xbf16>, vector<128x128xbf16>, vector<32x128xf32> -> vector<32x128xf32>
    %54 = arith.addf %48, %53 : vector<32x128xf32>
    %c2_62 = arith.constant 2 : index
    %c0_63 = arith.constant 0 : index
    %55 = vector.load %arg5[%c2_62, %c0_63] : memref<34x128xf32, #tpu.memory_space<vmem>>, vector<32x128xf32>
    %56 = arith.truncf %55 : vector<32x128xf32> to vector<32x128xbf16>
    %c1_64 = arith.constant 1 : index
    %c2_65 = arith.constant 2 : index
    %c0_66 = arith.constant 0 : index
    %c0_67 = arith.constant 0 : index
    %57 = vector.load %arg2[%c1_64, %c2_65, %c0_66, %c0_67] : memref<8x3x128x128xbf16, #tpu.memory_space<vmem>>, vector<1x1x128x128xbf16>
    %58 = vector.shape_cast %57 : vector<1x1x128x128xbf16> to vector<128x128xbf16>
    %cst_68 = arith.constant dense<0.000000e+00> : vector<32x128xf32>
    %59 = tpu.matmul %56, %58, %cst_68 {dimension_numbers = #tpu.dot_dimension_numbers<[1], [0], [0], [1], [0, 0, 1, 1], [], []>} : vector<32x128xbf16>, vector<128x128xbf16>, vector<32x128xf32> -> vector<32x128xf32>
    %60 = arith.addf %54, %59 : vector<32x128xf32>
    %c1_69 = arith.constant 1 : index
    %c0_70 = arith.constant 0 : index
    %c0_71 = arith.constant 0 : index
    %61 = vector.load %arg3[%c1_69, %c0_70, %c0_71] : memref<8x1x128xf32, #tpu.memory_space<vmem>>, vector<1x1x128xf32>
    %62 = vector.shape_cast %61 : vector<1x1x128xf32> to vector<1x128xf32>
    %63 = vector.broadcast %62 : vector<1x128xf32> to vector<32x128xf32>
    %64 = arith.addf %60, %63 : vector<32x128xf32>
    %cst_72 = arith.constant 0.000000e+00 : f32
    %65 = vector.broadcast %cst_72 : f32 to vector<32x128xf32>
    %66 = arith.cmpf oge, %64, %65 : vector<32x128xf32>
    %cst_73 = arith.constant 1.000000e-01 : f32
    %67 = vector.broadcast %cst_73 : f32 to vector<32x128xf32>
    %68 = arith.mulf %67, %64 : vector<32x128xf32>
    %69 = arith.select %66, %64, %68 : vector<32x128xi1>, vector<32x128xf32>
    %70 = vector.extract_strided_slice %69 {offsets = [1, 0], sizes = [31, 128], strides = [1, 1]} : vector<32x128xf32> to vector<31x128xf32>
    %71 = vector.extract_strided_slice %69 {offsets = [0, 0], sizes = [1, 128], strides = [1, 1]} : vector<32x128xf32> to vector<1x128xf32>
    %72 = tpu.concatenate %70, %71 in 0 : vector<31x128xf32>, vector<1x128xf32> -> vector<32x128xf32>
    %73 = arith.maximumf %69, %72 : vector<32x128xf32>
    %74 = arith.truncf %73 : vector<32x128xf32> to vector<32x128xbf16>
    %75 = tpu.iota {dimensions = array<i32: 0>} : vector<16x32xi32>
    %76 = tpu.iota {dimensions = array<i32: 1>} : vector<16x32xi32>
    %c2_i32 = arith.constant 2 : i32
    %77 = vector.broadcast %c2_i32 : i32 to vector<16x32xi32>
    %78 = arith.muli %77, %75 : vector<16x32xi32>
    %79 = arith.cmpi eq, %76, %78 : vector<16x32xi32>
    %80 = arith.extui %79 : vector<16x32xi1> to vector<16x32xi32>
    %81 = arith.sitofp %80 : vector<16x32xi32> to vector<16x32xf32>
    %82 = arith.truncf %81 : vector<16x32xf32> to vector<16x32xbf16>
    %cst_74 = arith.constant dense<0.000000e+00> : vector<16x128xf32>
    %83 = tpu.matmul %82, %74, %cst_74 {dimension_numbers = #tpu.dot_dimension_numbers<[1], [0], [0], [1], [0, 0, 1, 1], [], []>} : vector<16x32xbf16>, vector<32x128xbf16>, vector<16x128xf32> -> vector<16x128xf32>
    %c1_75 = arith.constant 1 : index
    %c0_76 = arith.constant 0 : index
    %84 = vector.load %arg6[%c1_75, %c0_76] : memref<18x128xf32, #tpu.memory_space<vmem>>, vector<16x128xf32>
    tpu.vector_store %arg6[%c1_75, %c0_76], %83 {strides = array<i32>} : memref<18x128xf32, #tpu.memory_space<vmem>>, vector<16x128xf32>,
    %c0_77 = arith.constant 0 : index
    %c0_78 = arith.constant 0 : index
    %85 = vector.load %arg6[%c0_77, %c0_78] : memref<18x128xf32, #tpu.memory_space<vmem>>, vector<16x128xf32>
    %86 = arith.truncf %85 : vector<16x128xf32> to vector<16x128xbf16>
    %c2_79 = arith.constant 2 : index
    %c0_80 = arith.constant 0 : index
    %c0_81 = arith.constant 0 : index
    %c0_82 = arith.constant 0 : index
    %87 = vector.load %arg2[%c2_79, %c0_80, %c0_81, %c0_82] : memref<8x3x128x128xbf16, #tpu.memory_space<vmem>>, vector<1x1x128x128xbf16>
    %88 = vector.shape_cast %87 : vector<1x1x128x128xbf16> to vector<128x128xbf16>
    %cst_83 = arith.constant dense<0.000000e+00> : vector<16x128xf32>
    %89 = tpu.matmul %86, %88, %cst_83 {dimension_numbers = #tpu.dot_dimension_numbers<[1], [0], [0], [1], [0, 0, 1, 1], [], []>} : vector<16x128xbf16>, vector<128x128xbf16>, vector<16x128xf32> -> vector<16x128xf32>
    %c1_84 = arith.constant 1 : index
    %c0_85 = arith.constant 0 : index
    %90 = vector.load %arg6[%c1_84, %c0_85] : memref<18x128xf32, #tpu.memory_space<vmem>>, vector<16x128xf32>
    %91 = arith.truncf %90 : vector<16x128xf32> to vector<16x128xbf16>
    %c2_86 = arith.constant 2 : index
    %c1_87 = arith.constant 1 : index
    %c0_88 = arith.constant 0 : index
    %c0_89 = arith.constant 0 : index
    %92 = vector.load %arg2[%c2_86, %c1_87, %c0_88, %c0_89] : memref<8x3x128x128xbf16, #tpu.memory_space<vmem>>, vector<1x1x128x128xbf16>
    %93 = vector.shape_cast %92 : vector<1x1x128x128xbf16> to vector<128x128xbf16>
    %cst_90 = arith.constant dense<0.000000e+00> : vector<16x128xf32>
    %94 = tpu.matmul %91, %93, %cst_90 {dimension_numbers = #tpu.dot_dimension_numbers<[1], [0], [0], [1], [0, 0, 1, 1], [], []>} : vector<16x128xbf16>, vector<128x128xbf16>, vector<16x128xf32> -> vector<16x128xf32>
    %95 = arith.addf %89, %94 : vector<16x128xf32>
    %c2_91 = arith.constant 2 : index
    %c0_92 = arith.constant 0 : index
    %96 = vector.load %arg6[%c2_91, %c0_92] : memref<18x128xf32, #tpu.memory_space<vmem>>, vector<16x128xf32>
    %97 = arith.truncf %96 : vector<16x128xf32> to vector<16x128xbf16>
    %c2_93 = arith.constant 2 : index
    %c2_94 = arith.constant 2 : index
    %c0_95 = arith.constant 0 : index
    %c0_96 = arith.constant 0 : index
    %98 = vector.load %arg2[%c2_93, %c2_94, %c0_95, %c0_96] : memref<8x3x128x128xbf16, #tpu.memory_space<vmem>>, vector<1x1x128x128xbf16>
    %99 = vector.shape_cast %98 : vector<1x1x128x128xbf16> to vector<128x128xbf16>
    %cst_97 = arith.constant dense<0.000000e+00> : vector<16x128xf32>
    %100 = tpu.matmul %97, %99, %cst_97 {dimension_numbers = #tpu.dot_dimension_numbers<[1], [0], [0], [1], [0, 0, 1, 1], [], []>} : vector<16x128xbf16>, vector<128x128xbf16>, vector<16x128xf32> -> vector<16x128xf32>
    %101 = arith.addf %95, %100 : vector<16x128xf32>
    %c2_98 = arith.constant 2 : index
    %c0_99 = arith.constant 0 : index
    %c0_100 = arith.constant 0 : index
    %102 = vector.load %arg3[%c2_98, %c0_99, %c0_100] : memref<8x1x128xf32, #tpu.memory_space<vmem>>, vector<1x1x128xf32>
    %103 = vector.shape_cast %102 : vector<1x1x128xf32> to vector<1x128xf32>
    %104 = vector.broadcast %103 : vector<1x128xf32> to vector<16x128xf32>
    %105 = arith.addf %101, %104 : vector<16x128xf32>
    %cst_101 = arith.constant 0.000000e+00 : f32
    %106 = vector.broadcast %cst_101 : f32 to vector<16x128xf32>
    %107 = arith.cmpf oge, %105, %106 : vector<16x128xf32>
    %cst_102 = arith.constant 1.000000e-01 : f32
    %108 = vector.broadcast %cst_102 : f32 to vector<16x128xf32>
    %109 = arith.mulf %108, %105 : vector<16x128xf32>
    %110 = arith.select %107, %105, %109 : vector<16x128xi1>, vector<16x128xf32>
    %c1_103 = arith.constant 1 : index
    %c0_104 = arith.constant 0 : index
    %111 = vector.load %arg7[%c1_103, %c0_104] : memref<18x128xf32, #tpu.memory_space<vmem>>, vector<16x128xf32>
    tpu.vector_store %arg7[%c1_103, %c0_104], %110 {strides = array<i32>} : memref<18x128xf32, #tpu.memory_space<vmem>>, vector<16x128xf32>,
    %c0_105 = arith.constant 0 : index
    %c0_106 = arith.constant 0 : index
    %112 = vector.load %arg7[%c0_105, %c0_106] : memref<18x128xf32, #tpu.memory_space<vmem>>, vector<16x128xf32>
    %113 = arith.truncf %112 : vector<16x128xf32> to vector<16x128xbf16>
    %c3 = arith.constant 3 : index
    %c0_107 = arith.constant 0 : index
    %c0_108 = arith.constant 0 : index
    %c0_109 = arith.constant 0 : index
    %114 = vector.load %arg2[%c3, %c0_107, %c0_108, %c0_109] : memref<8x3x128x128xbf16, #tpu.memory_space<vmem>>, vector<1x1x128x128xbf16>
    %115 = vector.shape_cast %114 : vector<1x1x128x128xbf16> to vector<128x128xbf16>
    %cst_110 = arith.constant dense<0.000000e+00> : vector<16x128xf32>
    %116 = tpu.matmul %113, %115, %cst_110 {dimension_numbers = #tpu.dot_dimension_numbers<[1], [0], [0], [1], [0, 0, 1, 1], [], []>} : vector<16x128xbf16>, vector<128x128xbf16>, vector<16x128xf32> -> vector<16x128xf32>
    %c1_111 = arith.constant 1 : index
    %c0_112 = arith.constant 0 : index
    %117 = vector.load %arg7[%c1_111, %c0_112] : memref<18x128xf32, #tpu.memory_space<vmem>>, vector<16x128xf32>
    %118 = arith.truncf %117 : vector<16x128xf32> to vector<16x128xbf16>
    %c3_113 = arith.constant 3 : index
    %c1_114 = arith.constant 1 : index
    %c0_115 = arith.constant 0 : index
    %c0_116 = arith.constant 0 : index
    %119 = vector.load %arg2[%c3_113, %c1_114, %c0_115, %c0_116] : memref<8x3x128x128xbf16, #tpu.memory_space<vmem>>, vector<1x1x128x128xbf16>
    %120 = vector.shape_cast %119 : vector<1x1x128x128xbf16> to vector<128x128xbf16>
    %cst_117 = arith.constant dense<0.000000e+00> : vector<16x128xf32>
    %121 = tpu.matmul %118, %120, %cst_117 {dimension_numbers = #tpu.dot_dimension_numbers<[1], [0], [0], [1], [0, 0, 1, 1], [], []>} : vector<16x128xbf16>, vector<128x128xbf16>, vector<16x128xf32> -> vector<16x128xf32>
    %122 = arith.addf %116, %121 : vector<16x128xf32>
    %c2_118 = arith.constant 2 : index
    %c0_119 = arith.constant 0 : index
    %123 = vector.load %arg7[%c2_118, %c0_119] : memref<18x128xf32, #tpu.memory_space<vmem>>, vector<16x128xf32>
    %124 = arith.truncf %123 : vector<16x128xf32> to vector<16x128xbf16>
    %c3_120 = arith.constant 3 : index
    %c2_121 = arith.constant 2 : index
    %c0_122 = arith.constant 0 : index
    %c0_123 = arith.constant 0 : index
    %125 = vector.load %arg2[%c3_120, %c2_121, %c0_122, %c0_123] : memref<8x3x128x128xbf16, #tpu.memory_space<vmem>>, vector<1x1x128x128xbf16>
    %126 = vector.shape_cast %125 : vector<1x1x128x128xbf16> to vector<128x128xbf16>
    %cst_124 = arith.constant dense<0.000000e+00> : vector<16x128xf32>
    %127 = tpu.matmul %124, %126, %cst_124 {dimension_numbers = #tpu.dot_dimension_numbers<[1], [0], [0], [1], [0, 0, 1, 1], [], []>} : vector<16x128xbf16>, vector<128x128xbf16>, vector<16x128xf32> -> vector<16x128xf32>
    %128 = arith.addf %122, %127 : vector<16x128xf32>
    %c3_125 = arith.constant 3 : index
    %c0_126 = arith.constant 0 : index
    %c0_127 = arith.constant 0 : index
    %129 = vector.load %arg3[%c3_125, %c0_126, %c0_127] : memref<8x1x128xf32, #tpu.memory_space<vmem>>, vector<1x1x128xf32>
    %130 = vector.shape_cast %129 : vector<1x1x128xf32> to vector<1x128xf32>
    %131 = vector.broadcast %130 : vector<1x128xf32> to vector<16x128xf32>
    %132 = arith.addf %128, %131 : vector<16x128xf32>
    %cst_128 = arith.constant 0.000000e+00 : f32
    %133 = vector.broadcast %cst_128 : f32 to vector<16x128xf32>
    %134 = arith.cmpf oge, %132, %133 : vector<16x128xf32>
    %cst_129 = arith.constant 1.000000e-01 : f32
    %135 = vector.broadcast %cst_129 : f32 to vector<16x128xf32>
    %136 = arith.mulf %135, %132 : vector<16x128xf32>
    %137 = arith.select %134, %132, %136 : vector<16x128xi1>, vector<16x128xf32>
    %c1_130 = arith.constant 1 : index
    %c0_131 = arith.constant 0 : index
    %138 = vector.load %arg8[%c1_130, %c0_131] : memref<18x128xf32, #tpu.memory_space<vmem>>, vector<16x128xf32>
    tpu.vector_store %arg8[%c1_130, %c0_131], %137 {strides = array<i32>} : memref<18x128xf32, #tpu.memory_space<vmem>>, vector<16x128xf32>,
    %c0_132 = arith.constant 0 : index
    %c0_133 = arith.constant 0 : index
    %139 = vector.load %arg8[%c0_132, %c0_133] : memref<18x128xf32, #tpu.memory_space<vmem>>, vector<16x128xf32>
    %140 = arith.truncf %139 : vector<16x128xf32> to vector<16x128xbf16>
    %c4 = arith.constant 4 : index
    %c0_134 = arith.constant 0 : index
    %c0_135 = arith.constant 0 : index
    %c0_136 = arith.constant 0 : index
    %141 = vector.load %arg2[%c4, %c0_134, %c0_135, %c0_136] : memref<8x3x128x128xbf16, #tpu.memory_space<vmem>>, vector<1x1x128x128xbf16>
    %142 = vector.shape_cast %141 : vector<1x1x128x128xbf16> to vector<128x128xbf16>
    %cst_137 = arith.constant dense<0.000000e+00> : vector<16x128xf32>
    %143 = tpu.matmul %140, %142, %cst_137 {dimension_numbers = #tpu.dot_dimension_numbers<[1], [0], [0], [1], [0, 0, 1, 1], [], []>} : vector<16x128xbf16>, vector<128x128xbf16>, vector<16x128xf32> -> vector<16x128xf32>
    %c1_138 = arith.constant 1 : index
    %c0_139 = arith.constant 0 : index
    %144 = vector.load %arg8[%c1_138, %c0_139] : memref<18x128xf32, #tpu.memory_space<vmem>>, vector<16x128xf32>
    %145 = arith.truncf %144 : vector<16x128xf32> to vector<16x128xbf16>
    %c4_140 = arith.constant 4 : index
    %c1_141 = arith.constant 1 : index
    %c0_142 = arith.constant 0 : index
    %c0_143 = arith.constant 0 : index
    %146 = vector.load %arg2[%c4_140, %c1_141, %c0_142, %c0_143] : memref<8x3x128x128xbf16, #tpu.memory_space<vmem>>, vector<1x1x128x128xbf16>
    %147 = vector.shape_cast %146 : vector<1x1x128x128xbf16> to vector<128x128xbf16>
    %cst_144 = arith.constant dense<0.000000e+00> : vector<16x128xf32>
    %148 = tpu.matmul %145, %147, %cst_144 {dimension_numbers = #tpu.dot_dimension_numbers<[1], [0], [0], [1], [0, 0, 1, 1], [], []>} : vector<16x128xbf16>, vector<128x128xbf16>, vector<16x128xf32> -> vector<16x128xf32>
    %149 = arith.addf %143, %148 : vector<16x128xf32>
    %c2_145 = arith.constant 2 : index
    %c0_146 = arith.constant 0 : index
    %150 = vector.load %arg8[%c2_145, %c0_146] : memref<18x128xf32, #tpu.memory_space<vmem>>, vector<16x128xf32>
    %151 = arith.truncf %150 : vector<16x128xf32> to vector<16x128xbf16>
    %c4_147 = arith.constant 4 : index
    %c2_148 = arith.constant 2 : index
    %c0_149 = arith.constant 0 : index
    %c0_150 = arith.constant 0 : index
    %152 = vector.load %arg2[%c4_147, %c2_148, %c0_149, %c0_150] : memref<8x3x128x128xbf16, #tpu.memory_space<vmem>>, vector<1x1x128x128xbf16>
    %153 = vector.shape_cast %152 : vector<1x1x128x128xbf16> to vector<128x128xbf16>
    %cst_151 = arith.constant dense<0.000000e+00> : vector<16x128xf32>
    %154 = tpu.matmul %151, %153, %cst_151 {dimension_numbers = #tpu.dot_dimension_numbers<[1], [0], [0], [1], [0, 0, 1, 1], [], []>} : vector<16x128xbf16>, vector<128x128xbf16>, vector<16x128xf32> -> vector<16x128xf32>
    %155 = arith.addf %149, %154 : vector<16x128xf32>
    %c4_152 = arith.constant 4 : index
    %c0_153 = arith.constant 0 : index
    %c0_154 = arith.constant 0 : index
    %156 = vector.load %arg3[%c4_152, %c0_153, %c0_154] : memref<8x1x128xf32, #tpu.memory_space<vmem>>, vector<1x1x128xf32>
    %157 = vector.shape_cast %156 : vector<1x1x128xf32> to vector<1x128xf32>
    %158 = vector.broadcast %157 : vector<1x128xf32> to vector<16x128xf32>
    %159 = arith.addf %155, %158 : vector<16x128xf32>
    %cst_155 = arith.constant 0.000000e+00 : f32
    %160 = vector.broadcast %cst_155 : f32 to vector<16x128xf32>
    %161 = arith.cmpf oge, %159, %160 : vector<16x128xf32>
    %cst_156 = arith.constant 1.000000e-01 : f32
    %162 = vector.broadcast %cst_156 : f32 to vector<16x128xf32>
    %163 = arith.mulf %162, %159 : vector<16x128xf32>
    %164 = arith.select %161, %159, %163 : vector<16x128xi1>, vector<16x128xf32>
    %165 = vector.extract_strided_slice %164 {offsets = [0, 1], sizes = [16, 127], strides = [1, 1]} : vector<16x128xf32> to vector<16x127xf32>
    %166 = vector.extract_strided_slice %164 {offsets = [0, 0], sizes = [16, 1], strides = [1, 1]} : vector<16x128xf32> to vector<16x1xf32>
    %167 = tpu.concatenate %165, %166 in 1 : vector<16x127xf32>, vector<16x1xf32> -> vector<16x128xf32>
    %168 = arith.maximumf %164, %167 : vector<16x128xf32>
    %169 = vector.extract_strided_slice %168 {offsets = [1, 0], sizes = [15, 128], strides = [1, 1]} : vector<16x128xf32> to vector<15x128xf32>
    %170 = vector.extract_strided_slice %168 {offsets = [0, 0], sizes = [1, 128], strides = [1, 1]} : vector<16x128xf32> to vector<1x128xf32>
    %171 = tpu.concatenate %169, %170 in 0 : vector<15x128xf32>, vector<1x128xf32> -> vector<16x128xf32>
    %172 = arith.maximumf %168, %171 : vector<16x128xf32>
    %173 = arith.truncf %172 : vector<16x128xf32> to vector<16x128xbf16>
    %174 = tpu.iota {dimensions = array<i32: 0>} : vector<8x16xi32>
    %175 = tpu.iota {dimensions = array<i32: 1>} : vector<8x16xi32>
    %c2_i32_157 = arith.constant 2 : i32
    %176 = vector.broadcast %c2_i32_157 : i32 to vector<8x16xi32>
    %177 = arith.muli %176, %174 : vector<8x16xi32>
    %178 = arith.cmpi eq, %175, %177 : vector<8x16xi32>
    %179 = arith.extui %178 : vector<8x16xi1> to vector<8x16xi32>
    %180 = arith.sitofp %179 : vector<8x16xi32> to vector<8x16xf32>
    %181 = arith.truncf %180 : vector<8x16xf32> to vector<8x16xbf16>
    %cst_158 = arith.constant dense<0.000000e+00> : vector<8x128xf32>
    %182 = tpu.matmul %181, %173, %cst_158 {dimension_numbers = #tpu.dot_dimension_numbers<[1], [0], [0], [1], [0, 0, 1, 1], [], []>} : vector<8x16xbf16>, vector<16x128xbf16>, vector<8x128xf32> -> vector<8x128xf32>
    %c1_159 = arith.constant 1 : index
    %c0_160 = arith.constant 0 : index
    %183 = vector.load %arg9[%c1_159, %c0_160] : memref<10x128xf32, #tpu.memory_space<vmem>>, vector<8x128xf32>
    tpu.vector_store %arg9[%c1_159, %c0_160], %182 {strides = array<i32>} : memref<10x128xf32, #tpu.memory_space<vmem>>, vector<8x128xf32>,
    %c0_161 = arith.constant 0 : index
    %c0_162 = arith.constant 0 : index
    %184 = vector.load %arg9[%c0_161, %c0_162] : memref<10x128xf32, #tpu.memory_space<vmem>>, vector<8x128xf32>
    %185 = arith.truncf %184 : vector<8x128xf32> to vector<8x128xbf16>
    %c5 = arith.constant 5 : index
    %c0_163 = arith.constant 0 : index
    %c0_164 = arith.constant 0 : index
    %c0_165 = arith.constant 0 : index
    %186 = vector.load %arg2[%c5, %c0_163, %c0_164, %c0_165] : memref<8x3x128x128xbf16, #tpu.memory_space<vmem>>, vector<1x1x128x128xbf16>
    %187 = vector.shape_cast %186 : vector<1x1x128x128xbf16> to vector<128x128xbf16>
    %cst_166 = arith.constant dense<0.000000e+00> : vector<8x128xf32>
    %188 = tpu.matmul %185, %187, %cst_166 {dimension_numbers = #tpu.dot_dimension_numbers<[1], [0], [0], [1], [0, 0, 1, 1], [], []>} : vector<8x128xbf16>, vector<128x128xbf16>, vector<8x128xf32> -> vector<8x128xf32>
    %c1_167 = arith.constant 1 : index
    %c0_168 = arith.constant 0 : index
    %189 = vector.load %arg9[%c1_167, %c0_168] : memref<10x128xf32, #tpu.memory_space<vmem>>, vector<8x128xf32>
    %190 = arith.truncf %189 : vector<8x128xf32> to vector<8x128xbf16>
    %c5_169 = arith.constant 5 : index
    %c1_170 = arith.constant 1 : index
    %c0_171 = arith.constant 0 : index
    %c0_172 = arith.constant 0 : index
    %191 = vector.load %arg2[%c5_169, %c1_170, %c0_171, %c0_172] : memref<8x3x128x128xbf16, #tpu.memory_space<vmem>>, vector<1x1x128x128xbf16>
    %192 = vector.shape_cast %191 : vector<1x1x128x128xbf16> to vector<128x128xbf16>
    %cst_173 = arith.constant dense<0.000000e+00> : vector<8x128xf32>
    %193 = tpu.matmul %190, %192, %cst_173 {dimension_numbers = #tpu.dot_dimension_numbers<[1], [0], [0], [1], [0, 0, 1, 1], [], []>} : vector<8x128xbf16>, vector<128x128xbf16>, vector<8x128xf32> -> vector<8x128xf32>
    %194 = arith.addf %188, %193 : vector<8x128xf32>
    %c2_174 = arith.constant 2 : index
    %c0_175 = arith.constant 0 : index
    %195 = vector.load %arg9[%c2_174, %c0_175] : memref<10x128xf32, #tpu.memory_space<vmem>>, vector<8x128xf32>
    %196 = arith.truncf %195 : vector<8x128xf32> to vector<8x128xbf16>
    %c5_176 = arith.constant 5 : index
    %c2_177 = arith.constant 2 : index
    %c0_178 = arith.constant 0 : index
    %c0_179 = arith.constant 0 : index
    %197 = vector.load %arg2[%c5_176, %c2_177, %c0_178, %c0_179] : memref<8x3x128x128xbf16, #tpu.memory_space<vmem>>, vector<1x1x128x128xbf16>
    %198 = vector.shape_cast %197 : vector<1x1x128x128xbf16> to vector<128x128xbf16>
    %cst_180 = arith.constant dense<0.000000e+00> : vector<8x128xf32>
    %199 = tpu.matmul %196, %198, %cst_180 {dimension_numbers = #tpu.dot_dimension_numbers<[1], [0], [0], [1], [0, 0, 1, 1], [], []>} : vector<8x128xbf16>, vector<128x128xbf16>, vector<8x128xf32> -> vector<8x128xf32>
    %200 = arith.addf %194, %199 : vector<8x128xf32>
    %c5_181 = arith.constant 5 : index
    %c0_182 = arith.constant 0 : index
    %c0_183 = arith.constant 0 : index
    %201 = vector.load %arg3[%c5_181, %c0_182, %c0_183] : memref<8x1x128xf32, #tpu.memory_space<vmem>>, vector<1x1x128xf32>
    %202 = vector.shape_cast %201 : vector<1x1x128xf32> to vector<1x128xf32>
    %203 = vector.broadcast %202 : vector<1x128xf32> to vector<8x128xf32>
    %204 = arith.addf %200, %203 : vector<8x128xf32>
    %cst_184 = arith.constant 0.000000e+00 : f32
    %205 = vector.broadcast %cst_184 : f32 to vector<8x128xf32>
    %206 = arith.cmpf oge, %204, %205 : vector<8x128xf32>
    %cst_185 = arith.constant 1.000000e-01 : f32
    %207 = vector.broadcast %cst_185 : f32 to vector<8x128xf32>
    %208 = arith.mulf %207, %204 : vector<8x128xf32>
    %209 = arith.select %206, %204, %208 : vector<8x128xi1>, vector<8x128xf32>
    %c1_186 = arith.constant 1 : index
    %c0_187 = arith.constant 0 : index
    %210 = vector.load %arg10[%c1_186, %c0_187] : memref<10x128xf32, #tpu.memory_space<vmem>>, vector<8x128xf32>
    tpu.vector_store %arg10[%c1_186, %c0_187], %209 {strides = array<i32>} : memref<10x128xf32, #tpu.memory_space<vmem>>, vector<8x128xf32>,
    %c0_188 = arith.constant 0 : index
    %c0_189 = arith.constant 0 : index
    %211 = vector.load %arg10[%c0_188, %c0_189] : memref<10x128xf32, #tpu.memory_space<vmem>>, vector<8x128xf32>
    %212 = arith.truncf %211 : vector<8x128xf32> to vector<8x128xbf16>
    %c6 = arith.constant 6 : index
    %c0_190 = arith.constant 0 : index
    %c0_191 = arith.constant 0 : index
    %c0_192 = arith.constant 0 : index
    %213 = vector.load %arg2[%c6, %c0_190, %c0_191, %c0_192] : memref<8x3x128x128xbf16, #tpu.memory_space<vmem>>, vector<1x1x128x128xbf16>
    %214 = vector.shape_cast %213 : vector<1x1x128x128xbf16> to vector<128x128xbf16>
    %cst_193 = arith.constant dense<0.000000e+00> : vector<8x128xf32>
    %215 = tpu.matmul %212, %214, %cst_193 {dimension_numbers = #tpu.dot_dimension_numbers<[1], [0], [0], [1], [0, 0, 1, 1], [], []>} : vector<8x128xbf16>, vector<128x128xbf16>, vector<8x128xf32> -> vector<8x128xf32>
    %c1_194 = arith.constant 1 : index
    %c0_195 = arith.constant 0 : index
    %216 = vector.load %arg10[%c1_194, %c0_195] : memref<10x128xf32, #tpu.memory_space<vmem>>, vector<8x128xf32>
    %217 = arith.truncf %216 : vector<8x128xf32> to vector<8x128xbf16>
    %c6_196 = arith.constant 6 : index
    %c1_197 = arith.constant 1 : index
    %c0_198 = arith.constant 0 : index
    %c0_199 = arith.constant 0 : index
    %218 = vector.load %arg2[%c6_196, %c1_197, %c0_198, %c0_199] : memref<8x3x128x128xbf16, #tpu.memory_space<vmem>>, vector<1x1x128x128xbf16>
    %219 = vector.shape_cast %218 : vector<1x1x128x128xbf16> to vector<128x128xbf16>
    %cst_200 = arith.constant dense<0.000000e+00> : vector<8x128xf32>
    %220 = tpu.matmul %217, %219, %cst_200 {dimension_numbers = #tpu.dot_dimension_numbers<[1], [0], [0], [1], [0, 0, 1, 1], [], []>} : vector<8x128xbf16>, vector<128x128xbf16>, vector<8x128xf32> -> vector<8x128xf32>
    %221 = arith.addf %215, %220 : vector<8x128xf32>
    %c2_201 = arith.constant 2 : index
    %c0_202 = arith.constant 0 : index
    %222 = vector.load %arg10[%c2_201, %c0_202] : memref<10x128xf32, #tpu.memory_space<vmem>>, vector<8x128xf32>
    %223 = arith.truncf %222 : vector<8x128xf32> to vector<8x128xbf16>
    %c6_203 = arith.constant 6 : index
    %c2_204 = arith.constant 2 : index
    %c0_205 = arith.constant 0 : index
    %c0_206 = arith.constant 0 : index
    %224 = vector.load %arg2[%c6_203, %c2_204, %c0_205, %c0_206] : memref<8x3x128x128xbf16, #tpu.memory_space<vmem>>, vector<1x1x128x128xbf16>
    %225 = vector.shape_cast %224 : vector<1x1x128x128xbf16> to vector<128x128xbf16>
    %cst_207 = arith.constant dense<0.000000e+00> : vector<8x128xf32>
    %226 = tpu.matmul %223, %225, %cst_207 {dimension_numbers = #tpu.dot_dimension_numbers<[1], [0], [0], [1], [0, 0, 1, 1], [], []>} : vector<8x128xbf16>, vector<128x128xbf16>, vector<8x128xf32> -> vector<8x128xf32>
    %227 = arith.addf %221, %226 : vector<8x128xf32>
    %c6_208 = arith.constant 6 : index
    %c0_209 = arith.constant 0 : index
    %c0_210 = arith.constant 0 : index
    %228 = vector.load %arg3[%c6_208, %c0_209, %c0_210] : memref<8x1x128xf32, #tpu.memory_space<vmem>>, vector<1x1x128xf32>
    %229 = vector.shape_cast %228 : vector<1x1x128xf32> to vector<1x128xf32>
    %230 = vector.broadcast %229 : vector<1x128xf32> to vector<8x128xf32>
    %231 = arith.addf %227, %230 : vector<8x128xf32>
    %cst_211 = arith.constant 0.000000e+00 : f32
    %232 = vector.broadcast %cst_211 : f32 to vector<8x128xf32>
    %233 = arith.cmpf oge, %231, %232 : vector<8x128xf32>
    %cst_212 = arith.constant 1.000000e-01 : f32
    %234 = vector.broadcast %cst_212 : f32 to vector<8x128xf32>
    %235 = arith.mulf %234, %231 : vector<8x128xf32>
    %236 = arith.select %233, %231, %235 : vector<8x128xi1>, vector<8x128xf32>
    %c1_213 = arith.constant 1 : index
    %c0_214 = arith.constant 0 : index
    %237 = vector.load %arg11[%c1_213, %c0_214] : memref<10x128xf32, #tpu.memory_space<vmem>>, vector<8x128xf32>
    tpu.vector_store %arg11[%c1_213, %c0_214], %236 {strides = array<i32>} : memref<10x128xf32, #tpu.memory_space<vmem>>, vector<8x128xf32>,
    %c0_215 = arith.constant 0 : index
    %c0_216 = arith.constant 0 : index
    %238 = vector.load %arg11[%c0_215, %c0_216] : memref<10x128xf32, #tpu.memory_space<vmem>>, vector<8x128xf32>
    %239 = arith.truncf %238 : vector<8x128xf32> to vector<8x128xbf16>
    %c7 = arith.constant 7 : index
    %c0_217 = arith.constant 0 : index
    %c0_218 = arith.constant 0 : index
    %c0_219 = arith.constant 0 : index
    %240 = vector.load %arg2[%c7, %c0_217, %c0_218, %c0_219] : memref<8x3x128x128xbf16, #tpu.memory_space<vmem>>, vector<1x1x128x128xbf16>
    %241 = vector.shape_cast %240 : vector<1x1x128x128xbf16> to vector<128x128xbf16>
    %cst_220 = arith.constant dense<0.000000e+00> : vector<8x128xf32>
    %242 = tpu.matmul %239, %241, %cst_220 {dimension_numbers = #tpu.dot_dimension_numbers<[1], [0], [0], [1], [0, 0, 1, 1], [], []>} : vector<8x128xbf16>, vector<128x128xbf16>, vector<8x128xf32> -> vector<8x128xf32>
    %c1_221 = arith.constant 1 : index
    %c0_222 = arith.constant 0 : index
    %243 = vector.load %arg11[%c1_221, %c0_222] : memref<10x128xf32, #tpu.memory_space<vmem>>, vector<8x128xf32>
    %244 = arith.truncf %243 : vector<8x128xf32> to vector<8x128xbf16>
    %c7_223 = arith.constant 7 : index
    %c1_224 = arith.constant 1 : index
    %c0_225 = arith.constant 0 : index
    %c0_226 = arith.constant 0 : index
    %245 = vector.load %arg2[%c7_223, %c1_224, %c0_225, %c0_226] : memref<8x3x128x128xbf16, #tpu.memory_space<vmem>>, vector<1x1x128x128xbf16>
    %246 = vector.shape_cast %245 : vector<1x1x128x128xbf16> to vector<128x128xbf16>
    %cst_227 = arith.constant dense<0.000000e+00> : vector<8x128xf32>
    %247 = tpu.matmul %244, %246, %cst_227 {dimension_numbers = #tpu.dot_dimension_numbers<[1], [0], [0], [1], [0, 0, 1, 1], [], []>} : vector<8x128xbf16>, vector<128x128xbf16>, vector<8x128xf32> -> vector<8x128xf32>
    %248 = arith.addf %242, %247 : vector<8x128xf32>
    %c2_228 = arith.constant 2 : index
    %c0_229 = arith.constant 0 : index
    %249 = vector.load %arg11[%c2_228, %c0_229] : memref<10x128xf32, #tpu.memory_space<vmem>>, vector<8x128xf32>
    %250 = arith.truncf %249 : vector<8x128xf32> to vector<8x128xbf16>
    %c7_230 = arith.constant 7 : index
    %c2_231 = arith.constant 2 : index
    %c0_232 = arith.constant 0 : index
    %c0_233 = arith.constant 0 : index
    %251 = vector.load %arg2[%c7_230, %c2_231, %c0_232, %c0_233] : memref<8x3x128x128xbf16, #tpu.memory_space<vmem>>, vector<1x1x128x128xbf16>
    %252 = vector.shape_cast %251 : vector<1x1x128x128xbf16> to vector<128x128xbf16>
    %cst_234 = arith.constant dense<0.000000e+00> : vector<8x128xf32>
    %253 = tpu.matmul %250, %252, %cst_234 {dimension_numbers = #tpu.dot_dimension_numbers<[1], [0], [0], [1], [0, 0, 1, 1], [], []>} : vector<8x128xbf16>, vector<128x128xbf16>, vector<8x128xf32> -> vector<8x128xf32>
    %254 = arith.addf %248, %253 : vector<8x128xf32>
    %c7_235 = arith.constant 7 : index
    %c0_236 = arith.constant 0 : index
    %c0_237 = arith.constant 0 : index
    %255 = vector.load %arg3[%c7_235, %c0_236, %c0_237] : memref<8x1x128xf32, #tpu.memory_space<vmem>>, vector<1x1x128xf32>
    %256 = vector.shape_cast %255 : vector<1x1x128xf32> to vector<1x128xf32>
    %257 = vector.broadcast %256 : vector<1x128xf32> to vector<8x128xf32>
    %258 = arith.addf %254, %257 : vector<8x128xf32>
    %cst_238 = arith.constant 0.000000e+00 : f32
    %259 = vector.broadcast %cst_238 : f32 to vector<8x128xf32>
    %260 = arith.cmpf oge, %258, %259 : vector<8x128xf32>
    %cst_239 = arith.constant 1.000000e-01 : f32
    %261 = vector.broadcast %cst_239 : f32 to vector<8x128xf32>
    %262 = arith.mulf %261, %258 : vector<8x128xf32>
    %263 = arith.select %260, %258, %262 : vector<8x128xi1>, vector<8x128xf32>
    %264 = vector.extract_strided_slice %263 {offsets = [0, 1], sizes = [8, 127], strides = [1, 1]} : vector<8x128xf32> to vector<8x127xf32>
    %265 = vector.extract_strided_slice %263 {offsets = [0, 0], sizes = [8, 1], strides = [1, 1]} : vector<8x128xf32> to vector<8x1xf32>
    %266 = tpu.concatenate %264, %265 in 1 : vector<8x127xf32>, vector<8x1xf32> -> vector<8x128xf32>
    %267 = arith.maximumf %263, %266 : vector<8x128xf32>
    %268 = vector.extract_strided_slice %267 {offsets = [1, 0], sizes = [7, 128], strides = [1, 1]} : vector<8x128xf32> to vector<7x128xf32>
    %269 = vector.extract_strided_slice %267 {offsets = [0, 0], sizes = [1, 128], strides = [1, 1]} : vector<8x128xf32> to vector<1x128xf32>
    %270 = tpu.concatenate %268, %269 in 0 : vector<7x128xf32>, vector<1x128xf32> -> vector<8x128xf32>
    %271 = arith.maximumf %267, %270 : vector<8x128xf32>
    %272 = arith.truncf %271 : vector<8x128xf32> to vector<8x128xbf16>
    %273 = tpu.iota {dimensions = array<i32: 0>} : vector<4x8xi32>
    %274 = tpu.iota {dimensions = array<i32: 1>} : vector<4x8xi32>
    %c2_i32_240 = arith.constant 2 : i32
    %275 = vector.broadcast %c2_i32_240 : i32 to vector<4x8xi32>
    %276 = arith.muli %275, %273 : vector<4x8xi32>
    %277 = arith.cmpi eq, %274, %276 : vector<4x8xi32>
    %278 = arith.extui %277 : vector<4x8xi1> to vector<4x8xi32>
    %279 = arith.sitofp %278 : vector<4x8xi32> to vector<4x8xf32>
    %280 = arith.truncf %279 : vector<4x8xf32> to vector<4x8xbf16>
    %cst_241 = arith.constant dense<0.000000e+00> : vector<4x128xf32>
    %281 = tpu.matmul %280, %272, %cst_241 {dimension_numbers = #tpu.dot_dimension_numbers<[1], [0], [0], [1], [0, 0, 1, 1], [], []>} : vector<4x8xbf16>, vector<8x128xbf16>, vector<4x128xf32> -> vector<4x128xf32>
    %282 = arith.truncf %281 : vector<4x128xf32> to vector<4x128xbf16>
    %c0_242 = arith.constant 0 : index
    %c0_243 = arith.constant 0 : index
    %283 = vector.load %arg4[%c0_242, %c0_243] : memref<4x128xbf16, #tpu.memory_space<vmem>>, vector<4x128xbf16>
    tpu.vector_store %arg4[%c0_242, %c0_243], %282 {strides = array<i32>} : memref<4x128xbf16, #tpu.memory_space<vmem>>, vector<4x128xbf16>,
    return
  }
  func.func @transform_0(%arg0: i32) -> (i32, i32, i32) {
    %c0_i32 = arith.constant 0 : i32
    %c0_i32_0 = arith.constant 0 : i32
    %c0_i32_1 = arith.constant 0 : i32
    return %arg0, %c0_i32, %c0_i32_0 : i32, i32, i32
  }
  func.func @transform_1(%arg0: i32) -> (i32, i32, i32, i32) {
    %c0_i32 = arith.constant 0 : i32
    %c0_i32_0 = arith.constant 0 : i32
    %c0_i32_1 = arith.constant 0 : i32
    %c0_i32_2 = arith.constant 0 : i32
    %c0_i32_3 = arith.constant 0 : i32
    return %c0_i32, %c0_i32_0, %c0_i32_1, %c0_i32_2 : i32, i32, i32, i32
  }
  func.func @transform_2(%arg0: i32) -> (i32, i32, i32) {
    %c0_i32 = arith.constant 0 : i32
    %c0_i32_0 = arith.constant 0 : i32
    %c0_i32_1 = arith.constant 0 : i32
    %c0_i32_2 = arith.constant 0 : i32
    return %c0_i32, %c0_i32_0, %c0_i32_1 : i32, i32, i32
  }
  func.func @transform_3(%arg0: i32) -> (i32, i32) {
    %c0_i32 = arith.constant 0 : i32
    %c0_i32_0 = arith.constant 0 : i32
    return %c0_i32, %arg0 : i32, i32
  }
}

module attributes {stable_mosaic.version = 11 : i64} {
  func.func @_bilstm_kernel(%arg0: memref<8x128xbf16, #tpu.memory_space<vmem>>, %arg1: memref<128x1024xbf16, #tpu.memory_space<vmem>>, %arg2: memref<1x1024xf32, #tpu.memory_space<vmem>>, %arg3: memref<256x512xbf16, #tpu.memory_space<vmem>>, %arg4: memref<4x256xf32, #tpu.memory_space<vmem>>, %arg5: memref<4x128xf32, #tpu.memory_space<vmem>>, %arg6: memref<8x256xbf16, #tpu.memory_space<vmem>>, %arg7: memref<4x4x512xf32, #tpu.memory_space<vmem>>, %arg8: memref<4x256xf32, #tpu.memory_space<vmem>>, %arg9: memref<4x128xf32, #tpu.memory_space<vmem>>) attributes {dimension_semantics = [], scalar_prefetch = 0 : i64, scratch_operands = 3 : i64, tpu.core_type = #tpu.core_type<tc>} {
    %c0 = arith.constant 0 : index
    %c0_0 = arith.constant 0 : index
    %0 = vector.load %arg0[%c0, %c0_0] : memref<8x128xbf16, #tpu.memory_space<vmem>>, vector<8x128xbf16>
    %c0_1 = arith.constant 0 : index
    %c0_2 = arith.constant 0 : index
    %1 = vector.load %arg1[%c0_1, %c0_2] : memref<128x1024xbf16, #tpu.memory_space<vmem>>, vector<128x1024xbf16>
    %cst = arith.constant dense<0.000000e+00> : vector<8x1024xf32>
    %2 = tpu.matmul %0, %1, %cst {dimension_numbers = #tpu.dot_dimension_numbers<[1], [0], [0], [1], [0, 0, 1, 1], [], []>} : vector<8x128xbf16>, vector<128x1024xbf16>, vector<8x1024xf32> -> vector<8x1024xf32>
    %c0_3 = arith.constant 0 : index
    %c0_4 = arith.constant 0 : index
    %3 = vector.load %arg2[%c0_3, %c0_4] : memref<1x1024xf32, #tpu.memory_space<vmem>>, vector<1x1024xf32>
    %4 = vector.broadcast %3 : vector<1x1024xf32> to vector<8x1024xf32>
    %5 = arith.addf %2, %4 : vector<8x1024xf32>
    %6 = vector.extract_strided_slice %5 {offsets = [0, 0], sizes = [2, 1024], strides = [1, 1]} : vector<8x1024xf32> to vector<2x1024xf32>
    %7 = vector.extract_strided_slice %6 {offsets = [0, 0], sizes = [2, 512], strides = [1, 1]} : vector<2x1024xf32> to vector<2x512xf32>
    %c0_5 = arith.constant 0 : index
    %c0_6 = arith.constant 0 : index
    %c0_7 = arith.constant 0 : index
    %8 = vector.load %arg7[%c0_5, %c0_6, %c0_7] : memref<4x4x512xf32, #tpu.memory_space<vmem>>, vector<1x2x512xf32>
    %9 = vector.shape_cast %8 : vector<1x2x512xf32> to vector<2x512xf32>
    %10 = vector.shape_cast %7 : vector<2x512xf32> to vector<1x2x512xf32>
    tpu.vector_store %arg7[%c0_5, %c0_6, %c0_7], %10 {strides = array<i32>} : memref<4x4x512xf32, #tpu.memory_space<vmem>>, vector<1x2x512xf32>,
    %11 = vector.extract_strided_slice %6 {offsets = [0, 512], sizes = [2, 512], strides = [1, 1]} : vector<2x1024xf32> to vector<2x512xf32>
    %c3 = arith.constant 3 : index
    %c2 = arith.constant 2 : index
    %c0_8 = arith.constant 0 : index
    %12 = vector.load %arg7[%c3, %c2, %c0_8] : memref<4x4x512xf32, #tpu.memory_space<vmem>>, vector<1x2x512xf32>
    %13 = vector.shape_cast %12 : vector<1x2x512xf32> to vector<2x512xf32>
    %14 = vector.shape_cast %11 : vector<2x512xf32> to vector<1x2x512xf32>
    tpu.vector_store %arg7[%c3, %c2, %c0_8], %14 {strides = array<i32>} : memref<4x4x512xf32, #tpu.memory_space<vmem>>, vector<1x2x512xf32>,
    %15 = vector.extract_strided_slice %5 {offsets = [2, 0], sizes = [2, 1024], strides = [1, 1]} : vector<8x1024xf32> to vector<2x1024xf32>
    %16 = vector.extract_strided_slice %15 {offsets = [0, 0], sizes = [2, 512], strides = [1, 1]} : vector<2x1024xf32> to vector<2x512xf32>
    %c1 = arith.constant 1 : index
    %c0_9 = arith.constant 0 : index
    %c0_10 = arith.constant 0 : index
    %17 = vector.load %arg7[%c1, %c0_9, %c0_10] : memref<4x4x512xf32, #tpu.memory_space<vmem>>, vector<1x2x512xf32>
    %18 = vector.shape_cast %17 : vector<1x2x512xf32> to vector<2x512xf32>
    %19 = vector.shape_cast %16 : vector<2x512xf32> to vector<1x2x512xf32>
    tpu.vector_store %arg7[%c1, %c0_9, %c0_10], %19 {strides = array<i32>} : memref<4x4x512xf32, #tpu.memory_space<vmem>>, vector<1x2x512xf32>,
    %20 = vector.extract_strided_slice %15 {offsets = [0, 512], sizes = [2, 512], strides = [1, 1]} : vector<2x1024xf32> to vector<2x512xf32>
    %c2_11 = arith.constant 2 : index
    %c2_12 = arith.constant 2 : index
    %c0_13 = arith.constant 0 : index
    %21 = vector.load %arg7[%c2_11, %c2_12, %c0_13] : memref<4x4x512xf32, #tpu.memory_space<vmem>>, vector<1x2x512xf32>
    %22 = vector.shape_cast %21 : vector<1x2x512xf32> to vector<2x512xf32>
    %23 = vector.shape_cast %20 : vector<2x512xf32> to vector<1x2x512xf32>
    tpu.vector_store %arg7[%c2_11, %c2_12, %c0_13], %23 {strides = array<i32>} : memref<4x4x512xf32, #tpu.memory_space<vmem>>, vector<1x2x512xf32>,
    %24 = vector.extract_strided_slice %5 {offsets = [4, 0], sizes = [2, 1024], strides = [1, 1]} : vector<8x1024xf32> to vector<2x1024xf32>
    %25 = vector.extract_strided_slice %24 {offsets = [0, 0], sizes = [2, 512], strides = [1, 1]} : vector<2x1024xf32> to vector<2x512xf32>
    %c2_14 = arith.constant 2 : index
    %c0_15 = arith.constant 0 : index
    %c0_16 = arith.constant 0 : index
    %26 = vector.load %arg7[%c2_14, %c0_15, %c0_16] : memref<4x4x512xf32, #tpu.memory_space<vmem>>, vector<1x2x512xf32>
    %27 = vector.shape_cast %26 : vector<1x2x512xf32> to vector<2x512xf32>
    %28 = vector.shape_cast %25 : vector<2x512xf32> to vector<1x2x512xf32>
    tpu.vector_store %arg7[%c2_14, %c0_15, %c0_16], %28 {strides = array<i32>} : memref<4x4x512xf32, #tpu.memory_space<vmem>>, vector<1x2x512xf32>,
    %29 = vector.extract_strided_slice %24 {offsets = [0, 512], sizes = [2, 512], strides = [1, 1]} : vector<2x1024xf32> to vector<2x512xf32>
    %c1_17 = arith.constant 1 : index
    %c2_18 = arith.constant 2 : index
    %c0_19 = arith.constant 0 : index
    %30 = vector.load %arg7[%c1_17, %c2_18, %c0_19] : memref<4x4x512xf32, #tpu.memory_space<vmem>>, vector<1x2x512xf32>
    %31 = vector.shape_cast %30 : vector<1x2x512xf32> to vector<2x512xf32>
    %32 = vector.shape_cast %29 : vector<2x512xf32> to vector<1x2x512xf32>
    tpu.vector_store %arg7[%c1_17, %c2_18, %c0_19], %32 {strides = array<i32>} : memref<4x4x512xf32, #tpu.memory_space<vmem>>, vector<1x2x512xf32>,
    %33 = vector.extract_strided_slice %5 {offsets = [6, 0], sizes = [2, 1024], strides = [1, 1]} : vector<8x1024xf32> to vector<2x1024xf32>
    %34 = vector.extract_strided_slice %33 {offsets = [0, 0], sizes = [2, 512], strides = [1, 1]} : vector<2x1024xf32> to vector<2x512xf32>
    %c3_20 = arith.constant 3 : index
    %c0_21 = arith.constant 0 : index
    %c0_22 = arith.constant 0 : index
    %35 = vector.load %arg7[%c3_20, %c0_21, %c0_22] : memref<4x4x512xf32, #tpu.memory_space<vmem>>, vector<1x2x512xf32>
    %36 = vector.shape_cast %35 : vector<1x2x512xf32> to vector<2x512xf32>
    %37 = vector.shape_cast %34 : vector<2x512xf32> to vector<1x2x512xf32>
    tpu.vector_store %arg7[%c3_20, %c0_21, %c0_22], %37 {strides = array<i32>} : memref<4x4x512xf32, #tpu.memory_space<vmem>>, vector<1x2x512xf32>,
    %38 = vector.extract_strided_slice %33 {offsets = [0, 512], sizes = [2, 512], strides = [1, 1]} : vector<2x1024xf32> to vector<2x512xf32>
    %c0_23 = arith.constant 0 : index
    %c2_24 = arith.constant 2 : index
    %c0_25 = arith.constant 0 : index
    %39 = vector.load %arg7[%c0_23, %c2_24, %c0_25] : memref<4x4x512xf32, #tpu.memory_space<vmem>>, vector<1x2x512xf32>
    %40 = vector.shape_cast %39 : vector<1x2x512xf32> to vector<2x512xf32>
    %41 = vector.shape_cast %38 : vector<2x512xf32> to vector<1x2x512xf32>
    tpu.vector_store %arg7[%c0_23, %c2_24, %c0_25], %41 {strides = array<i32>} : memref<4x4x512xf32, #tpu.memory_space<vmem>>, vector<1x2x512xf32>,
    %c0_26 = arith.constant 0 : index
    %c0_27 = arith.constant 0 : index
    %42 = vector.load %arg4[%c0_26, %c0_27] : memref<4x256xf32, #tpu.memory_space<vmem>>, vector<4x256xf32>
    %c0_28 = arith.constant 0 : index
    %c0_29 = arith.constant 0 : index
    %43 = vector.load %arg8[%c0_28, %c0_29] : memref<4x256xf32, #tpu.memory_space<vmem>>, vector<4x256xf32>
    tpu.vector_store %arg8[%c0_28, %c0_29], %42 {strides = array<i32>} : memref<4x256xf32, #tpu.memory_space<vmem>>, vector<4x256xf32>,
    %c0_30 = arith.constant 0 : index
    %c0_31 = arith.constant 0 : index
    %44 = vector.load %arg5[%c0_30, %c0_31] : memref<4x128xf32, #tpu.memory_space<vmem>>, vector<4x128xf32>
    %c0_32 = arith.constant 0 : index
    %c0_33 = arith.constant 0 : index
    %45 = vector.load %arg9[%c0_32, %c0_33] : memref<4x128xf32, #tpu.memory_space<vmem>>, vector<4x128xf32>
    tpu.vector_store %arg9[%c0_32, %c0_33], %44 {strides = array<i32>} : memref<4x128xf32, #tpu.memory_space<vmem>>, vector<4x128xf32>,
    %c0_34 = arith.constant 0 : index
    %c0_35 = arith.constant 0 : index
    %c0_36 = arith.constant 0 : index
    %46 = vector.load %arg7[%c0_34, %c0_35, %c0_36] : memref<4x4x512xf32, #tpu.memory_space<vmem>>, vector<1x4x512xf32>
    %47 = vector.shape_cast %46 : vector<1x4x512xf32> to vector<4x512xf32>
    %c0_37 = arith.constant 0 : index
    %c0_38 = arith.constant 0 : index
    %48 = vector.load %arg8[%c0_37, %c0_38] : memref<4x256xf32, #tpu.memory_space<vmem>>, vector<4x256xf32>
    %49 = arith.truncf %48 : vector<4x256xf32> to vector<4x256xbf16>
    %c0_39 = arith.constant 0 : index
    %c0_40 = arith.constant 0 : index
    %50 = vector.load %arg3[%c0_39, %c0_40] : memref<256x512xbf16, #tpu.memory_space<vmem>>, vector<256x512xbf16>
    %cst_41 = arith.constant dense<0.000000e+00> : vector<4x512xf32>
    %51 = tpu.matmul %49, %50, %cst_41 {dimension_numbers = #tpu.dot_dimension_numbers<[1], [0], [0], [1], [0, 0, 1, 1], [], []>} : vector<4x256xbf16>, vector<256x512xbf16>, vector<4x512xf32> -> vector<4x512xf32>
    %52 = arith.addf %47, %51 : vector<4x512xf32>
    %53 = vector.extract_strided_slice %52 {offsets = [0, 0], sizes = [4, 128], strides = [1, 1]} : vector<4x512xf32> to vector<4x128xf32>
    %54 = arith.negf %53 : vector<4x128xf32>
    %55 = math.exp %54 : vector<4x128xf32>
    %cst_42 = arith.constant 1.000000e+00 : f32
    %56 = vector.broadcast %cst_42 : f32 to vector<4x128xf32>
    %57 = arith.addf %56, %55 : vector<4x128xf32>
    %58 = arith.divf %56, %57 : vector<4x128xf32>
    %59 = vector.extract_strided_slice %52 {offsets = [0, 128], sizes = [4, 128], strides = [1, 1]} : vector<4x512xf32> to vector<4x128xf32>
    %60 = arith.negf %59 : vector<4x128xf32>
    %61 = math.exp %60 : vector<4x128xf32>
    %cst_43 = arith.constant 1.000000e+00 : f32
    %62 = vector.broadcast %cst_43 : f32 to vector<4x128xf32>
    %63 = arith.addf %62, %61 : vector<4x128xf32>
    %64 = arith.divf %62, %63 : vector<4x128xf32>
    %65 = vector.extract_strided_slice %52 {offsets = [0, 256], sizes = [4, 128], strides = [1, 1]} : vector<4x512xf32> to vector<4x128xf32>
    %66 = math.tanh %65 : vector<4x128xf32>
    %67 = vector.extract_strided_slice %52 {offsets = [0, 384], sizes = [4, 128], strides = [1, 1]} : vector<4x512xf32> to vector<4x128xf32>
    %68 = arith.negf %67 : vector<4x128xf32>
    %69 = math.exp %68 : vector<4x128xf32>
    %cst_44 = arith.constant 1.000000e+00 : f32
    %70 = vector.broadcast %cst_44 : f32 to vector<4x128xf32>
    %71 = arith.addf %70, %69 : vector<4x128xf32>
    %72 = arith.divf %70, %71 : vector<4x128xf32>
    %c0_45 = arith.constant 0 : index
    %c0_46 = arith.constant 0 : index
    %73 = vector.load %arg9[%c0_45, %c0_46] : memref<4x128xf32, #tpu.memory_space<vmem>>, vector<4x128xf32>
    %74 = arith.mulf %64, %73 : vector<4x128xf32>
    %75 = arith.mulf %58, %66 : vector<4x128xf32>
    %76 = arith.addf %74, %75 : vector<4x128xf32>
    %77 = math.tanh %76 : vector<4x128xf32>
    %78 = arith.mulf %72, %77 : vector<4x128xf32>
    %c0_47 = arith.constant 0 : index
    %c0_48 = arith.constant 0 : index
    %79 = vector.load %arg9[%c0_47, %c0_48] : memref<4x128xf32, #tpu.memory_space<vmem>>, vector<4x128xf32>
    tpu.vector_store %arg9[%c0_47, %c0_48], %76 {strides = array<i32>} : memref<4x128xf32, #tpu.memory_space<vmem>>, vector<4x128xf32>,
    %80 = vector.extract_strided_slice %78 {offsets = [0, 0], sizes = [2, 128], strides = [1, 1]} : vector<4x128xf32> to vector<2x128xf32>
    %c0_49 = arith.constant 0 : index
    %c0_50 = arith.constant 0 : index
    %81 = vector.load %arg8[%c0_49, %c0_50] : memref<4x256xf32, #tpu.memory_space<vmem>>, vector<2x128xf32>
    tpu.vector_store %arg8[%c0_49, %c0_50], %80 {strides = array<i32>} : memref<4x256xf32, #tpu.memory_space<vmem>>, vector<2x128xf32>,
    %82 = vector.extract_strided_slice %78 {offsets = [2, 0], sizes = [2, 128], strides = [1, 1]} : vector<4x128xf32> to vector<2x128xf32>
    %c2_51 = arith.constant 2 : index
    %c128 = arith.constant 128 : index
    %83 = vector.load %arg8[%c2_51, %c128] : memref<4x256xf32, #tpu.memory_space<vmem>>, vector<2x128xf32>
    tpu.vector_store %arg8[%c2_51, %c128], %82 {strides = array<i32>} : memref<4x256xf32, #tpu.memory_space<vmem>>, vector<2x128xf32>,
    %84 = arith.truncf %78 : vector<4x128xf32> to vector<4x128xbf16>
    %85 = vector.extract_strided_slice %84 {offsets = [0, 0], sizes = [2, 128], strides = [1, 1]} : vector<4x128xbf16> to vector<2x128xbf16>
    %c0_52 = arith.constant 0 : index
    %c0_53 = arith.constant 0 : index
    %86 = vector.load %arg6[%c0_52, %c0_53] : memref<8x256xbf16, #tpu.memory_space<vmem>>, vector<2x128xbf16>
    tpu.vector_store %arg6[%c0_52, %c0_53], %85 {strides = array<i32>} : memref<8x256xbf16, #tpu.memory_space<vmem>>, vector<2x128xbf16>,
    %87 = vector.extract_strided_slice %84 {offsets = [2, 0], sizes = [2, 128], strides = [1, 1]} : vector<4x128xbf16> to vector<2x128xbf16>
    %c6 = arith.constant 6 : index
    %c128_54 = arith.constant 128 : index
    %88 = vector.load %arg6[%c6, %c128_54] : memref<8x256xbf16, #tpu.memory_space<vmem>>, vector<2x128xbf16>
    tpu.vector_store %arg6[%c6, %c128_54], %87 {strides = array<i32>} : memref<8x256xbf16, #tpu.memory_space<vmem>>, vector<2x128xbf16>,
    %c1_55 = arith.constant 1 : index
    %c0_56 = arith.constant 0 : index
    %c0_57 = arith.constant 0 : index
    %89 = vector.load %arg7[%c1_55, %c0_56, %c0_57] : memref<4x4x512xf32, #tpu.memory_space<vmem>>, vector<1x4x512xf32>
    %90 = vector.shape_cast %89 : vector<1x4x512xf32> to vector<4x512xf32>
    %c0_58 = arith.constant 0 : index
    %c0_59 = arith.constant 0 : index
    %91 = vector.load %arg8[%c0_58, %c0_59] : memref<4x256xf32, #tpu.memory_space<vmem>>, vector<4x256xf32>
    %92 = arith.truncf %91 : vector<4x256xf32> to vector<4x256xbf16>
    %c0_60 = arith.constant 0 : index
    %c0_61 = arith.constant 0 : index
    %93 = vector.load %arg3[%c0_60, %c0_61] : memref<256x512xbf16, #tpu.memory_space<vmem>>, vector<256x512xbf16>
    %cst_62 = arith.constant dense<0.000000e+00> : vector<4x512xf32>
    %94 = tpu.matmul %92, %93, %cst_62 {dimension_numbers = #tpu.dot_dimension_numbers<[1], [0], [0], [1], [0, 0, 1, 1], [], []>} : vector<4x256xbf16>, vector<256x512xbf16>, vector<4x512xf32> -> vector<4x512xf32>
    %95 = arith.addf %90, %94 : vector<4x512xf32>
    %96 = vector.extract_strided_slice %95 {offsets = [0, 0], sizes = [4, 128], strides = [1, 1]} : vector<4x512xf32> to vector<4x128xf32>
    %97 = arith.negf %96 : vector<4x128xf32>
    %98 = math.exp %97 : vector<4x128xf32>
    %cst_63 = arith.constant 1.000000e+00 : f32
    %99 = vector.broadcast %cst_63 : f32 to vector<4x128xf32>
    %100 = arith.addf %99, %98 : vector<4x128xf32>
    %101 = arith.divf %99, %100 : vector<4x128xf32>
    %102 = vector.extract_strided_slice %95 {offsets = [0, 128], sizes = [4, 128], strides = [1, 1]} : vector<4x512xf32> to vector<4x128xf32>
    %103 = arith.negf %102 : vector<4x128xf32>
    %104 = math.exp %103 : vector<4x128xf32>
    %cst_64 = arith.constant 1.000000e+00 : f32
    %105 = vector.broadcast %cst_64 : f32 to vector<4x128xf32>
    %106 = arith.addf %105, %104 : vector<4x128xf32>
    %107 = arith.divf %105, %106 : vector<4x128xf32>
    %108 = vector.extract_strided_slice %95 {offsets = [0, 256], sizes = [4, 128], strides = [1, 1]} : vector<4x512xf32> to vector<4x128xf32>
    %109 = math.tanh %108 : vector<4x128xf32>
    %110 = vector.extract_strided_slice %95 {offsets = [0, 384], sizes = [4, 128], strides = [1, 1]} : vector<4x512xf32> to vector<4x128xf32>
    %111 = arith.negf %110 : vector<4x128xf32>
    %112 = math.exp %111 : vector<4x128xf32>
    %cst_65 = arith.constant 1.000000e+00 : f32
    %113 = vector.broadcast %cst_65 : f32 to vector<4x128xf32>
    %114 = arith.addf %113, %112 : vector<4x128xf32>
    %115 = arith.divf %113, %114 : vector<4x128xf32>
    %c0_66 = arith.constant 0 : index
    %c0_67 = arith.constant 0 : index
    %116 = vector.load %arg9[%c0_66, %c0_67] : memref<4x128xf32, #tpu.memory_space<vmem>>, vector<4x128xf32>
    %117 = arith.mulf %107, %116 : vector<4x128xf32>
    %118 = arith.mulf %101, %109 : vector<4x128xf32>
    %119 = arith.addf %117, %118 : vector<4x128xf32>
    %120 = math.tanh %119 : vector<4x128xf32>
    %121 = arith.mulf %115, %120 : vector<4x128xf32>
    %c0_68 = arith.constant 0 : index
    %c0_69 = arith.constant 0 : index
    %122 = vector.load %arg9[%c0_68, %c0_69] : memref<4x128xf32, #tpu.memory_space<vmem>>, vector<4x128xf32>
    tpu.vector_store %arg9[%c0_68, %c0_69], %119 {strides = array<i32>} : memref<4x128xf32, #tpu.memory_space<vmem>>, vector<4x128xf32>,
    %123 = vector.extract_strided_slice %121 {offsets = [0, 0], sizes = [2, 128], strides = [1, 1]} : vector<4x128xf32> to vector<2x128xf32>
    %c0_70 = arith.constant 0 : index
    %c0_71 = arith.constant 0 : index
    %124 = vector.load %arg8[%c0_70, %c0_71] : memref<4x256xf32, #tpu.memory_space<vmem>>, vector<2x128xf32>
    tpu.vector_store %arg8[%c0_70, %c0_71], %123 {strides = array<i32>} : memref<4x256xf32, #tpu.memory_space<vmem>>, vector<2x128xf32>,
    %125 = vector.extract_strided_slice %121 {offsets = [2, 0], sizes = [2, 128], strides = [1, 1]} : vector<4x128xf32> to vector<2x128xf32>
    %c2_72 = arith.constant 2 : index
    %c128_73 = arith.constant 128 : index
    %126 = vector.load %arg8[%c2_72, %c128_73] : memref<4x256xf32, #tpu.memory_space<vmem>>, vector<2x128xf32>
    tpu.vector_store %arg8[%c2_72, %c128_73], %125 {strides = array<i32>} : memref<4x256xf32, #tpu.memory_space<vmem>>, vector<2x128xf32>,
    %127 = arith.truncf %121 : vector<4x128xf32> to vector<4x128xbf16>
    %128 = vector.extract_strided_slice %127 {offsets = [0, 0], sizes = [2, 128], strides = [1, 1]} : vector<4x128xbf16> to vector<2x128xbf16>
    %c2_74 = arith.constant 2 : index
    %c0_75 = arith.constant 0 : index
    %129 = vector.load %arg6[%c2_74, %c0_75] : memref<8x256xbf16, #tpu.memory_space<vmem>>, vector<2x128xbf16>
    tpu.vector_store %arg6[%c2_74, %c0_75], %128 {strides = array<i32>} : memref<8x256xbf16, #tpu.memory_space<vmem>>, vector<2x128xbf16>,
    %130 = vector.extract_strided_slice %127 {offsets = [2, 0], sizes = [2, 128], strides = [1, 1]} : vector<4x128xbf16> to vector<2x128xbf16>
    %c4 = arith.constant 4 : index
    %c128_76 = arith.constant 128 : index
    %131 = vector.load %arg6[%c4, %c128_76] : memref<8x256xbf16, #tpu.memory_space<vmem>>, vector<2x128xbf16>
    tpu.vector_store %arg6[%c4, %c128_76], %130 {strides = array<i32>} : memref<8x256xbf16, #tpu.memory_space<vmem>>, vector<2x128xbf16>,
    %c2_77 = arith.constant 2 : index
    %c0_78 = arith.constant 0 : index
    %c0_79 = arith.constant 0 : index
    %132 = vector.load %arg7[%c2_77, %c0_78, %c0_79] : memref<4x4x512xf32, #tpu.memory_space<vmem>>, vector<1x4x512xf32>
    %133 = vector.shape_cast %132 : vector<1x4x512xf32> to vector<4x512xf32>
    %c0_80 = arith.constant 0 : index
    %c0_81 = arith.constant 0 : index
    %134 = vector.load %arg8[%c0_80, %c0_81] : memref<4x256xf32, #tpu.memory_space<vmem>>, vector<4x256xf32>
    %135 = arith.truncf %134 : vector<4x256xf32> to vector<4x256xbf16>
    %c0_82 = arith.constant 0 : index
    %c0_83 = arith.constant 0 : index
    %136 = vector.load %arg3[%c0_82, %c0_83] : memref<256x512xbf16, #tpu.memory_space<vmem>>, vector<256x512xbf16>
    %cst_84 = arith.constant dense<0.000000e+00> : vector<4x512xf32>
    %137 = tpu.matmul %135, %136, %cst_84 {dimension_numbers = #tpu.dot_dimension_numbers<[1], [0], [0], [1], [0, 0, 1, 1], [], []>} : vector<4x256xbf16>, vector<256x512xbf16>, vector<4x512xf32> -> vector<4x512xf32>
    %138 = arith.addf %133, %137 : vector<4x512xf32>
    %139 = vector.extract_strided_slice %138 {offsets = [0, 0], sizes = [4, 128], strides = [1, 1]} : vector<4x512xf32> to vector<4x128xf32>
    %140 = arith.negf %139 : vector<4x128xf32>
    %141 = math.exp %140 : vector<4x128xf32>
    %cst_85 = arith.constant 1.000000e+00 : f32
    %142 = vector.broadcast %cst_85 : f32 to vector<4x128xf32>
    %143 = arith.addf %142, %141 : vector<4x128xf32>
    %144 = arith.divf %142, %143 : vector<4x128xf32>
    %145 = vector.extract_strided_slice %138 {offsets = [0, 128], sizes = [4, 128], strides = [1, 1]} : vector<4x512xf32> to vector<4x128xf32>
    %146 = arith.negf %145 : vector<4x128xf32>
    %147 = math.exp %146 : vector<4x128xf32>
    %cst_86 = arith.constant 1.000000e+00 : f32
    %148 = vector.broadcast %cst_86 : f32 to vector<4x128xf32>
    %149 = arith.addf %148, %147 : vector<4x128xf32>
    %150 = arith.divf %148, %149 : vector<4x128xf32>
    %151 = vector.extract_strided_slice %138 {offsets = [0, 256], sizes = [4, 128], strides = [1, 1]} : vector<4x512xf32> to vector<4x128xf32>
    %152 = math.tanh %151 : vector<4x128xf32>
    %153 = vector.extract_strided_slice %138 {offsets = [0, 384], sizes = [4, 128], strides = [1, 1]} : vector<4x512xf32> to vector<4x128xf32>
    %154 = arith.negf %153 : vector<4x128xf32>
    %155 = math.exp %154 : vector<4x128xf32>
    %cst_87 = arith.constant 1.000000e+00 : f32
    %156 = vector.broadcast %cst_87 : f32 to vector<4x128xf32>
    %157 = arith.addf %156, %155 : vector<4x128xf32>
    %158 = arith.divf %156, %157 : vector<4x128xf32>
    %c0_88 = arith.constant 0 : index
    %c0_89 = arith.constant 0 : index
    %159 = vector.load %arg9[%c0_88, %c0_89] : memref<4x128xf32, #tpu.memory_space<vmem>>, vector<4x128xf32>
    %160 = arith.mulf %150, %159 : vector<4x128xf32>
    %161 = arith.mulf %144, %152 : vector<4x128xf32>
    %162 = arith.addf %160, %161 : vector<4x128xf32>
    %163 = math.tanh %162 : vector<4x128xf32>
    %164 = arith.mulf %158, %163 : vector<4x128xf32>
    %c0_90 = arith.constant 0 : index
    %c0_91 = arith.constant 0 : index
    %165 = vector.load %arg9[%c0_90, %c0_91] : memref<4x128xf32, #tpu.memory_space<vmem>>, vector<4x128xf32>
    tpu.vector_store %arg9[%c0_90, %c0_91], %162 {strides = array<i32>} : memref<4x128xf32, #tpu.memory_space<vmem>>, vector<4x128xf32>,
    %166 = vector.extract_strided_slice %164 {offsets = [0, 0], sizes = [2, 128], strides = [1, 1]} : vector<4x128xf32> to vector<2x128xf32>
    %c0_92 = arith.constant 0 : index
    %c0_93 = arith.constant 0 : index
    %167 = vector.load %arg8[%c0_92, %c0_93] : memref<4x256xf32, #tpu.memory_space<vmem>>, vector<2x128xf32>
    tpu.vector_store %arg8[%c0_92, %c0_93], %166 {strides = array<i32>} : memref<4x256xf32, #tpu.memory_space<vmem>>, vector<2x128xf32>,
    %168 = vector.extract_strided_slice %164 {offsets = [2, 0], sizes = [2, 128], strides = [1, 1]} : vector<4x128xf32> to vector<2x128xf32>
    %c2_94 = arith.constant 2 : index
    %c128_95 = arith.constant 128 : index
    %169 = vector.load %arg8[%c2_94, %c128_95] : memref<4x256xf32, #tpu.memory_space<vmem>>, vector<2x128xf32>
    tpu.vector_store %arg8[%c2_94, %c128_95], %168 {strides = array<i32>} : memref<4x256xf32, #tpu.memory_space<vmem>>, vector<2x128xf32>,
    %170 = arith.truncf %164 : vector<4x128xf32> to vector<4x128xbf16>
    %171 = vector.extract_strided_slice %170 {offsets = [0, 0], sizes = [2, 128], strides = [1, 1]} : vector<4x128xbf16> to vector<2x128xbf16>
    %c4_96 = arith.constant 4 : index
    %c0_97 = arith.constant 0 : index
    %172 = vector.load %arg6[%c4_96, %c0_97] : memref<8x256xbf16, #tpu.memory_space<vmem>>, vector<2x128xbf16>
    tpu.vector_store %arg6[%c4_96, %c0_97], %171 {strides = array<i32>} : memref<8x256xbf16, #tpu.memory_space<vmem>>, vector<2x128xbf16>,
    %173 = vector.extract_strided_slice %170 {offsets = [2, 0], sizes = [2, 128], strides = [1, 1]} : vector<4x128xbf16> to vector<2x128xbf16>
    %c2_98 = arith.constant 2 : index
    %c128_99 = arith.constant 128 : index
    %174 = vector.load %arg6[%c2_98, %c128_99] : memref<8x256xbf16, #tpu.memory_space<vmem>>, vector<2x128xbf16>
    tpu.vector_store %arg6[%c2_98, %c128_99], %173 {strides = array<i32>} : memref<8x256xbf16, #tpu.memory_space<vmem>>, vector<2x128xbf16>,
    %c3_100 = arith.constant 3 : index
    %c0_101 = arith.constant 0 : index
    %c0_102 = arith.constant 0 : index
    %175 = vector.load %arg7[%c3_100, %c0_101, %c0_102] : memref<4x4x512xf32, #tpu.memory_space<vmem>>, vector<1x4x512xf32>
    %176 = vector.shape_cast %175 : vector<1x4x512xf32> to vector<4x512xf32>
    %c0_103 = arith.constant 0 : index
    %c0_104 = arith.constant 0 : index
    %177 = vector.load %arg8[%c0_103, %c0_104] : memref<4x256xf32, #tpu.memory_space<vmem>>, vector<4x256xf32>
    %178 = arith.truncf %177 : vector<4x256xf32> to vector<4x256xbf16>
    %c0_105 = arith.constant 0 : index
    %c0_106 = arith.constant 0 : index
    %179 = vector.load %arg3[%c0_105, %c0_106] : memref<256x512xbf16, #tpu.memory_space<vmem>>, vector<256x512xbf16>
    %cst_107 = arith.constant dense<0.000000e+00> : vector<4x512xf32>
    %180 = tpu.matmul %178, %179, %cst_107 {dimension_numbers = #tpu.dot_dimension_numbers<[1], [0], [0], [1], [0, 0, 1, 1], [], []>} : vector<4x256xbf16>, vector<256x512xbf16>, vector<4x512xf32> -> vector<4x512xf32>
    %181 = arith.addf %176, %180 : vector<4x512xf32>
    %182 = vector.extract_strided_slice %181 {offsets = [0, 0], sizes = [4, 128], strides = [1, 1]} : vector<4x512xf32> to vector<4x128xf32>
    %183 = arith.negf %182 : vector<4x128xf32>
    %184 = math.exp %183 : vector<4x128xf32>
    %cst_108 = arith.constant 1.000000e+00 : f32
    %185 = vector.broadcast %cst_108 : f32 to vector<4x128xf32>
    %186 = arith.addf %185, %184 : vector<4x128xf32>
    %187 = arith.divf %185, %186 : vector<4x128xf32>
    %188 = vector.extract_strided_slice %181 {offsets = [0, 128], sizes = [4, 128], strides = [1, 1]} : vector<4x512xf32> to vector<4x128xf32>
    %189 = arith.negf %188 : vector<4x128xf32>
    %190 = math.exp %189 : vector<4x128xf32>
    %cst_109 = arith.constant 1.000000e+00 : f32
    %191 = vector.broadcast %cst_109 : f32 to vector<4x128xf32>
    %192 = arith.addf %191, %190 : vector<4x128xf32>
    %193 = arith.divf %191, %192 : vector<4x128xf32>
    %194 = vector.extract_strided_slice %181 {offsets = [0, 256], sizes = [4, 128], strides = [1, 1]} : vector<4x512xf32> to vector<4x128xf32>
    %195 = math.tanh %194 : vector<4x128xf32>
    %196 = vector.extract_strided_slice %181 {offsets = [0, 384], sizes = [4, 128], strides = [1, 1]} : vector<4x512xf32> to vector<4x128xf32>
    %197 = arith.negf %196 : vector<4x128xf32>
    %198 = math.exp %197 : vector<4x128xf32>
    %cst_110 = arith.constant 1.000000e+00 : f32
    %199 = vector.broadcast %cst_110 : f32 to vector<4x128xf32>
    %200 = arith.addf %199, %198 : vector<4x128xf32>
    %201 = arith.divf %199, %200 : vector<4x128xf32>
    %c0_111 = arith.constant 0 : index
    %c0_112 = arith.constant 0 : index
    %202 = vector.load %arg9[%c0_111, %c0_112] : memref<4x128xf32, #tpu.memory_space<vmem>>, vector<4x128xf32>
    %203 = arith.mulf %193, %202 : vector<4x128xf32>
    %204 = arith.mulf %187, %195 : vector<4x128xf32>
    %205 = arith.addf %203, %204 : vector<4x128xf32>
    %206 = math.tanh %205 : vector<4x128xf32>
    %207 = arith.mulf %201, %206 : vector<4x128xf32>
    %c0_113 = arith.constant 0 : index
    %c0_114 = arith.constant 0 : index
    %208 = vector.load %arg9[%c0_113, %c0_114] : memref<4x128xf32, #tpu.memory_space<vmem>>, vector<4x128xf32>
    tpu.vector_store %arg9[%c0_113, %c0_114], %205 {strides = array<i32>} : memref<4x128xf32, #tpu.memory_space<vmem>>, vector<4x128xf32>,
    %209 = vector.extract_strided_slice %207 {offsets = [0, 0], sizes = [2, 128], strides = [1, 1]} : vector<4x128xf32> to vector<2x128xf32>
    %c0_115 = arith.constant 0 : index
    %c0_116 = arith.constant 0 : index
    %210 = vector.load %arg8[%c0_115, %c0_116] : memref<4x256xf32, #tpu.memory_space<vmem>>, vector<2x128xf32>
    tpu.vector_store %arg8[%c0_115, %c0_116], %209 {strides = array<i32>} : memref<4x256xf32, #tpu.memory_space<vmem>>, vector<2x128xf32>,
    %211 = vector.extract_strided_slice %207 {offsets = [2, 0], sizes = [2, 128], strides = [1, 1]} : vector<4x128xf32> to vector<2x128xf32>
    %c2_117 = arith.constant 2 : index
    %c128_118 = arith.constant 128 : index
    %212 = vector.load %arg8[%c2_117, %c128_118] : memref<4x256xf32, #tpu.memory_space<vmem>>, vector<2x128xf32>
    tpu.vector_store %arg8[%c2_117, %c128_118], %211 {strides = array<i32>} : memref<4x256xf32, #tpu.memory_space<vmem>>, vector<2x128xf32>,
    %213 = arith.truncf %207 : vector<4x128xf32> to vector<4x128xbf16>
    %214 = vector.extract_strided_slice %213 {offsets = [0, 0], sizes = [2, 128], strides = [1, 1]} : vector<4x128xbf16> to vector<2x128xbf16>
    %c6_119 = arith.constant 6 : index
    %c0_120 = arith.constant 0 : index
    %215 = vector.load %arg6[%c6_119, %c0_120] : memref<8x256xbf16, #tpu.memory_space<vmem>>, vector<2x128xbf16>
    tpu.vector_store %arg6[%c6_119, %c0_120], %214 {strides = array<i32>} : memref<8x256xbf16, #tpu.memory_space<vmem>>, vector<2x128xbf16>,
    %216 = vector.extract_strided_slice %213 {offsets = [2, 0], sizes = [2, 128], strides = [1, 1]} : vector<4x128xbf16> to vector<2x128xbf16>
    %c0_121 = arith.constant 0 : index
    %c128_122 = arith.constant 128 : index
    %217 = vector.load %arg6[%c0_121, %c128_122] : memref<8x256xbf16, #tpu.memory_space<vmem>>, vector<2x128xbf16>
    tpu.vector_store %arg6[%c0_121, %c128_122], %216 {strides = array<i32>} : memref<8x256xbf16, #tpu.memory_space<vmem>>, vector<2x128xbf16>,
    return
  }
}

module attributes {stable_mosaic.version = 11 : i64} {
  func.func @_fc_stack_kernel(%arg0: i32, %arg1: memref<8x256xbf16, #tpu.memory_space<vmem>>, %arg2: memref<256x512xbf16, #tpu.memory_space<vmem>>, %arg3: memref<1x512xf32, #tpu.memory_space<vmem>>, %arg4: memref<512x512xbf16, #tpu.memory_space<vmem>>, %arg5: memref<1x512xf32, #tpu.memory_space<vmem>>, %arg6: memref<512x256xbf16, #tpu.memory_space<vmem>>, %arg7: memref<1x256xf32, #tpu.memory_space<vmem>>, %arg8: memref<256x128xbf16, #tpu.memory_space<vmem>>, %arg9: memref<1x128xf32, #tpu.memory_space<vmem>>, %arg10: memref<8x128xf32, #tpu.memory_space<vmem>>) attributes {dimension_semantics = [#tpu.dimension_semantics<parallel>], iteration_bounds = array<i64: 1>, scalar_prefetch = 0 : i64, scratch_operands = 0 : i64, tpu.core_type = #tpu.core_type<tc>, window_params = [{transform_indices = @transform_0, window_bounds = array<i64: 8, 256>}, {pipeline_mode = #tpu.pipeline_mode<synchronous>, transform_indices = @transform_1, window_bounds = array<i64: 256, 512>}, {pipeline_mode = #tpu.pipeline_mode<synchronous>, transform_indices = @transform_2, window_bounds = array<i64: 1, 512>}, {pipeline_mode = #tpu.pipeline_mode<synchronous>, transform_indices = @transform_3, window_bounds = array<i64: 512, 512>}, {pipeline_mode = #tpu.pipeline_mode<synchronous>, transform_indices = @transform_4, window_bounds = array<i64: 1, 512>}, {pipeline_mode = #tpu.pipeline_mode<synchronous>, transform_indices = @transform_5, window_bounds = array<i64: 512, 256>}, {pipeline_mode = #tpu.pipeline_mode<synchronous>, transform_indices = @transform_6, window_bounds = array<i64: 1, 256>}, {pipeline_mode = #tpu.pipeline_mode<synchronous>, transform_indices = @transform_7, window_bounds = array<i64: 256, 128>}, {pipeline_mode = #tpu.pipeline_mode<synchronous>, transform_indices = @transform_8, window_bounds = array<i64: 1, 128>}, {transform_indices = @transform_9, window_bounds = array<i64: 8, 128>}]} {
    %c0 = arith.constant 0 : index
    %c0_0 = arith.constant 0 : index
    %0 = vector.load %arg1[%c0, %c0_0] : memref<8x256xbf16, #tpu.memory_space<vmem>>, vector<8x256xbf16>
    %c0_1 = arith.constant 0 : index
    %c0_2 = arith.constant 0 : index
    %1 = vector.load %arg2[%c0_1, %c0_2] : memref<256x512xbf16, #tpu.memory_space<vmem>>, vector<256x512xbf16>
    %cst = arith.constant dense<0.000000e+00> : vector<8x512xf32>
    %2 = tpu.matmul %0, %1, %cst {dimension_numbers = #tpu.dot_dimension_numbers<[1], [0], [0], [1], [0, 0, 1, 1], [], []>} : vector<8x256xbf16>, vector<256x512xbf16>, vector<8x512xf32> -> vector<8x512xf32>
    %c0_3 = arith.constant 0 : index
    %c0_4 = arith.constant 0 : index
    %3 = vector.load %arg3[%c0_3, %c0_4] : memref<1x512xf32, #tpu.memory_space<vmem>>, vector<1x512xf32>
    %4 = vector.broadcast %3 : vector<1x512xf32> to vector<8x512xf32>
    %5 = arith.addf %2, %4 : vector<8x512xf32>
    %cst_5 = arith.constant 0.000000e+00 : f32
    %6 = vector.broadcast %cst_5 : f32 to vector<8x512xf32>
    %7 = arith.cmpf oge, %5, %6 : vector<8x512xf32>
    %cst_6 = arith.constant 1.000000e-01 : f32
    %8 = vector.broadcast %cst_6 : f32 to vector<8x512xf32>
    %9 = arith.mulf %8, %5 : vector<8x512xf32>
    %10 = arith.select %7, %5, %9 : vector<8x512xi1>, vector<8x512xf32>
    %11 = arith.truncf %10 : vector<8x512xf32> to vector<8x512xbf16>
    %c0_7 = arith.constant 0 : index
    %c0_8 = arith.constant 0 : index
    %12 = vector.load %arg4[%c0_7, %c0_8] : memref<512x512xbf16, #tpu.memory_space<vmem>>, vector<512x512xbf16>
    %cst_9 = arith.constant dense<0.000000e+00> : vector<8x512xf32>
    %13 = tpu.matmul %11, %12, %cst_9 {dimension_numbers = #tpu.dot_dimension_numbers<[1], [0], [0], [1], [0, 0, 1, 1], [], []>} : vector<8x512xbf16>, vector<512x512xbf16>, vector<8x512xf32> -> vector<8x512xf32>
    %c0_10 = arith.constant 0 : index
    %c0_11 = arith.constant 0 : index
    %14 = vector.load %arg5[%c0_10, %c0_11] : memref<1x512xf32, #tpu.memory_space<vmem>>, vector<1x512xf32>
    %15 = vector.broadcast %14 : vector<1x512xf32> to vector<8x512xf32>
    %16 = arith.addf %13, %15 : vector<8x512xf32>
    %cst_12 = arith.constant 0.000000e+00 : f32
    %17 = vector.broadcast %cst_12 : f32 to vector<8x512xf32>
    %18 = arith.cmpf oge, %16, %17 : vector<8x512xf32>
    %cst_13 = arith.constant 1.000000e-01 : f32
    %19 = vector.broadcast %cst_13 : f32 to vector<8x512xf32>
    %20 = arith.mulf %19, %16 : vector<8x512xf32>
    %21 = arith.select %18, %16, %20 : vector<8x512xi1>, vector<8x512xf32>
    %22 = arith.truncf %21 : vector<8x512xf32> to vector<8x512xbf16>
    %c0_14 = arith.constant 0 : index
    %c0_15 = arith.constant 0 : index
    %23 = vector.load %arg6[%c0_14, %c0_15] : memref<512x256xbf16, #tpu.memory_space<vmem>>, vector<512x256xbf16>
    %cst_16 = arith.constant dense<0.000000e+00> : vector<8x256xf32>
    %24 = tpu.matmul %22, %23, %cst_16 {dimension_numbers = #tpu.dot_dimension_numbers<[1], [0], [0], [1], [0, 0, 1, 1], [], []>} : vector<8x512xbf16>, vector<512x256xbf16>, vector<8x256xf32> -> vector<8x256xf32>
    %c0_17 = arith.constant 0 : index
    %c0_18 = arith.constant 0 : index
    %25 = vector.load %arg7[%c0_17, %c0_18] : memref<1x256xf32, #tpu.memory_space<vmem>>, vector<1x256xf32>
    %26 = vector.broadcast %25 : vector<1x256xf32> to vector<8x256xf32>
    %27 = arith.addf %24, %26 : vector<8x256xf32>
    %cst_19 = arith.constant 0.000000e+00 : f32
    %28 = vector.broadcast %cst_19 : f32 to vector<8x256xf32>
    %29 = arith.cmpf oge, %27, %28 : vector<8x256xf32>
    %cst_20 = arith.constant 1.000000e-01 : f32
    %30 = vector.broadcast %cst_20 : f32 to vector<8x256xf32>
    %31 = arith.mulf %30, %27 : vector<8x256xf32>
    %32 = arith.select %29, %27, %31 : vector<8x256xi1>, vector<8x256xf32>
    %33 = arith.truncf %32 : vector<8x256xf32> to vector<8x256xbf16>
    %c0_21 = arith.constant 0 : index
    %c0_22 = arith.constant 0 : index
    %34 = vector.load %arg8[%c0_21, %c0_22] : memref<256x128xbf16, #tpu.memory_space<vmem>>, vector<256x128xbf16>
    %cst_23 = arith.constant dense<0.000000e+00> : vector<8x128xf32>
    %35 = tpu.matmul %33, %34, %cst_23 {dimension_numbers = #tpu.dot_dimension_numbers<[1], [0], [0], [1], [0, 0, 1, 1], [], []>} : vector<8x256xbf16>, vector<256x128xbf16>, vector<8x128xf32> -> vector<8x128xf32>
    %c0_24 = arith.constant 0 : index
    %c0_25 = arith.constant 0 : index
    %36 = vector.load %arg9[%c0_24, %c0_25] : memref<1x128xf32, #tpu.memory_space<vmem>>, vector<1x128xf32>
    %37 = vector.broadcast %36 : vector<1x128xf32> to vector<8x128xf32>
    %38 = arith.addf %35, %37 : vector<8x128xf32>
    %cst_26 = arith.constant dense<0xFF800000> : vector<8xf32>
    %39 = vector.multi_reduction <maximumf>, %38, %cst_26 [1] : vector<8x128xf32> to vector<8xf32>
    %40 = vector.shape_cast %39 : vector<8xf32> to vector<8x1xf32>
    %41 = vector.broadcast %40 : vector<8x1xf32> to vector<8x128xf32>
    %42 = arith.subf %38, %41 : vector<8x128xf32>
    %43 = math.exp %42 : vector<8x128xf32>
    %cst_27 = arith.constant dense<0.000000e+00> : vector<8xf32>
    %44 = vector.multi_reduction <add>, %43, %cst_27 [1] : vector<8x128xf32> to vector<8xf32>
    %45 = vector.shape_cast %44 : vector<8xf32> to vector<8x1xf32>
    %46 = math.log %45 : vector<8x1xf32>
    %47 = vector.broadcast %46 : vector<8x1xf32> to vector<8x128xf32>
    %48 = arith.subf %42, %47 : vector<8x128xf32>
    %c0_28 = arith.constant 0 : index
    %c0_29 = arith.constant 0 : index
    %49 = vector.load %arg10[%c0_28, %c0_29] : memref<8x128xf32, #tpu.memory_space<vmem>>, vector<8x128xf32>
    tpu.vector_store %arg10[%c0_28, %c0_29], %48 {strides = array<i32>} : memref<8x128xf32, #tpu.memory_space<vmem>>, vector<8x128xf32>,
    return
  }
  func.func @transform_0(%arg0: i32) -> (i32, i32) {
    %c0_i32 = arith.constant 0 : i32
    %c0_i32_0 = arith.constant 0 : i32
    return %arg0, %c0_i32 : i32, i32
  }
  func.func @transform_1(%arg0: i32) -> (i32, i32) {
    %c0_i32 = arith.constant 0 : i32
    %c0_i32_0 = arith.constant 0 : i32
    %c0_i32_1 = arith.constant 0 : i32
    return %c0_i32, %c0_i32_0 : i32, i32
  }
  func.func @transform_2(%arg0: i32) -> (i32, i32) {
    %c0_i32 = arith.constant 0 : i32
    %c0_i32_0 = arith.constant 0 : i32
    %c0_i32_1 = arith.constant 0 : i32
    return %c0_i32, %c0_i32_0 : i32, i32
  }
  func.func @transform_3(%arg0: i32) -> (i32, i32) {
    %c0_i32 = arith.constant 0 : i32
    %c0_i32_0 = arith.constant 0 : i32
    %c0_i32_1 = arith.constant 0 : i32
    return %c0_i32, %c0_i32_0 : i32, i32
  }
  func.func @transform_4(%arg0: i32) -> (i32, i32) {
    %c0_i32 = arith.constant 0 : i32
    %c0_i32_0 = arith.constant 0 : i32
    %c0_i32_1 = arith.constant 0 : i32
    return %c0_i32, %c0_i32_0 : i32, i32
  }
  func.func @transform_5(%arg0: i32) -> (i32, i32) {
    %c0_i32 = arith.constant 0 : i32
    %c0_i32_0 = arith.constant 0 : i32
    %c0_i32_1 = arith.constant 0 : i32
    return %c0_i32, %c0_i32_0 : i32, i32
  }
  func.func @transform_6(%arg0: i32) -> (i32, i32) {
    %c0_i32 = arith.constant 0 : i32
    %c0_i32_0 = arith.constant 0 : i32
    %c0_i32_1 = arith.constant 0 : i32
    return %c0_i32, %c0_i32_0 : i32, i32
  }
  func.func @transform_7(%arg0: i32) -> (i32, i32) {
    %c0_i32 = arith.constant 0 : i32
    %c0_i32_0 = arith.constant 0 : i32
    %c0_i32_1 = arith.constant 0 : i32
    return %c0_i32, %c0_i32_0 : i32, i32
  }
  func.func @transform_8(%arg0: i32) -> (i32, i32) {
    %c0_i32 = arith.constant 0 : i32
    %c0_i32_0 = arith.constant 0 : i32
    %c0_i32_1 = arith.constant 0 : i32
    return %c0_i32, %c0_i32_0 : i32, i32
  }
  func.func @transform_9(%arg0: i32) -> (i32, i32) {
    %c0_i32 = arith.constant 0 : i32
    %c0_i32_0 = arith.constant 0 : i32
    return %arg0, %c0_i32 : i32, i32
  }
}

module attributes {stable_mosaic.version = 11 : i64} {
  func.func @_bilstm_kernel(%arg0: memref<8x256xbf16, #tpu.memory_space<vmem>>, %arg1: memref<256x1024xbf16, #tpu.memory_space<vmem>>, %arg2: memref<1x1024xf32, #tpu.memory_space<vmem>>, %arg3: memref<256x512xbf16, #tpu.memory_space<vmem>>, %arg4: memref<4x256xf32, #tpu.memory_space<vmem>>, %arg5: memref<4x128xf32, #tpu.memory_space<vmem>>, %arg6: memref<8x256xbf16, #tpu.memory_space<vmem>>, %arg7: memref<4x4x512xf32, #tpu.memory_space<vmem>>, %arg8: memref<4x256xf32, #tpu.memory_space<vmem>>, %arg9: memref<4x128xf32, #tpu.memory_space<vmem>>) attributes {dimension_semantics = [], scalar_prefetch = 0 : i64, scratch_operands = 3 : i64, tpu.core_type = #tpu.core_type<tc>} {
    %c0 = arith.constant 0 : index
    %c0_0 = arith.constant 0 : index
    %0 = vector.load %arg0[%c0, %c0_0] : memref<8x256xbf16, #tpu.memory_space<vmem>>, vector<8x256xbf16>
    %c0_1 = arith.constant 0 : index
    %c0_2 = arith.constant 0 : index
    %1 = vector.load %arg1[%c0_1, %c0_2] : memref<256x1024xbf16, #tpu.memory_space<vmem>>, vector<256x1024xbf16>
    %cst = arith.constant dense<0.000000e+00> : vector<8x1024xf32>
    %2 = tpu.matmul %0, %1, %cst {dimension_numbers = #tpu.dot_dimension_numbers<[1], [0], [0], [1], [0, 0, 1, 1], [], []>} : vector<8x256xbf16>, vector<256x1024xbf16>, vector<8x1024xf32> -> vector<8x1024xf32>
    %c0_3 = arith.constant 0 : index
    %c0_4 = arith.constant 0 : index
    %3 = vector.load %arg2[%c0_3, %c0_4] : memref<1x1024xf32, #tpu.memory_space<vmem>>, vector<1x1024xf32>
    %4 = vector.broadcast %3 : vector<1x1024xf32> to vector<8x1024xf32>
    %5 = arith.addf %2, %4 : vector<8x1024xf32>
    %6 = vector.extract_strided_slice %5 {offsets = [0, 0], sizes = [2, 1024], strides = [1, 1]} : vector<8x1024xf32> to vector<2x1024xf32>
    %7 = vector.extract_strided_slice %6 {offsets = [0, 0], sizes = [2, 512], strides = [1, 1]} : vector<2x1024xf32> to vector<2x512xf32>
    %c0_5 = arith.constant 0 : index
    %c0_6 = arith.constant 0 : index
    %c0_7 = arith.constant 0 : index
    %8 = vector.load %arg7[%c0_5, %c0_6, %c0_7] : memref<4x4x512xf32, #tpu.memory_space<vmem>>, vector<1x2x512xf32>
    %9 = vector.shape_cast %8 : vector<1x2x512xf32> to vector<2x512xf32>
    %10 = vector.shape_cast %7 : vector<2x512xf32> to vector<1x2x512xf32>
    tpu.vector_store %arg7[%c0_5, %c0_6, %c0_7], %10 {strides = array<i32>} : memref<4x4x512xf32, #tpu.memory_space<vmem>>, vector<1x2x512xf32>,
    %11 = vector.extract_strided_slice %6 {offsets = [0, 512], sizes = [2, 512], strides = [1, 1]} : vector<2x1024xf32> to vector<2x512xf32>
    %c3 = arith.constant 3 : index
    %c2 = arith.constant 2 : index
    %c0_8 = arith.constant 0 : index
    %12 = vector.load %arg7[%c3, %c2, %c0_8] : memref<4x4x512xf32, #tpu.memory_space<vmem>>, vector<1x2x512xf32>
    %13 = vector.shape_cast %12 : vector<1x2x512xf32> to vector<2x512xf32>
    %14 = vector.shape_cast %11 : vector<2x512xf32> to vector<1x2x512xf32>
    tpu.vector_store %arg7[%c3, %c2, %c0_8], %14 {strides = array<i32>} : memref<4x4x512xf32, #tpu.memory_space<vmem>>, vector<1x2x512xf32>,
    %15 = vector.extract_strided_slice %5 {offsets = [2, 0], sizes = [2, 1024], strides = [1, 1]} : vector<8x1024xf32> to vector<2x1024xf32>
    %16 = vector.extract_strided_slice %15 {offsets = [0, 0], sizes = [2, 512], strides = [1, 1]} : vector<2x1024xf32> to vector<2x512xf32>
    %c1 = arith.constant 1 : index
    %c0_9 = arith.constant 0 : index
    %c0_10 = arith.constant 0 : index
    %17 = vector.load %arg7[%c1, %c0_9, %c0_10] : memref<4x4x512xf32, #tpu.memory_space<vmem>>, vector<1x2x512xf32>
    %18 = vector.shape_cast %17 : vector<1x2x512xf32> to vector<2x512xf32>
    %19 = vector.shape_cast %16 : vector<2x512xf32> to vector<1x2x512xf32>
    tpu.vector_store %arg7[%c1, %c0_9, %c0_10], %19 {strides = array<i32>} : memref<4x4x512xf32, #tpu.memory_space<vmem>>, vector<1x2x512xf32>,
    %20 = vector.extract_strided_slice %15 {offsets = [0, 512], sizes = [2, 512], strides = [1, 1]} : vector<2x1024xf32> to vector<2x512xf32>
    %c2_11 = arith.constant 2 : index
    %c2_12 = arith.constant 2 : index
    %c0_13 = arith.constant 0 : index
    %21 = vector.load %arg7[%c2_11, %c2_12, %c0_13] : memref<4x4x512xf32, #tpu.memory_space<vmem>>, vector<1x2x512xf32>
    %22 = vector.shape_cast %21 : vector<1x2x512xf32> to vector<2x512xf32>
    %23 = vector.shape_cast %20 : vector<2x512xf32> to vector<1x2x512xf32>
    tpu.vector_store %arg7[%c2_11, %c2_12, %c0_13], %23 {strides = array<i32>} : memref<4x4x512xf32, #tpu.memory_space<vmem>>, vector<1x2x512xf32>,
    %24 = vector.extract_strided_slice %5 {offsets = [4, 0], sizes = [2, 1024], strides = [1, 1]} : vector<8x1024xf32> to vector<2x1024xf32>
    %25 = vector.extract_strided_slice %24 {offsets = [0, 0], sizes = [2, 512], strides = [1, 1]} : vector<2x1024xf32> to vector<2x512xf32>
    %c2_14 = arith.constant 2 : index
    %c0_15 = arith.constant 0 : index
    %c0_16 = arith.constant 0 : index
    %26 = vector.load %arg7[%c2_14, %c0_15, %c0_16] : memref<4x4x512xf32, #tpu.memory_space<vmem>>, vector<1x2x512xf32>
    %27 = vector.shape_cast %26 : vector<1x2x512xf32> to vector<2x512xf32>
    %28 = vector.shape_cast %25 : vector<2x512xf32> to vector<1x2x512xf32>
    tpu.vector_store %arg7[%c2_14, %c0_15, %c0_16], %28 {strides = array<i32>} : memref<4x4x512xf32, #tpu.memory_space<vmem>>, vector<1x2x512xf32>,
    %29 = vector.extract_strided_slice %24 {offsets = [0, 512], sizes = [2, 512], strides = [1, 1]} : vector<2x1024xf32> to vector<2x512xf32>
    %c1_17 = arith.constant 1 : index
    %c2_18 = arith.constant 2 : index
    %c0_19 = arith.constant 0 : index
    %30 = vector.load %arg7[%c1_17, %c2_18, %c0_19] : memref<4x4x512xf32, #tpu.memory_space<vmem>>, vector<1x2x512xf32>
    %31 = vector.shape_cast %30 : vector<1x2x512xf32> to vector<2x512xf32>
    %32 = vector.shape_cast %29 : vector<2x512xf32> to vector<1x2x512xf32>
    tpu.vector_store %arg7[%c1_17, %c2_18, %c0_19], %32 {strides = array<i32>} : memref<4x4x512xf32, #tpu.memory_space<vmem>>, vector<1x2x512xf32>,
    %33 = vector.extract_strided_slice %5 {offsets = [6, 0], sizes = [2, 1024], strides = [1, 1]} : vector<8x1024xf32> to vector<2x1024xf32>
    %34 = vector.extract_strided_slice %33 {offsets = [0, 0], sizes = [2, 512], strides = [1, 1]} : vector<2x1024xf32> to vector<2x512xf32>
    %c3_20 = arith.constant 3 : index
    %c0_21 = arith.constant 0 : index
    %c0_22 = arith.constant 0 : index
    %35 = vector.load %arg7[%c3_20, %c0_21, %c0_22] : memref<4x4x512xf32, #tpu.memory_space<vmem>>, vector<1x2x512xf32>
    %36 = vector.shape_cast %35 : vector<1x2x512xf32> to vector<2x512xf32>
    %37 = vector.shape_cast %34 : vector<2x512xf32> to vector<1x2x512xf32>
    tpu.vector_store %arg7[%c3_20, %c0_21, %c0_22], %37 {strides = array<i32>} : memref<4x4x512xf32, #tpu.memory_space<vmem>>, vector<1x2x512xf32>,
    %38 = vector.extract_strided_slice %33 {offsets = [0, 512], sizes = [2, 512], strides = [1, 1]} : vector<2x1024xf32> to vector<2x512xf32>
    %c0_23 = arith.constant 0 : index
    %c2_24 = arith.constant 2 : index
    %c0_25 = arith.constant 0 : index
    %39 = vector.load %arg7[%c0_23, %c2_24, %c0_25] : memref<4x4x512xf32, #tpu.memory_space<vmem>>, vector<1x2x512xf32>
    %40 = vector.shape_cast %39 : vector<1x2x512xf32> to vector<2x512xf32>
    %41 = vector.shape_cast %38 : vector<2x512xf32> to vector<1x2x512xf32>
    tpu.vector_store %arg7[%c0_23, %c2_24, %c0_25], %41 {strides = array<i32>} : memref<4x4x512xf32, #tpu.memory_space<vmem>>, vector<1x2x512xf32>,
    %c0_26 = arith.constant 0 : index
    %c0_27 = arith.constant 0 : index
    %42 = vector.load %arg4[%c0_26, %c0_27] : memref<4x256xf32, #tpu.memory_space<vmem>>, vector<4x256xf32>
    %c0_28 = arith.constant 0 : index
    %c0_29 = arith.constant 0 : index
    %43 = vector.load %arg8[%c0_28, %c0_29] : memref<4x256xf32, #tpu.memory_space<vmem>>, vector<4x256xf32>
    tpu.vector_store %arg8[%c0_28, %c0_29], %42 {strides = array<i32>} : memref<4x256xf32, #tpu.memory_space<vmem>>, vector<4x256xf32>,
    %c0_30 = arith.constant 0 : index
    %c0_31 = arith.constant 0 : index
    %44 = vector.load %arg5[%c0_30, %c0_31] : memref<4x128xf32, #tpu.memory_space<vmem>>, vector<4x128xf32>
    %c0_32 = arith.constant 0 : index
    %c0_33 = arith.constant 0 : index
    %45 = vector.load %arg9[%c0_32, %c0_33] : memref<4x128xf32, #tpu.memory_space<vmem>>, vector<4x128xf32>
    tpu.vector_store %arg9[%c0_32, %c0_33], %44 {strides = array<i32>} : memref<4x128xf32, #tpu.memory_space<vmem>>, vector<4x128xf32>,
    %c0_34 = arith.constant 0 : index
    %c0_35 = arith.constant 0 : index
    %c0_36 = arith.constant 0 : index
    %46 = vector.load %arg7[%c0_34, %c0_35, %c0_36] : memref<4x4x512xf32, #tpu.memory_space<vmem>>, vector<1x4x512xf32>
    %47 = vector.shape_cast %46 : vector<1x4x512xf32> to vector<4x512xf32>
    %c0_37 = arith.constant 0 : index
    %c0_38 = arith.constant 0 : index
    %48 = vector.load %arg8[%c0_37, %c0_38] : memref<4x256xf32, #tpu.memory_space<vmem>>, vector<4x256xf32>
    %49 = arith.truncf %48 : vector<4x256xf32> to vector<4x256xbf16>
    %c0_39 = arith.constant 0 : index
    %c0_40 = arith.constant 0 : index
    %50 = vector.load %arg3[%c0_39, %c0_40] : memref<256x512xbf16, #tpu.memory_space<vmem>>, vector<256x512xbf16>
    %cst_41 = arith.constant dense<0.000000e+00> : vector<4x512xf32>
    %51 = tpu.matmul %49, %50, %cst_41 {dimension_numbers = #tpu.dot_dimension_numbers<[1], [0], [0], [1], [0, 0, 1, 1], [], []>} : vector<4x256xbf16>, vector<256x512xbf16>, vector<4x512xf32> -> vector<4x512xf32>
    %52 = arith.addf %47, %51 : vector<4x512xf32>
    %53 = vector.extract_strided_slice %52 {offsets = [0, 0], sizes = [4, 128], strides = [1, 1]} : vector<4x512xf32> to vector<4x128xf32>
    %54 = arith.negf %53 : vector<4x128xf32>
    %55 = math.exp %54 : vector<4x128xf32>
    %cst_42 = arith.constant 1.000000e+00 : f32
    %56 = vector.broadcast %cst_42 : f32 to vector<4x128xf32>
    %57 = arith.addf %56, %55 : vector<4x128xf32>
    %58 = arith.divf %56, %57 : vector<4x128xf32>
    %59 = vector.extract_strided_slice %52 {offsets = [0, 128], sizes = [4, 128], strides = [1, 1]} : vector<4x512xf32> to vector<4x128xf32>
    %60 = arith.negf %59 : vector<4x128xf32>
    %61 = math.exp %60 : vector<4x128xf32>
    %cst_43 = arith.constant 1.000000e+00 : f32
    %62 = vector.broadcast %cst_43 : f32 to vector<4x128xf32>
    %63 = arith.addf %62, %61 : vector<4x128xf32>
    %64 = arith.divf %62, %63 : vector<4x128xf32>
    %65 = vector.extract_strided_slice %52 {offsets = [0, 256], sizes = [4, 128], strides = [1, 1]} : vector<4x512xf32> to vector<4x128xf32>
    %66 = math.tanh %65 : vector<4x128xf32>
    %67 = vector.extract_strided_slice %52 {offsets = [0, 384], sizes = [4, 128], strides = [1, 1]} : vector<4x512xf32> to vector<4x128xf32>
    %68 = arith.negf %67 : vector<4x128xf32>
    %69 = math.exp %68 : vector<4x128xf32>
    %cst_44 = arith.constant 1.000000e+00 : f32
    %70 = vector.broadcast %cst_44 : f32 to vector<4x128xf32>
    %71 = arith.addf %70, %69 : vector<4x128xf32>
    %72 = arith.divf %70, %71 : vector<4x128xf32>
    %c0_45 = arith.constant 0 : index
    %c0_46 = arith.constant 0 : index
    %73 = vector.load %arg9[%c0_45, %c0_46] : memref<4x128xf32, #tpu.memory_space<vmem>>, vector<4x128xf32>
    %74 = arith.mulf %64, %73 : vector<4x128xf32>
    %75 = arith.mulf %58, %66 : vector<4x128xf32>
    %76 = arith.addf %74, %75 : vector<4x128xf32>
    %77 = math.tanh %76 : vector<4x128xf32>
    %78 = arith.mulf %72, %77 : vector<4x128xf32>
    %c0_47 = arith.constant 0 : index
    %c0_48 = arith.constant 0 : index
    %79 = vector.load %arg9[%c0_47, %c0_48] : memref<4x128xf32, #tpu.memory_space<vmem>>, vector<4x128xf32>
    tpu.vector_store %arg9[%c0_47, %c0_48], %76 {strides = array<i32>} : memref<4x128xf32, #tpu.memory_space<vmem>>, vector<4x128xf32>,
    %80 = vector.extract_strided_slice %78 {offsets = [0, 0], sizes = [2, 128], strides = [1, 1]} : vector<4x128xf32> to vector<2x128xf32>
    %c0_49 = arith.constant 0 : index
    %c0_50 = arith.constant 0 : index
    %81 = vector.load %arg8[%c0_49, %c0_50] : memref<4x256xf32, #tpu.memory_space<vmem>>, vector<2x128xf32>
    tpu.vector_store %arg8[%c0_49, %c0_50], %80 {strides = array<i32>} : memref<4x256xf32, #tpu.memory_space<vmem>>, vector<2x128xf32>,
    %82 = vector.extract_strided_slice %78 {offsets = [2, 0], sizes = [2, 128], strides = [1, 1]} : vector<4x128xf32> to vector<2x128xf32>
    %c2_51 = arith.constant 2 : index
    %c128 = arith.constant 128 : index
    %83 = vector.load %arg8[%c2_51, %c128] : memref<4x256xf32, #tpu.memory_space<vmem>>, vector<2x128xf32>
    tpu.vector_store %arg8[%c2_51, %c128], %82 {strides = array<i32>} : memref<4x256xf32, #tpu.memory_space<vmem>>, vector<2x128xf32>,
    %84 = arith.truncf %78 : vector<4x128xf32> to vector<4x128xbf16>
    %85 = vector.extract_strided_slice %84 {offsets = [0, 0], sizes = [2, 128], strides = [1, 1]} : vector<4x128xbf16> to vector<2x128xbf16>
    %c0_52 = arith.constant 0 : index
    %c0_53 = arith.constant 0 : index
    %86 = vector.load %arg6[%c0_52, %c0_53] : memref<8x256xbf16, #tpu.memory_space<vmem>>, vector<2x128xbf16>
    tpu.vector_store %arg6[%c0_52, %c0_53], %85 {strides = array<i32>} : memref<8x256xbf16, #tpu.memory_space<vmem>>, vector<2x128xbf16>,
    %87 = vector.extract_strided_slice %84 {offsets = [2, 0], sizes = [2, 128], strides = [1, 1]} : vector<4x128xbf16> to vector<2x128xbf16>
    %c6 = arith.constant 6 : index
    %c128_54 = arith.constant 128 : index
    %88 = vector.load %arg6[%c6, %c128_54] : memref<8x256xbf16, #tpu.memory_space<vmem>>, vector<2x128xbf16>
    tpu.vector_store %arg6[%c6, %c128_54], %87 {strides = array<i32>} : memref<8x256xbf16, #tpu.memory_space<vmem>>, vector<2x128xbf16>,
    %c1_55 = arith.constant 1 : index
    %c0_56 = arith.constant 0 : index
    %c0_57 = arith.constant 0 : index
    %89 = vector.load %arg7[%c1_55, %c0_56, %c0_57] : memref<4x4x512xf32, #tpu.memory_space<vmem>>, vector<1x4x512xf32>
    %90 = vector.shape_cast %89 : vector<1x4x512xf32> to vector<4x512xf32>
    %c0_58 = arith.constant 0 : index
    %c0_59 = arith.constant 0 : index
    %91 = vector.load %arg8[%c0_58, %c0_59] : memref<4x256xf32, #tpu.memory_space<vmem>>, vector<4x256xf32>
    %92 = arith.truncf %91 : vector<4x256xf32> to vector<4x256xbf16>
    %c0_60 = arith.constant 0 : index
    %c0_61 = arith.constant 0 : index
    %93 = vector.load %arg3[%c0_60, %c0_61] : memref<256x512xbf16, #tpu.memory_space<vmem>>, vector<256x512xbf16>
    %cst_62 = arith.constant dense<0.000000e+00> : vector<4x512xf32>
    %94 = tpu.matmul %92, %93, %cst_62 {dimension_numbers = #tpu.dot_dimension_numbers<[1], [0], [0], [1], [0, 0, 1, 1], [], []>} : vector<4x256xbf16>, vector<256x512xbf16>, vector<4x512xf32> -> vector<4x512xf32>
    %95 = arith.addf %90, %94 : vector<4x512xf32>
    %96 = vector.extract_strided_slice %95 {offsets = [0, 0], sizes = [4, 128], strides = [1, 1]} : vector<4x512xf32> to vector<4x128xf32>
    %97 = arith.negf %96 : vector<4x128xf32>
    %98 = math.exp %97 : vector<4x128xf32>
    %cst_63 = arith.constant 1.000000e+00 : f32
    %99 = vector.broadcast %cst_63 : f32 to vector<4x128xf32>
    %100 = arith.addf %99, %98 : vector<4x128xf32>
    %101 = arith.divf %99, %100 : vector<4x128xf32>
    %102 = vector.extract_strided_slice %95 {offsets = [0, 128], sizes = [4, 128], strides = [1, 1]} : vector<4x512xf32> to vector<4x128xf32>
    %103 = arith.negf %102 : vector<4x128xf32>
    %104 = math.exp %103 : vector<4x128xf32>
    %cst_64 = arith.constant 1.000000e+00 : f32
    %105 = vector.broadcast %cst_64 : f32 to vector<4x128xf32>
    %106 = arith.addf %105, %104 : vector<4x128xf32>
    %107 = arith.divf %105, %106 : vector<4x128xf32>
    %108 = vector.extract_strided_slice %95 {offsets = [0, 256], sizes = [4, 128], strides = [1, 1]} : vector<4x512xf32> to vector<4x128xf32>
    %109 = math.tanh %108 : vector<4x128xf32>
    %110 = vector.extract_strided_slice %95 {offsets = [0, 384], sizes = [4, 128], strides = [1, 1]} : vector<4x512xf32> to vector<4x128xf32>
    %111 = arith.negf %110 : vector<4x128xf32>
    %112 = math.exp %111 : vector<4x128xf32>
    %cst_65 = arith.constant 1.000000e+00 : f32
    %113 = vector.broadcast %cst_65 : f32 to vector<4x128xf32>
    %114 = arith.addf %113, %112 : vector<4x128xf32>
    %115 = arith.divf %113, %114 : vector<4x128xf32>
    %c0_66 = arith.constant 0 : index
    %c0_67 = arith.constant 0 : index
    %116 = vector.load %arg9[%c0_66, %c0_67] : memref<4x128xf32, #tpu.memory_space<vmem>>, vector<4x128xf32>
    %117 = arith.mulf %107, %116 : vector<4x128xf32>
    %118 = arith.mulf %101, %109 : vector<4x128xf32>
    %119 = arith.addf %117, %118 : vector<4x128xf32>
    %120 = math.tanh %119 : vector<4x128xf32>
    %121 = arith.mulf %115, %120 : vector<4x128xf32>
    %c0_68 = arith.constant 0 : index
    %c0_69 = arith.constant 0 : index
    %122 = vector.load %arg9[%c0_68, %c0_69] : memref<4x128xf32, #tpu.memory_space<vmem>>, vector<4x128xf32>
    tpu.vector_store %arg9[%c0_68, %c0_69], %119 {strides = array<i32>} : memref<4x128xf32, #tpu.memory_space<vmem>>, vector<4x128xf32>,
    %123 = vector.extract_strided_slice %121 {offsets = [0, 0], sizes = [2, 128], strides = [1, 1]} : vector<4x128xf32> to vector<2x128xf32>
    %c0_70 = arith.constant 0 : index
    %c0_71 = arith.constant 0 : index
    %124 = vector.load %arg8[%c0_70, %c0_71] : memref<4x256xf32, #tpu.memory_space<vmem>>, vector<2x128xf32>
    tpu.vector_store %arg8[%c0_70, %c0_71], %123 {strides = array<i32>} : memref<4x256xf32, #tpu.memory_space<vmem>>, vector<2x128xf32>,
    %125 = vector.extract_strided_slice %121 {offsets = [2, 0], sizes = [2, 128], strides = [1, 1]} : vector<4x128xf32> to vector<2x128xf32>
    %c2_72 = arith.constant 2 : index
    %c128_73 = arith.constant 128 : index
    %126 = vector.load %arg8[%c2_72, %c128_73] : memref<4x256xf32, #tpu.memory_space<vmem>>, vector<2x128xf32>
    tpu.vector_store %arg8[%c2_72, %c128_73], %125 {strides = array<i32>} : memref<4x256xf32, #tpu.memory_space<vmem>>, vector<2x128xf32>,
    %127 = arith.truncf %121 : vector<4x128xf32> to vector<4x128xbf16>
    %128 = vector.extract_strided_slice %127 {offsets = [0, 0], sizes = [2, 128], strides = [1, 1]} : vector<4x128xbf16> to vector<2x128xbf16>
    %c2_74 = arith.constant 2 : index
    %c0_75 = arith.constant 0 : index
    %129 = vector.load %arg6[%c2_74, %c0_75] : memref<8x256xbf16, #tpu.memory_space<vmem>>, vector<2x128xbf16>
    tpu.vector_store %arg6[%c2_74, %c0_75], %128 {strides = array<i32>} : memref<8x256xbf16, #tpu.memory_space<vmem>>, vector<2x128xbf16>,
    %130 = vector.extract_strided_slice %127 {offsets = [2, 0], sizes = [2, 128], strides = [1, 1]} : vector<4x128xbf16> to vector<2x128xbf16>
    %c4 = arith.constant 4 : index
    %c128_76 = arith.constant 128 : index
    %131 = vector.load %arg6[%c4, %c128_76] : memref<8x256xbf16, #tpu.memory_space<vmem>>, vector<2x128xbf16>
    tpu.vector_store %arg6[%c4, %c128_76], %130 {strides = array<i32>} : memref<8x256xbf16, #tpu.memory_space<vmem>>, vector<2x128xbf16>,
    %c2_77 = arith.constant 2 : index
    %c0_78 = arith.constant 0 : index
    %c0_79 = arith.constant 0 : index
    %132 = vector.load %arg7[%c2_77, %c0_78, %c0_79] : memref<4x4x512xf32, #tpu.memory_space<vmem>>, vector<1x4x512xf32>
    %133 = vector.shape_cast %132 : vector<1x4x512xf32> to vector<4x512xf32>
    %c0_80 = arith.constant 0 : index
    %c0_81 = arith.constant 0 : index
    %134 = vector.load %arg8[%c0_80, %c0_81] : memref<4x256xf32, #tpu.memory_space<vmem>>, vector<4x256xf32>
    %135 = arith.truncf %134 : vector<4x256xf32> to vector<4x256xbf16>
    %c0_82 = arith.constant 0 : index
    %c0_83 = arith.constant 0 : index
    %136 = vector.load %arg3[%c0_82, %c0_83] : memref<256x512xbf16, #tpu.memory_space<vmem>>, vector<256x512xbf16>
    %cst_84 = arith.constant dense<0.000000e+00> : vector<4x512xf32>
    %137 = tpu.matmul %135, %136, %cst_84 {dimension_numbers = #tpu.dot_dimension_numbers<[1], [0], [0], [1], [0, 0, 1, 1], [], []>} : vector<4x256xbf16>, vector<256x512xbf16>, vector<4x512xf32> -> vector<4x512xf32>
    %138 = arith.addf %133, %137 : vector<4x512xf32>
    %139 = vector.extract_strided_slice %138 {offsets = [0, 0], sizes = [4, 128], strides = [1, 1]} : vector<4x512xf32> to vector<4x128xf32>
    %140 = arith.negf %139 : vector<4x128xf32>
    %141 = math.exp %140 : vector<4x128xf32>
    %cst_85 = arith.constant 1.000000e+00 : f32
    %142 = vector.broadcast %cst_85 : f32 to vector<4x128xf32>
    %143 = arith.addf %142, %141 : vector<4x128xf32>
    %144 = arith.divf %142, %143 : vector<4x128xf32>
    %145 = vector.extract_strided_slice %138 {offsets = [0, 128], sizes = [4, 128], strides = [1, 1]} : vector<4x512xf32> to vector<4x128xf32>
    %146 = arith.negf %145 : vector<4x128xf32>
    %147 = math.exp %146 : vector<4x128xf32>
    %cst_86 = arith.constant 1.000000e+00 : f32
    %148 = vector.broadcast %cst_86 : f32 to vector<4x128xf32>
    %149 = arith.addf %148, %147 : vector<4x128xf32>
    %150 = arith.divf %148, %149 : vector<4x128xf32>
    %151 = vector.extract_strided_slice %138 {offsets = [0, 256], sizes = [4, 128], strides = [1, 1]} : vector<4x512xf32> to vector<4x128xf32>
    %152 = math.tanh %151 : vector<4x128xf32>
    %153 = vector.extract_strided_slice %138 {offsets = [0, 384], sizes = [4, 128], strides = [1, 1]} : vector<4x512xf32> to vector<4x128xf32>
    %154 = arith.negf %153 : vector<4x128xf32>
    %155 = math.exp %154 : vector<4x128xf32>
    %cst_87 = arith.constant 1.000000e+00 : f32
    %156 = vector.broadcast %cst_87 : f32 to vector<4x128xf32>
    %157 = arith.addf %156, %155 : vector<4x128xf32>
    %158 = arith.divf %156, %157 : vector<4x128xf32>
    %c0_88 = arith.constant 0 : index
    %c0_89 = arith.constant 0 : index
    %159 = vector.load %arg9[%c0_88, %c0_89] : memref<4x128xf32, #tpu.memory_space<vmem>>, vector<4x128xf32>
    %160 = arith.mulf %150, %159 : vector<4x128xf32>
    %161 = arith.mulf %144, %152 : vector<4x128xf32>
    %162 = arith.addf %160, %161 : vector<4x128xf32>
    %163 = math.tanh %162 : vector<4x128xf32>
    %164 = arith.mulf %158, %163 : vector<4x128xf32>
    %c0_90 = arith.constant 0 : index
    %c0_91 = arith.constant 0 : index
    %165 = vector.load %arg9[%c0_90, %c0_91] : memref<4x128xf32, #tpu.memory_space<vmem>>, vector<4x128xf32>
    tpu.vector_store %arg9[%c0_90, %c0_91], %162 {strides = array<i32>} : memref<4x128xf32, #tpu.memory_space<vmem>>, vector<4x128xf32>,
    %166 = vector.extract_strided_slice %164 {offsets = [0, 0], sizes = [2, 128], strides = [1, 1]} : vector<4x128xf32> to vector<2x128xf32>
    %c0_92 = arith.constant 0 : index
    %c0_93 = arith.constant 0 : index
    %167 = vector.load %arg8[%c0_92, %c0_93] : memref<4x256xf32, #tpu.memory_space<vmem>>, vector<2x128xf32>
    tpu.vector_store %arg8[%c0_92, %c0_93], %166 {strides = array<i32>} : memref<4x256xf32, #tpu.memory_space<vmem>>, vector<2x128xf32>,
    %168 = vector.extract_strided_slice %164 {offsets = [2, 0], sizes = [2, 128], strides = [1, 1]} : vector<4x128xf32> to vector<2x128xf32>
    %c2_94 = arith.constant 2 : index
    %c128_95 = arith.constant 128 : index
    %169 = vector.load %arg8[%c2_94, %c128_95] : memref<4x256xf32, #tpu.memory_space<vmem>>, vector<2x128xf32>
    tpu.vector_store %arg8[%c2_94, %c128_95], %168 {strides = array<i32>} : memref<4x256xf32, #tpu.memory_space<vmem>>, vector<2x128xf32>,
    %170 = arith.truncf %164 : vector<4x128xf32> to vector<4x128xbf16>
    %171 = vector.extract_strided_slice %170 {offsets = [0, 0], sizes = [2, 128], strides = [1, 1]} : vector<4x128xbf16> to vector<2x128xbf16>
    %c4_96 = arith.constant 4 : index
    %c0_97 = arith.constant 0 : index
    %172 = vector.load %arg6[%c4_96, %c0_97] : memref<8x256xbf16, #tpu.memory_space<vmem>>, vector<2x128xbf16>
    tpu.vector_store %arg6[%c4_96, %c0_97], %171 {strides = array<i32>} : memref<8x256xbf16, #tpu.memory_space<vmem>>, vector<2x128xbf16>,
    %173 = vector.extract_strided_slice %170 {offsets = [2, 0], sizes = [2, 128], strides = [1, 1]} : vector<4x128xbf16> to vector<2x128xbf16>
    %c2_98 = arith.constant 2 : index
    %c128_99 = arith.constant 128 : index
    %174 = vector.load %arg6[%c2_98, %c128_99] : memref<8x256xbf16, #tpu.memory_space<vmem>>, vector<2x128xbf16>
    tpu.vector_store %arg6[%c2_98, %c128_99], %173 {strides = array<i32>} : memref<8x256xbf16, #tpu.memory_space<vmem>>, vector<2x128xbf16>,
    %c3_100 = arith.constant 3 : index
    %c0_101 = arith.constant 0 : index
    %c0_102 = arith.constant 0 : index
    %175 = vector.load %arg7[%c3_100, %c0_101, %c0_102] : memref<4x4x512xf32, #tpu.memory_space<vmem>>, vector<1x4x512xf32>
    %176 = vector.shape_cast %175 : vector<1x4x512xf32> to vector<4x512xf32>
    %c0_103 = arith.constant 0 : index
    %c0_104 = arith.constant 0 : index
    %177 = vector.load %arg8[%c0_103, %c0_104] : memref<4x256xf32, #tpu.memory_space<vmem>>, vector<4x256xf32>
    %178 = arith.truncf %177 : vector<4x256xf32> to vector<4x256xbf16>
    %c0_105 = arith.constant 0 : index
    %c0_106 = arith.constant 0 : index
    %179 = vector.load %arg3[%c0_105, %c0_106] : memref<256x512xbf16, #tpu.memory_space<vmem>>, vector<256x512xbf16>
    %cst_107 = arith.constant dense<0.000000e+00> : vector<4x512xf32>
    %180 = tpu.matmul %178, %179, %cst_107 {dimension_numbers = #tpu.dot_dimension_numbers<[1], [0], [0], [1], [0, 0, 1, 1], [], []>} : vector<4x256xbf16>, vector<256x512xbf16>, vector<4x512xf32> -> vector<4x512xf32>
    %181 = arith.addf %176, %180 : vector<4x512xf32>
    %182 = vector.extract_strided_slice %181 {offsets = [0, 0], sizes = [4, 128], strides = [1, 1]} : vector<4x512xf32> to vector<4x128xf32>
    %183 = arith.negf %182 : vector<4x128xf32>
    %184 = math.exp %183 : vector<4x128xf32>
    %cst_108 = arith.constant 1.000000e+00 : f32
    %185 = vector.broadcast %cst_108 : f32 to vector<4x128xf32>
    %186 = arith.addf %185, %184 : vector<4x128xf32>
    %187 = arith.divf %185, %186 : vector<4x128xf32>
    %188 = vector.extract_strided_slice %181 {offsets = [0, 128], sizes = [4, 128], strides = [1, 1]} : vector<4x512xf32> to vector<4x128xf32>
    %189 = arith.negf %188 : vector<4x128xf32>
    %190 = math.exp %189 : vector<4x128xf32>
    %cst_109 = arith.constant 1.000000e+00 : f32
    %191 = vector.broadcast %cst_109 : f32 to vector<4x128xf32>
    %192 = arith.addf %191, %190 : vector<4x128xf32>
    %193 = arith.divf %191, %192 : vector<4x128xf32>
    %194 = vector.extract_strided_slice %181 {offsets = [0, 256], sizes = [4, 128], strides = [1, 1]} : vector<4x512xf32> to vector<4x128xf32>
    %195 = math.tanh %194 : vector<4x128xf32>
    %196 = vector.extract_strided_slice %181 {offsets = [0, 384], sizes = [4, 128], strides = [1, 1]} : vector<4x512xf32> to vector<4x128xf32>
    %197 = arith.negf %196 : vector<4x128xf32>
    %198 = math.exp %197 : vector<4x128xf32>
    %cst_110 = arith.constant 1.000000e+00 : f32
    %199 = vector.broadcast %cst_110 : f32 to vector<4x128xf32>
    %200 = arith.addf %199, %198 : vector<4x128xf32>
    %201 = arith.divf %199, %200 : vector<4x128xf32>
    %c0_111 = arith.constant 0 : index
    %c0_112 = arith.constant 0 : index
    %202 = vector.load %arg9[%c0_111, %c0_112] : memref<4x128xf32, #tpu.memory_space<vmem>>, vector<4x128xf32>
    %203 = arith.mulf %193, %202 : vector<4x128xf32>
    %204 = arith.mulf %187, %195 : vector<4x128xf32>
    %205 = arith.addf %203, %204 : vector<4x128xf32>
    %206 = math.tanh %205 : vector<4x128xf32>
    %207 = arith.mulf %201, %206 : vector<4x128xf32>
    %c0_113 = arith.constant 0 : index
    %c0_114 = arith.constant 0 : index
    %208 = vector.load %arg9[%c0_113, %c0_114] : memref<4x128xf32, #tpu.memory_space<vmem>>, vector<4x128xf32>
    tpu.vector_store %arg9[%c0_113, %c0_114], %205 {strides = array<i32>} : memref<4x128xf32, #tpu.memory_space<vmem>>, vector<4x128xf32>,
    %209 = vector.extract_strided_slice %207 {offsets = [0, 0], sizes = [2, 128], strides = [1, 1]} : vector<4x128xf32> to vector<2x128xf32>
    %c0_115 = arith.constant 0 : index
    %c0_116 = arith.constant 0 : index
    %210 = vector.load %arg8[%c0_115, %c0_116] : memref<4x256xf32, #tpu.memory_space<vmem>>, vector<2x128xf32>
    tpu.vector_store %arg8[%c0_115, %c0_116], %209 {strides = array<i32>} : memref<4x256xf32, #tpu.memory_space<vmem>>, vector<2x128xf32>,
    %211 = vector.extract_strided_slice %207 {offsets = [2, 0], sizes = [2, 128], strides = [1, 1]} : vector<4x128xf32> to vector<2x128xf32>
    %c2_117 = arith.constant 2 : index
    %c128_118 = arith.constant 128 : index
    %212 = vector.load %arg8[%c2_117, %c128_118] : memref<4x256xf32, #tpu.memory_space<vmem>>, vector<2x128xf32>
    tpu.vector_store %arg8[%c2_117, %c128_118], %211 {strides = array<i32>} : memref<4x256xf32, #tpu.memory_space<vmem>>, vector<2x128xf32>,
    %213 = arith.truncf %207 : vector<4x128xf32> to vector<4x128xbf16>
    %214 = vector.extract_strided_slice %213 {offsets = [0, 0], sizes = [2, 128], strides = [1, 1]} : vector<4x128xbf16> to vector<2x128xbf16>
    %c6_119 = arith.constant 6 : index
    %c0_120 = arith.constant 0 : index
    %215 = vector.load %arg6[%c6_119, %c0_120] : memref<8x256xbf16, #tpu.memory_space<vmem>>, vector<2x128xbf16>
    tpu.vector_store %arg6[%c6_119, %c0_120], %214 {strides = array<i32>} : memref<8x256xbf16, #tpu.memory_space<vmem>>, vector<2x128xbf16>,
    %216 = vector.extract_strided_slice %213 {offsets = [2, 0], sizes = [2, 128], strides = [1, 1]} : vector<4x128xbf16> to vector<2x128xbf16>
    %c0_121 = arith.constant 0 : index
    %c128_122 = arith.constant 128 : index
    %217 = vector.load %arg6[%c0_121, %c128_122] : memref<8x256xbf16, #tpu.memory_space<vmem>>, vector<2x128xbf16>
    tpu.vector_store %arg6[%c0_121, %c128_122], %216 {strides = array<i32>} : memref<8x256xbf16, #tpu.memory_space<vmem>>, vector<2x128xbf16>,
    return
  }
}

</mosaic_0001>

<bundles_post_ra>
// kernel: model_forward.5
= control target key start
LH: loop header
LB: loop body
LE: loop exit
PB: predicated region body
PF: predicated region fallthrough
CT: control target
= control target key end

     0   :  { %11 = vsyncpa [#allocation6], 0  ;;  %s3437_s21 = smov [#allocation5]   ;;  %s4236_s0 = inlined_call_operand.vmem [shape: bf16[8,128], index: 0, kind: input, shape index: {}]   ;;  %s4237_s1 = inlined_call_operand.vmem [shape: bf16[128,1024], index: 1, kind: input, shape index: {}]   ;;  %s4238_s2 = inlined_call_operand.vmem [shape: f32[1,1024], index: 2, kind: input, shape index: {}]   ;;  %s4239_s3 = inlined_call_operand.hbm [shape: bf16[256,512], index: 3, kind: input, shape index: {}]   ;;  %s4240_s4 = inlined_call_operand.vmem [shape: f32[4,256], index: 4, kind: input, shape index: {}]   ;;  %s4241_s5 = inlined_call_operand.vmem [shape: f32[4,128], index: 5, kind: input, shape index: {}]   ;;  %s4242_s6 = inlined_call_operand.vmem [shape: bf16[8,256], index: 6, kind: output, shape index: {}]  }
   0x1   :  { %s23_s22 = sshll.u32 %s3437_s21, 4  ;;  %s24_s22 = int_to_ptr.vmem [resolvable:$true] %s23_s22 }
   0x2   :  { %s3423_s23 = scalar_lea.vmem %s24_s22, 8192  ;;  %p3428_p1 = scmp.lt.s32.totalorder %s24_s22, %s24_s22 }
   0x3   :  { %p3424_p0 = scmp.ne.s32.totalorder %s24_s22, %s3423_s23  ;;  %p3429_p2 = scmp.lt.s32.totalorder %s3423_s23, %s3423_s23 }
   0x5   :  { %p3430_p3 = por %p3429_p2, %p3428_p1 }
   0x7   :  { %p3431_p4 = pnand %p3430_p3, %p3424_p0 }
   0x9   :  { %3434 = shalt.err (!%p3431_p4)
}
   0xa   :  { %s3438_s24 = smov 256   ;;  %s3439_s25 = smov 16  }
   0xb   :  { %29 = dma.hbm_to_vmem [thread:$0]  %s4239_s3, 8192, %s24_s22, [#allocation6], %s3438_s24, %s3438_s24, %s3439_s25  }
   0xc   :  { %3435 = dma.done.wait [#allocation6], 8192  }
   0xd   :  { %3436 = vsyncadd [#allocation6], 4294959104  ;;  %v3440_v0 = vmov 0   ;;  %v95_v1 = vld [vmem:[%s4237_s1 + $0x1c0] sm:$0xff]  ;;  %v96_v3 = vld [vmem:[%s4237_s1 + $0x1c8] sm:$0xff] }
   0xe   :  { %497 = vmatprep.mubr.bf16.mxu0 %v3440_v0  ;;  %538 = vmatprep.mubr.bf16.mxu1 %v3440_v0  ;;  %v99_v2 = vld [vmem:[%s4237_s1 + $0x1e0] sm:$0xff]  ;;  %v100_v5 = vld [vmem:[%s4237_s1 + $0x1e8] sm:$0xff]  ;;  %v97_v62 = vld [vmem:[%s4237_s1 + $0x1d0] sm:$0xff] }
   0xf   :  { %v2864_v4 = vcombine.high %v95_v1, %v99_v2  ;;  %v2863_v6 = vcombine.low %v95_v1, %v99_v2  ;;  %v87_v7 = vld [vmem:[%s4237_s1 + $0x180] sm:$0xff]  ;;  %v2866_v9 = vcombine.high %v96_v3, %v100_v5  ;;  %v2865_v10 = vcombine.low %v96_v3, %v100_v5  ;;  %v88_v12 = vld [vmem:[%s4237_s1 + $0x188] sm:$0xff]  ;;  %v101_v1 = vld [vmem:[%s4237_s1 + $0x1f0] sm:$0xff] }
  0x10   :  { %v91_v8 = vld [vmem:[%s4237_s1 + $0x1a0] sm:$0xff]  ;;  %v92_v13 = vld [vmem:[%s4237_s1 + $0x1a8] sm:$0xff]  ;;  %v98_v2 = vld [vmem:[%s4237_s1 + $0x1d8] sm:$0xff] }
  0x11   :  { %v2856_v11 = vcombine.high %v87_v7, %v91_v8  ;;  %v79_v14 = vld [vmem:[%s4237_s1 + $0x140] sm:$0xff]  ;;  %465 = vmatprep.subr.bf16.mxu0 %v2864_v4  ;;  %v2858_v15 = vcombine.high %v88_v12, %v92_v13  ;;  %v80_v17 = vld [vmem:[%s4237_s1 + $0x148] sm:$0xff]  ;;  %506 = vmatprep.subr.bf16.mxu1 %v2866_v9  ;;  %v2855_v19 = vcombine.low %v87_v7, %v91_v8  ;;  %v102_v3 = vld [vmem:[%s4237_s1 + $0x1f8] sm:$0xff] }
  0x12   :  { %v83_v16 = vld [vmem:[%s4237_s1 + $0x160] sm:$0xff]  ;;  %v84_v18 = vld [vmem:[%s4237_s1 + $0x168] sm:$0xff]  ;;  %466 = vmatpush1.bf16.msra.mxu0 %v2863_v6  ;;  %507 = vmatpush1.bf16.msra.mxu1 %v2865_v10  ;;  %v2857_v20 = vcombine.low %v88_v12, %v92_v13  ;;  %v2868_v6 = vcombine.high %v97_v62, %v101_v1  ;;  %v89_v7 = vld [vmem:[%s4237_s1 + $0x190] sm:$0xff]  ;;  %v2870_v8 = vcombine.high %v98_v2, %v102_v3 }
  0x13   :  { %467 = vmatprep.subr.bf16.mxu0 %v2856_v11  ;;  %v2848_v21 = vcombine.high %v79_v14, %v83_v16  ;;  %508 = vmatprep.subr.bf16.mxu1 %v2858_v15  ;;  %v2850_v22 = vcombine.high %v80_v17, %v84_v18  ;;  %v71_v23 = vld [vmem:[%s4237_s1 + $0x100] sm:$0xff]  ;;  %v72_v25 = vld [vmem:[%s4237_s1 + $0x108] sm:$0xff]  ;;  %v2847_v27 = vcombine.low %v79_v14, %v83_v16  ;;  %v93_v9 = vld [vmem:[%s4237_s1 + $0x1b0] sm:$0xff] }
  0x14   :  { %v75_v24 = vld [vmem:[%s4237_s1 + $0x120] sm:$0xff]  ;;  %v76_v26 = vld [vmem:[%s4237_s1 + $0x128] sm:$0xff]  ;;  %v2849_v28 = vcombine.low %v80_v17, %v84_v18  ;;  %v90_v10 = vld [vmem:[%s4237_s1 + $0x198] sm:$0xff]  ;;  %v2867_v13 = vcombine.low %v97_v62, %v101_v1  ;;  %v2869_v14 = vcombine.low %v98_v2, %v102_v3  ;;  %v2860_v15 = vcombine.high %v89_v7, %v93_v9 }
  0x15   :  { %v2840_v29 = vcombine.high %v71_v23, %v75_v24  ;;  %v2842_v30 = vcombine.high %v72_v25, %v76_v26  ;;  %v63_v31 = vld [vmem:[%s4237_s1 + $0xc0] sm:$0xff]  ;;  %v64_v33 = vld [vmem:[%s4237_s1 + $0xc8] sm:$0xff]  ;;  %v2839_v35 = vcombine.low %v71_v23, %v75_v24  ;;  %v2841_v36 = vcombine.low %v72_v25, %v76_v26  ;;  %v94_v11 = vld [vmem:[%s4237_s1 + $0x1b8] sm:$0xff] }
  0x16   :  { %468 = vmatpush1.bf16.msra.mxu0 %v2855_v19  ;;  %509 = vmatpush1.bf16.msra.mxu1 %v2857_v20  ;;  %v67_v32 = vld [vmem:[%s4237_s1 + $0xe0] sm:$0xff]  ;;  %v68_v34 = vld [vmem:[%s4237_s1 + $0xe8] sm:$0xff]  ;;  %v81_v16 = vld [vmem:[%s4237_s1 + $0x150] sm:$0xff]  ;;  %v2862_v17 = vcombine.high %v90_v10, %v94_v11 }
  0x17   :  { %469 = vmatprep.subr.bf16.mxu0 %v2848_v21  ;;  %510 = vmatprep.subr.bf16.mxu1 %v2850_v22  ;;  %v2832_v37 = vcombine.high %v63_v31, %v67_v32  ;;  %v2834_v38 = vcombine.high %v64_v33, %v68_v34  ;;  %v55_v39 = vld [vmem:[%s4237_s1 + $0x80] sm:$0xff]  ;;  %v56_v41 = vld [vmem:[%s4237_s1 + $0x88] sm:$0xff]  ;;  %v2831_v43 = vcombine.low %v63_v31, %v67_v32  ;;  %v85_v18 = vld [vmem:[%s4237_s1 + $0x170] sm:$0xff] }
  0x18   :  { %v59_v40 = vld [vmem:[%s4237_s1 + $0xa0] sm:$0xff]  ;;  %v60_v42 = vld [vmem:[%s4237_s1 + $0xa8] sm:$0xff]  ;;  %v2833_v44 = vcombine.low %v64_v33, %v68_v34  ;;  %v82_v19 = vld [vmem:[%s4237_s1 + $0x158] sm:$0xff]  ;;  %v2859_v21 = vcombine.low %v89_v7, %v93_v9  ;;  %v2861_v22 = vcombine.low %v90_v10, %v94_v11  ;;  %v2852_v23 = vcombine.high %v81_v16, %v85_v18 }
  0x19   :  { %v2824_v45 = vcombine.high %v55_v39, %v59_v40  ;;  %v2826_v46 = vcombine.high %v56_v41, %v60_v42  ;;  %v47_v47 = vld [vmem:[%s4237_s1 + $0x40] sm:$0xff]  ;;  %v48_v49 = vld [vmem:[%s4237_s1 + $0x48] sm:$0xff]  ;;  %v2823_v51 = vcombine.low %v55_v39, %v59_v40  ;;  %v2825_v52 = vcombine.low %v56_v41, %v60_v42  ;;  %v86_v20 = vld [vmem:[%s4237_s1 + $0x178] sm:$0xff] }
  0x1a   :  { %470 = vmatpush1.bf16.msra.mxu0 %v2847_v27  ;;  %511 = vmatpush1.bf16.msra.mxu1 %v2849_v28  ;;  %v51_v48 = vld [vmem:[%s4237_s1 + $0x60] sm:$0xff]  ;;  %v52_v50 = vld [vmem:[%s4237_s1 + $0x68] sm:$0xff]  ;;  %v73_v24 = vld [vmem:[%s4237_s1 + $0x110] sm:$0xff]  ;;  %v2854_v25 = vcombine.high %v82_v19, %v86_v20 }
  0x1b   :  { %471 = vmatprep.subr.bf16.mxu0 %v2840_v29  ;;  %512 = vmatprep.subr.bf16.mxu1 %v2842_v30  ;;  %v2816_v53 = vcombine.high %v47_v47, %v51_v48  ;;  %v39_v54 = vld [vmem:[%s4237_s1] sm:$0xff]  ;;  %v2818_v55 = vcombine.high %v48_v49, %v52_v50  ;;  %v40_v57 = vld [vmem:[%s4237_s1 + $0x8] sm:$0xff]  ;;  %v2815_v59 = vcombine.low %v47_v47, %v51_v48  ;;  %v77_v26 = vld [vmem:[%s4237_s1 + $0x130] sm:$0xff] }
  0x1c   :  { %v43_v56 = vld [vmem:[%s4237_s1 + $0x20] sm:$0xff]  ;;  %v44_v58 = vld [vmem:[%s4237_s1 + $0x28] sm:$0xff]  ;;  %v2817_v60 = vcombine.low %v48_v49, %v52_v50  ;;  %v74_v27 = vld [vmem:[%s4237_s1 + $0x118] sm:$0xff]  ;;  %v2851_v29 = vcombine.low %v81_v16, %v85_v18  ;;  %v2853_v30 = vcombine.low %v82_v19, %v86_v20  ;;  %v2844_v31 = vcombine.high %v73_v24, %v77_v26 }
  0x1d   :  { %v2808_v61 = vcombine.high %v39_v54, %v43_v56  ;;  %v2810_v63 = vcombine.high %v40_v57, %v44_v58  ;;  %v2807_v4 = vcombine.low %v39_v54, %v43_v56  ;;  %v2809_v5 = vcombine.low %v40_v57, %v44_v58  ;;  %v3604_v12 = vld [vmem:[%s4236_s0] sm:$0xf]  ;;  %v78_v28 = vld [vmem:[%s4237_s1 + $0x138] sm:$0xff]  ;;  %v65_v32 = vld [vmem:[%s4237_s1 + $0xd0] sm:$0xff] }
  0x1e   :  { %472 = vmatpush1.bf16.msra.mxu0 %v2839_v35  ;;  %513 = vmatpush1.bf16.msra.mxu1 %v2841_v36  ;;  %v2846_v33 = vcombine.high %v74_v27, %v78_v28  ;;  %v69_v34 = vld [vmem:[%s4237_s1 + $0xf0] sm:$0xff]  ;;  %v70_v35 = vld [vmem:[%s4237_s1 + $0xf8] sm:$0xff]  ;;  %v2843_v36 = vcombine.low %v73_v24, %v77_v26  ;;  %v3697_v9 = vld [vmem:[%s4240_s4] sm:$0xff] }
  0x1f   :  { %473 = vmatprep.subr.bf16.mxu0 %v2832_v37  ;;  %514 = vmatprep.subr.bf16.mxu1 %v2834_v38  ;;  %v2845_v37 = vcombine.low %v74_v27, %v78_v28  ;;  %v2836_v38 = vcombine.high %v65_v32, %v69_v34  ;;  %v57_v39 = vld [vmem:[%s4237_s1 + $0x90] sm:$0xff]  ;;  %v58_v42 = vld [vmem:[%s4237_s1 + $0x98] sm:$0xff]  ;;  %693 = vst [vmem:[#allocation3] sm:$0xff] %v3697_v9 }
  0x20   :  { %v61_v41 = vld [vmem:[%s4237_s1 + $0xb0] sm:$0xff]  ;;  %v50_v50 = vld [vmem:[%s4237_s1 + $0x58] sm:$0xff]  ;;  %v700_v10 = vcombine.high %v3697_v9, %v3697_v9 }
  0x21   :  { %v49_v47 = vld [vmem:[%s4237_s1 + $0x50] sm:$0xff]  ;;  %v42_v58 = vld [vmem:[%s4237_s1 + $0x18] sm:$0xff] }
  0x22   :  { %474 = vmatpush1.bf16.msra.mxu0 %v2831_v43  ;;  %515 = vmatpush1.bf16.msra.mxu1 %v2833_v44  ;;  %v62_v43 = vld [vmem:[%s4237_s1 + $0xb8] sm:$0xff]  ;;  %v2835_v44 = vcombine.low %v65_v32, %v69_v34  ;;  %v53_v49 = vld [vmem:[%s4237_s1 + $0x70] sm:$0xff] }
  0x23   :  { %475 = vmatprep.subr.bf16.mxu0 %v2824_v45  ;;  %516 = vmatprep.subr.bf16.mxu1 %v2826_v46  ;;  %v2828_v46 = vcombine.high %v57_v39, %v61_v41  ;;  %v2830_v48 = vcombine.high %v58_v42, %v62_v43  ;;  %v2820_v54 = vcombine.high %v49_v47, %v53_v49  ;;  %v45_v57 = vld [vmem:[%s4237_s1 + $0x30] sm:$0xff]  ;;  %v3704_v11 = vld [vmem:[#allocation5 + $0xc0] ss:$16 sps:$4 sm:$0xff]   ;;  %v3713_v16 = vld [vmem:[#allocation5 + $0xac] ss:$16 sps:$4 sm:$0xff]  }
  0x24   :  { %v3682_v3 = vld [vmem:[#allocation5 + $0xe4] ss:$16 sps:$4 sm:$0xff]   ;;  %v3720_v18 = vld [vmem:[#allocation5 + $0xa8] ss:$16 sps:$4 sm:$0xff]   ;;  %v3730_v20 = vld [vmem:[#allocation5 + $0x80] ss:$16 sps:$4 sm:$0xff]  }
  0x25   :  { %v3690_v7 = vld [vmem:[#allocation5 + $0xc4] ss:$16 sps:$4 sm:$0xff]   ;;  %v3742_v24 = vld [vmem:[#allocation5 + $0x60] ss:$16 sps:$4 sm:$0xff]   ;;  %v3749_v27 = vld [vmem:[#allocation5 + $0x4c] ss:$16 sps:$4 sm:$0xff]  }
  0x26   :  { %476 = vmatpush1.bf16.msra.mxu0 %v2823_v51  ;;  %517 = vmatpush1.bf16.msra.mxu1 %v2825_v52  ;;  %v54_v51 = vld [vmem:[%s4237_s1 + $0x78] sm:$0xff]  ;;  %v2827_v52 = vcombine.low %v57_v39, %v61_v41  ;;  %v3722_v19 = vld [vmem:[#allocation5 + $0x84] ss:$16 sps:$4 sm:$0xff]  }
  0x27   :  { %477 = vmatprep.subr.bf16.mxu0 %v2816_v53  ;;  %518 = vmatprep.subr.bf16.mxu1 %v2818_v55  ;;  %v2829_v53 = vcombine.low %v58_v42, %v62_v43  ;;  %v41_v55 = vld [vmem:[%s4237_s1 + $0x10] sm:$0xff]  ;;  %v2822_v56 = vcombine.high %v50_v50, %v54_v51  ;;  %v3754_v28 = vld [vmem:[#allocation5 + $0x40] ss:$16 sps:$4 sm:$0xff]   ;;  %v3800_v42 = vld [vmem:[#allocation5 + $0x1cc] ss:$16 sps:$4 sm:$0xff]  }
  0x28   :  { %v2812_v62 = vcombine.high %v41_v55, %v45_v57  ;;  %v2811_v1 = vcombine.low %v41_v55, %v45_v57  ;;  %v3746_v26 = vld [vmem:[#allocation5 + $0x44] ss:$16 sps:$4 sm:$0xff]   ;;  %v3767_v32 = vld [vmem:[#allocation5 + $0x20] ss:$16 sps:$4 sm:$0xff]  }
  0x29   :  { %v3773_v34 = vld [vmem:[#allocation5 + $0x4] ss:$16 sps:$4 sm:$0xff]   ;;  %v3791_v39 = vld [vmem:[#allocation5 + $0x1e0] ss:$16 sps:$4 sm:$0xff]  }
  0x2a   :  { %478 = vmatpush1.bf16.msra.mxu0 %v2815_v59  ;;  %519 = vmatpush1.bf16.msra.mxu1 %v2817_v60  ;;  %v46_v59 = vld [vmem:[%s4237_s1 + $0x38] sm:$0xff]  ;;  %v2819_v60 = vcombine.low %v49_v47, %v53_v49  ;;  %v3797_v41 = vld [vmem:[#allocation5 + $0x1c4] ss:$16 sps:$4 sm:$0xff]  }
  0x2b   :  { %479 = vmatprep.subr.bf16.mxu0 %v2808_v61  ;;  %520 = vmatprep.subr.bf16.mxu1 %v2810_v63  ;;  %v2821_v61 = vcombine.low %v50_v50, %v54_v51  ;;  %v2814_v63 = vcombine.high %v42_v58, %v46_v59  ;;  %v2813_v2 = vcombine.low %v42_v58, %v46_v59  ;;  %v3803_v43 = vld [vmem:[#allocation5 + $0x1c0] ss:$16 sps:$4 sm:$0xff]   ;;  %v3821_v49 = vld [vmem:[#allocation5 + $0x184] ss:$16 sps:$4 sm:$0xff]   ;;  %v3824_v50 = vld [vmem:[#allocation5 + $0x18c] ss:$16 sps:$4 sm:$0xff]  }
  0x2c   :  { %v3815_v47 = vld [vmem:[#allocation5 + $0x1a0] ss:$16 sps:$4 sm:$0xff]   ;;  %v3845_v57 = vld [vmem:[#allocation5 + $0x144] ss:$16 sps:$4 sm:$0xff]   ;;  %v3848_v58 = vld [vmem:[#allocation5 + $0x14c] ss:$16 sps:$4 sm:$0xff]  }
  0x2d   :  { %v3827_v51 = vld [vmem:[#allocation5 + $0x180] ss:$16 sps:$4 sm:$0xff]  }
  0x2e   :  { %480 = vmatpush1.bf16.msra.mxu0 %v2807_v4  ;;  %521 = vmatpush1.bf16.msra.mxu1 %v2809_v5  ;;  %v3684_v4 = vld [vmem:[#allocation5 + $0xe0] ss:$16 sps:$4 sm:$0xff]   ;;  %v3686_v5 = vld [vmem:[#allocation5 + $0xec] ss:$16 sps:$4 sm:$0xff]  }
  0x2f   :  { %547 = vmatprep.subr.bf16.mxu0 %v2868_v6  ;;  %588 = vmatprep.subr.bf16.mxu1 %v2870_v8  ;;  %v3688_v6 = vld [vmem:[#allocation5 + $0xe8] ss:$16 sps:$4 sm:$0xff]   ;;  %v3692_v8 = vld [vmem:[#allocation5 + $0xcc] ss:$16 sps:$4 sm:$0xff]   ;;  %v3839_v55 = vld [vmem:[#allocation5 + $0x160] ss:$16 sps:$4 sm:$0xff]  }
  0x30   :  { %v3851_v59 = vld [vmem:[#allocation5 + $0x140] ss:$16 sps:$4 sm:$0xff]  }
  0x31   :  { %498 = vmatmul.mubr.bf16.vlgmr.msra.gmra.mxu0 %v3604_v12  ;;  %539 = vmatmul.mubr.bf16.vlgmr.msra.gmra.mxu1 %v3604_v12  ;;  %4265 = vst [vmem:[#allocation8_spill] sm:$0xff] %v3851_v59 }
  0x32   :  { %548 = vmatpush1.bf16.msra.mxu0 %v2867_v13  ;;  %589 = vmatpush1.bf16.msra.mxu1 %v2869_v14  ;;  %v3707_v13 = vld [vmem:[#allocation5 + $0xc8] ss:$16 sps:$4 sm:$0xff]   ;;  %v3709_v14 = vld [vmem:[#allocation5 + $0xa4] ss:$16 sps:$4 sm:$0xff]  }
  0x33   :  { %549 = vmatprep.subr.bf16.mxu0 %v2860_v15  ;;  %590 = vmatprep.subr.bf16.mxu1 %v2862_v17  ;;  %v703_v15 = vpack.c.bf16 %v700_v10, %v700_v10  ;;  %v3718_v17 = vld [vmem:[#allocation5 + $0xa0] ss:$16 sps:$4 sm:$0xff]   ;;  %v3872_v10 = vld [vmem:[#allocation5 + $0x10c] ss:$16 sps:$4 sm:$0xff]  }
  0x34   :  { %579 = vmatprep.mubr.bf16.mxu0 %v3440_v0  ;;  %620 = vmatprep.mubr.bf16.mxu1 %v3440_v0  ;;  %v66_v0 = vld [vmem:[%s4237_s1 + $0xd8] sm:$0xff] }
  0x35   :  { %v2838_v40 = vcombine.high %v66_v0, %v70_v35  ;;  %v2837_v45 = vcombine.low %v66_v0, %v70_v35  ;;  %v3776_v0 = vld [vmem:[#allocation5 + $0xc] ss:$16 sps:$4 sm:$0xff]   ;;  %v3779_v35 = vld [vmem:[#allocation5] ss:$16 sps:$4 sm:$0xff]  }
  0x36   :  { %550 = vmatpush1.bf16.msra.mxu0 %v2859_v21  ;;  %591 = vmatpush1.bf16.msra.mxu1 %v2861_v22  ;;  %v3732_v21 = vld [vmem:[#allocation5 + $0x88] ss:$16 sps:$4 sm:$0xff]   ;;  %v3734_v22 = vld [vmem:[#allocation5 + $0x64] ss:$16 sps:$4 sm:$0xff]  }
  0x37   :  { %551 = vmatprep.subr.bf16.mxu0 %v2852_v23  ;;  %592 = vmatprep.subr.bf16.mxu1 %v2854_v25  ;;  %v3737_v23 = vld [vmem:[#allocation5 + $0x6c] ss:$16 sps:$4 sm:$0xff]   ;;  %v3744_v25 = vld [vmem:[#allocation5 + $0x68] ss:$16 sps:$4 sm:$0xff]  }
  0x3a   :  { %552 = vmatpush1.bf16.msra.mxu0 %v2851_v29  ;;  %593 = vmatpush1.bf16.msra.mxu1 %v2853_v30  ;;  %v3756_v29 = vld [vmem:[#allocation5 + $0x48] ss:$16 sps:$4 sm:$0xff]   ;;  %v3758_v30 = vld [vmem:[#allocation5 + $0x24] ss:$16 sps:$4 sm:$0xff]  }
  0x3b   :  { %553 = vmatprep.subr.bf16.mxu0 %v2844_v31  ;;  %594 = vmatprep.subr.bf16.mxu1 %v2846_v33  ;;  %v3764_v31 = vld [vmem:[#allocation5 + $0x2c] ss:$16 sps:$4 sm:$0xff]   ;;  %v3771_v33 = vld [vmem:[#allocation5 + $0x28] ss:$16 sps:$4 sm:$0xff]  }
  0x3e   :  { %554 = vmatpush1.bf16.msra.mxu0 %v2843_v36  ;;  %595 = vmatpush1.bf16.msra.mxu1 %v2845_v37  ;;  %v3783_v36 = vld [vmem:[#allocation5 + $0x8] ss:$16 sps:$4 sm:$0xff]   ;;  %v3785_v37 = vld [vmem:[#allocation5 + $0x1e4] ss:$16 sps:$4 sm:$0xff]  }
  0x3f   :  { %555 = vmatprep.subr.bf16.mxu0 %v2836_v38  ;;  %596 = vmatprep.subr.bf16.mxu1 %v2838_v40  ;;  %v3788_v38 = vld [vmem:[#allocation5 + $0x1ec] ss:$16 sps:$4 sm:$0xff]   ;;  %v3795_v40 = vld [vmem:[#allocation5 + $0x1e8] ss:$16 sps:$4 sm:$0xff]  }
  0x42   :  { %556 = vmatpush1.bf16.msra.mxu0 %v2835_v44  ;;  %597 = vmatpush1.bf16.msra.mxu1 %v2837_v45  ;;  %v3807_v44 = vld [vmem:[#allocation5 + $0x1c8] ss:$16 sps:$4 sm:$0xff]   ;;  %v3809_v45 = vld [vmem:[#allocation5 + $0x1a4] ss:$16 sps:$4 sm:$0xff]  }
  0x43   :  { %557 = vmatprep.subr.bf16.mxu0 %v2828_v46  ;;  %598 = vmatprep.subr.bf16.mxu1 %v2830_v48  ;;  %v3812_v46 = vld [vmem:[#allocation5 + $0x1ac] ss:$16 sps:$4 sm:$0xff]   ;;  %v3819_v48 = vld [vmem:[#allocation5 + $0x1a8] ss:$16 sps:$4 sm:$0xff]  }
  0x46   :  { %558 = vmatpush1.bf16.msra.mxu0 %v2827_v52  ;;  %599 = vmatpush1.bf16.msra.mxu1 %v2829_v53  ;;  %v3831_v52 = vld [vmem:[#allocation5 + $0x188] ss:$16 sps:$4 sm:$0xff]   ;;  %v3833_v53 = vld [vmem:[#allocation5 + $0x164] ss:$16 sps:$4 sm:$0xff]  }
  0x47   :  { %559 = vmatprep.subr.bf16.mxu0 %v2820_v54  ;;  %600 = vmatprep.subr.bf16.mxu1 %v2822_v56  ;;  %v3836_v54 = vld [vmem:[#allocation5 + $0x16c] ss:$16 sps:$4 sm:$0xff]   ;;  %v3843_v56 = vld [vmem:[#allocation5 + $0x168] ss:$16 sps:$4 sm:$0xff]  }
  0x4a   :  { %560 = vmatpush1.bf16.msra.mxu0 %v2819_v60  ;;  %601 = vmatpush1.bf16.msra.mxu1 %v2821_v61  ;;  %v3855_v60 = vld [vmem:[#allocation5 + $0x148] ss:$16 sps:$4 sm:$0xff]   ;;  %v3857_v61 = vld [vmem:[#allocation5 + $0x124] ss:$16 sps:$4 sm:$0xff]  }
  0x4b   :  { %561 = vmatprep.subr.bf16.mxu0 %v2812_v62  ;;  %602 = vmatprep.subr.bf16.mxu1 %v2814_v63  ;;  %4266 = vst [vmem:[#allocation9_spill] sm:$0xff] %v3857_v61  ;;  %v3860_v62 = vld [vmem:[#allocation5 + $0x12c] ss:$16 sps:$4 sm:$0xff]   ;;  %v3863_v63 = vld [vmem:[#allocation5 + $0x120] ss:$16 sps:$4 sm:$0xff]  }
  0x4e   :  { %562 = vmatpush1.bf16.msra.mxu0 %v2811_v1  ;;  %603 = vmatpush1.bf16.msra.mxu1 %v2813_v2  ;;  %v3867_v1 = vld [vmem:[#allocation5 + $0x128] ss:$16 sps:$4 sm:$0xff]   ;;  %v3869_v2 = vld [vmem:[#allocation5 + $0x104] ss:$16 sps:$4 sm:$0xff]  }
  0x4f   :  { %1088 = vmatprep.subr.bf16.mxu0 %v3682_v3  ;;  %1129 = vmatprep.subr.bf16.mxu1 %v3686_v5 }
  0x51   :  { %580 = vmatmul.mubr.bf16.vlgmr.msra.gmra.mxu0 %v3604_v12  ;;  %621 = vmatmul.mubr.bf16.vlgmr.msra.gmra.mxu1 %v3604_v12  ;;  %v3725_v12 = vld [vmem:[#allocation5 + $0x8c] ss:$16 sps:$4 sm:$0xff]  }
  0x52   :  { %1089 = vmatpush1.bf16.msra.mxu0 %v3684_v4  ;;  %1130 = vmatpush1.bf16.msra.mxu1 %v3688_v6 }
  0x53   :  { %1090 = vmatprep.subr.bf16.mxu0 %v3690_v7  ;;  %1131 = vmatprep.subr.bf16.mxu1 %v3692_v8 }
  0x54   :  { %1120 = vmatprep.mubr.bf16.mxu0 %v703_v15  ;;  %1161 = vmatprep.mubr.bf16.mxu1 %v703_v15  ;;  %v3875_v15 = vld [vmem:[#allocation5 + $0x100] ss:$16 sps:$4 sm:$0xff]  }
  0x56   :  { %1091 = vmatpush1.bf16.msra.mxu0 %v3704_v11  ;;  %1132 = vmatpush1.bf16.msra.mxu1 %v3707_v13 }
  0x57   :  { %1092 = vmatprep.subr.bf16.mxu0 %v3709_v14  ;;  %1133 = vmatprep.subr.bf16.mxu1 %v3713_v16 }
  0x5a   :  { %1093 = vmatpush1.bf16.msra.mxu0 %v3718_v17  ;;  %1134 = vmatpush1.bf16.msra.mxu1 %v3720_v18 }
  0x5b   :  { %1094 = vmatprep.subr.bf16.mxu0 %v3722_v19  ;;  %1135 = vmatprep.subr.bf16.mxu1 %v3725_v12 }
  0x5e   :  { %1095 = vmatpush1.bf16.msra.mxu0 %v3730_v20  ;;  %1136 = vmatpush1.bf16.msra.mxu1 %v3732_v21 }
  0x5f   :  { %1096 = vmatprep.subr.bf16.mxu0 %v3734_v22  ;;  %1137 = vmatprep.subr.bf16.mxu1 %v3737_v23 }
  0x62   :  { %1097 = vmatpush1.bf16.msra.mxu0 %v3742_v24  ;;  %1138 = vmatpush1.bf16.msra.mxu1 %v3744_v25 }
  0x63   :  { %1098 = vmatprep.subr.bf16.mxu0 %v3746_v26  ;;  %1139 = vmatprep.subr.bf16.mxu1 %v3749_v27 }
  0x66   :  { %1099 = vmatpush1.bf16.msra.mxu0 %v3754_v28  ;;  %1140 = vmatpush1.bf16.msra.mxu1 %v3756_v29 }
  0x67   :  { %1100 = vmatprep.subr.bf16.mxu0 %v3758_v30  ;;  %1141 = vmatprep.subr.bf16.mxu1 %v3764_v31 }
  0x6a   :  { %1101 = vmatpush1.bf16.msra.mxu0 %v3767_v32  ;;  %1142 = vmatpush1.bf16.msra.mxu1 %v3771_v33 }
  0x6b   :  { %1102 = vmatprep.subr.bf16.mxu0 %v3773_v34  ;;  %1143 = vmatprep.subr.bf16.mxu1 %v3776_v0 }
  0x6e   :  { %1103 = vmatpush1.bf16.msra.mxu0 %v3779_v35  ;;  %1144 = vmatpush1.bf16.msra.mxu1 %v3783_v36 }
  0x6f   :  { %1104 = vmatprep.subr.bf16.mxu0 %v3785_v37  ;;  %1145 = vmatprep.subr.bf16.mxu1 %v3788_v38 }
  0x72   :  { %1105 = vmatpush2.bf16.msra.mxu0 %v3791_v39  ;;  %1146 = vmatpush2.bf16.msra.mxu1 %v3795_v40 }
  0x73   :  { %1106 = vmatprep.subr.bf16.mxu0 %v3797_v41  ;;  %1147 = vmatprep.subr.bf16.mxu1 %v3800_v42 }
  0x76   :  { %1107 = vmatpush2.bf16.msra.mxu0 %v3803_v43  ;;  %1148 = vmatpush2.bf16.msra.mxu1 %v3807_v44 }
  0x77   :  { %1108 = vmatprep.subr.bf16.mxu0 %v3809_v45  ;;  %1149 = vmatprep.subr.bf16.mxu1 %v3812_v46 }
  0x7a   :  { %1109 = vmatpush2.bf16.msra.mxu0 %v3815_v47  ;;  %1150 = vmatpush2.bf16.msra.mxu1 %v3819_v48 }
  0x7b   :  { %1110 = vmatprep.subr.bf16.mxu0 %v3821_v49  ;;  %1151 = vmatprep.subr.bf16.mxu1 %v3824_v50 }
  0x7e   :  { %1111 = vmatpush2.bf16.msra.mxu0 %v3827_v51  ;;  %1152 = vmatpush2.bf16.msra.mxu1 %v3831_v52 }
  0x7f   :  { %1112 = vmatprep.subr.bf16.mxu0 %v3833_v53  ;;  %1153 = vmatprep.subr.bf16.mxu1 %v3836_v54 }
  0x82   :  { %1113 = vmatpush2.bf16.msra.mxu0 %v3839_v55  ;;  %1154 = vmatpush2.bf16.msra.mxu1 %v3843_v56 }
  0x83   :  { %1114 = vmatprep.subr.bf16.mxu0 %v3845_v57  ;;  %1155 = vmatprep.subr.bf16.mxu1 %v3848_v58 }
  0x86   :  { %1115 = vmatpush2.bf16.msra.mxu0 %v3851_v59  ;;  %1156 = vmatpush2.bf16.msra.mxu1 %v3855_v60  ;;  %v3879_v59 = vld [vmem:[#allocation5 + $0x108] ss:$16 sps:$4 sm:$0xff]  }
  0x87   :  { %1116 = vmatprep.subr.bf16.mxu0 %v3857_v61  ;;  %1157 = vmatprep.subr.bf16.mxu1 %v3860_v62  ;;  %v702_v61 = vpack.c.bf16 %v3697_v9, %v3697_v9 }
  0x8a   :  { %1117 = vmatpush2.bf16.msra.mxu0 %v3863_v63  ;;  %1158 = vmatpush2.bf16.msra.mxu1 %v3867_v1 }
  0x8b   :  { %1118 = vmatprep.subr.bf16.mxu0 %v3869_v2  ;;  %1159 = vmatprep.subr.bf16.mxu1 %v3872_v10 }
  0x8e   :  { %1119 = vmatpush2.bf16.msra.mxu0 %v3875_v15  ;;  %1160 = vmatpush2.bf16.msra.mxu1 %v3879_v59 }
  0x8f   :  { %1614 = vmatprep.subr.bf16.mxu0 %v3682_v3  ;;  %1655 = vmatprep.subr.bf16.mxu1 %v3686_v5  ;;  %v4267_v3 = vld [vmem:[#allocation8_spill] sm:$0xff]  ;;  %v105_v5 = vlaneseq }
  0x91   :  { %1121 = vmatmul.mubr.bf16.vlgmr.msra.gmra.mxu0 %v702_v61  ;;  %1162 = vmatmul.mubr.bf16.vlgmr.msra.gmra.mxu1 %v702_v61 }
  0x92   :  { %1615 = vmatpush1.bf16.msra.mxu0 %v3684_v4  ;;  %1656 = vmatpush1.bf16.msra.mxu1 %v3688_v6  ;;  %v4268_v4 = vld [vmem:[#allocation9_spill] sm:$0xff]  ;;  %v106_v6 = vshrl.u32 %v105_v5, 7 }
  0x93   :  { %1616 = vmatprep.subr.bf16.mxu0 %v3690_v7  ;;  %1657 = vmatprep.subr.bf16.mxu1 %v3692_v8  ;;  %v103_v8 = vld [vmem:[%s4238_s2] sm:$0xff] }
  0x94   :  { %v107_v7 = vsub.s32 0, %v106_v6  ;;  %v115_v9 = vsub.s32 2, %v106_v6 }
  0x96   :  { %1617 = vmatpush1.bf16.msra.mxu0 %v3704_v11  ;;  %1658 = vmatpush1.bf16.msra.mxu1 %v3707_v13  ;;  %v111_v11 = vsub.s32 1, %v106_v6  ;;  %v694_v13 = vld [vmem:[%s4241_s5] sm:$0xf] }
  0x97   :  { %1618 = vmatprep.subr.bf16.mxu0 %v3709_v14  ;;  %1659 = vmatprep.subr.bf16.mxu1 %v3713_v16  ;;  %v119_v14 = vsub.s32 3, %v106_v6  ;;  %695 = vst [vmem:[#allocation4] sm:$0xf] %v694_v13  ;;  %v108_v16 = vrot.slane %v103_v8, %v107_v7 }
  0x9a   :  { %1619 = vmatpush1.bf16.msra.mxu0 %v3718_v17  ;;  %1660 = vmatpush1.bf16.msra.mxu1 %v3720_v18  ;;  %v116_v17 = vrot.slane %v103_v8, %v115_v9  ;;  %v112_v18 = vrot.slane %v103_v8, %v111_v11 }
  0x9b   :  { %1620 = vmatprep.subr.bf16.mxu0 %v3722_v19  ;;  %1661 = vmatprep.subr.bf16.mxu1 %v3725_v12  ;;  %v120_v12 = vrot.slane %v103_v8, %v119_v14 }
  0x9e   :  { %1621 = vmatpush1.bf16.msra.mxu0 %v3730_v20  ;;  %1662 = vmatpush1.bf16.msra.mxu1 %v3732_v21 }
  0x9f   :  { %1622 = vmatprep.subr.bf16.mxu0 %v3734_v22  ;;  %1663 = vmatprep.subr.bf16.mxu1 %v3737_v23 }
  0xa2   :  { %1623 = vmatpush1.bf16.msra.mxu0 %v3742_v24  ;;  %1664 = vmatpush1.bf16.msra.mxu1 %v3744_v25 }
  0xa3   :  { %1624 = vmatprep.subr.bf16.mxu0 %v3746_v26  ;;  %1665 = vmatprep.subr.bf16.mxu1 %v3749_v27 }
  0xa6   :  { %1625 = vmatpush1.bf16.msra.mxu0 %v3754_v28  ;;  %1666 = vmatpush1.bf16.msra.mxu1 %v3756_v29 }
  0xa7   :  { %1626 = vmatprep.subr.bf16.mxu0 %v3758_v30  ;;  %1667 = vmatprep.subr.bf16.mxu1 %v3764_v31 }
  0xaa   :  { %1627 = vmatpush1.bf16.msra.mxu0 %v3767_v32  ;;  %1668 = vmatpush1.bf16.msra.mxu1 %v3771_v33 }
  0xab   :  { %1628 = vmatprep.subr.bf16.mxu0 %v3773_v34  ;;  %1669 = vmatprep.subr.bf16.mxu1 %v3776_v0 }
  0xae   :  { %1629 = vmatpush1.bf16.msra.mxu0 %v3779_v35  ;;  %1670 = vmatpush1.bf16.msra.mxu1 %v3783_v36 }
  0xaf   :  { %1630 = vmatprep.subr.bf16.mxu0 %v3785_v37  ;;  %1671 = vmatprep.subr.bf16.mxu1 %v3788_v38  ;;  %v123_v38 = vsub.s32 4, %v106_v6 }
  0xb2   :  { %1631 = vmatpush2.bf16.msra.mxu0 %v3791_v39  ;;  %1672 = vmatpush2.bf16.msra.mxu1 %v3795_v40  ;;  %v131_v39 = vsub.s32 6, %v106_v6  ;;  %v127_v40 = vsub.s32 5, %v106_v6 }
  0xb3   :  { %1632 = vmatprep.subr.bf16.mxu0 %v3797_v41  ;;  %1673 = vmatprep.subr.bf16.mxu1 %v3800_v42  ;;  %v135_v41 = vsub.s32 7, %v106_v6  ;;  %v124_v42 = vrot.slane %v103_v8, %v123_v38 }
  0xb6   :  { %1633 = vmatpush2.bf16.msra.mxu0 %v3803_v43  ;;  %1674 = vmatpush2.bf16.msra.mxu1 %v3807_v44  ;;  %v132_v43 = vrot.slane %v103_v8, %v131_v39  ;;  %v128_v44 = vrot.slane %v103_v8, %v127_v40 }
  0xb7   :  { %1634 = vmatprep.subr.bf16.mxu0 %v3809_v45  ;;  %1675 = vmatprep.subr.bf16.mxu1 %v3812_v46  ;;  %v136_v46 = vrot.slane %v103_v8, %v135_v41 }
  0xba   :  { %1635 = vmatpush2.bf16.msra.mxu0 %v3815_v47  ;;  %1676 = vmatpush2.bf16.msra.mxu1 %v3819_v48 }
  0xbb   :  { %1636 = vmatprep.subr.bf16.mxu0 %v3821_v49  ;;  %1677 = vmatprep.subr.bf16.mxu1 %v3824_v50 }
  0xbe   :  { %1637 = vmatpush2.bf16.msra.mxu0 %v3827_v51  ;;  %1678 = vmatpush2.bf16.msra.mxu1 %v3831_v52 }
  0xbf   :  { %1638 = vmatprep.subr.bf16.mxu0 %v3833_v53  ;;  %1679 = vmatprep.subr.bf16.mxu1 %v3836_v54 }
  0xc2   :  { %1639 = vmatpush2.bf16.msra.mxu0 %v3839_v55  ;;  %1680 = vmatpush2.bf16.msra.mxu1 %v3843_v56 }
  0xc3   :  { %1640 = vmatprep.subr.bf16.mxu0 %v3845_v57  ;;  %1681 = vmatprep.subr.bf16.mxu1 %v3848_v58 }
  0xc6   :  { %1641 = vmatpush2.bf16.msra.mxu0 %v4267_v3  ;;  %1682 = vmatpush2.bf16.msra.mxu1 %v3855_v60 }
  0xc7   :  { %1642 = vmatprep.subr.bf16.mxu0 %v4268_v4  ;;  %1683 = vmatprep.subr.bf16.mxu1 %v3860_v62 }
  0xca   :  { %1643 = vmatpush2.bf16.msra.mxu0 %v3863_v63  ;;  %1684 = vmatpush2.bf16.msra.mxu1 %v3867_v1 }
  0xcb   :  { %1644 = vmatprep.subr.bf16.mxu0 %v3869_v2  ;;  %1685 = vmatprep.subr.bf16.mxu1 %v3872_v10 }
  0xce   :  { %1645 = vmatpush2.bf16.msra.mxu0 %v3875_v15  ;;  %1686 = vmatpush2.bf16.msra.mxu1 %v3879_v59 }
  0xf1   :  { %v499_v19 = vpop.f32.mrf.mxu0  ;;  %v540_v21 = vpop.f32.mrf.mxu1 }
  0xf2   :  { %v500_v20 = vadd.f32 %v499_v19, %v108_v16  ;;  %v541_v23 = vadd.f32 %v540_v21, %v116_v17 }
  0xf3   :  { %v501_v22 = vpop.f32.mrf.mxu0  ;;  %v542_v25 = vpop.f32.mrf.mxu1 }
  0xf4   :  { %v502_v24 = vadd.f32 %v501_v22, %v112_v18  ;;  %v543_v27 = vadd.f32 %v542_v25, %v120_v12 }
  0xf5   :  { %v503_v26 = vpop.f32.mrf.mxu0  ;;  %v544_v30 = vpop.f32.mrf.mxu1 }
  0xf6   :  { %v633_v28 = vcombine.low %v500_v20, %v502_v24  ;;  %v666_v29 = vcombine.high %v500_v20, %v502_v24  ;;  %v634_v32 = vcombine.low %v541_v23, %v543_v27  ;;  %v667_v33 = vcombine.high %v541_v23, %v543_v27 }
  0xf7   :  { %v504_v31 = vpop.f32.mrf.mxu0  ;;  %v545_v35 = vpop.f32.mrf.mxu1 }
  0xf8   :  { %637 = vst [vmem:[#allocation2 + $0x20] sm:$0x33] %v633_v28  ;;  %v2871_v34 = vrot.slane %v633_v28, 10  ;;  %670 = vst [vmem:[#allocation2 + $0x18] sm:$0x33] %v666_v29  ;;  %v2873_v0 = vrot.slane %v666_v29, 10 }
  0xf9   :  { %638 = vst [vmem:[#allocation2] sm:$0x33] %v634_v32  ;;  %v2872_v36 = vrot.slane %v634_v32, 10  ;;  %671 = vst [vmem:[#allocation2 + $0x28] sm:$0x33] %v667_v33  ;;  %v2874_v37 = vrot.slane %v667_v33, 10 }
  0xfa   :  { %659 = vst [vmem:[#allocation2 + $0x8] sm:$0x33] %v2871_v34  ;;  %686 = vst [vmem:[#allocation2 + $0x38] sm:$0x33] %v2873_v0  ;;  %v1205_v28 = vld [vmem:[#allocation4] sm:$0xf] }
  0xfb   :  { %660 = vst [vmem:[#allocation2 + $0x10] sm:$0x33] %v2872_v36  ;;  %687 = vst [vmem:[#allocation2 + $0x30] sm:$0x33] %v2874_v37 }
 0x111   :  { %v581_v45 = vpop.f32.mrf.mxu0  ;;  %v622_v48 = vpop.f32.mrf.mxu1 }
 0x112   :  { %v582_v47 = vadd.f32 %v581_v45, %v124_v42  ;;  %v623_v49 = vadd.f32 %v622_v48, %v132_v43  ;;  %v3962_v43 = vld [vmem:[#allocation5 + $0xe4] ss:$16 sps:$4 sm:$0xff]   ;;  %v3966_v45 = vld [vmem:[#allocation5 + $0xe0] ss:$16 sps:$4 sm:$0xff]   ;;  %v3976_v48 = vld [vmem:[#allocation5 + $0xcc] ss:$16 sps:$4 sm:$0xff]  }
 0x113   :  { %v583_v50 = vpop.f32.mrf.mxu0  ;;  %v624_v52 = vpop.f32.mrf.mxu1  ;;  %2140 = vmatprep.subr.bf16.mxu0 %v3962_v43 }
 0x114   :  { %v584_v51 = vadd.f32 %v583_v50, %v128_v44  ;;  %v625_v53 = vadd.f32 %v624_v52, %v136_v46  ;;  %v3964_v44 = vld [vmem:[#allocation5 + $0xec] ss:$16 sps:$4 sm:$0xff]   ;;  %v3968_v46 = vld [vmem:[#allocation5 + $0xe8] ss:$16 sps:$4 sm:$0xff]  }
 0x115   :  { %v585_v54 = vpop.f32.mrf.mxu0  ;;  %v626_v57 = vpop.f32.mrf.mxu1  ;;  %2181 = vmatprep.subr.bf16.mxu1 %v3964_v44  ;;  %v3980_v50 = vld [vmem:[#allocation5 + $0xc8] ss:$16 sps:$4 sm:$0xff]   ;;  %v3988_v52 = vld [vmem:[#allocation5 + $0xac] ss:$16 sps:$4 sm:$0xff]  }
 0x116   :  { %v643_v55 = vcombine.low %v582_v47, %v584_v51  ;;  %v672_v56 = vcombine.high %v582_v47, %v584_v51  ;;  %v644_v58 = vcombine.low %v623_v49, %v625_v53  ;;  %v673_v59 = vcombine.high %v623_v49, %v625_v53  ;;  %v3974_v47 = vld [vmem:[#allocation5 + $0xc4] ss:$16 sps:$4 sm:$0xff]   ;;  %v3978_v49 = vld [vmem:[#allocation5 + $0xc0] ss:$16 sps:$4 sm:$0xff]   ;;  %v3992_v54 = vld [vmem:[#allocation5 + $0xa8] ss:$16 sps:$4 sm:$0xff]  }
 0x117   :  { %v586_v60 = vpop.f32.mrf.mxu0  ;;  %v627_v63 = vpop.f32.mrf.mxu1  ;;  %v3986_v51 = vld [vmem:[#allocation5 + $0xa4] ss:$16 sps:$4 sm:$0xff]   ;;  %v3990_v53 = vld [vmem:[#allocation5 + $0xa0] ss:$16 sps:$4 sm:$0xff]  }
 0x118   :  { %v645_v61 = vrot.slane %v643_v55, 6  ;;  %664 = vst [vmem:[#allocation2 + $0x18] sm:$0xcc] %v643_v55  ;;  %v674_v62 = vrot.slane %v672_v56, 6  ;;  %690 = vst [vmem:[#allocation2 + $0x20] sm:$0xcc] %v672_v56 }
 0x119   :  { %v646_v1 = vrot.slane %v644_v58, 6  ;;  %665 = vst [vmem:[#allocation2 + $0x28] sm:$0xcc] %v644_v58  ;;  %v675_v2 = vrot.slane %v673_v59, 6  ;;  %691 = vst [vmem:[#allocation2] sm:$0xcc] %v673_v59 }
 0x11a   :  { %650 = vst [vmem:[#allocation2 + $0x38] sm:$0xcc] %v645_v61  ;;  %678 = vst [vmem:[#allocation2 + $0x8] sm:$0xcc] %v674_v62  ;;  %v3998_v55 = vld [vmem:[#allocation5 + $0x84] ss:$16 sps:$4 sm:$0xff]  }
 0x11b   :  { %651 = vst [vmem:[#allocation2 + $0x30] sm:$0xcc] %v646_v1  ;;  %679 = vst [vmem:[#allocation2 + $0x10] sm:$0xcc] %v675_v2  ;;  %v4000_v56 = vld [vmem:[#allocation5 + $0x8c] ss:$16 sps:$4 sm:$0xff]  }
 0x11c   :  { %v4002_v57 = vld [vmem:[#allocation5 + $0x80] ss:$16 sps:$4 sm:$0xff]   ;;  %v4004_v58 = vld [vmem:[#allocation5 + $0x88] ss:$16 sps:$4 sm:$0xff]   ;;  %v4010_v59 = vld [vmem:[#allocation5 + $0x64] ss:$16 sps:$4 sm:$0xff]  }
 0x11d   :  { %v4012_v60 = vld [vmem:[#allocation5 + $0x6c] ss:$16 sps:$4 sm:$0xff]   ;;  %v4014_v61 = vld [vmem:[#allocation5 + $0x60] ss:$16 sps:$4 sm:$0xff]   ;;  %v4016_v62 = vld [vmem:[#allocation5 + $0x68] ss:$16 sps:$4 sm:$0xff]  }
 0x11e   :  { %v4022_v63 = vld [vmem:[#allocation5 + $0x44] ss:$16 sps:$4 sm:$0xff]   ;;  %v4024_v1 = vld [vmem:[#allocation5 + $0x4c] ss:$16 sps:$4 sm:$0xff]   ;;  %v4026_v2 = vld [vmem:[#allocation5 + $0x40] ss:$16 sps:$4 sm:$0xff]  }
 0x11f   :  { %v696_v6 = vld [vmem:[#allocation2 + $0x20] sm:$0xff] }
 0x120   :  { %v697_v19 = vld [vmem:[#allocation2] sm:$0xff] }
 0x151   :  { %v1122_v10 = vpop.f32.mrf.mxu0  ;;  %v1163_v15 = vpop.f32.mrf.mxu1 }
 0x153   :  { %v1124_v3 = vpop.f32.mrf.mxu0  ;;  %v1165_v5 = vpop.f32.mrf.mxu1 }
 0x154   :  { %v1174_v4 = vcombine.low %v1122_v10, %v1124_v3  ;;  %v1175_v17 = vcombine.low %v1163_v15, %v1165_v5  ;;  %v4028_v10 = vld [vmem:[#allocation5 + $0x48] ss:$16 sps:$4 sm:$0xff]   ;;  %v4034_v15 = vld [vmem:[#allocation5 + $0x24] ss:$16 sps:$4 sm:$0xff]   ;;  %v4036_v3 = vld [vmem:[#allocation5 + $0x2c] ss:$16 sps:$4 sm:$0xff]  }
 0x155   :  { %v1126_v7 = vpop.f32.mrf.mxu0  ;;  %v1167_v9 = vpop.f32.mrf.mxu1  ;;  %v4040_v5 = vld [vmem:[#allocation5 + $0x28] ss:$16 sps:$4 sm:$0xff]  }
 0x156   :  { %v1178_v8 = vadd.f32 %v1174_v4, %v696_v6  ;;  %v1179_v12 = vadd.f32 %v1175_v17, %v697_v19  ;;  %v4038_v4 = vld [vmem:[#allocation5 + $0x20] ss:$16 sps:$4 sm:$0xff]   ;;  %v4046_v6 = vld [vmem:[#allocation5 + $0x4] ss:$16 sps:$4 sm:$0xff]   ;;  %v4048_v7 = vld [vmem:[#allocation5 + $0xc] ss:$16 sps:$4 sm:$0xff]  }
 0x157   :  { %v1127_v11 = vpop.f32.mrf.mxu0  ;;  %v1168_v16 = vpop.f32.mrf.mxu1  ;;  %v4052_v9 = vld [vmem:[#allocation5 + $0x8] ss:$16 sps:$4 sm:$0xff]   ;;  %v4070_v17 = vld [vmem:[#allocation5 + $0x1c4] ss:$16 sps:$4 sm:$0xff]   ;;  %v4074_v19 = vld [vmem:[#allocation5 + $0x1c0] ss:$16 sps:$4 sm:$0xff]  }
 0x158   :  { %v2939_v13 = vmul.f32 -1.442695, %v1178_v8  ;;  %v1187_v14 = vrot.slane %v1178_v8, 4  ;;  %v1197_v20 = vrot.slane %v1179_v12, 4  ;;  %v4050_v8 = vld [vmem:[#allocation5] ss:$16 sps:$4 sm:$0xff]  }
 0x159   :  { %v4058_v11 = vld [vmem:[#allocation5 + $0x1e4] ss:$16 sps:$4 sm:$0xff]   ;;  %v4064_v16 = vld [vmem:[#allocation5 + $0x1e8] ss:$16 sps:$4 sm:$0xff]  }
 0x15a   :  { %3351 = vpow2.f32 %v2939_v13  ;;  %v2940_v18 = vmul.f32 -1.442695, %v1187_v14  ;;  %v2941_v21 = vmul.f32 -1.442695, %v1197_v20  ;;  %v4060_v13 = vld [vmem:[#allocation5 + $0x1ec] ss:$16 sps:$4 sm:$0xff]  }
 0x15b   :  { %v4062_v14 = vld [vmem:[#allocation5 + $0x1e0] ss:$16 sps:$4 sm:$0xff]   ;;  %v4082_v20 = vld [vmem:[#allocation5 + $0x1a4] ss:$16 sps:$4 sm:$0xff]  }
 0x15c   :  { %3353 = vpow2.f32 %v2940_v18  ;;  %v4072_v18 = vld [vmem:[#allocation5 + $0x1cc] ss:$16 sps:$4 sm:$0xff]  }
 0x15d   :  { %3355 = vpow2.f32 %v2941_v21  ;;  %v4084_v21 = vld [vmem:[#allocation5 + $0x1ac] ss:$16 sps:$4 sm:$0xff]  }
 0x167   :  { %v3352_v22 = vpop.eup %3351 }
 0x168   :  { %v1183_v23 = vadd.f32 1.0, %v3352_v22  ;;  %v4086_v22 = vld [vmem:[#allocation5 + $0x1a0] ss:$16 sps:$4 sm:$0xff]  }
 0x169   :  { %v3354_v24 = vpop.eup %3353 }
 0x16a   :  { %3357 = vrcp.f32 %v1183_v23  ;;  %v1192_v25 = vadd.f32 1.0, %v3354_v24  ;;  %v3356_v26 = vpop.eup %3355  ;;  %v4088_v23 = vld [vmem:[#allocation5 + $0x1a8] ss:$16 sps:$4 sm:$0xff]   ;;  %v4094_v24 = vld [vmem:[#allocation5 + $0x184] ss:$16 sps:$4 sm:$0xff]  }
 0x16b   :  { %3359 = vtanh.f32 %v1179_v12  ;;  %v1202_v31 = vadd.f32 1.0, %v3356_v26  ;;  %v4076_v12 = vld [vmem:[#allocation5 + $0x1c8] ss:$16 sps:$4 sm:$0xff]   ;;  %4269 = vst [vmem:[#allocation8_spill] sm:$0xff] %v4094_v24  ;;  %v4098_v26 = vld [vmem:[#allocation5 + $0x180] ss:$16 sps:$4 sm:$0xff]  }
 0x16c   :  { %3361 = vrcp.f32 %v1192_v25  ;;  %v4096_v25 = vld [vmem:[#allocation5 + $0x18c] ss:$16 sps:$4 sm:$0xff]   ;;  %4271 = vst [vmem:[#allocation10_spill] sm:$0xff] %v4098_v26 }
 0x16d   :  { %3363 = vrcp.f32 %v1202_v31  ;;  %4270 = vst [vmem:[#allocation9_spill] sm:$0xff] %v4096_v25  ;;  %v4112_v31 = vld [vmem:[#allocation5 + $0x168] ss:$16 sps:$4 sm:$0xff]  }
 0x16e   :  { %4276 = vst [vmem:[#allocation15_spill] sm:$0xff] %v4112_v31 }
 0x177   :  { %v3358_v27 = vpop.eup %3357 }
 0x178   :  { %v3360_v29 = vpop.eup %3359 }
 0x179   :  { %v3362_v30 = vpop.eup %3361  ;;  %v1207_v33 = vmul.f32 %v3360_v29, %v3358_v27  ;;  %v4100_v27 = vld [vmem:[#allocation5 + $0x188] ss:$16 sps:$4 sm:$0xff]   ;;  %v4108_v29 = vld [vmem:[#allocation5 + $0x16c] ss:$16 sps:$4 sm:$0xff]  }
 0x17a   :  { %v1206_v32 = vmul.f32 %v3362_v30, %v1205_v28  ;;  %v3364_v0 = vpop.eup %3363  ;;  %4272 = vst [vmem:[#allocation11_spill] sm:$0xff] %v4100_v27  ;;  %v4106_v28 = vld [vmem:[#allocation5 + $0x164] ss:$16 sps:$4 sm:$0xff]   ;;  %4274 = vst [vmem:[#allocation13_spill] sm:$0xff] %v4108_v29  ;;  %v4110_v30 = vld [vmem:[#allocation5 + $0x160] ss:$16 sps:$4 sm:$0xff]  }
 0x17b   :  { %4273 = vst [vmem:[#allocation12_spill] sm:$0xff] %v4106_v28  ;;  %4275 = vst [vmem:[#allocation14_spill] sm:$0xff] %v4110_v30 }
 0x17c   :  { %v1208_v34 = vadd.f32 %v1207_v33, %v1206_v32  ;;  %v4118_v32 = vld [vmem:[#allocation5 + $0x144] ss:$16 sps:$4 sm:$0xff]   ;;  %v4120_v33 = vld [vmem:[#allocation5 + $0x14c] ss:$16 sps:$4 sm:$0xff]  }
 0x17d   :  { %4277 = vst [vmem:[#allocation16_spill] sm:$0xff] %v4118_v32  ;;  %4278 = vst [vmem:[#allocation17_spill] sm:$0xff] %v4120_v33 }
 0x17e   :  { %3365 = vtanh.f32 %v1208_v34  ;;  %1211 = vst [vmem:[#allocation4] sm:$0xf] %v1208_v34  ;;  %v4122_v34 = vld [vmem:[#allocation5 + $0x140] ss:$16 sps:$4 sm:$0xff]  }
 0x17f   :  { %4279 = vst [vmem:[#allocation18_spill] sm:$0xff] %v4122_v34 }
 0x18b   :  { %v3366_v35 = vpop.eup %3365 }
 0x18c   :  { %v1210_v36 = vmul.f32 %v3366_v35, %v3364_v0  ;;  %v4124_v0 = vld [vmem:[#allocation5 + $0x148] ss:$16 sps:$4 sm:$0xff]   ;;  %v4130_v35 = vld [vmem:[#allocation5 + $0x120] ss:$16 sps:$4 sm:$0xff]  }
 0x18d   :  { %4280 = vst [vmem:[#allocation19_spill] sm:$0xff] %v4124_v0  ;;  %4281 = vst [vmem:[#allocation20_spill] sm:$0xff] %v4130_v35 }
 0x18e   :  { %1212 = vst [vmem:[#allocation3] sm:$0x3] %v1210_v36  ;;  %1213 = vst [vmem:[#allocation3 + $0x4] sm:$0xc] %v1210_v36  ;;  %v1214_v37 = vpack.c.bf16 %v1210_v36, %v1210_v36  ;;  %v4132_v36 = vld [vmem:[#allocation5 + $0x124] ss:$16 sps:$4 sm:$0xff]  }
 0x18f   :  { %4282 = vst [vmem:[#allocation21_spill] sm:$0xff] %v4132_v36 }
 0x190   :  { %1215 = vst [vmem:[%s4242_s6] sm:$0x1] %v1214_v37  ;;  %v1219_v38 = vrot.slane %v1214_v37, 6  ;;  %v4134_v37 = vld [vmem:[#allocation5 + $0x128] ss:$16 sps:$4 sm:$0xff]  }
 0x191   :  { %4283 = vst [vmem:[#allocation22_spill] sm:$0xff] %v4134_v37 }
 0x192   :  { %1221 = vst [vmem:[%s4242_s6 + $0x4] sm:$0x8] %v1219_v38  ;;  %v4136_v38 = vld [vmem:[#allocation5 + $0x12c] ss:$16 sps:$4 sm:$0xff]  }
 0x193   :  { %4284 = vst [vmem:[#allocation23_spill] sm:$0xff] %v4136_v38 }
 0x195   :  { %v1224_v39 = vld [vmem:[#allocation3] sm:$0xff] }
 0x196   :  { %v1226_v40 = vcombine.high %v1224_v39, %v1224_v39  ;;  %v1228_v42 = vpack.c.bf16 %v1224_v39, %v1224_v39  ;;  %v4138_v39 = vld [vmem:[#allocation5 + $0x104] ss:$16 sps:$4 sm:$0xff]  }
 0x197   :  { %4285 = vst [vmem:[#allocation24_spill] sm:$0xff] %v4138_v39 }
 0x198   :  { %v1229_v41 = vpack.c.bf16 %v1226_v40, %v1226_v40  ;;  %v4141_v40 = vld [vmem:[#allocation5 + $0x10c] ss:$16 sps:$4 sm:$0xff]  }
 0x199   :  { %4286 = vst [vmem:[#allocation25_spill] sm:$0xff] %v4141_v40 }
 0x19a   :  { %1646 = vmatprep.mubr.bf16.mxu0 %v1229_v41  ;;  %1687 = vmatprep.mubr.bf16.mxu1 %v1229_v41  ;;  %v4145_v41 = vld [vmem:[#allocation5 + $0x100] ss:$16 sps:$4 sm:$0xff]  }
 0x19b   :  { %1647 = vmatmul.mubr.bf16.vlgmr.msra.gmra.mxu0 %v1228_v42  ;;  %1688 = vmatmul.mubr.bf16.vlgmr.msra.gmra.mxu1 %v1228_v42  ;;  %4287 = vst [vmem:[#allocation26_spill] sm:$0xff] %v4145_v41  ;;  %v4149_v42 = vld [vmem:[#allocation5 + $0x108] ss:$16 sps:$4 sm:$0xff]  }
 0x19c   :  { %2141 = vmatpush1.bf16.msra.mxu0 %v3966_v45  ;;  %2182 = vmatpush1.bf16.msra.mxu1 %v3968_v46  ;;  %4288 = vst [vmem:[#allocation27_spill] sm:$0xff] %v4149_v42 }
 0x19d   :  { %2142 = vmatprep.subr.bf16.mxu0 %v3974_v47  ;;  %2183 = vmatprep.subr.bf16.mxu1 %v3976_v48 }
 0x1a0   :  { %2143 = vmatpush1.bf16.msra.mxu0 %v3978_v49  ;;  %2184 = vmatpush1.bf16.msra.mxu1 %v3980_v50 }
 0x1a1   :  { %2144 = vmatprep.subr.bf16.mxu0 %v3986_v51  ;;  %2185 = vmatprep.subr.bf16.mxu1 %v3988_v52 }
 0x1a4   :  { %2145 = vmatpush1.bf16.msra.mxu0 %v3990_v53  ;;  %2186 = vmatpush1.bf16.msra.mxu1 %v3992_v54 }
 0x1a5   :  { %2146 = vmatprep.subr.bf16.mxu0 %v3998_v55  ;;  %2187 = vmatprep.subr.bf16.mxu1 %v4000_v56 }
 0x1a8   :  { %2147 = vmatpush1.bf16.msra.mxu0 %v4002_v57  ;;  %2188 = vmatpush1.bf16.msra.mxu1 %v4004_v58 }
 0x1a9   :  { %2148 = vmatprep.subr.bf16.mxu0 %v4010_v59  ;;  %2189 = vmatprep.subr.bf16.mxu1 %v4012_v60 }
 0x1ac   :  { %2149 = vmatpush1.bf16.msra.mxu0 %v4014_v61  ;;  %2190 = vmatpush1.bf16.msra.mxu1 %v4016_v62 }
 0x1ad   :  { %2150 = vmatprep.subr.bf16.mxu0 %v4022_v63  ;;  %2191 = vmatprep.subr.bf16.mxu1 %v4024_v1 }
 0x1b0   :  { %2151 = vmatpush1.bf16.msra.mxu0 %v4026_v2  ;;  %2192 = vmatpush1.bf16.msra.mxu1 %v4028_v10 }
 0x1b1   :  { %2152 = vmatprep.subr.bf16.mxu0 %v4034_v15  ;;  %2193 = vmatprep.subr.bf16.mxu1 %v4036_v3 }
 0x1b4   :  { %2153 = vmatpush1.bf16.msra.mxu0 %v4038_v4  ;;  %2194 = vmatpush1.bf16.msra.mxu1 %v4040_v5 }
 0x1b5   :  { %2154 = vmatprep.subr.bf16.mxu0 %v4046_v6  ;;  %2195 = vmatprep.subr.bf16.mxu1 %v4048_v7 }
 0x1b8   :  { %2155 = vmatpush1.bf16.msra.mxu0 %v4050_v8  ;;  %2196 = vmatpush1.bf16.msra.mxu1 %v4052_v9 }
 0x1b9   :  { %2156 = vmatprep.subr.bf16.mxu0 %v4058_v11  ;;  %2197 = vmatprep.subr.bf16.mxu1 %v4060_v13 }
 0x1bc   :  { %2157 = vmatpush2.bf16.msra.mxu0 %v4062_v14  ;;  %2198 = vmatpush2.bf16.msra.mxu1 %v4064_v16 }
 0x1bd   :  { %2158 = vmatprep.subr.bf16.mxu0 %v4070_v17  ;;  %2199 = vmatprep.subr.bf16.mxu1 %v4072_v18 }
 0x1c0   :  { %2159 = vmatpush2.bf16.msra.mxu0 %v4074_v19  ;;  %2200 = vmatpush2.bf16.msra.mxu1 %v4076_v12 }
 0x1c1   :  { %2160 = vmatprep.subr.bf16.mxu0 %v4082_v20  ;;  %2201 = vmatprep.subr.bf16.mxu1 %v4084_v21 }
 0x1c4   :  { %2161 = vmatpush2.bf16.msra.mxu0 %v4086_v22  ;;  %2202 = vmatpush2.bf16.msra.mxu1 %v4088_v23 }
 0x1c5   :  { %2162 = vmatprep.subr.bf16.mxu0 %v4094_v24  ;;  %2203 = vmatprep.subr.bf16.mxu1 %v4096_v25 }
 0x1c8   :  { %2163 = vmatpush2.bf16.msra.mxu0 %v4098_v26  ;;  %2204 = vmatpush2.bf16.msra.mxu1 %v4100_v27 }
 0x1c9   :  { %2164 = vmatprep.subr.bf16.mxu0 %v4106_v28  ;;  %2205 = vmatprep.subr.bf16.mxu1 %v4108_v29 }
 0x1cc   :  { %2165 = vmatpush2.bf16.msra.mxu0 %v4110_v30  ;;  %2206 = vmatpush2.bf16.msra.mxu1 %v4112_v31 }
 0x1cd   :  { %2166 = vmatprep.subr.bf16.mxu0 %v4118_v32  ;;  %2207 = vmatprep.subr.bf16.mxu1 %v4120_v33 }
 0x1d0   :  { %2167 = vmatpush2.bf16.msra.mxu0 %v4122_v34  ;;  %2208 = vmatpush2.bf16.msra.mxu1 %v4124_v0 }
 0x1d1   :  { %2168 = vmatprep.subr.bf16.mxu0 %v4132_v36  ;;  %2209 = vmatprep.subr.bf16.mxu1 %v4136_v38 }
 0x1d4   :  { %2169 = vmatpush2.bf16.msra.mxu0 %v4130_v35  ;;  %2210 = vmatpush2.bf16.msra.mxu1 %v4134_v37  ;;  %v1222_v37 = vld [vmem:[#allocation2 + $0x8] sm:$0xff] }
 0x1d5   :  { %2170 = vmatprep.subr.bf16.mxu0 %v4138_v39  ;;  %2211 = vmatprep.subr.bf16.mxu1 %v4141_v40 }
 0x1d8   :  { %2171 = vmatpush2.bf16.msra.mxu0 %v4145_v41  ;;  %2212 = vmatpush2.bf16.msra.mxu1 %v4149_v42 }
 0x1d9   :  { %2666 = vmatprep.subr.bf16.mxu0 %v3962_v43  ;;  %2707 = vmatprep.subr.bf16.mxu1 %v3964_v44  ;;  %v1223_v43 = vld [vmem:[#allocation2 + $0x10] sm:$0xff] }
 0x25b   :  { %v1648_v38 = vpop.f32.mrf.mxu0  ;;  %v1689_v35 = vpop.f32.mrf.mxu1 }
 0x25d   :  { %v1650_v36 = vpop.f32.mrf.mxu0  ;;  %v1691_v0 = vpop.f32.mrf.mxu1 }
 0x25e   :  { %v1700_v34 = vcombine.low %v1648_v38, %v1650_v36  ;;  %v1701_v41 = vcombine.low %v1689_v35, %v1691_v0  ;;  %v1731_v35 = vld [vmem:[#allocation4] sm:$0xf] }
 0x25f   :  { %v1652_v33 = vpop.f32.mrf.mxu0  ;;  %v1693_v39 = vpop.f32.mrf.mxu1 }
 0x260   :  { %v1704_v32 = vadd.f32 %v1700_v34, %v1222_v37  ;;  %v1705_v28 = vadd.f32 %v1701_v41, %v1223_v43 }
 0x261   :  { %v1653_v31 = vpop.f32.mrf.mxu0  ;;  %v1694_v30 = vpop.f32.mrf.mxu1 }
 0x262   :  { %v3007_v40 = vmul.f32 -1.442695, %v1704_v32  ;;  %v1713_v29 = vrot.slane %v1704_v32, 4  ;;  %v1723_v44 = vrot.slane %v1705_v28, 4 }
 0x264   :  { %3367 = vpow2.f32 %v3007_v40  ;;  %v3008_v42 = vmul.f32 -1.442695, %v1713_v29  ;;  %v3009_v27 = vmul.f32 -1.442695, %v1723_v44 }
 0x266   :  { %3369 = vpow2.f32 %v3008_v42 }
 0x267   :  { %3371 = vpow2.f32 %v3009_v27 }
 0x271   :  { %v3368_v26 = vpop.eup %3367 }
 0x272   :  { %v1709_v25 = vadd.f32 1.0, %v3368_v26 }
 0x273   :  { %v3370_v24 = vpop.eup %3369 }
 0x274   :  { %3373 = vrcp.f32 %v1709_v25  ;;  %v1718_v33 = vadd.f32 1.0, %v3370_v24  ;;  %v3372_v31 = vpop.eup %3371 }
 0x275   :  { %3375 = vtanh.f32 %v1705_v28  ;;  %v1728_v0 = vadd.f32 1.0, %v3372_v31 }
 0x276   :  { %3377 = vrcp.f32 %v1718_v33 }
 0x277   :  { %3379 = vrcp.f32 %v1728_v0 }
 0x281   :  { %v3374_v30 = vpop.eup %3373 }
 0x282   :  { %v3376_v34 = vpop.eup %3375 }
 0x283   :  { %v3378_v32 = vpop.eup %3377  ;;  %v1733_v36 = vmul.f32 %v3376_v34, %v3374_v30 }
 0x284   :  { %v1732_v29 = vmul.f32 %v3378_v32, %v1731_v35  ;;  %v3380_v38 = vpop.eup %3379 }
 0x286   :  { %v1734_v37 = vadd.f32 %v1733_v36, %v1732_v29 }
 0x288   :  { %3381 = vtanh.f32 %v1734_v37  ;;  %1737 = vst [vmem:[#allocation4] sm:$0xf] %v1734_v37 }
 0x28f   :  { %v2257_v34 = vld [vmem:[#allocation4] sm:$0xf] }
 0x295   :  { %v3382_v26 = vpop.eup %3381 }
 0x296   :  { %v1736_v39 = vmul.f32 %v3382_v26, %v3380_v38 }
 0x298   :  { %1738 = vst [vmem:[#allocation3] sm:$0x3] %v1736_v39  ;;  %1739 = vst [vmem:[#allocation3 + $0x4] sm:$0xc] %v1736_v39  ;;  %v3148_v24 = vpack.c.bf16 %v1736_v39, %v1736_v39 }
 0x29a   :  { %v1744_v25 = vrot.slane %v3148_v24, 7 }
 0x29c   :  { %1746 = vst [vmem:[%s4242_s6] sm:$0x2] %v1744_v25  ;;  %1747 = vst [vmem:[%s4242_s6 + $0x4] sm:$0x4] %v1744_v25 }
 0x29f   :  { %v1750_v27 = vld [vmem:[#allocation3] sm:$0xff] }
 0x2a0   :  { %v1752_v28 = vcombine.high %v1750_v27, %v1750_v27  ;;  %v1754_v41 = vpack.c.bf16 %v1750_v27, %v1750_v27 }
 0x2a2   :  { %v1755_v40 = vpack.c.bf16 %v1752_v28, %v1752_v28 }
 0x2a4   :  { %2172 = vmatprep.mubr.bf16.mxu0 %v1755_v40  ;;  %2213 = vmatprep.mubr.bf16.mxu1 %v1755_v40 }
 0x2a5   :  { %2173 = vmatmul.mubr.bf16.vlgmr.msra.gmra.mxu0 %v1754_v41  ;;  %2214 = vmatmul.mubr.bf16.vlgmr.msra.gmra.mxu1 %v1754_v41 }
 0x2a6   :  { %2667 = vmatpush1.bf16.msra.mxu0 %v3966_v45  ;;  %2708 = vmatpush1.bf16.msra.mxu1 %v3968_v46  ;;  %v4289_v45 = vld [vmem:[#allocation8_spill] sm:$0xff]  ;;  %v4290_v46 = vld [vmem:[#allocation9_spill] sm:$0xff] }
 0x2a7   :  { %2668 = vmatprep.subr.bf16.mxu0 %v3974_v47  ;;  %2709 = vmatprep.subr.bf16.mxu1 %v3976_v48  ;;  %v4291_v47 = vld [vmem:[#allocation10_spill] sm:$0xff]  ;;  %v4292_v48 = vld [vmem:[#allocation11_spill] sm:$0xff] }
 0x2aa   :  { %2669 = vmatpush1.bf16.msra.mxu0 %v3978_v49  ;;  %2710 = vmatpush1.bf16.msra.mxu1 %v3980_v50  ;;  %v4293_v49 = vld [vmem:[#allocation12_spill] sm:$0xff]  ;;  %v4294_v50 = vld [vmem:[#allocation13_spill] sm:$0xff] }
 0x2ab   :  { %2670 = vmatprep.subr.bf16.mxu0 %v3986_v51  ;;  %2711 = vmatprep.subr.bf16.mxu1 %v3988_v52  ;;  %v4295_v51 = vld [vmem:[#allocation14_spill] sm:$0xff]  ;;  %v4296_v52 = vld [vmem:[#allocation15_spill] sm:$0xff] }
 0x2ae   :  { %2671 = vmatpush1.bf16.msra.mxu0 %v3990_v53  ;;  %2712 = vmatpush1.bf16.msra.mxu1 %v3992_v54  ;;  %v4297_v53 = vld [vmem:[#allocation16_spill] sm:$0xff]  ;;  %v4298_v54 = vld [vmem:[#allocation17_spill] sm:$0xff] }
 0x2af   :  { %2672 = vmatprep.subr.bf16.mxu0 %v3998_v55  ;;  %2713 = vmatprep.subr.bf16.mxu1 %v4000_v56  ;;  %v4299_v55 = vld [vmem:[#allocation18_spill] sm:$0xff]  ;;  %v4300_v56 = vld [vmem:[#allocation19_spill] sm:$0xff] }
 0x2b2   :  { %2673 = vmatpush1.bf16.msra.mxu0 %v4002_v57  ;;  %2714 = vmatpush1.bf16.msra.mxu1 %v4004_v58  ;;  %v4301_v57 = vld [vmem:[#allocation21_spill] sm:$0xff]  ;;  %v4302_v58 = vld [vmem:[#allocation23_spill] sm:$0xff] }
 0x2b3   :  { %2674 = vmatprep.subr.bf16.mxu0 %v4010_v59  ;;  %2715 = vmatprep.subr.bf16.mxu1 %v4012_v60  ;;  %v4303_v59 = vld [vmem:[#allocation20_spill] sm:$0xff]  ;;  %v4304_v60 = vld [vmem:[#allocation22_spill] sm:$0xff] }
 0x2b6   :  { %2675 = vmatpush1.bf16.msra.mxu0 %v4014_v61  ;;  %2716 = vmatpush1.bf16.msra.mxu1 %v4016_v62  ;;  %v4305_v61 = vld [vmem:[#allocation24_spill] sm:$0xff]  ;;  %v4306_v62 = vld [vmem:[#allocation25_spill] sm:$0xff] }
 0x2b7   :  { %2676 = vmatprep.subr.bf16.mxu0 %v4022_v63  ;;  %2717 = vmatprep.subr.bf16.mxu1 %v4024_v1  ;;  %v4307_v63 = vld [vmem:[#allocation26_spill] sm:$0xff]  ;;  %v4308_v1 = vld [vmem:[#allocation27_spill] sm:$0xff] }
 0x2ba   :  { %2677 = vmatpush1.bf16.msra.mxu0 %v4026_v2  ;;  %2718 = vmatpush1.bf16.msra.mxu1 %v4028_v10 }
 0x2bb   :  { %2678 = vmatprep.subr.bf16.mxu0 %v4034_v15  ;;  %2719 = vmatprep.subr.bf16.mxu1 %v4036_v3 }
 0x2be   :  { %2679 = vmatpush1.bf16.msra.mxu0 %v4038_v4  ;;  %2720 = vmatpush1.bf16.msra.mxu1 %v4040_v5  ;;  %v1748_v5 = vld [vmem:[#allocation2 + $0x18] sm:$0xff] }
 0x2bf   :  { %2680 = vmatprep.subr.bf16.mxu0 %v4046_v6  ;;  %2721 = vmatprep.subr.bf16.mxu1 %v4048_v7 }
 0x2c2   :  { %2681 = vmatpush1.bf16.msra.mxu0 %v4050_v8  ;;  %2722 = vmatpush1.bf16.msra.mxu1 %v4052_v9 }
 0x2c3   :  { %2682 = vmatprep.subr.bf16.mxu0 %v4058_v11  ;;  %2723 = vmatprep.subr.bf16.mxu1 %v4060_v13 }
 0x2c6   :  { %2683 = vmatpush2.bf16.msra.mxu0 %v4062_v14  ;;  %2724 = vmatpush2.bf16.msra.mxu1 %v4064_v16 }
 0x2c7   :  { %2684 = vmatprep.subr.bf16.mxu0 %v4070_v17  ;;  %2725 = vmatprep.subr.bf16.mxu1 %v4072_v18  ;;  %v1749_v18 = vld [vmem:[#allocation2 + $0x28] sm:$0xff] }
 0x2ca   :  { %2685 = vmatpush2.bf16.msra.mxu0 %v4074_v19  ;;  %2726 = vmatpush2.bf16.msra.mxu1 %v4076_v12 }
 0x2cb   :  { %2686 = vmatprep.subr.bf16.mxu0 %v4082_v20  ;;  %2727 = vmatprep.subr.bf16.mxu1 %v4084_v21 }
 0x2ce   :  { %2687 = vmatpush2.bf16.msra.mxu0 %v4086_v22  ;;  %2728 = vmatpush2.bf16.msra.mxu1 %v4088_v23 }
 0x2cf   :  { %2688 = vmatprep.subr.bf16.mxu0 %v4289_v45  ;;  %2729 = vmatprep.subr.bf16.mxu1 %v4290_v46 }
 0x2d2   :  { %2689 = vmatpush2.bf16.msra.mxu0 %v4291_v47  ;;  %2730 = vmatpush2.bf16.msra.mxu1 %v4292_v48  ;;  %v2274_v47 = vld [vmem:[#allocation2 + $0x38] sm:$0xff] }
 0x2d3   :  { %2690 = vmatprep.subr.bf16.mxu0 %v4293_v49  ;;  %2731 = vmatprep.subr.bf16.mxu1 %v4294_v50 }
 0x2d6   :  { %2691 = vmatpush2.bf16.msra.mxu0 %v4295_v51  ;;  %2732 = vmatpush2.bf16.msra.mxu1 %v4296_v52 }
 0x2d7   :  { %2692 = vmatprep.subr.bf16.mxu0 %v4297_v53  ;;  %2733 = vmatprep.subr.bf16.mxu1 %v4298_v54 }
 0x2da   :  { %2693 = vmatpush2.bf16.msra.mxu0 %v4299_v55  ;;  %2734 = vmatpush2.bf16.msra.mxu1 %v4300_v56 }
 0x2db   :  { %2694 = vmatprep.subr.bf16.mxu0 %v4301_v57  ;;  %2735 = vmatprep.subr.bf16.mxu1 %v4302_v58  ;;  %v2275_v57 = vld [vmem:[#allocation2 + $0x30] sm:$0xff] }
 0x2de   :  { %2695 = vmatpush2.bf16.msra.mxu0 %v4303_v59  ;;  %2736 = vmatpush2.bf16.msra.mxu1 %v4304_v60 }
 0x2df   :  { %2696 = vmatprep.subr.bf16.mxu0 %v4305_v61  ;;  %2737 = vmatprep.subr.bf16.mxu1 %v4306_v62 }
 0x2e2   :  { %2697 = vmatpush2.bf16.msra.mxu0 %v4307_v63  ;;  %2738 = vmatpush2.bf16.msra.mxu1 %v4308_v1 }
 0x365   :  { %v2174_v2 = vpop.f32.mrf.mxu0  ;;  %v2215_v10 = vpop.f32.mrf.mxu1 }
 0x367   :  { %v2176_v15 = vpop.f32.mrf.mxu0  ;;  %v2217_v3 = vpop.f32.mrf.mxu1 }
 0x368   :  { %v2226_v4 = vcombine.low %v2174_v2, %v2176_v15  ;;  %v2227_v16 = vcombine.low %v2215_v10, %v2217_v3 }
 0x369   :  { %v2178_v6 = vpop.f32.mrf.mxu0  ;;  %v2219_v7 = vpop.f32.mrf.mxu1 }
 0x36a   :  { %v2230_v8 = vadd.f32 %v2226_v4, %v1748_v5  ;;  %v2231_v19 = vadd.f32 %v2227_v16, %v1749_v18 }
 0x36b   :  { %v2179_v9 = vpop.f32.mrf.mxu0  ;;  %v2220_v11 = vpop.f32.mrf.mxu1 }
 0x36c   :  { %v3075_v13 = vmul.f32 -1.442695, %v2230_v8  ;;  %v2239_v14 = vrot.slane %v2230_v8, 4  ;;  %v2249_v12 = vrot.slane %v2231_v19, 4 }
 0x36e   :  { %3383 = vpow2.f32 %v3075_v13  ;;  %v3076_v17 = vmul.f32 -1.442695, %v2239_v14  ;;  %v3077_v20 = vmul.f32 -1.442695, %v2249_v12 }
 0x370   :  { %3385 = vpow2.f32 %v3076_v17 }
 0x371   :  { %3387 = vpow2.f32 %v3077_v20 }
 0x37b   :  { %v3384_v21 = vpop.eup %3383 }
 0x37c   :  { %v2235_v22 = vadd.f32 1.0, %v3384_v21 }
 0x37d   :  { %v3386_v23 = vpop.eup %3385 }
 0x37e   :  { %3389 = vrcp.f32 %v2235_v22  ;;  %v2244_v42 = vadd.f32 1.0, %v3386_v23  ;;  %v3388_v43 = vpop.eup %3387 }
 0x37f   :  { %3391 = vtanh.f32 %v2231_v19  ;;  %v2254_v30 = vadd.f32 1.0, %v3388_v43 }
 0x380   :  { %3393 = vrcp.f32 %v2244_v42 }
 0x381   :  { %3395 = vrcp.f32 %v2254_v30 }
 0x38b   :  { %v3390_v44 = vpop.eup %3389 }
 0x38c   :  { %v3392_v33 = vpop.eup %3391 }
 0x38d   :  { %v3394_v31 = vpop.eup %3393  ;;  %v2259_v0 = vmul.f32 %v3392_v33, %v3390_v44 }
 0x38e   :  { %v2258_v32 = vmul.f32 %v3394_v31, %v2257_v34  ;;  %v3396_v29 = vpop.eup %3395 }
 0x390   :  { %v2260_v35 = vadd.f32 %v2259_v0, %v2258_v32 }
 0x392   :  { %3397 = vtanh.f32 %v2260_v35  ;;  %2263 = vst [vmem:[#allocation4] sm:$0xf] %v2260_v35 }
 0x399   :  { %v2783_v5 = vld [vmem:[#allocation4] sm:$0xf] }
 0x39f   :  { %v3398_v36 = vpop.eup %3397 }
 0x3a0   :  { %v2262_v37 = vmul.f32 %v3398_v36, %v3396_v29 }
 0x3a2   :  { %v2266_v38 = vpack.c.bf16 %v2262_v37, %v2262_v37  ;;  %2264 = vst [vmem:[#allocation3] sm:$0x3] %v2262_v37  ;;  %2265 = vst [vmem:[#allocation3 + $0x4] sm:$0xc] %v2262_v37 }
 0x3a4   :  { %v2270_v26 = vrot.slane %v2266_v38, 6  ;;  %2273 = vst [vmem:[%s4242_s6 + $0x4] sm:$0x2] %v2266_v38 }
 0x3a6   :  { %2272 = vst [vmem:[%s4242_s6] sm:$0x4] %v2270_v26 }
 0x3a9   :  { %v2276_v39 = vld [vmem:[#allocation3] sm:$0xff] }
 0x3aa   :  { %v2278_v24 = vcombine.high %v2276_v39, %v2276_v39  ;;  %v2280_v27 = vpack.c.bf16 %v2276_v39, %v2276_v39 }
 0x3ac   :  { %v2281_v25 = vpack.c.bf16 %v2278_v24, %v2278_v24 }
 0x3ae   :  { %2698 = vmatprep.mubr.bf16.mxu0 %v2281_v25  ;;  %2739 = vmatprep.mubr.bf16.mxu1 %v2281_v25 }
 0x3af   :  { %2699 = vmatmul.mubr.bf16.vlgmr.msra.gmra.mxu0 %v2280_v27  ;;  %2740 = vmatmul.mubr.bf16.vlgmr.msra.gmra.mxu1 %v2280_v27 }
 0x46f   :  { %v2700_v28 = vpop.f32.mrf.mxu0  ;;  %v2741_v40 = vpop.f32.mrf.mxu1 }
 0x471   :  { %v2702_v41 = vpop.f32.mrf.mxu0  ;;  %v2743_v45 = vpop.f32.mrf.mxu1 }
 0x472   :  { %v2752_v46 = vcombine.low %v2700_v28, %v2702_v41  ;;  %v2753_v55 = vcombine.low %v2741_v40, %v2743_v45 }
 0x473   :  { %v2704_v48 = vpop.f32.mrf.mxu0  ;;  %v2745_v49 = vpop.f32.mrf.mxu1 }
 0x474   :  { %v2756_v50 = vadd.f32 %v2752_v46, %v2274_v47  ;;  %v2757_v58 = vadd.f32 %v2753_v55, %v2275_v57 }
 0x475   :  { %v2705_v51 = vpop.f32.mrf.mxu0  ;;  %v2746_v52 = vpop.f32.mrf.mxu1 }
 0x476   :  { %v3143_v53 = vmul.f32 -1.442695, %v2756_v50  ;;  %v2765_v54 = vrot.slane %v2756_v50, 4  ;;  %v2775_v59 = vrot.slane %v2757_v58, 4 }
 0x478   :  { %3399 = vpow2.f32 %v3143_v53  ;;  %v3144_v56 = vmul.f32 -1.442695, %v2765_v54  ;;  %v3145_v60 = vmul.f32 -1.442695, %v2775_v59 }
 0x47a   :  { %3401 = vpow2.f32 %v3144_v56 }
 0x47b   :  { %3403 = vpow2.f32 %v3145_v60 }
 0x485   :  { %v3400_v61 = vpop.eup %3399 }
 0x486   :  { %v2761_v62 = vadd.f32 1.0, %v3400_v61 }
 0x487   :  { %v3402_v63 = vpop.eup %3401 }
 0x488   :  { %3405 = vrcp.f32 %v2761_v62  ;;  %v2770_v1 = vadd.f32 1.0, %v3402_v63  ;;  %v3404_v2 = vpop.eup %3403 }
 0x489   :  { %3407 = vtanh.f32 %v2757_v58  ;;  %v2780_v4 = vadd.f32 1.0, %v3404_v2 }
 0x48a   :  { %3409 = vrcp.f32 %v2770_v1 }
 0x48b   :  { %3411 = vrcp.f32 %v2780_v4 }
 0x495   :  { %v3406_v10 = vpop.eup %3405 }
 0x496   :  { %v3408_v15 = vpop.eup %3407 }
 0x497   :  { %v3410_v3 = vpop.eup %3409  ;;  %v2785_v7 = vmul.f32 %v3408_v15, %v3406_v10 }
 0x498   :  { %v2784_v6 = vmul.f32 %v3410_v3, %v2783_v5  ;;  %v3412_v9 = vpop.eup %3411 }
 0x49a   :  { %v2786_v8 = vadd.f32 %v2785_v7, %v2784_v6 }
 0x49c   :  { %3413 = vtanh.f32 %v2786_v8  ;;  %2789 = vst [vmem:[#allocation4] sm:$0xf] %v2786_v8 }
 0x4a9   :  { %v3414_v11 = vpop.eup %3413 }
 0x4aa   :  { %v2788_v13 = vmul.f32 %v3414_v11, %v3412_v9 }
 0x4ac   :  { %2790 = vst [vmem:[#allocation3] sm:$0x3] %v2788_v13  ;;  %2791 = vst [vmem:[#allocation3 + $0x4] sm:$0xc] %v2788_v13  ;;  %v3150_v14 = vpack.c.bf16 %v2788_v13, %v2788_v13 }
 0x4ae   :  { %v2796_v16 = vrot.slane %v3150_v14, 5 }
 0x4b0   :  { %2798 = vst [vmem:[%s4242_s6] sm:$0x8] %v2796_v16  ;;  %v2799_v17 = vrot.slane %v2796_v16, 4 }
 0x4b2   :  { %2801 = vst [vmem:[%s4242_s6 + $0x4] sm:$0x1] %v2799_v17 }
 0x4b3   :  { %2806 = vsyncpa [#allocation6], 1 }

// kernel: model_forward.4
= control target key start
LH: loop header
LB: loop body
LE: loop exit
PB: predicated region body
PF: predicated region fallthrough
CT: control target
= control target key end

     0   :  { %8 = vsyncpa [#allocation10], 0  ;;  %s4543_s12 = smov 0   ;;  %s4855_s0 = inlined_call_operand.vmem [shape: f32[2,34,128], index: 0, kind: input, shape index: {}]   ;;  %s4856_s1 = inlined_call_operand.hbm [shape: bf16[8,3,128,128], index: 1, kind: input, shape index: {}]   ;;  %s4857_s2 = inlined_call_operand.vmem [shape: f32[8,1,128], index: 2, kind: input, shape index: {}]   ;;  %s4858_s3 = inlined_call_operand.vmem [shape: bf16[4,256], index: 3, kind: output, shape index: {}]  }
   0x1 LB: > { %s4549_s13 = sadd.s32 4294967295, %s4515_s12   ;;  %p3306_p0 = scmp.ge.s32.totalorder %s4515_s12, 1  ;;  %s4515_s12 = sphi %s4543_s12, %s14_s12  }
   0x2   : > { %p113_p1 = scmp.lt.s32.totalorder %s4515_s12, 3  ;;  %s4517_s14 = smov [#allocation9]  }
   0x3   : > { %s125_s15 = sshll.u32 %s4517_s14, 4  ;;  %p4265_p3 = scmp.eq.s32.totalorder %s4549_s13, 0  ;;  %s126_s15 = int_to_ptr.vmem [resolvable:$true] %s125_s15 }
   0x4   : > { %p4553_p2 = pnand %p3306_p0, %p113_p1  ;;  %s4490_s17 = scalar_lea.vmem %s126_s15, 24576 }
   0x5   : > { %p4491_p7 = scmp.ne.s32.totalorder %s126_s15, %s4490_s17  ;;  %p4498_p10 = scmp.lt.s32.totalorder %s126_s15, %s126_s15 }
   0x6   : > { %p4261_p4 = pneg %p4553_p2  ;;  %p4499_p11 = scmp.lt.s32.totalorder %s4490_s17, %s4490_s17 }
   0x8   : > { %p4262_p5 = pnand %p4265_p3, %p4261_p4  ;;  %p4500_p12 = por %p4499_p11, %p4498_p10 }
   0xa   : > { %p4481_p6 = pneg %p4262_p5 }
   0xc   : > { %p4493_p8 = pnand %p4491_p7, %p4481_p6 }
   0xe   : > { %p4494_p9 = pneg %p4493_p8 }
  0x10   : > { %p4501_p13 = pnand %p4500_p12, %p4494_p9 }
  0x12   : > { %4504 = shalt.err (!%p4501_p13)
}
  0x13   : > { %s4518_s18 = smov 64   ;;  %s4519_s19 = smov 4  }
  0x14   : > { %4264 = dma.hbm_to_vmem [thread:$0]  (!%p4262_p5), %s4856_s1, 24576, %s126_s15, [#allocation10], %s4518_s18, %s4518_s18, %s4519_s19  }
  0x15   : > { %152 = sbr.rel (%p4553_p2) target bundleno = 2815 (0xaff), region = 32 }
  0x1a   : > { %4510 = dma.done.wait (%p4265_p3), [#allocation10], 24576  }
  0x1b   : > { %4512 = vsyncadd (%p4265_p3), [#allocation10], 4294942720  ;;  %v4286_v0 = vld [vmem:[#allocation9 + $0x78] sm:$0xff]   ;;  %p175_p0 = scmp.lt.s32.totalorder %s4549_s13, 1  ;;  %v4288_v2 = vld [vmem:[#allocation9 + $0x70] sm:$0xff]   ;;  %v4520_v46 = vmov 0.0  }
  0x1c   : > { %v4287_v1 = vld [vmem:[#allocation9 + $0x38] sm:$0xff]   ;;  %3756 = vmatprep.subr.bf16.mxu0 %v4286_v0  ;;  %v4289_v3 = vld [vmem:[#allocation9 + $0x30] sm:$0xff]   ;;  %v4290_v4 = vld [vmem:[#allocation9 + $0x68] sm:$0xff]   ;;  %187 = vst [vmem:[#allocation2 + $0x10] sm:$0xff] %v4520_v46  ;;  %vm4521_vm4 = vmmov 0   ;;  %vm987_vm8 = vcmask 1046528  }
  0x1d   : > { %3776 = vmatprep.subr.bf16.mxu1 %v4287_v1  ;;  %3757 = vmatpush3.bf16.msra.mxu0 %v4286_v0  ;;  %v4291_v5 = vld [vmem:[#allocation9 + $0x28] sm:$0xff]   ;;  %s4861_s13 = smov (!%p175_p0, %s4549_s13), 1  ;;  %v4292_v6 = vld [vmem:[#allocation9 + $0x60] sm:$0xff]   ;;  %v4294_v8 = vld [vmem:[#allocation9 + $0x58] sm:$0xff]   ;;  %188 = vst [vmem:[#allocation2 + $0x18] sm:$0xff] %v4520_v46  ;;  %vm1021_vm12 = vcmask 261120  }
  0x1e   : > { %3777 = vmatpush3.bf16.msra.mxu1 %v4287_v1  ;;  %3758 = vmatprep.subr.bf16.mxu0 %v4288_v2  ;;  %v4293_v7 = vld [vmem:[#allocation9 + $0x20] sm:$0xff]   ;;  %s4256_s22 = smul.u32 40, %s4861_s13  ;;  %v4295_v9 = vld [vmem:[#allocation9 + $0x18] sm:$0xff]   ;;  %v4296_v10 = vld [vmem:[#allocation9 + $0x50] sm:$0xff]   ;;  %185 = vst [vmem:[#allocation2] sm:$0xff] %v4520_v46  ;;  %s4522_s9 = smov 127  }
  0x1f   : > { %3778 = vmatprep.subr.bf16.mxu1 %v4289_v3  ;;  %v4297_v14 = vld [vmem:[#allocation9 + $0x10] sm:$0xff]   ;;  %v4298_v18 = vld [vmem:[#allocation9 + $0x48] sm:$0xff]   ;;  %v4300_v20 = vld [vmem:[#allocation9 + $0x40] sm:$0xff]   ;;  %186 = vst [vmem:[#allocation2 + $0x8] sm:$0xff] %v4520_v46  ;;  %s3312_s18 = sshll.u32 %s4861_s13, 1 }
  0x20   : > { %s4579_s25 = scalar_lea.vmem %s4855_s0, %s4256_s22  ;;  %v4299_v19 = vld [vmem:[#allocation9 + $0x8] sm:$0xff]   ;;  %v4301_v21 = vld [vmem:[#allocation9] sm:$0xff]   ;;  %v4302_v26 = vld [vmem:[#allocation9 + $0xb8] sm:$0xff]   ;;  %189 = vst [vmem:[#allocation2 + $0x20] sm:$0x3] %v4520_v46  ;;  %s183_s21 = scalar_lea.vmem %s4858_s3, %s3312_s18 }
  0x21   : > { %3759 = vmatpush3.bf16.msra.mxu0 %v4288_v2  ;;  %v227_v11 = vld [vmem:[%s4579_s25 + $0x1] sm:$0xff]  ;;  %v228_v12 = vld [vmem:[%s4579_s25 + $0x9] sm:$0xff]  ;;  %v229_v22 = vld [vmem:[%s4579_s25 + $0x11] sm:$0xff]  ;;  %190 = vst [vmem:[#allocation3] sm:$0xff] %v4520_v46 }
  0x22   : > { %3779 = vmatpush3.bf16.msra.mxu1 %v4289_v3  ;;  %3760 = vmatprep.subr.bf16.mxu0 %v4290_v4  ;;  %v205_v13 = vld [vmem:[%s4579_s25] sm:$0xff]  ;;  %v231_v15 = vpack.c.bf16 %v228_v12, %v227_v11  ;;  %v206_v16 = vld [vmem:[%s4579_s25 + $0x8] sm:$0xff]  ;;  %v207_v24 = vld [vmem:[%s4579_s25 + $0x10] sm:$0xff]  ;;  %191 = vst [vmem:[#allocation3 + $0x8] sm:$0xff] %v4520_v46 }
  0x23   : > { %3780 = vmatprep.subr.bf16.mxu1 %v4291_v5  ;;  %v209_v17 = vpack.c.bf16 %v206_v16, %v205_v13  ;;  %v230_v23 = vld [vmem:[%s4579_s25 + $0x19] sm:$0xff]  ;;  %v444_v27 = vld [vmem:[%s4579_s25 + $0x2] sm:$0xff]  ;;  %v445_v28 = vld [vmem:[%s4579_s25 + $0xa] sm:$0xff]  ;;  %192 = vst [vmem:[#allocation3 + $0x10] sm:$0x3] %v4520_v46 }
  0x24   : > { %3772 = vmatprep.mubr.bf16.mxu0 %v231_v15  ;;  %v208_v25 = vld [vmem:[%s4579_s25 + $0x18] sm:$0xff]  ;;  %v232_v29 = vpack.c.bf16 %v230_v23, %v229_v22  ;;  %v4303_v30 = vld [vmem:[#allocation9 + $0xb0] sm:$0xff]   ;;  %v448_v32 = vpack.c.bf16 %v445_v28, %v444_v27  ;;  %v4304_v33 = vld [vmem:[#allocation9 + $0xa8] sm:$0xff]   ;;  %193 = vst [vmem:[#allocation4] sm:$0xff] %v4520_v46 }
  0x25   : > { %3761 = vmatpush3.bf16.msra.mxu0 %v4290_v4  ;;  %3792 = vmatprep.mubr.bf16.mxu1 %v209_v17  ;;  %v210_v31 = vpack.c.bf16 %v208_v25, %v207_v24  ;;  %v4305_v34 = vld [vmem:[#allocation9 + $0xa0] sm:$0xff]   ;;  %v4306_v35 = vld [vmem:[#allocation9 + $0x98] sm:$0xff]   ;;  %v4307_v36 = vld [vmem:[#allocation9 + $0x90] sm:$0xff]   ;;  %194 = vst [vmem:[#allocation4 + $0x8] sm:$0xff] %v4520_v46 }
  0x26   : > { %3781 = vmatpush3.bf16.msra.mxu1 %v4291_v5  ;;  %3762 = vmatprep.subr.bf16.mxu0 %v4292_v6  ;;  %v4308_v37 = vld [vmem:[#allocation9 + $0x88] sm:$0xff]   ;;  %v4309_v38 = vld [vmem:[#allocation9 + $0x80] sm:$0xff]   ;;  %v446_v39 = vld [vmem:[%s4579_s25 + $0x12] sm:$0xff]  ;;  %195 = vst [vmem:[#allocation4 + $0x10] sm:$0x3] %v4520_v46 }
  0x27   : > { %3782 = vmatprep.subr.bf16.mxu1 %v4293_v7  ;;  %v447_v40 = vld [vmem:[%s4579_s25 + $0x1a] sm:$0xff]  ;;  %v4312_v44 = vld [vmem:[#allocation9 + $0x130] sm:$0xff]   ;;  %196 = vst [vmem:[#allocation5] sm:$0xff] %v4520_v46  ;;  %197 = vst [vmem:[#allocation5 + $0x8] sm:$0xff] %v4520_v46 }
  0x28   : > { %v449_v41 = vpack.c.bf16 %v447_v40, %v446_v39  ;;  %v4310_v42 = vld [vmem:[#allocation9 + $0x138] sm:$0xff]   ;;  %v4313_v45 = vld [vmem:[#allocation9 + $0xf0] sm:$0xff]   ;;  %198 = vst [vmem:[#allocation5 + $0x10] sm:$0x3] %v4520_v46  ;;  %199 = vst [vmem:[#allocation6] sm:$0xff] %v4520_v46 }
  0x29   : > { %3763 = vmatpush3.bf16.msra.mxu0 %v4292_v6  ;;  %v4311_v43 = vld [vmem:[#allocation9 + $0xf8] sm:$0xff]   ;;  %200 = vst [vmem:[#allocation6 + $0x8] sm:$0x3] %v4520_v46  ;;  %201 = vst [vmem:[#allocation7] sm:$0xff] %v4520_v46  ;;  %v4314_v47 = vld [vmem:[#allocation9 + $0x128] sm:$0xff]  }
  0x2a   : > { %3783 = vmatpush3.bf16.msra.mxu1 %v4293_v7  ;;  %3764 = vmatprep.subr.bf16.mxu0 %v4294_v8  ;;  %202 = vst [vmem:[#allocation7 + $0x8] sm:$0x3] %v4520_v46  ;;  %203 = vst [vmem:[#allocation8] sm:$0xff] %v4520_v46  ;;  %v4316_v48 = vld [vmem:[#allocation9 + $0x120] sm:$0xff]   ;;  %v4318_v49 = vld [vmem:[#allocation9 + $0x118] sm:$0xff]  }
  0x2b   : > { %3784 = vmatprep.subr.bf16.mxu1 %v4295_v9  ;;  %204 = vst [vmem:[#allocation8 + $0x8] sm:$0x3] %v4520_v46  ;;  %v4315_v50 = vld [vmem:[#allocation9 + $0xe8] sm:$0xff]   ;;  %v4320_v51 = vld [vmem:[#allocation9 + $0x110] sm:$0xff]   ;;  %v4317_v52 = vld [vmem:[#allocation9 + $0xe0] sm:$0xff]  }
  0x2c   : > { %v4322_v53 = vld [vmem:[#allocation9 + $0x108] sm:$0xff]   ;;  %v4319_v54 = vld [vmem:[#allocation9 + $0xd8] sm:$0xff]   ;;  %v4324_v55 = vld [vmem:[#allocation9 + $0x100] sm:$0xff]  }
  0x2d   : > { %3765 = vmatpush3.bf16.msra.mxu0 %v4294_v8  ;;  %v4321_v56 = vld [vmem:[#allocation9 + $0xd0] sm:$0xff]   ;;  %v4323_v57 = vld [vmem:[#allocation9 + $0xc8] sm:$0xff]   ;;  %v4326_v58 = vld [vmem:[#allocation9 + $0x178] sm:$0xff]  }
  0x2e   : > { %3785 = vmatpush3.bf16.msra.mxu1 %v4295_v9  ;;  %3766 = vmatprep.subr.bf16.mxu0 %v4296_v10  ;;  %v4325_v59 = vld [vmem:[#allocation9 + $0xc0] sm:$0xff]  }
  0x2f   : > { %3786 = vmatprep.subr.bf16.mxu1 %v4297_v14  ;;  %v3337_v5 = vld [vmem:[%s4857_s2] ss:$0 sm:$0xff] }
  0x31   : > { %3767 = vmatpush3.bf16.msra.mxu0 %v4296_v10 }
  0x32   : > { %3787 = vmatpush3.bf16.msra.mxu1 %v4297_v14  ;;  %3768 = vmatprep.subr.bf16.mxu0 %v4298_v18 }
  0x33   : > { %3788 = vmatprep.subr.bf16.mxu1 %v4299_v19 }
  0x35   : > { %3769 = vmatpush3.bf16.msra.mxu0 %v4298_v18 }
  0x36   : > { %3789 = vmatpush3.bf16.msra.mxu1 %v4299_v19  ;;  %3770 = vmatprep.subr.bf16.mxu0 %v4300_v20 }
  0x37   : > { %3790 = vmatprep.subr.bf16.mxu1 %v4301_v21 }
  0x39   : > { %3771 = vmatpush3.bf16.msra.mxu0 %v4300_v20 }
  0x3a   : > { %3791 = vmatpush3.bf16.msra.mxu1 %v4301_v21  ;;  %3796 = vmatprep.subr.bf16.mxu0 %v4302_v26 }
  0x3b   : > { %3816 = vmatprep.subr.bf16.mxu1 %v4310_v42 }
  0x3c   : > { %3773 = vmatmul.mubr.bf16.vlgmr.msra.gmra.mxu0 %v232_v29 }
  0x3d   : > { %3793 = vmatmul.mubr.bf16.vlgmr.msra.gmra.mxu1 %v210_v31  ;;  %3797 = vmatpush3.bf16.msra.mxu0 %v4302_v26  ;;  %v4327_v31 = vld [vmem:[#allocation9 + $0x170] sm:$0xff]  }
  0x3e   : > { %3798 = vmatprep.subr.bf16.mxu0 %v4303_v30  ;;  %3812 = vmatprep.mubr.bf16.mxu0 %v448_v32  ;;  %v4328_v32 = vld [vmem:[#allocation9 + $0x168] sm:$0xff]  }
  0x3f   : > { %3817 = vmatpush3.bf16.msra.mxu1 %v4310_v42  ;;  %v4329_v42 = vld [vmem:[#allocation9 + $0x160] sm:$0xff]  }
  0x40   : > { %3818 = vmatprep.subr.bf16.mxu1 %v4312_v44 }
  0x41   : > { %3799 = vmatpush3.bf16.msra.mxu0 %v4303_v30 }
  0x42   : > { %3800 = vmatprep.subr.bf16.mxu0 %v4304_v33 }
  0x43   : > { %3819 = vmatpush3.bf16.msra.mxu1 %v4312_v44  ;;  %v4331_v44 = vld [vmem:[#allocation9 + $0x150] sm:$0xff]  }
  0x44   : > { %3820 = vmatprep.subr.bf16.mxu1 %v4314_v47 }
  0x45   : > { %3801 = vmatpush3.bf16.msra.mxu0 %v4304_v33 }
  0x46   : > { %3802 = vmatprep.subr.bf16.mxu0 %v4305_v34 }
  0x47   : > { %3821 = vmatpush3.bf16.msra.mxu1 %v4314_v47  ;;  %v4333_v47 = vld [vmem:[#allocation9 + $0x140] sm:$0xff]  }
  0x48   : > { %3822 = vmatprep.subr.bf16.mxu1 %v4316_v48 }
  0x49   : > { %3803 = vmatpush3.bf16.msra.mxu0 %v4305_v34 }
  0x4a   : > { %3804 = vmatprep.subr.bf16.mxu0 %v4306_v35 }
  0x4b   : > { %3823 = vmatpush3.bf16.msra.mxu1 %v4316_v48 }
  0x4c   : > { %3824 = vmatprep.subr.bf16.mxu1 %v4318_v49 }
  0x4d   : > { %3805 = vmatpush3.bf16.msra.mxu0 %v4306_v35 }
  0x4e   : > { %3806 = vmatprep.subr.bf16.mxu0 %v4307_v36 }
  0x4f   : > { %3825 = vmatpush3.bf16.msra.mxu1 %v4318_v49 }
  0x50   : > { %3826 = vmatprep.subr.bf16.mxu1 %v4320_v51 }
  0x51   : > { %3807 = vmatpush3.bf16.msra.mxu0 %v4307_v36 }
  0x52   : > { %3808 = vmatprep.subr.bf16.mxu0 %v4308_v37 }
  0x53   : > { %3827 = vmatpush3.bf16.msra.mxu1 %v4320_v51  ;;  %v4334_v51 = vld [vmem:[#allocation9 + $0x1f8] sm:$0xff]  }
  0x54   : > { %3828 = vmatprep.subr.bf16.mxu1 %v4322_v53 }
  0x55   : > { %3809 = vmatpush3.bf16.msra.mxu0 %v4308_v37 }
  0x56   : > { %3810 = vmatprep.subr.bf16.mxu0 %v4309_v38 }
  0x57   : > { %3829 = vmatpush3.bf16.msra.mxu1 %v4322_v53  ;;  %v4338_v53 = vld [vmem:[#allocation9 + $0x1e8] sm:$0xff]  }
  0x58   : > { %3830 = vmatprep.subr.bf16.mxu1 %v4324_v55 }
  0x59   : > { %3811 = vmatpush3.bf16.msra.mxu0 %v4309_v38 }
  0x5a   : > { %3836 = vmatprep.subr.bf16.mxu0 %v4311_v43 }
  0x5b   : > { %3831 = vmatpush3.bf16.msra.mxu1 %v4324_v55  ;;  %v4342_v55 = vld [vmem:[#allocation9 + $0x1d8] sm:$0xff]  }
  0x5c   : > { %3813 = vmatmul.mubr.bf16.vlgmr.msra.gmra.mxu0 %v449_v41  ;;  %3856 = vmatprep.subr.bf16.mxu1 %v4326_v58 }
  0x5d   : > { %3837 = vmatpush3.bf16.msra.mxu0 %v4311_v43  ;;  %v4330_v43 = vld [vmem:[#allocation9 + $0x158] sm:$0xff]  }
  0x5e   : > { %3838 = vmatprep.subr.bf16.mxu0 %v4313_v45 }
  0x61   : > { %3839 = vmatpush3.bf16.msra.mxu0 %v4313_v45  ;;  %v4332_v45 = vld [vmem:[#allocation9 + $0x148] sm:$0xff]  }
  0x62   : > { %3840 = vmatprep.subr.bf16.mxu0 %v4315_v50 }
  0x65   : > { %3841 = vmatpush3.bf16.msra.mxu0 %v4315_v50 }
  0x66   : > { %3842 = vmatprep.subr.bf16.mxu0 %v4317_v52 }
  0x69   : > { %3843 = vmatpush3.bf16.msra.mxu0 %v4317_v52  ;;  %v4336_v52 = vld [vmem:[#allocation9 + $0x1f0] sm:$0xff]  }
  0x6a   : > { %3844 = vmatprep.subr.bf16.mxu0 %v4319_v54 }
  0x6d   : > { %3845 = vmatpush3.bf16.msra.mxu0 %v4319_v54  ;;  %v4340_v54 = vld [vmem:[#allocation9 + $0x1e0] sm:$0xff]  }
  0x6e   : > { %3846 = vmatprep.subr.bf16.mxu0 %v4321_v56 }
  0x71   : > { %3847 = vmatpush3.bf16.msra.mxu0 %v4321_v56 }
  0x72   : > { %3848 = vmatprep.subr.bf16.mxu0 %v4323_v57 }
  0x75   : > { %3849 = vmatpush3.bf16.msra.mxu0 %v4323_v57 }
  0x76   : > { %3850 = vmatprep.subr.bf16.mxu0 %v4325_v59 }
  0x79   : > { %3851 = vmatpush3.bf16.msra.mxu0 %v4325_v59 }
  0x7a   : > { %3876 = vmatprep.subr.bf16.mxu0 %v4520_v46 }
  0xfc   : > { %v3774_v60 = vpop.f32.mrf.mxu0 }
  0xfd   : > { %v3794_v62 = vpop.f32.mrf.mxu1 }
  0xfe   : > { %v332_v61 = vpop.f32.mrf.mxu0  ;;  %v438_v2 = vadd.f32 %v3794_v62, %v3774_v60 }
  0xff   : > { %v429_v0 = vpop.f32.mrf.mxu1 }
 0x100   : > { %v3775_v63 = vpop.f32.mrf.mxu0  ;;  %v430_v6 = vadd.f32 %v429_v0, %v332_v61  ;;  %v1007_v0 = vlaneseq }
 0x101   : > { %v3795_v3 = vpop.f32.mrf.mxu1 }
 0x102   : > { %v335_v1 = vpop.f32.mrf.mxu0  ;;  %v441_v9 = vadd.f32 %v3795_v3, %v3775_v63 }
 0x103   : > { %v432_v10 = vpop.f32.mrf.mxu1 }
 0x104   : > { %v433_v17 = vadd.f32 %v432_v10, %v335_v1  ;;  %v1008_v10 = vshrl.u32 %v1007_v0, 7 }
 0x11c   : > { %v3814_v4 = vpop.f32.mrf.mxu0 }
 0x11d   : > { %v566_v7 = vadd.f32 %v3814_v4, %v438_v2  ;;  %v3363_v2 = vld [vmem:[%s4857_s2 + $0x1] ss:$0 sm:$0xff] }
 0x11e   : > { %v549_v8 = vpop.f32.mrf.mxu0 }
 0x11f   : > { %v577_v11 = vadd.f32 %v3337_v5, %v566_v7  ;;  %v564_v12 = vadd.f32 %v549_v8, %v430_v6 }
 0x120   : > { %v3815_v13 = vpop.f32.mrf.mxu0 }
 0x121   : > { %vm581_vm0 = vcmp.ge.f32.partialorder %v577_v11, 0.0  ;;  %v585_v14 = vmul.f32 0.1, %v577_v11  ;;  %v575_v15 = vadd.f32 %v3337_v5, %v564_v12  ;;  %v567_v16 = vadd.f32 %v3815_v13, %v441_v9 }
 0x122   : > { %v552_v18 = vpop.f32.mrf.mxu0 }
 0x123   : > { %v589_v19 = vsel %vm581_vm0, %v577_v11, %v585_v14  ;;  %vm579_vm1 = vcmp.ge.f32.partialorder %v575_v15, 0.0  ;;  %v583_v20 = vmul.f32 0.1, %v575_v15  ;;  %v578_v21 = vadd.f32 %v3337_v5, %v567_v16 }
 0x124   : > { %593 = vst [vmem:[#allocation2 + $0x11] sm:$0xff] %v589_v19  ;;  %v565_v22 = vadd.f32 %v552_v18, %v433_v17 }
 0x125   : > { %v587_v23 = vsel %vm579_vm1, %v575_v15, %v583_v20  ;;  %vm582_vm2 = vcmp.ge.f32.partialorder %v578_v21, 0.0  ;;  %v586_v24 = vmul.f32 0.1, %v578_v21 }
 0x126   : > { %591 = vst [vmem:[#allocation2 + $0x1] sm:$0xff] %v587_v23  ;;  %v576_v25 = vadd.f32 %v3337_v5, %v565_v22 }
 0x127   : > { %v590_v26 = vsel %vm582_vm2, %v578_v21, %v586_v24 }
 0x128   : > { %594 = vst [vmem:[#allocation2 + $0x19] sm:$0xff] %v590_v26  ;;  %vm580_vm3 = vcmp.ge.f32.partialorder %v576_v25, 0.0  ;;  %v584_v27 = vmul.f32 0.1, %v576_v25  ;;  %v623_v30 = vpack.c.bf16 %v590_v26, %v589_v19  ;;  %v1009_v19 = vadd.s32 8, %v1008_v10 }
 0x12a   : > { %v588_v28 = vsel %vm580_vm3, %v576_v25, %v584_v27  ;;  %v1011_v25 = vand.u32 127, %v1007_v0  ;;  %vm2130_vm3 = vcmask 130048  }
 0x12b   : > { %592 = vst [vmem:[#allocation2 + $0x9] sm:$0xff] %v588_v28  ;;  %v622_v29 = vpack.c.bf16 %v588_v28, %v587_v23  ;;  %v1012_v28 = vmul.u32 2, %v1008_v10  ;;  %v4356_v10 = vld [vmem:[#allocation9 + $0x208] sm:$0xff]  }
 0x12d   : > { %3832 = vmatprep.mubr.bf16.mxu1 %v622_v29  ;;  %v595_v33 = vld [vmem:[#allocation2] sm:$0xff]  ;;  %v1013_v29 = vmul.u32 2, %v1009_v19  ;;  %vm1014_vm10 = vcmp.eq.s32.totalorder %v1011_v25, %v1012_v28  ;;  %v4362_v19 = vld [vmem:[#allocation9 + $0x2a8] sm:$0xff]   ;;  %v4369_v28 = vld [vmem:[#allocation9 + $0x250] sm:$0xff]  }
 0x12e   : > { %3833 = vmatmul.mubr.bf16.vlgmr.msra.gmra.mxu1 %v623_v30 }
 0x12f   : > { %3857 = vmatpush3.bf16.msra.mxu1 %v4326_v58  ;;  %v598_v34 = vld [vmem:[#allocation2 + $0x18] sm:$0xff]  ;;  %vm1015_vm11 = vcmp.eq.s32.totalorder %v1011_v25, %v1013_v29  ;;  %v4370_v25 = vld [vmem:[#allocation9 + $0x288] sm:$0xff]  }
 0x130   : > { %3858 = vmatprep.subr.bf16.mxu1 %v4327_v31  ;;  %v837_v48 = vld [vmem:[#allocation2 + $0x12] sm:$0xff]  ;;  %v838_v49 = vld [vmem:[#allocation2 + $0x1a] sm:$0xff]  ;;  %v4371_v29 = vld [vmem:[#allocation9 + $0x248] sm:$0xff]  }
 0x131   : > { %v840_v50 = vpack.c.bf16 %v838_v49, %v837_v48  ;;  %v4335_v49 = vld [vmem:[#allocation9 + $0x1b8] sm:$0xff]  }
 0x132   : > { %v596_v35 = vld [vmem:[#allocation2 + $0x8] sm:$0xff]  ;;  %v597_v36 = vld [vmem:[#allocation2 + $0x10] sm:$0xff] }
 0x133   : > { %v835_v37 = vld [vmem:[#allocation2 + $0x2] sm:$0xff]  ;;  %v599_v38 = vpack.c.bf16 %v596_v35, %v595_v33  ;;  %v600_v39 = vpack.c.bf16 %v598_v34, %v597_v36  ;;  %v836_v40 = vld [vmem:[#allocation2 + $0xa] sm:$0xff]  ;;  %3859 = vmatpush3.bf16.msra.mxu1 %v4327_v31 }
 0x134   : > { %v839_v41 = vpack.c.bf16 %v836_v40, %v835_v37  ;;  %3860 = vmatprep.subr.bf16.mxu1 %v4328_v32 }
 0x135   : > { %3852 = vmatprep.mubr.bf16.mxu0 %v599_v38 }
 0x136   : > { %3853 = vmatmul.mubr.bf16.vlgmr.msra.gmra.mxu0 %v600_v39  ;;  %3872 = vmatprep.mubr.bf16.mxu1 %v839_v41 }
 0x137   : > { %3861 = vmatpush3.bf16.msra.mxu1 %v4328_v32  ;;  %3880 = vmatprep.mubr.msk.bf16.mxu0 %vm4521_vm4, %v4520_v46 }
 0x138   : > { %3862 = vmatprep.subr.bf16.mxu1 %v4329_v42 }
 0x13b   : > { %3863 = vmatpush3.bf16.msra.mxu1 %v4329_v42 }
 0x13c   : > { %3864 = vmatprep.subr.bf16.mxu1 %v4330_v43 }
 0x13f   : > { %3865 = vmatpush3.bf16.msra.mxu1 %v4330_v43 }
 0x140   : > { %3866 = vmatprep.subr.bf16.mxu1 %v4331_v44 }
 0x143   : > { %3867 = vmatpush3.bf16.msra.mxu1 %v4331_v44  ;;  %v4635_v44 = vsel %vm1014_vm10, 1.0, %v4520_v46 }
 0x144   : > { %3868 = vmatprep.subr.bf16.mxu1 %v4332_v45 }
 0x147   : > { %3869 = vmatpush3.bf16.msra.mxu1 %v4332_v45  ;;  %v3365_v45 = vsel %vm1015_vm11, 1.0, %v4520_v46 }
 0x148   : > { %3870 = vmatprep.subr.bf16.mxu1 %v4333_v47  ;;  %v1020_v48 = vpack.c.bf16 %v3365_v45, %v4635_v44 }
 0x14b   : > { %3871 = vmatpush3.bf16.msra.mxu1 %v4333_v47 }
 0x14c   : > { %3884 = vmatprep.subr.bf16.mxu1 %v4520_v46 }
 0x14e   : > { %3873 = vmatmul.mubr.bf16.vlgmr.msra.gmra.mxu1 %v840_v50  ;;  %v4337_v50 = vld [vmem:[#allocation9 + $0x1b0] sm:$0xff]  }
 0x14f   : > { %3900 = vmatprep.mubr.msk.bf16.mxu1 %vm4521_vm4, %v4520_v46  ;;  %3885 = vmatpush3.bf16.msra.mxu1 %v4334_v51  ;;  %v4339_v51 = vld [vmem:[#allocation9 + $0x1a8] sm:$0xff]  }
 0x150   : > { %3886 = vmatprep.subr.bf16.mxu1 %v4520_v46 }
 0x153   : > { %3887 = vmatpush3.bf16.msra.mxu1 %v4336_v52  ;;  %v4341_v52 = vld [vmem:[#allocation9 + $0x1a0] sm:$0xff]  }
 0x154   : > { %3888 = vmatprep.subr.bf16.mxu1 %v4520_v46 }
 0x157   : > { %3889 = vmatpush3.bf16.msra.mxu1 %v4338_v53  ;;  %v4344_v53 = vld [vmem:[#allocation9 + $0x1d0] sm:$0xff]  }
 0x158   : > { %3890 = vmatprep.subr.bf16.mxu1 %v4520_v46 }
 0x15b   : > { %3891 = vmatpush3.bf16.msra.mxu1 %v4340_v54  ;;  %v4346_v54 = vld [vmem:[#allocation9 + $0x1c8] sm:$0xff]  }
 0x15c   : > { %3892 = vmatprep.subr.bf16.mxu1 %v4520_v46 }
 0x15f   : > { %3893 = vmatpush3.bf16.msra.mxu1 %v4342_v55  ;;  %v4343_v55 = vld [vmem:[#allocation9 + $0x198] sm:$0xff]  }
 0x160   : > { %3894 = vmatprep.subr.bf16.mxu1 %v4520_v46 }
 0x163   : > { %3895 = vmatpush3.bf16.msra.mxu1 %v4344_v53 }
 0x164   : > { %3896 = vmatprep.subr.bf16.mxu1 %v4520_v46 }
 0x167   : > { %3897 = vmatpush3.bf16.msra.mxu1 %v4346_v54 }
 0x168   : > { %3898 = vmatprep.subr.bf16.mxu1 %v4520_v46 }
 0x1ee   : > { %v3834_v56 = vpop.f32.mrf.mxu1 }
 0x1f0   : > { %v723_v57 = vpop.f32.mrf.mxu1 }
 0x1f2   : > { %v3835_v59 = vpop.f32.mrf.mxu1 }
 0x1f4   : > { %v726_v61 = vpop.f32.mrf.mxu1 }
 0x1f6   : > { %v3854_v58 = vpop.f32.mrf.mxu0 }
 0x1f7   : > { %v829_v62 = vadd.f32 %v3854_v58, %v3834_v56  ;;  %v4348_v56 = vld [vmem:[#allocation9 + $0x1c0] sm:$0xff]   ;;  %v4347_v58 = vld [vmem:[#allocation9 + $0x188] sm:$0xff]  }
 0x1f8   : > { %v820_v60 = vpop.f32.mrf.mxu0  ;;  %3899 = vmatpush3.bf16.msra.mxu1 %v4348_v56  ;;  %v4374_v56 = vld [vmem:[#allocation9 + $0x2f8] sm:$0xff]  }
 0x1f9   : > { %v821_v3 = vadd.f32 %v820_v60, %v723_v57  ;;  %v4345_v57 = vld [vmem:[#allocation9 + $0x190] sm:$0xff]   ;;  %3924 = vmatprep.subr.bf16.mxu1 %v4520_v46 }
 0x1fa   : > { %v3855_v63 = vpop.f32.mrf.mxu0 }
 0x1fb   : > { %v832_v6 = vadd.f32 %v3855_v63, %v3835_v59  ;;  %v4349_v59 = vld [vmem:[#allocation9 + $0x180] sm:$0xff]   ;;  %v4350_v63 = vld [vmem:[#allocation9 + $0x238] sm:$0xff]  }
 0x1fc   : > { %v823_v7 = vpop.f32.mrf.mxu0 }
 0x1fd   : > { %v824_v15 = vadd.f32 %v823_v7, %v726_v61  ;;  %v4353_v7 = vld [vmem:[#allocation9 + $0x220] sm:$0xff]  }
 0x20e   : > { %v3874_v1 = vpop.f32.mrf.mxu1 }
 0x20f   : > { %v957_v4 = vadd.f32 %v3874_v1, %v829_v62 }
 0x210   : > { %v940_v5 = vpop.f32.mrf.mxu1 }
 0x211   : > { %v969_v8 = vadd.f32 %v3363_v2, %v957_v4  ;;  %v955_v9 = vadd.f32 %v940_v5, %v821_v3  ;;  %v4352_v5 = vld [vmem:[#allocation9 + $0x228] sm:$0xff]  }
 0x212   : > { %v3875_v11 = vpop.f32.mrf.mxu1 }
 0x213   : > { %vm973_vm5 = vcmp.ge.f32.partialorder %v969_v8, 0.0  ;;  %v977_v12 = vmul.f32 0.1, %v969_v8  ;;  %v967_v13 = vadd.f32 %v3363_v2, %v955_v9  ;;  %v958_v14 = vadd.f32 %v3875_v11, %v832_v6  ;;  %v4355_v9 = vld [vmem:[#allocation9 + $0x210] sm:$0xff]   ;;  %v4357_v11 = vld [vmem:[#allocation9 + $0x200] sm:$0xff]  }
 0x214   : > { %v943_v16 = vpop.f32.mrf.mxu1 }
 0x215   : > { %vm971_vm6 = vcmp.ge.f32.partialorder %v967_v13, 0.0  ;;  %v975_v17 = vmul.f32 0.1, %v967_v13  ;;  %v970_v18 = vadd.f32 %v3363_v2, %v958_v14  ;;  %v981_v20 = vsel %vm973_vm5, %v969_v8, %v977_v12  ;;  %v4354_v8 = vld [vmem:[#allocation9 + $0x218] sm:$0xff]  }
 0x216   : > { %v956_v21 = vadd.f32 %v943_v16, %v824_v15  ;;  %v991_v26 = vrot.slane %v981_v20, 1  ;;  %v4358_v15 = vld [vmem:[#allocation9 + $0x2b8] sm:$0xff]  }
 0x217   : > { %v979_v22 = vsel %vm971_vm6, %v967_v13, %v975_v17  ;;  %vm974_vm7 = vcmp.ge.f32.partialorder %v970_v18, 0.0  ;;  %v978_v23 = vmul.f32 0.1, %v970_v18  ;;  %v4359_v16 = vld [vmem:[#allocation9 + $0x278] sm:$0xff]   ;;  %v4360_v17 = vld [vmem:[#allocation9 + $0x2b0] sm:$0xff]  }
 0x218   : > { %v968_v24 = vadd.f32 %v3363_v2, %v956_v21  ;;  %v988_v30 = vrot.slane %v979_v22, 1  ;;  %v4351_v2 = vld [vmem:[#allocation9 + $0x230] sm:$0xff]   ;;  %v4364_v21 = vld [vmem:[#allocation9 + $0x2a0] sm:$0xff]  }
 0x219   : > { %v982_v27 = vsel %vm974_vm7, %v970_v18, %v978_v23  ;;  %v4361_v18 = vld [vmem:[#allocation9 + $0x270] sm:$0xff]   ;;  %vm3193_vm7 = vcmask 1043456  }
 0x21a   : > { %v993_v31 = vrot.slane %v982_v27, 1  ;;  %vm972_vm9 = vcmp.ge.f32.partialorder %v968_v24, 0.0  ;;  %v976_v32 = vmul.f32 0.1, %v968_v24  ;;  %v4368_v23 = vld [vmem:[#allocation9 + $0x290] sm:$0xff]  }
 0x21c   : > { %v1000_v33 = vsel %vm987_vm8, %v993_v31, %v988_v30  ;;  %v980_v34 = vsel %vm972_vm9, %v968_v24, %v976_v32  ;;  %v994_v35 = vsel %vm987_vm8, %v991_v26, %v993_v31  ;;  %v4365_v24 = vld [vmem:[#allocation9 + $0x260] sm:$0xff]  }
 0x21d   : > { %v1004_v36 = vmax.f32 %v982_v27, %v1000_v33  ;;  %v989_v37 = vrot.slane %v980_v34, 1  ;;  %v1003_v38 = vmax.f32 %v981_v20, %v994_v35  ;;  %v4363_v20 = vld [vmem:[#allocation9 + $0x268] sm:$0xff]   ;;  %v4372_v27 = vld [vmem:[#allocation9 + $0x280] sm:$0xff]  }
 0x21f   : > { %v992_v39 = vsel %vm987_vm8, %v989_v37, %v991_v26  ;;  %v1006_v40 = vpack.c.bf16 %v1004_v36, %v1003_v38  ;;  %v990_v41 = vsel %vm987_vm8, %v988_v30, %v989_v37  ;;  %v4367_v26 = vld [vmem:[#allocation9 + $0x258] sm:$0xff]   ;;  %v4373_v30 = vld [vmem:[#allocation9 + $0x240] sm:$0xff]  }
 0x220   : > { %v1002_v42 = vmax.f32 %v980_v34, %v992_v39  ;;  %v1001_v43 = vmax.f32 %v979_v22, %v990_v41  ;;  %v4366_v22 = vld [vmem:[#allocation9 + $0x298] sm:$0xff]   ;;  %v3392_v41 = vld [vmem:[%s4857_s2 + $0x2] ss:$0 sm:$0xff] }
 0x221   : > { %3877 = vmatpush3.bf16.msra.mxu0 %v1006_v40 }
 0x222   : > { %3878 = vmatprep.subr.bf16.mxu0 %v4520_v46  ;;  %v1005_v47 = vpack.c.bf16 %v1002_v42, %v1001_v43 }
 0x225   : > { %3879 = vmatpush3.bf16.msra.mxu0 %v1005_v47 }
 0x226   : > { %3904 = vmatprep.subr.bf16.mxu0 %v4520_v46 }
 0x228   : > { %3881 = vmatmul.mubr.msk.bf16.vlgmr.msra.gmra.mxu0 %vm1021_vm12, %v1020_v48 }
 0x229   : > { %3905 = vmatpush3.bf16.msra.mxu0 %v4335_v49  ;;  %3920 = vmatprep.mubr.msk.bf16.mxu0 %vm4521_vm4, %v4520_v46 }
 0x22a   : > { %3906 = vmatprep.subr.bf16.mxu0 %v4520_v46 }
 0x22d   : > { %3907 = vmatpush3.bf16.msra.mxu0 %v4337_v50 }
 0x22e   : > { %3908 = vmatprep.subr.bf16.mxu0 %v4520_v46 }
 0x231   : > { %3909 = vmatpush3.bf16.msra.mxu0 %v4339_v51 }
 0x232   : > { %3910 = vmatprep.subr.bf16.mxu0 %v4520_v46 }
 0x235   : > { %3911 = vmatpush3.bf16.msra.mxu0 %v4341_v52 }
 0x236   : > { %3912 = vmatprep.subr.bf16.mxu0 %v4520_v46 }
 0x239   : > { %3913 = vmatpush3.bf16.msra.mxu0 %v4343_v55 }
 0x23a   : > { %3914 = vmatprep.subr.bf16.mxu0 %v4520_v46 }
 0x23d   : > { %3915 = vmatpush3.bf16.msra.mxu0 %v4345_v57 }
 0x23e   : > { %3916 = vmatprep.subr.bf16.mxu0 %v4520_v46 }
 0x241   : > { %3917 = vmatpush3.bf16.msra.mxu0 %v4347_v58  ;;  %v4375_v58 = vld [vmem:[#allocation9 + $0x2f0] sm:$0xff]  }
 0x242   : > { %3918 = vmatprep.subr.bf16.mxu0 %v4520_v46 }
 0x245   : > { %3919 = vmatpush3.bf16.msra.mxu0 %v4349_v59 }
 0x246   : > { %3944 = vmatprep.subr.bf16.mxu0 %v4520_v46 }
 0x2e8   : > { %v1059_v60 = vpop.f32.mrf.mxu0 }
 0x2e9   : > { %1066 = vst [vmem:[#allocation3 + $0x1] sm:$0xff] %v1059_v60 }
 0x2ea   : > { %v3882_v61 = vpop.f32.mrf.mxu0 }
 0x2eb   : > { %v4376_v61 = vld [vmem:[#allocation9 + $0x2e8] sm:$0xff]  }
 0x2ec   : > { %v1062_v62 = vpop.f32.mrf.mxu0 }
 0x2ed   : > { %1067 = vst [vmem:[#allocation3 + $0x9] sm:$0xff] %v1062_v62  ;;  %v1090_v0 = vpack.c.bf16 %v1062_v62, %v1059_v60 }
 0x2ee   : > { %v3883_v1 = vpop.f32.mrf.mxu0 }
 0x2ef   : > { %3901 = vmatmul.mubr.bf16.vlgmr.msra.gmra.mxu1 %v1090_v0  ;;  %v4378_v0 = vld [vmem:[#allocation9 + $0x2d8] sm:$0xff]   ;;  %v4379_v1 = vld [vmem:[#allocation9 + $0x2d0] sm:$0xff]  }
 0x2f0   : > { %3925 = vmatpush3.bf16.msra.mxu1 %v4350_v63  ;;  %3940 = vmatprep.mubr.msk.bf16.mxu1 %vm4521_vm4, %v4520_v46  ;;  %v1068_v3 = vld [vmem:[#allocation3] sm:$0xff]  ;;  %v4377_v63 = vld [vmem:[#allocation9 + $0x2e0] sm:$0xff]  }
 0x2f1   : > { %3926 = vmatprep.subr.bf16.mxu1 %v4520_v46 }
 0x2f4   : > { %v1069_v4 = vld [vmem:[#allocation3 + $0x8] sm:$0xff]  ;;  %3927 = vmatpush3.bf16.msra.mxu1 %v4351_v2  ;;  %v4380_v2 = vld [vmem:[#allocation9 + $0x2c8] sm:$0xff]  }
 0x2f5   : > { %v1070_v6 = vpack.c.bf16 %v1069_v4, %v1068_v3  ;;  %3928 = vmatprep.subr.bf16.mxu1 %v4520_v46  ;;  %v1286_v12 = vld [vmem:[#allocation3 + $0x2] sm:$0xff]  ;;  %v1287_v13 = vld [vmem:[#allocation3 + $0xa] sm:$0xff]  ;;  %v4381_v3 = vld [vmem:[#allocation9 + $0x2c0] sm:$0xff]  }
 0x2f6   : > { %v1288_v14 = vpack.c.bf16 %v1287_v13, %v1286_v12  ;;  %v4387_v12 = vld [vmem:[#allocation9 + $0x328] sm:$0xff]   ;;  %v4388_v13 = vld [vmem:[#allocation9 + $0x360] sm:$0xff]  }
 0x2f7   : > { %3921 = vmatmul.mubr.bf16.vlgmr.msra.gmra.mxu0 %v1070_v6 }
 0x2f8   : > { %3929 = vmatpush3.bf16.msra.mxu1 %v4352_v5  ;;  %3960 = vmatprep.mubr.msk.bf16.mxu0 %vm4521_vm4, %v4520_v46 }
 0x2f9   : > { %3930 = vmatprep.subr.bf16.mxu1 %v4520_v46  ;;  %3945 = vmatpush3.bf16.msra.mxu0 %v4358_v15  ;;  %v4392_v15 = vld [vmem:[#allocation9 + $0x350] sm:$0xff]  }
 0x2fa   : > { %3946 = vmatprep.subr.bf16.mxu0 %v4520_v46 }
 0x2fc   : > { %3931 = vmatpush3.bf16.msra.mxu1 %v4353_v7  ;;  %v4698_v7 = vld [vmem:[#allocation5] sm:$0xff] }
 0x2fd   : > { %3932 = vmatprep.subr.bf16.mxu1 %v4520_v46  ;;  %3947 = vmatpush3.bf16.msra.mxu0 %v4360_v17  ;;  %v4394_v17 = vld [vmem:[#allocation9 + $0x348] sm:$0xff]  }
 0x2fe   : > { %3948 = vmatprep.subr.bf16.mxu0 %v4520_v46 }
 0x300   : > { %3933 = vmatpush3.bf16.msra.mxu1 %v4354_v8  ;;  %v4382_v8 = vld [vmem:[#allocation9 + $0x378] sm:$0xff]  }
 0x301   : > { %3934 = vmatprep.subr.bf16.mxu1 %v4520_v46  ;;  %3949 = vmatpush3.bf16.msra.mxu0 %v4362_v19  ;;  %v4396_v19 = vld [vmem:[#allocation9 + $0x340] sm:$0xff]  }
 0x302   : > { %3950 = vmatprep.subr.bf16.mxu0 %v4520_v46 }
 0x304   : > { %3935 = vmatpush3.bf16.msra.mxu1 %v4355_v9  ;;  %v4383_v9 = vld [vmem:[#allocation9 + $0x338] sm:$0xff]  }
 0x305   : > { %3936 = vmatprep.subr.bf16.mxu1 %v4520_v46  ;;  %3951 = vmatpush3.bf16.msra.mxu0 %v4364_v21  ;;  %v4395_v21 = vld [vmem:[#allocation9 + $0x308] sm:$0xff]  }
 0x306   : > { %3952 = vmatprep.subr.bf16.mxu0 %v4520_v46 }
 0x308   : > { %3937 = vmatpush3.bf16.msra.mxu1 %v4356_v10  ;;  %v4384_v10 = vld [vmem:[#allocation9 + $0x370] sm:$0xff]  }
 0x309   : > { %3938 = vmatprep.subr.bf16.mxu1 %v4520_v46  ;;  %3953 = vmatpush3.bf16.msra.mxu0 %v4366_v22  ;;  %v4397_v22 = vld [vmem:[#allocation9 + $0x300] sm:$0xff]  }
 0x30a   : > { %3954 = vmatprep.subr.bf16.mxu0 %v4520_v46 }
 0x30c   : > { %3939 = vmatpush3.bf16.msra.mxu1 %v4357_v11  ;;  %v4386_v11 = vld [vmem:[#allocation9 + $0x368] sm:$0xff]  }
 0x30d   : > { %3964 = vmatprep.subr.bf16.mxu1 %v4520_v46  ;;  %3955 = vmatpush3.bf16.msra.mxu0 %v4368_v23 }
 0x30e   : > { %3956 = vmatprep.subr.bf16.mxu0 %v4520_v46 }
 0x30f   : > { %3941 = vmatmul.mubr.bf16.vlgmr.msra.gmra.mxu1 %v1288_v14  ;;  %v4390_v14 = vld [vmem:[#allocation9 + $0x358] sm:$0xff]  }
 0x310   : > { %3980 = vmatprep.mubr.msk.bf16.mxu1 %vm4521_vm4, %v4520_v46  ;;  %3965 = vmatpush3.bf16.msra.mxu1 %v4359_v16  ;;  %v4389_v16 = vld [vmem:[#allocation9 + $0x320] sm:$0xff]  }
 0x311   : > { %3966 = vmatprep.subr.bf16.mxu1 %v4520_v46  ;;  %3957 = vmatpush3.bf16.msra.mxu0 %v4370_v25 }
 0x312   : > { %3958 = vmatprep.subr.bf16.mxu0 %v4520_v46 }
 0x314   : > { %3967 = vmatpush3.bf16.msra.mxu1 %v4361_v18  ;;  %v4391_v18 = vld [vmem:[#allocation9 + $0x318] sm:$0xff]  }
 0x315   : > { %3968 = vmatprep.subr.bf16.mxu1 %v4520_v46  ;;  %3959 = vmatpush3.bf16.msra.mxu0 %v4372_v27 }
 0x316   : > { %3984 = vmatprep.subr.bf16.mxu0 %v4520_v46 }
 0x318   : > { %3969 = vmatpush3.bf16.msra.mxu1 %v4363_v20  ;;  %v4393_v20 = vld [vmem:[#allocation9 + $0x310] sm:$0xff]  }
 0x319   : > { %3970 = vmatprep.subr.bf16.mxu1 %v4520_v46 }
 0x31c   : > { %3971 = vmatpush3.bf16.msra.mxu1 %v4365_v24 }
 0x31d   : > { %3972 = vmatprep.subr.bf16.mxu1 %v4520_v46 }
 0x320   : > { %3973 = vmatpush3.bf16.msra.mxu1 %v4367_v26 }
 0x321   : > { %3974 = vmatprep.subr.bf16.mxu1 %v4520_v46 }
 0x324   : > { %3975 = vmatpush3.bf16.msra.mxu1 %v4369_v28 }
 0x325   : > { %3976 = vmatprep.subr.bf16.mxu1 %v4520_v46 }
 0x328   : > { %3977 = vmatpush3.bf16.msra.mxu1 %v4371_v29 }
 0x329   : > { %3978 = vmatprep.subr.bf16.mxu1 %v4520_v46 }
 0x32c   : > { %3979 = vmatpush3.bf16.msra.mxu1 %v4373_v30 }
 0x32d   : > { %4004 = vmatprep.subr.bf16.mxu1 %v4520_v46 }
 0x3af   : > { %v1190_v31 = vpop.f32.mrf.mxu1 }
 0x3b1   : > { %v3902_v32 = vpop.f32.mrf.mxu1 }
 0x3b3   : > { %v1193_v33 = vpop.f32.mrf.mxu1 }
 0x3b5   : > { %v3903_v34 = vpop.f32.mrf.mxu1 }
 0x3b7   : > { %v1279_v35 = vpop.f32.mrf.mxu0 }
 0x3b8   : > { %v1280_v39 = vadd.f32 %v1279_v35, %v1190_v31 }
 0x3b9   : > { %v3922_v36 = vpop.f32.mrf.mxu0 }
 0x3bb   : > { %v1282_v37 = vpop.f32.mrf.mxu0 }
 0x3bc   : > { %v1283_v45 = vadd.f32 %v1282_v37, %v1193_v33  ;;  %v3418_v33 = vld [vmem:[%s4857_s2 + $0x3] ss:$0 sm:$0xff] }
 0x3bd   : > { %v3923_v38 = vpop.f32.mrf.mxu0 }
 0x3cf   : > { %v1388_v40 = vpop.f32.mrf.mxu1 }
 0x3d0   : > { %v1395_v42 = vadd.f32 %v1388_v40, %v1280_v39 }
 0x3d1   : > { %v3942_v43 = vpop.f32.mrf.mxu1 }
 0x3d2   : > { %v1405_v47 = vadd.f32 %v3392_v41, %v1395_v42 }
 0x3d3   : > { %v1391_v48 = vpop.f32.mrf.mxu1 }
 0x3d4   : > { %vm1407_vm13 = vcmp.ge.f32.partialorder %v1405_v47, 0.0  ;;  %v1409_v49 = vmul.f32 0.1, %v1405_v47  ;;  %v1396_v50 = vadd.f32 %v1391_v48, %v1283_v45  ;;  %v4398_v48 = vld [vmem:[#allocation9 + $0x3b8] sm:$0xff]  }
 0x3d5   : > { %v3943_v51 = vpop.f32.mrf.mxu1 }
 0x3d6   : > { %v1411_v52 = vsel %vm1407_vm13, %v1405_v47, %v1409_v49  ;;  %v1406_v53 = vadd.f32 %v3392_v41, %v1396_v50  ;;  %v4399_v50 = vld [vmem:[#allocation9 + $0x3b0] sm:$0xff]  }
 0x3d7   : > { %1413 = vst [vmem:[#allocation4 + $0x1] sm:$0xff] %v1411_v52 }
 0x3d8   : > { %vm1408_vm14 = vcmp.ge.f32.partialorder %v1406_v53, 0.0  ;;  %v1410_v54 = vmul.f32 0.1, %v1406_v53 }
 0x3da   : > { %v1412_v55 = vsel %vm1408_vm14, %v1406_v53, %v1410_v54  ;;  %v4400_v53 = vld [vmem:[#allocation9 + $0x3a8] sm:$0xff]  }
 0x3db   : > { %1414 = vst [vmem:[#allocation4 + $0x9] sm:$0xff] %v1412_v55  ;;  %v1437_v57 = vpack.c.bf16 %v1412_v55, %v1411_v52  ;;  %v4401_v55 = vld [vmem:[#allocation9 + $0x3a0] sm:$0xff]  }
 0x3dd   : > { %3961 = vmatmul.mubr.bf16.vlgmr.msra.gmra.mxu0 %v1437_v57  ;;  %v4403_v57 = vld [vmem:[#allocation9 + $0x390] sm:$0xff]  }
 0x3de   : > { %3985 = vmatpush3.bf16.msra.mxu0 %v4374_v56  ;;  %4000 = vmatprep.mubr.msk.bf16.mxu0 %vm4521_vm4, %v4520_v46  ;;  %v1415_v59 = vld [vmem:[#allocation4] sm:$0xff]  ;;  %v4402_v56 = vld [vmem:[#allocation9 + $0x398] sm:$0xff]  }
 0x3df   : > { %3986 = vmatprep.subr.bf16.mxu0 %v4520_v46 }
 0x3e2   : > { %v1416_v60 = vld [vmem:[#allocation4 + $0x8] sm:$0xff]  ;;  %3987 = vmatpush3.bf16.msra.mxu0 %v4375_v58 }
 0x3e3   : > { %v1417_v62 = vpack.c.bf16 %v1416_v60, %v1415_v59  ;;  %3988 = vmatprep.subr.bf16.mxu0 %v4520_v46  ;;  %v1633_v4 = vld [vmem:[#allocation4 + $0x2] sm:$0xff]  ;;  %v1634_v5 = vld [vmem:[#allocation4 + $0xa] sm:$0xff] }
 0x3e4   : > { %v1635_v6 = vpack.c.bf16 %v1634_v5, %v1633_v4  ;;  %v4404_v58 = vld [vmem:[#allocation9 + $0x388] sm:$0xff]   ;;  %v4405_v59 = vld [vmem:[#allocation9 + $0x380] sm:$0xff]  }
 0x3e5   : > { %3981 = vmatmul.mubr.bf16.vlgmr.msra.gmra.mxu1 %v1417_v62 }
 0x3e6   : > { %3989 = vmatpush3.bf16.msra.mxu0 %v4376_v61  ;;  %4020 = vmatprep.mubr.msk.bf16.mxu1 %vm4521_vm4, %v4520_v46 }
 0x3e7   : > { %3990 = vmatprep.subr.bf16.mxu0 %v4520_v46  ;;  %4005 = vmatpush3.bf16.msra.mxu1 %v4382_v8 }
 0x3e8   : > { %4006 = vmatprep.subr.bf16.mxu1 %v4698_v7 }
 0x3ea   : > { %3991 = vmatpush3.bf16.msra.mxu0 %v4377_v63 }
 0x3eb   : > { %3992 = vmatprep.subr.bf16.mxu0 %v4520_v46  ;;  %4007 = vmatpush3.bf16.msra.mxu1 %v4384_v10  ;;  %v3444_v10 = vld [vmem:[%s4857_s2 + $0x4] ss:$0 sm:$0xff] }
 0x3ec   : > { %4008 = vmatprep.subr.bf16.mxu1 %v4698_v7 }
 0x3ee   : > { %3993 = vmatpush3.bf16.msra.mxu0 %v4378_v0 }
 0x3ef   : > { %3994 = vmatprep.subr.bf16.mxu0 %v4520_v46  ;;  %4009 = vmatpush3.bf16.msra.mxu1 %v4386_v11 }
 0x3f0   : > { %4010 = vmatprep.subr.bf16.mxu1 %v4698_v7 }
 0x3f2   : > { %3995 = vmatpush3.bf16.msra.mxu0 %v4379_v1 }
 0x3f3   : > { %3996 = vmatprep.subr.bf16.mxu0 %v4520_v46  ;;  %4011 = vmatpush3.bf16.msra.mxu1 %v4388_v13 }
 0x3f4   : > { %4012 = vmatprep.subr.bf16.mxu1 %v4698_v7 }
 0x3f6   : > { %3997 = vmatpush3.bf16.msra.mxu0 %v4380_v2 }
 0x3f7   : > { %3998 = vmatprep.subr.bf16.mxu0 %v4520_v46  ;;  %v4385_v46 = vld [vmem:[#allocation9 + $0x330] sm:$0xff]   ;;  %4013 = vmatpush3.bf16.msra.mxu1 %v4390_v14 }
 0x3f8   : > { %4014 = vmatprep.subr.bf16.mxu1 %v4698_v7 }
 0x3fa   : > { %3999 = vmatpush3.bf16.msra.mxu0 %v4381_v3 }
 0x3fb   : > { %4024 = vmatprep.subr.bf16.mxu0 %v4698_v7  ;;  %4015 = vmatpush3.bf16.msra.mxu1 %v4392_v15 }
 0x3fc   : > { %4016 = vmatprep.subr.bf16.mxu1 %v4698_v7 }
 0x3fd   : > { %4001 = vmatmul.mubr.bf16.vlgmr.msra.gmra.mxu0 %v1635_v6 }
 0x3fe   : > { %4040 = vmatprep.mubr.msk.bf16.mxu0 %vm4521_vm4, %v4698_v7  ;;  %4025 = vmatpush3.bf16.msra.mxu0 %v4383_v9 }
 0x3ff   : > { %4026 = vmatprep.subr.bf16.mxu0 %v4698_v7  ;;  %4017 = vmatpush3.bf16.msra.mxu1 %v4394_v17 }
 0x400   : > { %4018 = vmatprep.subr.bf16.mxu1 %v4698_v7 }
 0x402   : > { %4027 = vmatpush3.bf16.msra.mxu0 %v4385_v46 }
 0x403   : > { %4028 = vmatprep.subr.bf16.mxu0 %v4698_v7  ;;  %4019 = vmatpush3.bf16.msra.mxu1 %v4396_v19 }
 0x404   : > { %4044 = vmatprep.subr.bf16.mxu1 %v4698_v7 }
 0x406   : > { %4029 = vmatpush3.bf16.msra.mxu0 %v4387_v12 }
 0x407   : > { %4030 = vmatprep.subr.bf16.mxu0 %v4698_v7 }
 0x40a   : > { %4031 = vmatpush3.bf16.msra.mxu0 %v4389_v16 }
 0x40b   : > { %4032 = vmatprep.subr.bf16.mxu0 %v4698_v7 }
 0x40e   : > { %4033 = vmatpush3.bf16.msra.mxu0 %v4391_v18 }
 0x40f   : > { %4034 = vmatprep.subr.bf16.mxu0 %v4698_v7 }
 0x412   : > { %4035 = vmatpush3.bf16.msra.mxu0 %v4393_v20 }
 0x413   : > { %4036 = vmatprep.subr.bf16.mxu0 %v4698_v7 }
 0x416   : > { %4037 = vmatpush3.bf16.msra.mxu0 %v4395_v21 }
 0x417   : > { %4038 = vmatprep.subr.bf16.mxu0 %v4698_v7 }
 0x41a   : > { %4039 = vmatpush3.bf16.msra.mxu0 %v4397_v22 }
 0x41b   : > { %4064 = vmatprep.subr.bf16.mxu0 %v4698_v7 }
 0x49d   : > { %v1537_v23 = vpop.f32.mrf.mxu0 }
 0x49f   : > { %v3962_v24 = vpop.f32.mrf.mxu0 }
 0x4a0   : > { %v4409_v24 = vld [vmem:[#allocation9 + $0x3f0] sm:$0xff]  }
 0x4a1   : > { %v1540_v25 = vpop.f32.mrf.mxu0 }
 0x4a3   : > { %v3963_v26 = vpop.f32.mrf.mxu0 }
 0x4a4   : > { %v4413_v26 = vld [vmem:[#allocation9 + $0x3e0] sm:$0xff]  }
 0x4a5   : > { %v1626_v27 = vpop.f32.mrf.mxu1 }
 0x4a6   : > { %v1627_v31 = vadd.f32 %v1626_v27, %v1537_v23  ;;  %v4407_v23 = vld [vmem:[#allocation9 + $0x3f8] sm:$0xff]  }
 0x4a7   : > { %v3982_v28 = vpop.f32.mrf.mxu1  ;;  %v4415_v27 = vld [vmem:[#allocation9 + $0x3d8] sm:$0xff]  }
 0x4a9   : > { %v1629_v29 = vpop.f32.mrf.mxu1 }
 0x4aa   : > { %v1630_v36 = vadd.f32 %v1629_v29, %v1540_v25  ;;  %v4411_v25 = vld [vmem:[#allocation9 + $0x3e8] sm:$0xff]  }
 0x4ab   : > { %v3983_v30 = vpop.f32.mrf.mxu1 }
 0x4bd   : > { %v1735_v32 = vpop.f32.mrf.mxu0 }
 0x4be   : > { %v1742_v34 = vadd.f32 %v1735_v32, %v1627_v31 }
 0x4bf   : > { %v4002_v35 = vpop.f32.mrf.mxu0 }
 0x4c0   : > { %v1752_v37 = vadd.f32 %v3418_v33, %v1742_v34 }
 0x4c1   : > { %v1738_v38 = vpop.f32.mrf.mxu0 }
 0x4c2   : > { %vm1754_vm15 = vcmp.ge.f32.partialorder %v1752_v37, 0.0  ;;  %v1756_v39 = vmul.f32 0.1, %v1752_v37  ;;  %v1743_v40 = vadd.f32 %v1738_v38, %v1630_v36 }
 0x4c3   : > { %v4003_v41 = vpop.f32.mrf.mxu0 }
 0x4c4   : > { %v1758_v42 = vsel %vm1754_vm15, %v1752_v37, %v1756_v39  ;;  %v1753_v43 = vadd.f32 %v3418_v33, %v1743_v40  ;;  %v4749_v40 = vpack.c.bf16 %v4635_v44, %v4635_v44  ;;  %v4406_v41 = vld [vmem:[#allocation9 + $0x438] sm:$0xff]   ;;  %v4412_v44 = vld [vmem:[#allocation9 + $0x420] sm:$0xff]  }
 0x4c5   : > { %1760 = vst [vmem:[#allocation5 + $0x1] sm:$0xff] %v1758_v42 }
 0x4c6   : > { %vm1755_vm0 = vcmp.ge.f32.partialorder %v1753_v43, 0.0  ;;  %v1757_v45 = vmul.f32 0.1, %v1753_v43 }
 0x4c8   : > { %v1759_v47 = vsel %vm1755_vm0, %v1753_v43, %v1757_v45  ;;  %v4410_v43 = vld [vmem:[#allocation9 + $0x428] sm:$0xff]   ;;  %v4414_v45 = vld [vmem:[#allocation9 + $0x418] sm:$0xff]  }
 0x4c9   : > { %1761 = vst [vmem:[#allocation5 + $0x9] sm:$0xff] %v1759_v47  ;;  %v1784_v49 = vpack.c.bf16 %v1759_v47, %v1758_v42  ;;  %v4408_v42 = vld [vmem:[#allocation9 + $0x430] sm:$0xff]  }
 0x4ca   : > { %v4416_v47 = vld [vmem:[#allocation9 + $0x410] sm:$0xff]  }
 0x4cb   : > { %4021 = vmatmul.mubr.bf16.vlgmr.msra.gmra.mxu1 %v1784_v49  ;;  %v4420_v49 = vld [vmem:[#allocation9 + $0x400] sm:$0xff]  }
 0x4cc   : > { %4045 = vmatpush3.bf16.msra.mxu1 %v4398_v48  ;;  %4060 = vmatprep.mubr.msk.bf16.mxu1 %vm4521_vm4, %v4698_v7  ;;  %v1762_v51 = vld [vmem:[#allocation5] sm:$0xff]  ;;  %v4418_v48 = vld [vmem:[#allocation9 + $0x408] sm:$0xff]  }
 0x4cd   : > { %4046 = vmatprep.subr.bf16.mxu1 %v4698_v7 }
 0x4d0   : > { %v1763_v52 = vld [vmem:[#allocation5 + $0x8] sm:$0xff]  ;;  %4047 = vmatpush3.bf16.msra.mxu1 %v4399_v50  ;;  %v4417_v50 = vld [vmem:[#allocation9 + $0x3d0] sm:$0xff]  }
 0x4d1   : > { %v1764_v54 = vpack.c.bf16 %v1763_v52, %v1762_v51  ;;  %4048 = vmatprep.subr.bf16.mxu1 %v4698_v7  ;;  %v1980_v60 = vld [vmem:[#allocation5 + $0x2] sm:$0xff]  ;;  %v1981_v61 = vld [vmem:[#allocation5 + $0xa] sm:$0xff] }
 0x4d2   : > { %v1982_v62 = vpack.c.bf16 %v1981_v61, %v1980_v60  ;;  %v4419_v51 = vld [vmem:[#allocation9 + $0x3c8] sm:$0xff]   ;;  %v4421_v52 = vld [vmem:[#allocation9 + $0x3c0] sm:$0xff]  }
 0x4d3   : > { %4041 = vmatmul.mubr.bf16.vlgmr.msra.gmra.mxu0 %v1764_v54  ;;  %v4422_v54 = vld [vmem:[#allocation9 + $0x478] sm:$0xff]   ;;  %v4424_v61 = vld [vmem:[#allocation9 + $0x468] sm:$0xff]  }
 0x4d4   : > { %4049 = vmatpush3.bf16.msra.mxu1 %v4400_v53  ;;  %4066 = vmatprep.mubr.msk.bf16.mxu0 %vm4521_vm4, %v4698_v7 }
 0x4d5   : > { %4050 = vmatprep.subr.bf16.mxu1 %v4698_v7 }
 0x4d8   : > { %4051 = vmatpush3.bf16.msra.mxu1 %v4401_v55 }
 0x4d9   : > { %4052 = vmatprep.subr.bf16.mxu1 %v4698_v7 }
 0x4dc   : > { %4053 = vmatpush3.bf16.msra.mxu1 %v4402_v56 }
 0x4dd   : > { %4054 = vmatprep.subr.bf16.mxu1 %v4698_v7 }
 0x4e0   : > { %4055 = vmatpush3.bf16.msra.mxu1 %v4403_v57 }
 0x4e1   : > { %4056 = vmatprep.subr.bf16.mxu1 %v4698_v7 }
 0x4e4   : > { %4057 = vmatpush3.bf16.msra.mxu1 %v4404_v58  ;;  %v4423_v58 = vld [vmem:[#allocation9 + $0x470] sm:$0xff]  }
 0x4e5   : > { %4058 = vmatprep.subr.bf16.mxu1 %v4698_v7 }
 0x4e8   : > { %4059 = vmatpush3.bf16.msra.mxu1 %v4405_v59 }
 0x4e9   : > { %4090 = vmatprep.subr.bf16.mxu1 %v4698_v7 }
 0x4eb   : > { %4061 = vmatmul.mubr.bf16.vlgmr.msra.gmra.mxu1 %v1982_v62 }
 0x4ec   : > { %4106 = vmatprep.mubr.msk.bf16.mxu1 %vm4521_vm4, %v4698_v7  ;;  %4091 = vmatpush3.bf16.msra.mxu1 %v4407_v23 }
 0x4ed   : > { %4092 = vmatprep.subr.bf16.mxu1 %v4698_v7 }
 0x4f0   : > { %4093 = vmatpush3.bf16.msra.mxu1 %v4409_v24 }
 0x4f1   : > { %4094 = vmatprep.subr.bf16.mxu1 %v4698_v7 }
 0x4f4   : > { %4095 = vmatpush3.bf16.msra.mxu1 %v4411_v25 }
 0x4f5   : > { %4096 = vmatprep.subr.bf16.mxu1 %v4698_v7 }
 0x4f8   : > { %4097 = vmatpush3.bf16.msra.mxu1 %v4413_v26 }
 0x4f9   : > { %4098 = vmatprep.subr.bf16.mxu1 %v4698_v7 }
 0x4fc   : > { %4099 = vmatpush3.bf16.msra.mxu1 %v4415_v27 }
 0x4fd   : > { %4100 = vmatprep.subr.bf16.mxu1 %v4698_v7 }
 0x500   : > { %4101 = vmatpush3.bf16.msra.mxu1 %v4417_v50  ;;  %v4451_v50 = vld [vmem:[#allocation9 + $0x510] sm:$0xff]  }
 0x501   : > { %4102 = vmatprep.subr.bf16.mxu1 %v4698_v7 }
 0x504   : > { %4103 = vmatpush3.bf16.msra.mxu1 %v4419_v51  ;;  %v4452_v51 = vld [vmem:[#allocation9 + $0x508] sm:$0xff]  }
 0x505   : > { %4104 = vmatprep.subr.bf16.mxu1 %v4698_v7 }
 0x508   : > { %4105 = vmatpush3.bf16.msra.mxu1 %v4421_v52  ;;  %v4453_v52 = vld [vmem:[#allocation9 + $0x500] sm:$0xff]  }
 0x509   : > { %4130 = vmatprep.subr.bf16.mxu1 %v4698_v7 }
 0x58b   : > { %v1884_v63 = vpop.f32.mrf.mxu1 }
 0x58d   : > { %v4022_v0 = vpop.f32.mrf.mxu1 }
 0x58e   : > { %v4426_v0 = vld [vmem:[#allocation9 + $0x458] sm:$0xff]  }
 0x58f   : > { %v1887_v1 = vpop.f32.mrf.mxu1 }
 0x591   : > { %v4023_v2 = vpop.f32.mrf.mxu1 }
 0x592   : > { %v4428_v2 = vld [vmem:[#allocation9 + $0x448] sm:$0xff]  }
 0x593   : > { %v1973_v3 = vpop.f32.mrf.mxu0 }
 0x594   : > { %v1974_v8 = vadd.f32 %v1973_v3, %v1884_v63  ;;  %v4425_v63 = vld [vmem:[#allocation9 + $0x460] sm:$0xff]  }
 0x595   : > { %v4042_v4 = vpop.f32.mrf.mxu0  ;;  %v4429_v3 = vld [vmem:[#allocation9 + $0x440] sm:$0xff]  }
 0x597   : > { %v1976_v5 = vpop.f32.mrf.mxu0 }
 0x598   : > { %v1977_v12 = vadd.f32 %v1976_v5, %v1887_v1  ;;  %v4427_v1 = vld [vmem:[#allocation9 + $0x450] sm:$0xff]  }
 0x599   : > { %v4043_v6 = vpop.f32.mrf.mxu0 }
 0x59a   : > { %v4430_v6 = vld [vmem:[#allocation9 + $0x4f8] sm:$0xff]  }
 0x5ab   : > { %v2082_v9 = vpop.f32.mrf.mxu1 }
 0x5ac   : > { %v2089_v46 = vadd.f32 %v2082_v9, %v1974_v8  ;;  %v4432_v8 = vld [vmem:[#allocation9 + $0x4f0] sm:$0xff]   ;;  %v4431_v9 = vld [vmem:[#allocation9 + $0x4b8] sm:$0xff]  }
 0x5ad   : > { %v4062_v11 = vpop.f32.mrf.mxu1 }
 0x5ae   : > { %v2099_v13 = vadd.f32 %v3444_v10, %v2089_v46  ;;  %v4433_v46 = vld [vmem:[#allocation9 + $0x4b0] sm:$0xff]   ;;  %v4436_v11 = vld [vmem:[#allocation9 + $0x4e0] sm:$0xff]  }
 0x5af   : > { %v2085_v14 = vpop.f32.mrf.mxu1 }
 0x5b0   : > { %v2090_v15 = vadd.f32 %v2085_v14, %v1977_v12  ;;  %v2103_v18 = vmul.f32 0.1, %v2099_v13  ;;  %vm2101_vm1 = vcmp.ge.f32.partialorder %v2099_v13, 0.0  ;;  %v4435_v12 = vld [vmem:[#allocation9 + $0x4a8] sm:$0xff]   ;;  %v4438_v14 = vld [vmem:[#allocation9 + $0x4d8] sm:$0xff]  }
 0x5b1   : > { %v4063_v16 = vpop.f32.mrf.mxu1 }
 0x5b2   : > { %v2100_v17 = vadd.f32 %v3444_v10, %v2090_v15  ;;  %v2105_v20 = vsel %vm2101_vm1, %v2099_v13, %v2103_v18  ;;  %v4434_v10 = vld [vmem:[#allocation9 + $0x4e8] sm:$0xff]   ;;  %v4437_v13 = vld [vmem:[#allocation9 + $0x4a0] sm:$0xff]   ;;  %v4440_v15 = vld [vmem:[#allocation9 + $0x4d0] sm:$0xff]  }
 0x5b3   : > { %v4442_v16 = vld [vmem:[#allocation9 + $0x4c8] sm:$0xff]   ;;  %v4444_v18 = vld [vmem:[#allocation9 + $0x4c0] sm:$0xff]  }
 0x5b4   : > { %vm2102_vm2 = vcmp.ge.f32.partialorder %v2100_v17, 0.0  ;;  %v2104_v19 = vmul.f32 0.1, %v2100_v17 }
 0x5b6   : > { %v2106_v21 = vsel %vm2102_vm2, %v2100_v17, %v2104_v19  ;;  %v4439_v17 = vld [vmem:[#allocation9 + $0x498] sm:$0xff]   ;;  %v4441_v19 = vld [vmem:[#allocation9 + $0x490] sm:$0xff]  }
 0x5b7   : > { %v4281_v22 = vpack.i.bf16 %v2106_v21, %v2105_v20 }
 0x5b9   : > { %4282 = vrot.lane.b32.xlu0 %v4281_v22, %s4522_s9 }
 0x62b   : > { %v4283_v28 = vpop.permute.xlu0 %4282 }
 0x62c   : > { %v4285_v29 = vunpack.i.h.bf16 %v4283_v28  ;;  %v4284_v30 = vunpack.i.l.bf16 %v4283_v28 }
 0x62e   : > { %v2116_v31 = vmax.f32 %v2106_v21, %v4285_v29  ;;  %v2115_v32 = vmax.f32 %v2105_v20, %v4284_v30  ;;  %v4443_v20 = vld [vmem:[#allocation9 + $0x488] sm:$0xff]   ;;  %v4445_v21 = vld [vmem:[#allocation9 + $0x480] sm:$0xff]  }
 0x630   : > { %v2120_v33 = vrot.slane %v2116_v31, 1  ;;  %v2119_v34 = vrot.slane %v2115_v32, 1 }
 0x632   : > { %v2121_v35 = vsel %vm987_vm8, %v2119_v34, %v2120_v33  ;;  %v2125_v36 = vsel %vm987_vm8, %v2120_v33, %v2119_v34  ;;  %vm3190_vm8 = vcmask 64512  }
 0x633   : > { %v2126_v37 = vmax.f32 %v2115_v32, %v2121_v35  ;;  %v2127_v38 = vmax.f32 %v2116_v31, %v2125_v36  ;;  %v3471_v32 = vld [vmem:[%s4857_s2 + $0x5] ss:$0 sm:$0xff] }
 0x635   : > { %v2128_v39 = vpack.c.bf16 %v2127_v38, %v2126_v37 }
 0x637   : > { %4065 = vmatpush3.bf16.msra.mxu0 %v2128_v39 }
 0x638   : > { %4070 = vmatprep.subr.bf16.mxu0 %v4698_v7 }
 0x63a   : > { %4067 = vmatmul.mubr.msk.bf16.vlgmr.msra.gmra.mxu0 %vm2130_vm3, %v4749_v40 }
 0x63b   : > { %4071 = vmatpush3.bf16.msra.mxu0 %v4406_v41  ;;  %4086 = vmatprep.mubr.msk.bf16.mxu0 %vm4521_vm4, %v4698_v7  ;;  %v4446_v41 = vld [vmem:[#allocation9 + $0x538] sm:$0xff]  }
 0x63c   : > { %4072 = vmatprep.subr.bf16.mxu0 %v4698_v7 }
 0x63f   : > { %4073 = vmatpush3.bf16.msra.mxu0 %v4408_v42 }
 0x640   : > { %4074 = vmatprep.subr.bf16.mxu0 %v4698_v7 }
 0x643   : > { %4075 = vmatpush3.bf16.msra.mxu0 %v4410_v43  ;;  %v4447_v43 = vld [vmem:[#allocation9 + $0x530] sm:$0xff]  }
 0x644   : > { %4076 = vmatprep.subr.bf16.mxu0 %v4698_v7 }
 0x647   : > { %4077 = vmatpush3.bf16.msra.mxu0 %v4412_v44 }
 0x648   : > { %4078 = vmatprep.subr.bf16.mxu0 %v4698_v7 }
 0x64b   : > { %4079 = vmatpush3.bf16.msra.mxu0 %v4414_v45  ;;  %v4448_v45 = vld [vmem:[#allocation9 + $0x528] sm:$0xff]  }
 0x64c   : > { %4080 = vmatprep.subr.bf16.mxu0 %v4698_v7 }
 0x64f   : > { %4081 = vmatpush3.bf16.msra.mxu0 %v4416_v47 }
 0x650   : > { %4082 = vmatprep.subr.bf16.mxu0 %v4698_v7 }
 0x653   : > { %4083 = vmatpush3.bf16.msra.mxu0 %v4418_v48  ;;  %v4449_v48 = vld [vmem:[#allocation9 + $0x520] sm:$0xff]  }
 0x654   : > { %4084 = vmatprep.subr.bf16.mxu0 %v4698_v7 }
 0x657   : > { %4085 = vmatpush3.bf16.msra.mxu0 %v4420_v49  ;;  %v4450_v49 = vld [vmem:[#allocation9 + $0x518] sm:$0xff]  }
 0x658   : > { %4110 = vmatprep.subr.bf16.mxu0 %v4698_v7 }
 0x6fa   : > { %v2168_v53 = vpop.f32.mrf.mxu0 }
 0x6fb   : > { %2174 = vst [vmem:[#allocation6 + $0x1] sm:$0xff] %v2168_v53  ;;  %v2195_v55 = vpack.c.bf16 %v2168_v53, %v2168_v53 }
 0x6fc   : > { %v4068_v56 = vpop.f32.mrf.mxu0 }
 0x6fd   : > { %4087 = vmatmul.mubr.bf16.vlgmr.msra.gmra.mxu0 %v2195_v55  ;;  %v4454_v55 = vld [vmem:[#allocation9 + $0x5b8] sm:$0xff]   ;;  %v4456_v56 = vld [vmem:[#allocation9 + $0x5b0] sm:$0xff]  }
 0x6fe   : > { %v2171_v57 = vpop.f32.mrf.mxu0  ;;  %4111 = vmatpush3.bf16.msra.mxu0 %v4422_v54  ;;  %4126 = vmatprep.mubr.msk.bf16.mxu0 %vm4521_vm4, %v4698_v7 }
 0x6ff   : > { %4112 = vmatprep.subr.bf16.mxu0 %v4698_v7  ;;  %v4455_v57 = vld [vmem:[#allocation9 + $0x578] sm:$0xff]  }
 0x700   : > { %v4069_v59 = vpop.f32.mrf.mxu0 }
 0x701   : > { %v4457_v59 = vld [vmem:[#allocation9 + $0x570] sm:$0xff]  }
 0x702   : > { %v2175_v60 = vld [vmem:[#allocation6] sm:$0xff]  ;;  %4113 = vmatpush3.bf16.msra.mxu0 %v4423_v58  ;;  %v4458_v58 = vld [vmem:[#allocation9 + $0x5a8] sm:$0xff]  }
 0x703   : > { %v2176_v62 = vpack.c.bf16 %v2175_v60, %v2175_v60  ;;  %4114 = vmatprep.subr.bf16.mxu0 %v4698_v7  ;;  %v2389_v4 = vld [vmem:[#allocation6 + $0x2] sm:$0xff]  ;;  %v4460_v60 = vld [vmem:[#allocation9 + $0x5a0] sm:$0xff]  }
 0x704   : > { %v2390_v5 = vpack.c.bf16 %v2389_v4, %v2389_v4  ;;  %v4465_v4 = vld [vmem:[#allocation9 + $0x550] sm:$0xff]  }
 0x705   : > { %4107 = vmatmul.mubr.bf16.vlgmr.msra.gmra.mxu1 %v2176_v62  ;;  %v4461_v62 = vld [vmem:[#allocation9 + $0x560] sm:$0xff]  }
 0x706   : > { %4115 = vmatpush3.bf16.msra.mxu0 %v4424_v61  ;;  %4146 = vmatprep.mubr.msk.bf16.mxu1 %vm4521_vm4, %v4698_v7  ;;  %v4459_v61 = vld [vmem:[#allocation9 + $0x568] sm:$0xff]  }
 0x707   : > { %4116 = vmatprep.subr.bf16.mxu0 %v4698_v7  ;;  %4131 = vmatpush3.bf16.msra.mxu1 %v4430_v6  ;;  %v4469_v6 = vld [vmem:[#allocation9 + $0x540] sm:$0xff]  }
 0x708   : > { %4132 = vmatprep.subr.bf16.mxu1 %v4698_v7 }
 0x70a   : > { %4117 = vmatpush3.bf16.msra.mxu0 %v4425_v63  ;;  %v4462_v63 = vld [vmem:[#allocation9 + $0x598] sm:$0xff]  }
 0x70b   : > { %4118 = vmatprep.subr.bf16.mxu0 %v4698_v7  ;;  %4133 = vmatpush3.bf16.msra.mxu1 %v4432_v8 }
 0x70c   : > { %4134 = vmatprep.subr.bf16.mxu1 %v4698_v7 }
 0x70e   : > { %4119 = vmatpush3.bf16.msra.mxu0 %v4426_v0  ;;  %v4464_v0 = vld [vmem:[#allocation9 + $0x590] sm:$0xff]  }
 0x70f   : > { %4120 = vmatprep.subr.bf16.mxu0 %v4698_v7  ;;  %4135 = vmatpush3.bf16.msra.mxu1 %v4434_v10 }
 0x710   : > { %4136 = vmatprep.subr.bf16.mxu1 %v4698_v7 }
 0x712   : > { %4121 = vmatpush3.bf16.msra.mxu0 %v4427_v1  ;;  %v4466_v1 = vld [vmem:[#allocation9 + $0x588] sm:$0xff]  }
 0x713   : > { %4122 = vmatprep.subr.bf16.mxu0 %v4698_v7  ;;  %4137 = vmatpush3.bf16.msra.mxu1 %v4436_v11 }
 0x714   : > { %4138 = vmatprep.subr.bf16.mxu1 %v4698_v7 }
 0x716   : > { %4123 = vmatpush3.bf16.msra.mxu0 %v4428_v2  ;;  %v4463_v2 = vld [vmem:[#allocation9 + $0x558] sm:$0xff]  }
 0x717   : > { %4124 = vmatprep.subr.bf16.mxu0 %v4698_v7  ;;  %4139 = vmatpush3.bf16.msra.mxu1 %v4438_v14 }
 0x718   : > { %4140 = vmatprep.subr.bf16.mxu1 %v4698_v7 }
 0x71a   : > { %4125 = vmatpush3.bf16.msra.mxu0 %v4429_v3  ;;  %v4468_v3 = vld [vmem:[#allocation9 + $0x580] sm:$0xff]  }
 0x71b   : > { %4150 = vmatprep.subr.bf16.mxu0 %v4698_v7  ;;  %4141 = vmatpush3.bf16.msra.mxu1 %v4440_v15 }
 0x71c   : > { %4142 = vmatprep.subr.bf16.mxu1 %v4698_v7 }
 0x71d   : > { %4127 = vmatmul.mubr.bf16.vlgmr.msra.gmra.mxu0 %v2390_v5  ;;  %v4467_v5 = vld [vmem:[#allocation9 + $0x548] sm:$0xff]  }
 0x71e   : > { %4166 = vmatprep.mubr.msk.bf16.mxu0 %vm4521_vm4, %v4698_v7  ;;  %4151 = vmatpush3.bf16.msra.mxu0 %v4431_v9 }
 0x71f   : > { %4152 = vmatprep.subr.bf16.mxu0 %v4698_v7  ;;  %4143 = vmatpush3.bf16.msra.mxu1 %v4442_v16 }
 0x720   : > { %4144 = vmatprep.subr.bf16.mxu1 %v4698_v7 }
 0x722   : > { %4153 = vmatpush3.bf16.msra.mxu0 %v4433_v46 }
 0x723   : > { %4154 = vmatprep.subr.bf16.mxu0 %v4698_v7  ;;  %4145 = vmatpush3.bf16.msra.mxu1 %v4444_v18 }
 0x724   : > { %4170 = vmatprep.subr.bf16.mxu1 %v4698_v7 }
 0x726   : > { %4155 = vmatpush3.bf16.msra.mxu0 %v4435_v12 }
 0x727   : > { %4156 = vmatprep.subr.bf16.mxu0 %v4698_v7 }
 0x72a   : > { %4157 = vmatpush3.bf16.msra.mxu0 %v4437_v13 }
 0x72b   : > { %4158 = vmatprep.subr.bf16.mxu0 %v4698_v7 }
 0x72e   : > { %4159 = vmatpush3.bf16.msra.mxu0 %v4439_v17  ;;  %v3497_v17 = vld [vmem:[%s4857_s2 + $0x6] ss:$0 sm:$0xff] }
 0x72f   : > { %4160 = vmatprep.subr.bf16.mxu0 %v4698_v7 }
 0x732   : > { %4161 = vmatpush3.bf16.msra.mxu0 %v4441_v19 }
 0x733   : > { %4162 = vmatprep.subr.bf16.mxu0 %v4698_v7 }
 0x736   : > { %4163 = vmatpush3.bf16.msra.mxu0 %v4443_v20 }
 0x737   : > { %4164 = vmatprep.subr.bf16.mxu0 %v4698_v7 }
 0x73a   : > { %4165 = vmatpush3.bf16.msra.mxu0 %v4445_v21 }
 0x73b   : > { %4190 = vmatprep.subr.bf16.mxu0 %v4698_v7 }
 0x7bd   : > { %v2295_v22 = vpop.f32.mrf.mxu0 }
 0x7bf   : > { %v4088_v23 = vpop.f32.mrf.mxu0 }
 0x7c1   : > { %v2298_v24 = vpop.f32.mrf.mxu0 }
 0x7c3   : > { %v4089_v25 = vpop.f32.mrf.mxu0 }
 0x7c4   : > { %v4470_v25 = vld [vmem:[#allocation9 + $0x5f8] sm:$0xff]  }
 0x7c5   : > { %v2383_v26 = vpop.f32.mrf.mxu1 }
 0x7c6   : > { %v2384_v30 = vadd.f32 %v2383_v26, %v2295_v22 }
 0x7c7   : > { %v4108_v27 = vpop.f32.mrf.mxu1 }
 0x7c8   : > { %v4471_v27 = vld [vmem:[#allocation9 + $0x5f0] sm:$0xff]  }
 0x7c9   : > { %v2386_v28 = vpop.f32.mrf.mxu1 }
 0x7cb   : > { %v4109_v29 = vpop.f32.mrf.mxu1 }
 0x7cc   : > { %v4472_v29 = vld [vmem:[#allocation9 + $0x5e8] sm:$0xff]  }
 0x7dd   : > { %v2490_v31 = vpop.f32.mrf.mxu0 }
 0x7de   : > { %v2496_v33 = vadd.f32 %v2490_v31, %v2384_v30  ;;  %v4473_v31 = vld [vmem:[#allocation9 + $0x5e0] sm:$0xff]  }
 0x7df   : > { %v4128_v34 = vpop.f32.mrf.mxu0 }
 0x7e0   : > { %v2505_v35 = vadd.f32 %v3471_v32, %v2496_v33  ;;  %v4474_v32 = vld [vmem:[#allocation9 + $0x5d8] sm:$0xff]   ;;  %v4475_v33 = vld [vmem:[#allocation9 + $0x5d0] sm:$0xff]   ;;  %v4476_v34 = vld [vmem:[#allocation9 + $0x5c8] sm:$0xff]  }
 0x7e1   : > { %v2493_v36 = vpop.f32.mrf.mxu0 }
 0x7e2   : > { %vm2506_vm5 = vcmp.ge.f32.partialorder %v2505_v35, 0.0  ;;  %v2507_v37 = vmul.f32 0.1, %v2505_v35 }
 0x7e3   : > { %v4129_v38 = vpop.f32.mrf.mxu0 }
 0x7e4   : > { %v2508_v39 = vsel %vm2506_vm5, %v2505_v35, %v2507_v37  ;;  %v4477_v35 = vld [vmem:[#allocation9 + $0x5c0] sm:$0xff]  }
 0x7e5   : > { %2509 = vst [vmem:[#allocation7 + $0x1] sm:$0xff] %v2508_v39  ;;  %v2530_v42 = vpack.c.bf16 %v2508_v39, %v2508_v39 }
 0x7e7   : > { %4147 = vmatmul.mubr.bf16.vlgmr.msra.gmra.mxu1 %v2530_v42 }
 0x7e8   : > { %4171 = vmatpush3.bf16.msra.mxu1 %v4446_v41  ;;  %4186 = vmatprep.mubr.msk.bf16.mxu1 %vm4521_vm4, %v4698_v7 }
 0x7e9   : > { %4172 = vmatprep.subr.bf16.mxu1 %v4698_v7 }
 0x7ec   : > { %v2510_v44 = vld [vmem:[#allocation7] sm:$0xff]  ;;  %4173 = vmatpush3.bf16.msra.mxu1 %v4447_v43 }
 0x7ed   : > { %v2511_v47 = vpack.c.bf16 %v2510_v44, %v2510_v44  ;;  %4174 = vmatprep.subr.bf16.mxu1 %v4698_v7  ;;  %v2724_v53 = vld [vmem:[#allocation7 + $0x2] sm:$0xff] }
 0x7ee   : > { %v2725_v54 = vpack.c.bf16 %v2724_v53, %v2724_v53 }
 0x7ef   : > { %4167 = vmatmul.mubr.bf16.vlgmr.msra.gmra.mxu0 %v2511_v47 }
 0x7f0   : > { %4175 = vmatpush3.bf16.msra.mxu1 %v4448_v45  ;;  %4206 = vmatprep.mubr.msk.bf16.mxu0 %vm4521_vm4, %v4698_v7 }
 0x7f1   : > { %4176 = vmatprep.subr.bf16.mxu1 %v4698_v7  ;;  %4191 = vmatpush3.bf16.msra.mxu0 %v4454_v55 }
 0x7f2   : > { %4192 = vmatprep.subr.bf16.mxu0 %v4698_v7 }
 0x7f4   : > { %4177 = vmatpush3.bf16.msra.mxu1 %v4449_v48 }
 0x7f5   : > { %4178 = vmatprep.subr.bf16.mxu1 %v4698_v7  ;;  %4193 = vmatpush3.bf16.msra.mxu0 %v4456_v56 }
 0x7f6   : > { %4194 = vmatprep.subr.bf16.mxu0 %v4698_v7 }
 0x7f8   : > { %4179 = vmatpush3.bf16.msra.mxu1 %v4450_v49 }
 0x7f9   : > { %4180 = vmatprep.subr.bf16.mxu1 %v4698_v7  ;;  %4195 = vmatpush3.bf16.msra.mxu0 %v4458_v58 }
 0x7fa   : > { %4196 = vmatprep.subr.bf16.mxu0 %v4698_v7 }
 0x7fc   : > { %4181 = vmatpush3.bf16.msra.mxu1 %v4451_v50  ;;  %v3523_v50 = vld [vmem:[%s4857_s2 + $0x7] ss:$0 sm:$0xff] }
 0x7fd   : > { %4182 = vmatprep.subr.bf16.mxu1 %v4698_v7  ;;  %4197 = vmatpush3.bf16.msra.mxu0 %v4460_v60 }
 0x7fe   : > { %4198 = vmatprep.subr.bf16.mxu0 %v4698_v7 }
 0x800   : > { %4183 = vmatpush3.bf16.msra.mxu1 %v4452_v51 }
 0x801   : > { %4184 = vmatprep.subr.bf16.mxu1 %v4698_v7  ;;  %4199 = vmatpush3.bf16.msra.mxu0 %v4462_v63 }
 0x802   : > { %4200 = vmatprep.subr.bf16.mxu0 %v4698_v7 }
 0x804   : > { %4185 = vmatpush3.bf16.msra.mxu1 %v4453_v52 }
 0x805   : > { %4210 = vmatprep.subr.bf16.mxu1 %v4698_v7  ;;  %4201 = vmatpush3.bf16.msra.mxu0 %v4464_v0 }
 0x806   : > { %4202 = vmatprep.subr.bf16.mxu0 %v4698_v7 }
 0x807   : > { %4187 = vmatmul.mubr.bf16.vlgmr.msra.gmra.mxu1 %v2725_v54 }
 0x808   : > { %4226 = vmatprep.mubr.msk.bf16.mxu1 %vm4521_vm4, %v4698_v7  ;;  %4211 = vmatpush3.bf16.msra.mxu1 %v4455_v57 }
 0x809   : > { %4212 = vmatprep.subr.bf16.mxu1 %v4698_v7  ;;  %4203 = vmatpush3.bf16.msra.mxu0 %v4466_v1 }
 0x80a   : > { %4204 = vmatprep.subr.bf16.mxu0 %v4698_v7 }
 0x80c   : > { %4213 = vmatpush3.bf16.msra.mxu1 %v4457_v59 }
 0x80d   : > { %4214 = vmatprep.subr.bf16.mxu1 %v4698_v7  ;;  %4205 = vmatpush3.bf16.msra.mxu0 %v4468_v3 }
 0x80e   : > { %4230 = vmatprep.subr.bf16.mxu0 %v4698_v7 }
 0x810   : > { %4215 = vmatpush3.bf16.msra.mxu1 %v4459_v61 }
 0x811   : > { %4216 = vmatprep.subr.bf16.mxu1 %v4698_v7 }
 0x814   : > { %4217 = vmatpush3.bf16.msra.mxu1 %v4461_v62 }
 0x815   : > { %4218 = vmatprep.subr.bf16.mxu1 %v4698_v7 }
 0x818   : > { %4219 = vmatpush3.bf16.msra.mxu1 %v4463_v2 }
 0x819   : > { %4220 = vmatprep.subr.bf16.mxu1 %v4698_v7 }
 0x81c   : > { %4221 = vmatpush3.bf16.msra.mxu1 %v4465_v4 }
 0x81d   : > { %4222 = vmatprep.subr.bf16.mxu1 %v4698_v7 }
 0x820   : > { %4223 = vmatpush3.bf16.msra.mxu1 %v4467_v5 }
 0x821   : > { %4224 = vmatprep.subr.bf16.mxu1 %v4698_v7 }
 0x824   : > { %4225 = vmatpush3.bf16.msra.mxu1 %v4469_v6 }
 0x825   : > { %4250 = vmatprep.subr.bf16.mxu1 %v4698_v7 }
 0x8a7   : > { %v2630_v8 = vpop.f32.mrf.mxu1 }
 0x8a9   : > { %v4148_v9 = vpop.f32.mrf.mxu1 }
 0x8ab   : > { %v2633_v10 = vpop.f32.mrf.mxu1 }
 0x8ad   : > { %v4149_v46 = vpop.f32.mrf.mxu1 }
 0x8af   : > { %v2718_v11 = vpop.f32.mrf.mxu0 }
 0x8b0   : > { %v2719_v15 = vadd.f32 %v2718_v11, %v2630_v8 }
 0x8b1   : > { %v4168_v12 = vpop.f32.mrf.mxu0 }
 0x8b3   : > { %v2721_v13 = vpop.f32.mrf.mxu0 }
 0x8b5   : > { %v4169_v14 = vpop.f32.mrf.mxu0 }
 0x8c7   : > { %v2825_v16 = vpop.f32.mrf.mxu1 }
 0x8c8   : > { %v2831_v18 = vadd.f32 %v2825_v16, %v2719_v15 }
 0x8c9   : > { %v4188_v19 = vpop.f32.mrf.mxu1 }
 0x8ca   : > { %v2840_v20 = vadd.f32 %v3497_v17, %v2831_v18 }
 0x8cb   : > { %v2828_v21 = vpop.f32.mrf.mxu1 }
 0x8cc   : > { %vm2841_vm6 = vcmp.ge.f32.partialorder %v2840_v20, 0.0  ;;  %v2842_v22 = vmul.f32 0.1, %v2840_v20 }
 0x8cd   : > { %v4189_v23 = vpop.f32.mrf.mxu1 }
 0x8ce   : > { %v2843_v24 = vsel %vm2841_vm6, %v2840_v20, %v2842_v22 }
 0x8cf   : > { %2844 = vst [vmem:[#allocation8 + $0x1] sm:$0xff] %v2843_v24  ;;  %v2865_v26 = vpack.c.bf16 %v2843_v24, %v2843_v24 }
 0x8d1   : > { %4207 = vmatmul.mubr.bf16.vlgmr.msra.gmra.mxu0 %v2865_v26 }
 0x8d2   : > { %4231 = vmatpush3.bf16.msra.mxu0 %v4470_v25  ;;  %4246 = vmatprep.mubr.msk.bf16.mxu0 %vm4521_vm4, %v4698_v7 }
 0x8d3   : > { %4232 = vmatprep.subr.bf16.mxu0 %v4698_v7 }
 0x8d6   : > { %v2845_v28 = vld [vmem:[#allocation8] sm:$0xff]  ;;  %4233 = vmatpush3.bf16.msra.mxu0 %v4471_v27 }
 0x8d7   : > { %v2846_v30 = vpack.c.bf16 %v2845_v28, %v2845_v28  ;;  %4234 = vmatprep.subr.bf16.mxu0 %v4698_v7  ;;  %v3059_v36 = vld [vmem:[#allocation8 + $0x2] sm:$0xff] }
 0x8d8   : > { %v3060_v37 = vpack.c.bf16 %v3059_v36, %v3059_v36 }
 0x8d9   : > { %4227 = vmatmul.mubr.bf16.vlgmr.msra.gmra.mxu1 %v2846_v30 }
 0x8da   : > { %4235 = vmatpush3.bf16.msra.mxu0 %v4472_v29  ;;  %4252 = vmatprep.mubr.msk.bf16.mxu1 %vm4521_vm4, %v4698_v7 }
 0x8db   : > { %4236 = vmatprep.subr.bf16.mxu0 %v4698_v7 }
 0x8de   : > { %4237 = vmatpush3.bf16.msra.mxu0 %v4473_v31 }
 0x8df   : > { %4238 = vmatprep.subr.bf16.mxu0 %v4698_v7 }
 0x8e2   : > { %4239 = vmatpush3.bf16.msra.mxu0 %v4474_v32 }
 0x8e3   : > { %4240 = vmatprep.subr.bf16.mxu0 %v4698_v7 }
 0x8e6   : > { %4241 = vmatpush3.bf16.msra.mxu0 %v4475_v33 }
 0x8e7   : > { %4242 = vmatprep.subr.bf16.mxu0 %v4698_v7 }
 0x8ea   : > { %4243 = vmatpush3.bf16.msra.mxu0 %v4476_v34 }
 0x8eb   : > { %4244 = vmatprep.subr.bf16.mxu0 %v4698_v7 }
 0x8ee   : > { %4245 = vmatpush3.bf16.msra.mxu0 %v4477_v35 }
 0x8f1   : > { %4247 = vmatmul.mubr.bf16.vlgmr.msra.gmra.mxu0 %v3060_v37 }
 0x991   : > { %v2965_v38 = vpop.f32.mrf.mxu0 }
 0x993   : > { %v4208_v39 = vpop.f32.mrf.mxu0 }
 0x995   : > { %v2968_v41 = vpop.f32.mrf.mxu0 }
 0x997   : > { %v4209_v42 = vpop.f32.mrf.mxu0 }
 0x999   : > { %v3053_v43 = vpop.f32.mrf.mxu1 }
 0x99a   : > { %v3054_v48 = vadd.f32 %v3053_v43, %v2965_v38 }
 0x99b   : > { %v4228_v44 = vpop.f32.mrf.mxu1 }
 0x99d   : > { %v3056_v45 = vpop.f32.mrf.mxu1 }
 0x99f   : > { %v4229_v47 = vpop.f32.mrf.mxu1 }
 0x9b1   : > { %v3160_v49 = vpop.f32.mrf.mxu0 }
 0x9b2   : > { %v3166_v51 = vadd.f32 %v3160_v49, %v3054_v48 }
 0x9b3   : > { %v4248_v7 = vpop.f32.mrf.mxu0 }
 0x9b4   : > { %v3175_v52 = vadd.f32 %v3523_v50, %v3166_v51 }
 0x9b5   : > { %v3163_v53 = vpop.f32.mrf.mxu0 }
 0x9b6   : > { %vm3176_vm4 = vcmp.ge.f32.partialorder %v3175_v52, 0.0  ;;  %v3177_v54 = vmul.f32 0.1, %v3175_v52 }
 0x9b7   : > { %v4249_v55 = vpop.f32.mrf.mxu0 }
 0x9b8   : > { %v3178_v56 = vsel %vm3176_vm4, %v3175_v52, %v3177_v54 }
 0x9b9   : > { %3180 = vrot.lane.b32.xlu0 %v3178_v56, %s4522_s9 }
 0xa2b   : > { %v3181_v57 = vpop.permute.xlu0 %3180 }
 0xa2c   : > { %v3183_v58 = vmax.f32 %v3178_v56, %v3181_v57 }
 0xa2e   : > { %v3185_v59 = vrot.slane %v3183_v58, 1 }
 0xa30   : > { %v3188_v60 = vmax.f32 %v3183_v58, %v3185_v59 }
 0xa32   : > { %v3189_v61 = vpack.c.bf16 %v3188_v60, %v3188_v60 }
 0xa34   : > { %v3195_v62 = vsel %vm3193_vm7, %v3189_v61, 0 }
 0xa35   : > { %4251 = vmatpush3.bf16.msra.mxu1 %v3195_v62 }
 0xa38   : > { %4253 = vmatmul.mubr.msk.bf16.vlgmr.msra.gmra.mxu1 %vm3190_vm8, %v4749_v40 }
 0xaf8   : > { %v3231_v63 = vpop.f32.mrf.mxu1 }
 0xaf9   : > { %v3237_v0 = vpack.c.bf16 %v3231_v63, %v3231_v63 }
 0xafa   : > { %v4254_v1 = vpop.f32.mrf.mxu1 }
 0xafb   : > { %3238 = vst [vmem:[%s183_s21] sm:$0x3] %v3237_v0 }
 0xafc   : > { %v3234_v2 = vpop.f32.mrf.mxu1 }
 0xafe   : > { %v4255_v3 = vpop.f32.mrf.mxu1 }
 0xaff PF: > { %s14_s12 = sadd.s32 1, %s4515_s12  }
 0xb00   : > { %p11_p1 = scmp.ge.s32.totalorder %s14_s12, 4  }
 0xb02   :  { %13 = sbr.rel (!%p11_p1) target bundleno = 1 (0x1), region = 97 }
 0xb07   :  { %3258 = vsyncpa [#allocation10], 1 }
 0xb08   :  { %3260 = vsyncpa [#allocation10 + $0x1], 1 }

// kernel: model_forward.7
= control target key start
LH: loop header
LB: loop body
LE: loop exit
PB: predicated region body
PF: predicated region fallthrough
CT: control target
= control target key end

     0   :  { %s3845_s0 = inlined_call_operand.vmem [shape: bf16[8,256], index: 0, kind: input, shape index: {}]   ;;  %s3846_s1 = inlined_call_operand.vmem [shape: bf16[256,512], index: 1, kind: input, shape index: {}]   ;;  %s3847_s2 = inlined_call_operand.vmem [shape: f32[1,512], index: 2, kind: input, shape index: {}]   ;;  %s3848_s3 = inlined_call_operand.vmem [shape: bf16[512,512], index: 3, kind: input, shape index: {}]   ;;  %s3849_s4 = inlined_call_operand.vmem [shape: f32[1,512], index: 4, kind: input, shape index: {}]   ;;  %s3850_s5 = inlined_call_operand.vmem [shape: bf16[512,256], index: 5, kind: input, shape index: {}]   ;;  %s3851_s6 = inlined_call_operand.vmem [shape: f32[1,256], index: 6, kind: input, shape index: {}]   ;;  %s3852_s7 = inlined_call_operand.vmem [shape: bf16[256,128], index: 7, kind: input, shape index: {}]   ;;  %s3853_s8 = inlined_call_operand.vmem [shape: f32[1,128], index: 8, kind: input, shape index: {}]   ;;  %s3854_s9 = inlined_call_operand.hbm [shape: f32[8,128], index: 9, kind: output, shape index: {}]  }
   0x1   :  { %v2500_v0 = vld [vmem:[%s3846_s1 + $0xe4] ss:$16 sps:$4 sm:$0xff]   ;;  %v2502_v1 = vld [vmem:[%s3846_s1 + $0xec] ss:$16 sps:$4 sm:$0xff]   ;;  %v2504_v2 = vld [vmem:[%s3846_s1 + $0xe0] ss:$16 sps:$4 sm:$0xff]  }
   0x2   :  { %448 = vmatprep.subr.bf16.mxu0 %v2500_v0  ;;  %v2505_v3 = vld [vmem:[%s3846_s1 + $0xe8] ss:$16 sps:$4 sm:$0xff]   ;;  %489 = vmatprep.subr.bf16.mxu1 %v2502_v1  ;;  %v2506_v4 = vld [vmem:[%s3846_s1 + $0xc4] ss:$16 sps:$4 sm:$0xff]   ;;  %v2508_v5 = vld [vmem:[%s3846_s1 + $0xcc] ss:$16 sps:$4 sm:$0xff]  }
   0x3   :  { %449 = vmatpush1.bf16.msra.mxu0 %v2504_v2  ;;  %490 = vmatpush1.bf16.msra.mxu1 %v2505_v3  ;;  %v2510_v6 = vld [vmem:[%s3846_s1 + $0xc0] ss:$16 sps:$4 sm:$0xff]   ;;  %v2511_v7 = vld [vmem:[%s3846_s1 + $0xc8] ss:$16 sps:$4 sm:$0xff]   ;;  %v2512_v8 = vld [vmem:[%s3846_s1 + $0xa4] ss:$16 sps:$4 sm:$0xff]  }
   0x4   :  { %450 = vmatprep.subr.bf16.mxu0 %v2506_v4  ;;  %491 = vmatprep.subr.bf16.mxu1 %v2508_v5  ;;  %v2514_v9 = vld [vmem:[%s3846_s1 + $0xac] ss:$16 sps:$4 sm:$0xff]   ;;  %v2516_v10 = vld [vmem:[%s3846_s1 + $0xa0] ss:$16 sps:$4 sm:$0xff]   ;;  %v2517_v11 = vld [vmem:[%s3846_s1 + $0xa8] ss:$16 sps:$4 sm:$0xff]  }
   0x5   :  { %v2518_v12 = vld [vmem:[%s3846_s1 + $0x84] ss:$16 sps:$4 sm:$0xff]   ;;  %v2520_v13 = vld [vmem:[%s3846_s1 + $0x8c] ss:$16 sps:$4 sm:$0xff]   ;;  %v2522_v14 = vld [vmem:[%s3846_s1 + $0x80] ss:$16 sps:$4 sm:$0xff]  }
   0x6   :  { %v2523_v15 = vld [vmem:[%s3846_s1 + $0x88] ss:$16 sps:$4 sm:$0xff]   ;;  %v2524_v16 = vld [vmem:[%s3846_s1 + $0x64] ss:$16 sps:$4 sm:$0xff]   ;;  %v2526_v17 = vld [vmem:[%s3846_s1 + $0x6c] ss:$16 sps:$4 sm:$0xff]  }
   0x7   :  { %451 = vmatpush1.bf16.msra.mxu0 %v2510_v6  ;;  %492 = vmatpush1.bf16.msra.mxu1 %v2511_v7  ;;  %v2528_v18 = vld [vmem:[%s3846_s1 + $0x60] ss:$16 sps:$4 sm:$0xff]   ;;  %v2529_v19 = vld [vmem:[%s3846_s1 + $0x68] ss:$16 sps:$4 sm:$0xff]   ;;  %v2530_v20 = vld [vmem:[%s3846_s1 + $0x44] ss:$16 sps:$4 sm:$0xff]  }
   0x8   :  { %452 = vmatprep.subr.bf16.mxu0 %v2512_v8  ;;  %493 = vmatprep.subr.bf16.mxu1 %v2514_v9  ;;  %v2532_v21 = vld [vmem:[%s3846_s1 + $0x4c] ss:$16 sps:$4 sm:$0xff]   ;;  %v2534_v22 = vld [vmem:[%s3846_s1 + $0x40] ss:$16 sps:$4 sm:$0xff]   ;;  %v2535_v23 = vld [vmem:[%s3846_s1 + $0x48] ss:$16 sps:$4 sm:$0xff]  }
   0x9   :  { %v2536_v24 = vld [vmem:[%s3846_s1 + $0x24] ss:$16 sps:$4 sm:$0xff]   ;;  %v2538_v25 = vld [vmem:[%s3846_s1 + $0x2c] ss:$16 sps:$4 sm:$0xff]   ;;  %v2540_v26 = vld [vmem:[%s3846_s1 + $0x20] ss:$16 sps:$4 sm:$0xff]  }
   0xa   :  { %v2541_v27 = vld [vmem:[%s3846_s1 + $0x28] ss:$16 sps:$4 sm:$0xff]   ;;  %v2542_v28 = vld [vmem:[%s3846_s1 + $0x4] ss:$16 sps:$4 sm:$0xff]   ;;  %v2544_v29 = vld [vmem:[%s3846_s1 + $0xc] ss:$16 sps:$4 sm:$0xff]  }
   0xb   :  { %453 = vmatpush1.bf16.msra.mxu0 %v2516_v10  ;;  %494 = vmatpush1.bf16.msra.mxu1 %v2517_v11  ;;  %v2546_v30 = vld [vmem:[%s3846_s1] ss:$16 sps:$4 sm:$0xff]   ;;  %v2547_v31 = vld [vmem:[%s3846_s1 + $0x8] ss:$16 sps:$4 sm:$0xff]   ;;  %v2548_v32 = vld [vmem:[%s3846_s1 + $0x1e4] ss:$16 sps:$4 sm:$0xff]  }
   0xc   :  { %454 = vmatprep.subr.bf16.mxu0 %v2518_v12  ;;  %495 = vmatprep.subr.bf16.mxu1 %v2520_v13  ;;  %v2550_v33 = vld [vmem:[%s3846_s1 + $0x1ec] ss:$16 sps:$4 sm:$0xff]   ;;  %v2552_v34 = vld [vmem:[%s3846_s1 + $0x1e0] ss:$16 sps:$4 sm:$0xff]   ;;  %v2553_v35 = vld [vmem:[%s3846_s1 + $0x1e8] ss:$16 sps:$4 sm:$0xff]  }
   0xd   :  { %v2554_v36 = vld [vmem:[%s3846_s1 + $0x1c4] ss:$16 sps:$4 sm:$0xff]   ;;  %v2556_v37 = vld [vmem:[%s3846_s1 + $0x1cc] ss:$16 sps:$4 sm:$0xff]   ;;  %v2558_v38 = vld [vmem:[%s3846_s1 + $0x1c0] ss:$16 sps:$4 sm:$0xff]  }
   0xe   :  { %v2559_v39 = vld [vmem:[%s3846_s1 + $0x1c8] ss:$16 sps:$4 sm:$0xff]   ;;  %v2560_v40 = vld [vmem:[%s3846_s1 + $0x1a4] ss:$16 sps:$4 sm:$0xff]   ;;  %v2562_v41 = vld [vmem:[%s3846_s1 + $0x1ac] ss:$16 sps:$4 sm:$0xff]  }
   0xf   :  { %455 = vmatpush1.bf16.msra.mxu0 %v2522_v14  ;;  %496 = vmatpush1.bf16.msra.mxu1 %v2523_v15  ;;  %v2564_v42 = vld [vmem:[%s3846_s1 + $0x1a0] ss:$16 sps:$4 sm:$0xff]   ;;  %v2565_v43 = vld [vmem:[%s3846_s1 + $0x1a8] ss:$16 sps:$4 sm:$0xff]   ;;  %v2566_v44 = vld [vmem:[%s3846_s1 + $0x184] ss:$16 sps:$4 sm:$0xff]  }
  0x10   :  { %456 = vmatprep.subr.bf16.mxu0 %v2524_v16  ;;  %497 = vmatprep.subr.bf16.mxu1 %v2526_v17  ;;  %v2568_v45 = vld [vmem:[%s3846_s1 + $0x18c] ss:$16 sps:$4 sm:$0xff]   ;;  %v34_v46 = vld [vmem:[%s3845_s0] sm:$0xff]  ;;  %v2571_v49 = vld [vmem:[%s3846_s1 + $0x188] ss:$16 sps:$4 sm:$0xff]  }
  0x11   :  { %v2570_v47 = vld [vmem:[%s3846_s1 + $0x180] ss:$16 sps:$4 sm:$0xff]   ;;  %v2203_v48 = vcombine.high %v34_v46, %v34_v46  ;;  %v2572_v50 = vld [vmem:[%s3846_s1 + $0x164] ss:$16 sps:$4 sm:$0xff]   ;;  %v2574_v51 = vld [vmem:[%s3846_s1 + $0x16c] ss:$16 sps:$4 sm:$0xff]   ;;  %v2202_v4 = vcombine.low %v34_v46, %v34_v46 }
  0x12   :  { %v2576_v52 = vld [vmem:[%s3846_s1 + $0x160] ss:$16 sps:$4 sm:$0xff]   ;;  %v2577_v53 = vld [vmem:[%s3846_s1 + $0x168] ss:$16 sps:$4 sm:$0xff]   ;;  %v2578_v54 = vld [vmem:[%s3846_s1 + $0x144] ss:$16 sps:$4 sm:$0xff]  }
  0x13   :  { %457 = vmatpush1.bf16.msra.mxu0 %v2528_v18  ;;  %498 = vmatpush1.bf16.msra.mxu1 %v2529_v19  ;;  %v2580_v55 = vld [vmem:[%s3846_s1 + $0x14c] ss:$16 sps:$4 sm:$0xff]   ;;  %v2582_v56 = vld [vmem:[%s3846_s1 + $0x140] ss:$16 sps:$4 sm:$0xff]   ;;  %v2583_v57 = vld [vmem:[%s3846_s1 + $0x148] ss:$16 sps:$4 sm:$0xff]  }
  0x14   :  { %458 = vmatprep.subr.bf16.mxu0 %v2530_v20  ;;  %499 = vmatprep.subr.bf16.mxu1 %v2532_v21  ;;  %v2584_v58 = vld [vmem:[%s3846_s1 + $0x124] ss:$16 sps:$4 sm:$0xff]   ;;  %v2586_v59 = vld [vmem:[%s3846_s1 + $0x12c] ss:$16 sps:$4 sm:$0xff]   ;;  %v2588_v60 = vld [vmem:[%s3846_s1 + $0x120] ss:$16 sps:$4 sm:$0xff]  }
  0x15   :  { %480 = vmatprep.mubr.bf16.mxu0 %v2203_v48  ;;  %521 = vmatprep.mubr.bf16.mxu1 %v2203_v48  ;;  %v2589_v61 = vld [vmem:[%s3846_s1 + $0x128] ss:$16 sps:$4 sm:$0xff]   ;;  %v2590_v62 = vld [vmem:[%s3846_s1 + $0x104] ss:$16 sps:$4 sm:$0xff]   ;;  %v2592_v63 = vld [vmem:[%s3846_s1 + $0x10c] ss:$16 sps:$4 sm:$0xff]  }
  0x16   :  { %v2594_v0 = vld [vmem:[%s3846_s1 + $0x100] ss:$16 sps:$4 sm:$0xff]   ;;  %v2595_v1 = vld [vmem:[%s3846_s1 + $0x108] ss:$16 sps:$4 sm:$0xff]   ;;  %v2600_v2 = vld [vmem:[%s3848_s3 + $0xe4] ss:$16 sps:$4 sm:$0xff]  }
  0x17   :  { %459 = vmatpush1.bf16.msra.mxu0 %v2534_v22  ;;  %500 = vmatpush1.bf16.msra.mxu1 %v2535_v23  ;;  %v2603_v3 = vld [vmem:[%s3848_s3 + $0x2e4] ss:$16 sps:$4 sm:$0xff]   ;;  %v2598_v5 = vld [vmem:[%s3848_s3 + $0xe0] ss:$16 sps:$4 sm:$0xff]  }
  0x18   :  { %460 = vmatprep.subr.bf16.mxu0 %v2536_v24  ;;  %501 = vmatprep.subr.bf16.mxu1 %v2538_v25  ;;  %v2601_v6 = vld [vmem:[%s3848_s3 + $0x2e0] ss:$16 sps:$4 sm:$0xff]   ;;  %v2606_v7 = vld [vmem:[%s3848_s3 + $0xc4] ss:$16 sps:$4 sm:$0xff]  }
  0x19   :  { %v2609_v8 = vld [vmem:[%s3848_s3 + $0x2c4] ss:$16 sps:$4 sm:$0xff]   ;;  %v2604_v9 = vld [vmem:[%s3848_s3 + $0xc0] ss:$16 sps:$4 sm:$0xff]  }
  0x1a   :  { %v2607_v10 = vld [vmem:[%s3848_s3 + $0x2c0] ss:$16 sps:$4 sm:$0xff]   ;;  %v2612_v11 = vld [vmem:[%s3848_s3 + $0xa4] ss:$16 sps:$4 sm:$0xff]  }
  0x1b   :  { %461 = vmatpush1.bf16.msra.mxu0 %v2540_v26  ;;  %502 = vmatpush1.bf16.msra.mxu1 %v2541_v27  ;;  %v2615_v12 = vld [vmem:[%s3848_s3 + $0x2a4] ss:$16 sps:$4 sm:$0xff]   ;;  %v2610_v13 = vld [vmem:[%s3848_s3 + $0xa0] ss:$16 sps:$4 sm:$0xff]  }
  0x1c   :  { %462 = vmatprep.subr.bf16.mxu0 %v2542_v28  ;;  %503 = vmatprep.subr.bf16.mxu1 %v2544_v29  ;;  %v2613_v14 = vld [vmem:[%s3848_s3 + $0x2a0] ss:$16 sps:$4 sm:$0xff]   ;;  %v2618_v15 = vld [vmem:[%s3848_s3 + $0x84] ss:$16 sps:$4 sm:$0xff]  }
  0x1d   :  { %v2621_v16 = vld [vmem:[%s3848_s3 + $0x284] ss:$16 sps:$4 sm:$0xff]   ;;  %v2616_v17 = vld [vmem:[%s3848_s3 + $0x80] ss:$16 sps:$4 sm:$0xff]  }
  0x1e   :  { %v2619_v18 = vld [vmem:[%s3848_s3 + $0x280] ss:$16 sps:$4 sm:$0xff]   ;;  %v2624_v19 = vld [vmem:[%s3848_s3 + $0x64] ss:$16 sps:$4 sm:$0xff]  }
  0x1f   :  { %463 = vmatpush1.bf16.msra.mxu0 %v2546_v30  ;;  %504 = vmatpush1.bf16.msra.mxu1 %v2547_v31  ;;  %v2627_v20 = vld [vmem:[%s3848_s3 + $0x264] ss:$16 sps:$4 sm:$0xff]   ;;  %v2622_v21 = vld [vmem:[%s3848_s3 + $0x60] ss:$16 sps:$4 sm:$0xff]  }
  0x20   :  { %464 = vmatprep.subr.bf16.mxu0 %v2548_v32  ;;  %505 = vmatprep.subr.bf16.mxu1 %v2550_v33  ;;  %v2625_v22 = vld [vmem:[%s3848_s3 + $0x260] ss:$16 sps:$4 sm:$0xff]   ;;  %v2630_v23 = vld [vmem:[%s3848_s3 + $0x44] ss:$16 sps:$4 sm:$0xff]  }
  0x21   :  { %v2633_v24 = vld [vmem:[%s3848_s3 + $0x244] ss:$16 sps:$4 sm:$0xff]   ;;  %v2628_v25 = vld [vmem:[%s3848_s3 + $0x40] ss:$16 sps:$4 sm:$0xff]  }
  0x22   :  { %v2631_v26 = vld [vmem:[%s3848_s3 + $0x240] ss:$16 sps:$4 sm:$0xff]   ;;  %v2636_v27 = vld [vmem:[%s3848_s3 + $0x24] ss:$16 sps:$4 sm:$0xff]  }
  0x23   :  { %465 = vmatpush2.bf16.msra.mxu0 %v2552_v34  ;;  %506 = vmatpush2.bf16.msra.mxu1 %v2553_v35  ;;  %v2639_v28 = vld [vmem:[%s3848_s3 + $0x224] ss:$16 sps:$4 sm:$0xff]   ;;  %v2634_v29 = vld [vmem:[%s3848_s3 + $0x20] ss:$16 sps:$4 sm:$0xff]  }
  0x24   :  { %466 = vmatprep.subr.bf16.mxu0 %v2554_v36  ;;  %507 = vmatprep.subr.bf16.mxu1 %v2556_v37  ;;  %v2637_v30 = vld [vmem:[%s3848_s3 + $0x220] ss:$16 sps:$4 sm:$0xff]   ;;  %v2642_v31 = vld [vmem:[%s3848_s3 + $0x4] ss:$16 sps:$4 sm:$0xff]  }
  0x25   :  { %v2645_v32 = vld [vmem:[%s3848_s3 + $0x204] ss:$16 sps:$4 sm:$0xff]   ;;  %v2640_v33 = vld [vmem:[%s3848_s3] ss:$16 sps:$4 sm:$0xff]  }
  0x26   :  { %v2643_v34 = vld [vmem:[%s3848_s3 + $0x200] ss:$16 sps:$4 sm:$0xff]   ;;  %v2648_v35 = vld [vmem:[%s3848_s3 + $0x1e4] ss:$16 sps:$4 sm:$0xff]  }
  0x27   :  { %467 = vmatpush2.bf16.msra.mxu0 %v2558_v38  ;;  %508 = vmatpush2.bf16.msra.mxu1 %v2559_v39  ;;  %v2651_v36 = vld [vmem:[%s3848_s3 + $0x3e4] ss:$16 sps:$4 sm:$0xff]   ;;  %v2646_v37 = vld [vmem:[%s3848_s3 + $0x1e0] ss:$16 sps:$4 sm:$0xff]  }
  0x28   :  { %468 = vmatprep.subr.bf16.mxu0 %v2560_v40  ;;  %509 = vmatprep.subr.bf16.mxu1 %v2562_v41  ;;  %v2649_v38 = vld [vmem:[%s3848_s3 + $0x3e0] ss:$16 sps:$4 sm:$0xff]   ;;  %v2654_v39 = vld [vmem:[%s3848_s3 + $0x1c4] ss:$16 sps:$4 sm:$0xff]  }
  0x29   :  { %v2657_v40 = vld [vmem:[%s3848_s3 + $0x3c4] ss:$16 sps:$4 sm:$0xff]   ;;  %v2652_v41 = vld [vmem:[%s3848_s3 + $0x1c0] ss:$16 sps:$4 sm:$0xff]  }
  0x2a   :  { %v2661_v46 = vld [vmem:[%s3848_s3 + $0x3a0] ss:$16 sps:$4 sm:$0xff]   ;;  %v2669_v48 = vld [vmem:[%s3848_s3 + $0x384] ss:$16 sps:$4 sm:$0xff]  }
  0x2b   :  { %469 = vmatpush2.bf16.msra.mxu0 %v2564_v42  ;;  %510 = vmatpush2.bf16.msra.mxu1 %v2565_v43  ;;  %v2655_v42 = vld [vmem:[%s3848_s3 + $0x3c0] ss:$16 sps:$4 sm:$0xff]   ;;  %v2660_v43 = vld [vmem:[%s3848_s3 + $0x1a4] ss:$16 sps:$4 sm:$0xff]  }
  0x2c   :  { %470 = vmatprep.subr.bf16.mxu0 %v2566_v44  ;;  %511 = vmatprep.subr.bf16.mxu1 %v2568_v45  ;;  %v2663_v44 = vld [vmem:[%s3848_s3 + $0x3a4] ss:$16 sps:$4 sm:$0xff]   ;;  %v2658_v45 = vld [vmem:[%s3848_s3 + $0x1a0] ss:$16 sps:$4 sm:$0xff]  }
  0x2f   :  { %471 = vmatpush2.bf16.msra.mxu0 %v2570_v47  ;;  %512 = vmatpush2.bf16.msra.mxu1 %v2571_v49  ;;  %v2666_v47 = vld [vmem:[%s3848_s3 + $0x184] ss:$16 sps:$4 sm:$0xff]   ;;  %v2664_v49 = vld [vmem:[%s3848_s3 + $0x180] ss:$16 sps:$4 sm:$0xff]  }
  0x30   :  { %472 = vmatprep.subr.bf16.mxu0 %v2572_v50  ;;  %513 = vmatprep.subr.bf16.mxu1 %v2574_v51  ;;  %v2667_v50 = vld [vmem:[%s3848_s3 + $0x380] ss:$16 sps:$4 sm:$0xff]   ;;  %v2672_v51 = vld [vmem:[%s3848_s3 + $0x164] ss:$16 sps:$4 sm:$0xff]  }
  0x33   :  { %473 = vmatpush2.bf16.msra.mxu0 %v2576_v52  ;;  %514 = vmatpush2.bf16.msra.mxu1 %v2577_v53  ;;  %v2675_v52 = vld [vmem:[%s3848_s3 + $0x364] ss:$16 sps:$4 sm:$0xff]   ;;  %v2670_v53 = vld [vmem:[%s3848_s3 + $0x160] ss:$16 sps:$4 sm:$0xff]  }
  0x34   :  { %474 = vmatprep.subr.bf16.mxu0 %v2578_v54  ;;  %515 = vmatprep.subr.bf16.mxu1 %v2580_v55  ;;  %v2673_v54 = vld [vmem:[%s3848_s3 + $0x360] ss:$16 sps:$4 sm:$0xff]   ;;  %v2678_v55 = vld [vmem:[%s3848_s3 + $0x144] ss:$16 sps:$4 sm:$0xff]  }
  0x37   :  { %475 = vmatpush2.bf16.msra.mxu0 %v2582_v56  ;;  %516 = vmatpush2.bf16.msra.mxu1 %v2583_v57  ;;  %v2681_v56 = vld [vmem:[%s3848_s3 + $0x344] ss:$16 sps:$4 sm:$0xff]   ;;  %v2676_v57 = vld [vmem:[%s3848_s3 + $0x140] ss:$16 sps:$4 sm:$0xff]  }
  0x38   :  { %476 = vmatprep.subr.bf16.mxu0 %v2584_v58  ;;  %517 = vmatprep.subr.bf16.mxu1 %v2586_v59  ;;  %v2679_v58 = vld [vmem:[%s3848_s3 + $0x340] ss:$16 sps:$4 sm:$0xff]   ;;  %v2684_v59 = vld [vmem:[%s3848_s3 + $0x124] ss:$16 sps:$4 sm:$0xff]  }
  0x3b   :  { %477 = vmatpush2.bf16.msra.mxu0 %v2588_v60  ;;  %518 = vmatpush2.bf16.msra.mxu1 %v2589_v61  ;;  %v2687_v60 = vld [vmem:[%s3848_s3 + $0x324] ss:$16 sps:$4 sm:$0xff]   ;;  %v2682_v61 = vld [vmem:[%s3848_s3 + $0x120] ss:$16 sps:$4 sm:$0xff]  }
  0x3c   :  { %478 = vmatprep.subr.bf16.mxu0 %v2590_v62  ;;  %519 = vmatprep.subr.bf16.mxu1 %v2592_v63  ;;  %v2685_v62 = vld [vmem:[%s3848_s3 + $0x320] ss:$16 sps:$4 sm:$0xff]   ;;  %v2690_v63 = vld [vmem:[%s3848_s3 + $0x104] ss:$16 sps:$4 sm:$0xff]  }
  0x3f   :  { %479 = vmatpush2.bf16.msra.mxu0 %v2594_v0  ;;  %520 = vmatpush2.bf16.msra.mxu1 %v2595_v1  ;;  %v2693_v0 = vld [vmem:[%s3848_s3 + $0x304] ss:$16 sps:$4 sm:$0xff]   ;;  %v2688_v1 = vld [vmem:[%s3848_s3 + $0x100] ss:$16 sps:$4 sm:$0xff]  }
  0x40   :  { %1336 = vmatprep.subr.bf16.mxu0 %v2600_v2  ;;  %1377 = vmatprep.subr.bf16.mxu1 %v2603_v3  ;;  %v2691_v2 = vld [vmem:[%s3848_s3 + $0x300] ss:$16 sps:$4 sm:$0xff]  }
  0x42   :  { %481 = vmatmul.mubr.bf16.vlgmr.msra.gmra.mxu0 %v2202_v4  ;;  %522 = vmatmul.mubr.bf16.vlgmr.msra.gmra.mxu1 %v2202_v4 }
  0x43   :  { %1337 = vmatpush1.bf16.msra.mxu0 %v2598_v5  ;;  %1378 = vmatpush1.bf16.msra.mxu1 %v2601_v6 }
  0x44   :  { %1338 = vmatprep.subr.bf16.mxu0 %v2606_v7  ;;  %1379 = vmatprep.subr.bf16.mxu1 %v2609_v8 }
  0x47   :  { %1339 = vmatpush1.bf16.msra.mxu0 %v2604_v9  ;;  %1380 = vmatpush1.bf16.msra.mxu1 %v2607_v10 }
  0x48   :  { %1340 = vmatprep.subr.bf16.mxu0 %v2612_v11  ;;  %1381 = vmatprep.subr.bf16.mxu1 %v2615_v12 }
  0x4b   :  { %1341 = vmatpush1.bf16.msra.mxu0 %v2610_v13  ;;  %1382 = vmatpush1.bf16.msra.mxu1 %v2613_v14 }
  0x4c   :  { %1342 = vmatprep.subr.bf16.mxu0 %v2618_v15  ;;  %1383 = vmatprep.subr.bf16.mxu1 %v2621_v16 }
  0x4f   :  { %1343 = vmatpush1.bf16.msra.mxu0 %v2616_v17  ;;  %1384 = vmatpush1.bf16.msra.mxu1 %v2619_v18 }
  0x50   :  { %1344 = vmatprep.subr.bf16.mxu0 %v2624_v19  ;;  %1385 = vmatprep.subr.bf16.mxu1 %v2627_v20 }
  0x53   :  { %1345 = vmatpush1.bf16.msra.mxu0 %v2622_v21  ;;  %1386 = vmatpush1.bf16.msra.mxu1 %v2625_v22 }
  0x54   :  { %1346 = vmatprep.subr.bf16.mxu0 %v2630_v23  ;;  %1387 = vmatprep.subr.bf16.mxu1 %v2633_v24 }
  0x57   :  { %1347 = vmatpush1.bf16.msra.mxu0 %v2628_v25  ;;  %1388 = vmatpush1.bf16.msra.mxu1 %v2631_v26 }
  0x58   :  { %1348 = vmatprep.subr.bf16.mxu0 %v2636_v27  ;;  %1389 = vmatprep.subr.bf16.mxu1 %v2639_v28 }
  0x5b   :  { %1349 = vmatpush1.bf16.msra.mxu0 %v2634_v29  ;;  %1390 = vmatpush1.bf16.msra.mxu1 %v2637_v30 }
  0x5c   :  { %1350 = vmatprep.subr.bf16.mxu0 %v2642_v31  ;;  %1391 = vmatprep.subr.bf16.mxu1 %v2645_v32 }
  0x5f   :  { %1351 = vmatpush1.bf16.msra.mxu0 %v2640_v33  ;;  %1392 = vmatpush1.bf16.msra.mxu1 %v2643_v34 }
  0x60   :  { %1352 = vmatprep.subr.bf16.mxu0 %v2648_v35  ;;  %1393 = vmatprep.subr.bf16.mxu1 %v2651_v36 }
  0x63   :  { %1353 = vmatpush2.bf16.msra.mxu0 %v2646_v37  ;;  %1394 = vmatpush2.bf16.msra.mxu1 %v2649_v38 }
  0x64   :  { %1354 = vmatprep.subr.bf16.mxu0 %v2654_v39  ;;  %1395 = vmatprep.subr.bf16.mxu1 %v2657_v40 }
  0x67   :  { %1355 = vmatpush2.bf16.msra.mxu0 %v2652_v41  ;;  %1396 = vmatpush2.bf16.msra.mxu1 %v2655_v42 }
  0x68   :  { %1356 = vmatprep.subr.bf16.mxu0 %v2660_v43  ;;  %1397 = vmatprep.subr.bf16.mxu1 %v2663_v44 }
  0x6b   :  { %1357 = vmatpush2.bf16.msra.mxu0 %v2658_v45  ;;  %1398 = vmatpush2.bf16.msra.mxu1 %v2661_v46 }
  0x6c   :  { %1358 = vmatprep.subr.bf16.mxu0 %v2666_v47  ;;  %1399 = vmatprep.subr.bf16.mxu1 %v2669_v48 }
  0x6f   :  { %1359 = vmatpush2.bf16.msra.mxu0 %v2664_v49  ;;  %1400 = vmatpush2.bf16.msra.mxu1 %v2667_v50 }
  0x70   :  { %1360 = vmatprep.subr.bf16.mxu0 %v2672_v51  ;;  %1401 = vmatprep.subr.bf16.mxu1 %v2675_v52 }
  0x73   :  { %1361 = vmatpush2.bf16.msra.mxu0 %v2670_v53  ;;  %1402 = vmatpush2.bf16.msra.mxu1 %v2673_v54 }
  0x74   :  { %1362 = vmatprep.subr.bf16.mxu0 %v2678_v55  ;;  %1403 = vmatprep.subr.bf16.mxu1 %v2681_v56 }
  0x77   :  { %1363 = vmatpush2.bf16.msra.mxu0 %v2676_v57  ;;  %1404 = vmatpush2.bf16.msra.mxu1 %v2679_v58 }
  0x78   :  { %1364 = vmatprep.subr.bf16.mxu0 %v2684_v59  ;;  %1405 = vmatprep.subr.bf16.mxu1 %v2687_v60 }
  0x7b   :  { %1365 = vmatpush2.bf16.msra.mxu0 %v2682_v61  ;;  %1406 = vmatpush2.bf16.msra.mxu1 %v2685_v62 }
  0x7c   :  { %1366 = vmatprep.subr.bf16.mxu0 %v2690_v63  ;;  %1407 = vmatprep.subr.bf16.mxu1 %v2693_v0 }
  0x7f   :  { %1367 = vmatpush2.bf16.msra.mxu0 %v2688_v1  ;;  %1408 = vmatpush2.bf16.msra.mxu1 %v2691_v2 }
  0x80   :  { %14 = vsyncpa [#allocation3], 0  ;;  %v2696_v3 = vld [vmem:[%s3848_s3 + $0xec] ss:$16 sps:$4 sm:$0xff]   ;;  %v101_v5 = vlaneseq  ;;  %v99_v9 = vld [vmem:[%s3847_s2] sm:$0xf] }
  0x81   :  { %v2699_v4 = vld [vmem:[%s3848_s3 + $0x2ec] ss:$16 sps:$4 sm:$0xff]   ;;  %1418 = vmatprep.subr.bf16.mxu0 %v2696_v3  ;;  %v2694_v37 = vld [vmem:[%s3848_s3 + $0xe8] ss:$16 sps:$4 sm:$0xff]   ;;  %s2928_s1 = smov [#allocation2]  }
  0x82   :  { %1459 = vmatprep.subr.bf16.mxu1 %v2699_v4  ;;  %v3372_v6 = vshrl.u32 %v101_v5, 7  ;;  %v2697_v40 = vld [vmem:[%s3848_s3 + $0x2e8] ss:$16 sps:$4 sm:$0xff]   ;;  %v2702_v42 = vld [vmem:[%s3848_s3 + $0xcc] ss:$16 sps:$4 sm:$0xff]   ;;  %s2194_s19 = sshll.u32 %s2928_s1, 4  ;;  %s2195_s19 = int_to_ptr.vmem [resolvable:$true] %s2194_s19 }
  0x83   :  { %v2705_v43 = vld [vmem:[%s3848_s3 + $0x2cc] ss:$16 sps:$4 sm:$0xff]   ;;  %v2700_v44 = vld [vmem:[%s3848_s3 + $0xc8] ss:$16 sps:$4 sm:$0xff]   ;;  %p2911_p1 = scmp.lt.s32.totalorder %s2195_s19, %s2195_s19 }
  0x84   :  { %v3375_v7 = vsub.s32 0, %v3372_v6  ;;  %v111_v8 = vsub.s32 2, %v3372_v6  ;;  %v3382_v10 = vsub.s32 1, %v3372_v6  ;;  %v115_v11 = vsub.s32 3, %v3372_v6  ;;  %v2703_v45 = vld [vmem:[%s3848_s3 + $0x2c8] ss:$16 sps:$4 sm:$0xff]  }
  0x85   :  { %v2708_v46 = vld [vmem:[%s3848_s3 + $0xac] ss:$16 sps:$4 sm:$0xff]   ;;  %v2706_v48 = vld [vmem:[%s3848_s3 + $0xa8] ss:$16 sps:$4 sm:$0xff]  }
  0x86   :  { %v104_v12 = vrot.slane %v99_v9, %v3375_v7  ;;  %v112_v13 = vrot.slane %v99_v9, %v111_v8  ;;  %v108_v16 = vrot.slane %v99_v9, %v3382_v10  ;;  %v116_v17 = vrot.slane %v99_v9, %v115_v11  ;;  %v2711_v47 = vld [vmem:[%s3848_s3 + $0x2ac] ss:$16 sps:$4 sm:$0xff]   ;;  %v2709_v49 = vld [vmem:[%s3848_s3 + $0x2a8] ss:$16 sps:$4 sm:$0xff]  }
  0x87   :  { %v2714_v50 = vld [vmem:[%s3848_s3 + $0x8c] ss:$16 sps:$4 sm:$0xff]   ;;  %v2712_v52 = vld [vmem:[%s3848_s3 + $0x88] ss:$16 sps:$4 sm:$0xff]  }
  0x88   :  { %v2717_v51 = vld [vmem:[%s3848_s3 + $0x28c] ss:$16 sps:$4 sm:$0xff]   ;;  %v2715_v53 = vld [vmem:[%s3848_s3 + $0x288] ss:$16 sps:$4 sm:$0xff]  }
  0x89   :  { %v2720_v54 = vld [vmem:[%s3848_s3 + $0x6c] ss:$16 sps:$4 sm:$0xff]   ;;  %v2718_v56 = vld [vmem:[%s3848_s3 + $0x68] ss:$16 sps:$4 sm:$0xff]  }
  0x8a   :  { %v2723_v55 = vld [vmem:[%s3848_s3 + $0x26c] ss:$16 sps:$4 sm:$0xff]   ;;  %v2721_v57 = vld [vmem:[%s3848_s3 + $0x268] ss:$16 sps:$4 sm:$0xff]  }
  0x8b   :  { %v2726_v58 = vld [vmem:[%s3848_s3 + $0x4c] ss:$16 sps:$4 sm:$0xff]   ;;  %v2724_v60 = vld [vmem:[%s3848_s3 + $0x48] ss:$16 sps:$4 sm:$0xff]  }
  0x8c   :  { %v2729_v59 = vld [vmem:[%s3848_s3 + $0x24c] ss:$16 sps:$4 sm:$0xff]   ;;  %v2727_v61 = vld [vmem:[%s3848_s3 + $0x248] ss:$16 sps:$4 sm:$0xff]  }
  0x8d   :  { %v2732_v62 = vld [vmem:[%s3848_s3 + $0x2c] ss:$16 sps:$4 sm:$0xff]   ;;  %v2730_v0 = vld [vmem:[%s3848_s3 + $0x28] ss:$16 sps:$4 sm:$0xff]  }
  0x8e   :  { %v2735_v63 = vld [vmem:[%s3848_s3 + $0x22c] ss:$16 sps:$4 sm:$0xff]   ;;  %v2733_v1 = vld [vmem:[%s3848_s3 + $0x228] ss:$16 sps:$4 sm:$0xff]  }
  0x8f   :  { %v2738_v2 = vld [vmem:[%s3848_s3 + $0xc] ss:$16 sps:$4 sm:$0xff]   ;;  %v2736_v4 = vld [vmem:[%s3848_s3 + $0x8] ss:$16 sps:$4 sm:$0xff]  }
  0x90   :  { %v2741_v3 = vld [vmem:[%s3848_s3 + $0x20c] ss:$16 sps:$4 sm:$0xff]   ;;  %v2739_v5 = vld [vmem:[%s3848_s3 + $0x208] ss:$16 sps:$4 sm:$0xff]  }
  0x91   :  { %v2744_v9 = vld [vmem:[%s3848_s3 + $0x1ec] ss:$16 sps:$4 sm:$0xff]  }
 0x102   :  { %v482_v14 = vpop.f32.mrf.mxu0  ;;  %v523_v15 = vpop.f32.mrf.mxu1 }
 0x103   :  { %v483_v18 = vadd.f32 %v482_v14, %v104_v12  ;;  %v524_v19 = vadd.f32 %v523_v15, %v112_v13  ;;  %v2747_v12 = vld [vmem:[%s3848_s3 + $0x3ec] ss:$16 sps:$4 sm:$0xff]   ;;  %v2742_v13 = vld [vmem:[%s3848_s3 + $0x1e8] ss:$16 sps:$4 sm:$0xff]  }
 0x104   :  { %v484_v20 = vpop.f32.mrf.mxu0  ;;  %v525_v21 = vpop.f32.mrf.mxu1  ;;  %v2745_v14 = vld [vmem:[%s3848_s3 + $0x3e8] ss:$16 sps:$4 sm:$0xff]   ;;  %v2750_v15 = vld [vmem:[%s3848_s3 + $0x1cc] ss:$16 sps:$4 sm:$0xff]  }
 0x105   :  { %v534_v22 = vmul.f32 0.1, %v483_v18  ;;  %vm530_vm0 = vcmp.ge.f32.partialorder %v483_v18, 0.0  ;;  %v536_v23 = vmul.f32 0.1, %v524_v19  ;;  %v485_v24 = vadd.f32 %v484_v20, %v108_v16 }
 0x106   :  { %v526_v25 = vadd.f32 %v525_v21, %v116_v17  ;;  %v486_v26 = vpop.f32.mrf.mxu0  ;;  %v527_v27 = vpop.f32.mrf.mxu1  ;;  %vm532_vm1 = vcmp.ge.f32.partialorder %v524_v19, 0.0  ;;  %v2753_v16 = vld [vmem:[%s3848_s3 + $0x3cc] ss:$16 sps:$4 sm:$0xff]   ;;  %v2748_v17 = vld [vmem:[%s3848_s3 + $0x1c8] ss:$16 sps:$4 sm:$0xff]  }
 0x107   :  { %vm531_vm2 = vcmp.ge.f32.partialorder %v485_v24, 0.0  ;;  %v535_v28 = vmul.f32 0.1, %v485_v24  ;;  %v538_v31 = vsel %vm530_vm0, %v483_v18, %v534_v22  ;;  %v540_v33 = vsel %vm532_vm1, %v524_v19, %v536_v23  ;;  %v2751_v18 = vld [vmem:[%s3848_s3 + $0x3c8] ss:$16 sps:$4 sm:$0xff]  }
 0x108   :  { %v487_v29 = vpop.f32.mrf.mxu0  ;;  %v528_v30 = vpop.f32.mrf.mxu1  ;;  %vm533_vm3 = vcmp.ge.f32.partialorder %v526_v25, 0.0  ;;  %v537_v32 = vmul.f32 0.1, %v526_v25  ;;  %v3394_v38 = vpack.c.bf16 %v538_v31, %v538_v31  ;;  %v3399_v41 = vpack.c.bf16 %v540_v33, %v540_v33  ;;  %v2756_v19 = vld [vmem:[%s3848_s3 + $0x1ac] ss:$16 sps:$4 sm:$0xff]  }
 0x109   :  { %v539_v34 = vsel %vm531_vm2, %v485_v24, %v535_v28  ;;  %v2759_v20 = vld [vmem:[%s3848_s3 + $0x3ac] ss:$16 sps:$4 sm:$0xff]   ;;  %v2754_v21 = vld [vmem:[%s3848_s3 + $0x1a8] ss:$16 sps:$4 sm:$0xff]  }
 0x10a   :  { %v543_v35 = vpack.c.bf16 %v539_v34, %v539_v34  ;;  %v541_v36 = vsel %vm533_vm3, %v526_v25, %v537_v32  ;;  %v2757_v22 = vld [vmem:[%s3848_s3 + $0x3a8] ss:$16 sps:$4 sm:$0xff]   ;;  %v2762_v23 = vld [vmem:[%s3848_s3 + $0x18c] ss:$16 sps:$4 sm:$0xff]  }
 0x10b   :  { %v545_v39 = vpack.c.bf16 %v541_v36, %v541_v36  ;;  %v2765_v24 = vld [vmem:[%s3848_s3 + $0x38c] ss:$16 sps:$4 sm:$0xff]   ;;  %v2760_v25 = vld [vmem:[%s3848_s3 + $0x188] ss:$16 sps:$4 sm:$0xff]  }
 0x10c   :  { %1368 = vmatprep.mubr.bf16.mxu0 %v543_v35  ;;  %v2763_v26 = vld [vmem:[%s3848_s3 + $0x388] ss:$16 sps:$4 sm:$0xff]   ;;  %v2768_v27 = vld [vmem:[%s3848_s3 + $0x16c] ss:$16 sps:$4 sm:$0xff]  }
 0x10d   :  { %1409 = vmatprep.mubr.bf16.mxu1 %v545_v39  ;;  %1369 = vmatmul.mubr.bf16.vlgmr.msra.gmra.mxu0 %v3394_v38  ;;  %v2771_v28 = vld [vmem:[%s3848_s3 + $0x36c] ss:$16 sps:$4 sm:$0xff]   ;;  %v2766_v29 = vld [vmem:[%s3848_s3 + $0x168] ss:$16 sps:$4 sm:$0xff]  }
 0x10e   :  { %1410 = vmatmul.mubr.bf16.vlgmr.msra.gmra.mxu1 %v3399_v41  ;;  %1419 = vmatpush1.bf16.msra.mxu0 %v2694_v37  ;;  %v2769_v30 = vld [vmem:[%s3848_s3 + $0x368] ss:$16 sps:$4 sm:$0xff]   ;;  %v2774_v31 = vld [vmem:[%s3848_s3 + $0x14c] ss:$16 sps:$4 sm:$0xff]  }
 0x10f   :  { %1460 = vmatpush1.bf16.msra.mxu1 %v2697_v40  ;;  %1450 = vmatprep.mubr.bf16.mxu0 %v543_v35  ;;  %v2777_v32 = vld [vmem:[%s3848_s3 + $0x34c] ss:$16 sps:$4 sm:$0xff]   ;;  %v2772_v33 = vld [vmem:[%s3848_s3 + $0x148] ss:$16 sps:$4 sm:$0xff]  }
 0x110   :  { %1491 = vmatprep.mubr.bf16.mxu1 %v545_v39  ;;  %1420 = vmatprep.subr.bf16.mxu0 %v2702_v42  ;;  %v2775_v34 = vld [vmem:[%s3848_s3 + $0x348] ss:$16 sps:$4 sm:$0xff]   ;;  %v2780_v35 = vld [vmem:[%s3848_s3 + $0x12c] ss:$16 sps:$4 sm:$0xff]  }
 0x111   :  { %1461 = vmatprep.subr.bf16.mxu1 %v2705_v43  ;;  %v2783_v36 = vld [vmem:[%s3848_s3 + $0x32c] ss:$16 sps:$4 sm:$0xff]   ;;  %v2778_v37 = vld [vmem:[%s3848_s3 + $0x128] ss:$16 sps:$4 sm:$0xff]  }
 0x112   :  { %1421 = vmatpush1.bf16.msra.mxu0 %v2700_v44  ;;  %v2781_v39 = vld [vmem:[%s3848_s3 + $0x328] ss:$16 sps:$4 sm:$0xff]   ;;  %v2786_v40 = vld [vmem:[%s3848_s3 + $0x10c] ss:$16 sps:$4 sm:$0xff]  }
 0x113   :  { %1462 = vmatpush1.bf16.msra.mxu1 %v2703_v45  ;;  %1422 = vmatprep.subr.bf16.mxu0 %v2708_v46  ;;  %v2789_v42 = vld [vmem:[%s3848_s3 + $0x30c] ss:$16 sps:$4 sm:$0xff]   ;;  %v2784_v43 = vld [vmem:[%s3848_s3 + $0x108] ss:$16 sps:$4 sm:$0xff]  }
 0x114   :  { %1463 = vmatprep.subr.bf16.mxu1 %v2711_v47  ;;  %v2787_v44 = vld [vmem:[%s3848_s3 + $0x308] ss:$16 sps:$4 sm:$0xff]   ;;  %v2792_v45 = vld [vmem:[%s3850_s5 + $0x74] ss:$8 sps:$4 sm:$0xff]   ;;  %v2795_v47 = vld [vmem:[%s3850_s5 + $0x64] ss:$8 sps:$4 sm:$0xff]  }
 0x115   :  { %v2790_v46 = vld [vmem:[%s3850_s5 + $0x70] ss:$8 sps:$4 sm:$0xff]  }
 0x116   :  { %1423 = vmatpush1.bf16.msra.mxu0 %v2706_v48  ;;  %v2793_v48 = vld [vmem:[%s3850_s5 + $0x60] ss:$8 sps:$4 sm:$0xff]  }
 0x117   :  { %1464 = vmatpush1.bf16.msra.mxu1 %v2709_v49  ;;  %1424 = vmatprep.subr.bf16.mxu0 %v2714_v50  ;;  %v2798_v49 = vld [vmem:[%s3850_s5 + $0x54] ss:$8 sps:$4 sm:$0xff]   ;;  %v2796_v50 = vld [vmem:[%s3850_s5 + $0x50] ss:$8 sps:$4 sm:$0xff]  }
 0x118   :  { %1465 = vmatprep.subr.bf16.mxu1 %v2717_v51  ;;  %v2804_v51 = vld [vmem:[%s3850_s5 + $0x34] ss:$8 sps:$4 sm:$0xff]  }
 0x11a   :  { %1425 = vmatpush1.bf16.msra.mxu0 %v2712_v52  ;;  %v2838_v52 = vld [vmem:[%s3850_s5 + $0x170] ss:$8 sps:$4 sm:$0xff]  }
 0x11b   :  { %1466 = vmatpush1.bf16.msra.mxu1 %v2715_v53  ;;  %1426 = vmatprep.subr.bf16.mxu0 %v2720_v54  ;;  %v2840_v53 = vld [vmem:[%s3850_s5 + $0x174] ss:$8 sps:$4 sm:$0xff]   ;;  %v2802_v54 = vld [vmem:[%s3850_s5 + $0x30] ss:$8 sps:$4 sm:$0xff]  }
 0x11c   :  { %1467 = vmatprep.subr.bf16.mxu1 %v2723_v55  ;;  %v2843_v55 = vld [vmem:[%s3850_s5 + $0x164] ss:$8 sps:$4 sm:$0xff]  }
 0x11e   :  { %1427 = vmatpush1.bf16.msra.mxu0 %v2718_v56  ;;  %v2807_v56 = vld [vmem:[%s3850_s5 + $0x24] ss:$8 sps:$4 sm:$0xff]  }
 0x11f   :  { %1468 = vmatpush1.bf16.msra.mxu1 %v2721_v57  ;;  %1428 = vmatprep.subr.bf16.mxu0 %v2726_v58  ;;  %v2841_v57 = vld [vmem:[%s3850_s5 + $0x160] ss:$8 sps:$4 sm:$0xff]   ;;  %v2846_v58 = vld [vmem:[%s3850_s5 + $0x154] ss:$8 sps:$4 sm:$0xff]  }
 0x120   :  { %1469 = vmatprep.subr.bf16.mxu1 %v2729_v59  ;;  %v2805_v59 = vld [vmem:[%s3850_s5 + $0x20] ss:$8 sps:$4 sm:$0xff]  }
 0x122   :  { %1429 = vmatpush1.bf16.msra.mxu0 %v2724_v60  ;;  %v2810_v60 = vld [vmem:[%s3850_s5 + $0x14] ss:$8 sps:$4 sm:$0xff]  }
 0x123   :  { %1470 = vmatpush1.bf16.msra.mxu1 %v2727_v61  ;;  %1430 = vmatprep.subr.bf16.mxu0 %v2732_v62  ;;  %v2844_v61 = vld [vmem:[%s3850_s5 + $0x150] ss:$8 sps:$4 sm:$0xff]   ;;  %v2849_v62 = vld [vmem:[%s3850_s5 + $0x144] ss:$8 sps:$4 sm:$0xff]  }
 0x124   :  { %1471 = vmatprep.subr.bf16.mxu1 %v2735_v63  ;;  %v2808_v63 = vld [vmem:[%s3850_s5 + $0x10] ss:$8 sps:$4 sm:$0xff]  }
 0x126   :  { %1431 = vmatpush1.bf16.msra.mxu0 %v2730_v0  ;;  %v2813_v0 = vld [vmem:[%s3850_s5 + $0x4] ss:$8 sps:$4 sm:$0xff]  }
 0x127   :  { %1472 = vmatpush1.bf16.msra.mxu1 %v2733_v1  ;;  %1432 = vmatprep.subr.bf16.mxu0 %v2738_v2  ;;  %v2847_v1 = vld [vmem:[%s3850_s5 + $0x140] ss:$8 sps:$4 sm:$0xff]   ;;  %v2852_v2 = vld [vmem:[%s3850_s5 + $0x134] ss:$8 sps:$4 sm:$0xff]  }
 0x128   :  { %1473 = vmatprep.subr.bf16.mxu1 %v2741_v3  ;;  %v2811_v3 = vld [vmem:[%s3850_s5] ss:$8 sps:$4 sm:$0xff]  }
 0x12a   :  { %1433 = vmatpush1.bf16.msra.mxu0 %v2736_v4  ;;  %v2816_v4 = vld [vmem:[%s3850_s5 + $0xf4] ss:$8 sps:$4 sm:$0xff]  }
 0x12b   :  { %1474 = vmatpush1.bf16.msra.mxu1 %v2739_v5  ;;  %1434 = vmatprep.subr.bf16.mxu0 %v2744_v9  ;;  %v2850_v5 = vld [vmem:[%s3850_s5 + $0x130] ss:$8 sps:$4 sm:$0xff]   ;;  %v2855_v9 = vld [vmem:[%s3850_s5 + $0x124] ss:$8 sps:$4 sm:$0xff]  }
 0x12c   :  { %1475 = vmatprep.subr.bf16.mxu1 %v2747_v12  ;;  %v2814_v12 = vld [vmem:[%s3850_s5 + $0xf0] ss:$8 sps:$4 sm:$0xff]  }
 0x12e   :  { %1435 = vmatpush2.bf16.msra.mxu0 %v2742_v13  ;;  %v2819_v13 = vld [vmem:[%s3850_s5 + $0xe4] ss:$8 sps:$4 sm:$0xff]  }
 0x12f   :  { %1476 = vmatpush2.bf16.msra.mxu1 %v2745_v14  ;;  %1436 = vmatprep.subr.bf16.mxu0 %v2750_v15  ;;  %v2853_v14 = vld [vmem:[%s3850_s5 + $0x120] ss:$8 sps:$4 sm:$0xff]   ;;  %v2858_v15 = vld [vmem:[%s3850_s5 + $0x114] ss:$8 sps:$4 sm:$0xff]  }
 0x130   :  { %1477 = vmatprep.subr.bf16.mxu1 %v2753_v16  ;;  %v2817_v16 = vld [vmem:[%s3850_s5 + $0xe0] ss:$8 sps:$4 sm:$0xff]  }
 0x132   :  { %1437 = vmatpush2.bf16.msra.mxu0 %v2748_v17  ;;  %v2822_v17 = vld [vmem:[%s3850_s5 + $0xd4] ss:$8 sps:$4 sm:$0xff]  }
 0x133   :  { %1478 = vmatpush2.bf16.msra.mxu1 %v2751_v18  ;;  %1438 = vmatprep.subr.bf16.mxu0 %v2756_v19  ;;  %v2856_v18 = vld [vmem:[%s3850_s5 + $0x110] ss:$8 sps:$4 sm:$0xff]   ;;  %v2861_v19 = vld [vmem:[%s3850_s5 + $0x104] ss:$8 sps:$4 sm:$0xff]  }
 0x134   :  { %1479 = vmatprep.subr.bf16.mxu1 %v2759_v20  ;;  %v2820_v20 = vld [vmem:[%s3850_s5 + $0xd0] ss:$8 sps:$4 sm:$0xff]  }
 0x136   :  { %1439 = vmatpush2.bf16.msra.mxu0 %v2754_v21  ;;  %v2825_v21 = vld [vmem:[%s3850_s5 + $0xc4] ss:$8 sps:$4 sm:$0xff]  }
 0x137   :  { %1480 = vmatpush2.bf16.msra.mxu1 %v2757_v22  ;;  %1440 = vmatprep.subr.bf16.mxu0 %v2762_v23  ;;  %v2859_v22 = vld [vmem:[%s3850_s5 + $0x100] ss:$8 sps:$4 sm:$0xff]   ;;  %v2864_v23 = vld [vmem:[%s3850_s5 + $0x1f4] ss:$8 sps:$4 sm:$0xff]  }
 0x138   :  { %1481 = vmatprep.subr.bf16.mxu1 %v2765_v24  ;;  %v2823_v24 = vld [vmem:[%s3850_s5 + $0xc0] ss:$8 sps:$4 sm:$0xff]  }
 0x13a   :  { %1441 = vmatpush2.bf16.msra.mxu0 %v2760_v25  ;;  %v2828_v25 = vld [vmem:[%s3850_s5 + $0xb4] ss:$8 sps:$4 sm:$0xff]  }
 0x13b   :  { %1482 = vmatpush2.bf16.msra.mxu1 %v2763_v26  ;;  %1442 = vmatprep.subr.bf16.mxu0 %v2768_v27  ;;  %v2862_v26 = vld [vmem:[%s3850_s5 + $0x1f0] ss:$8 sps:$4 sm:$0xff]   ;;  %v2867_v27 = vld [vmem:[%s3850_s5 + $0x1e4] ss:$8 sps:$4 sm:$0xff]  }
 0x13c   :  { %1483 = vmatprep.subr.bf16.mxu1 %v2771_v28  ;;  %v2826_v28 = vld [vmem:[%s3850_s5 + $0xb0] ss:$8 sps:$4 sm:$0xff]  }
 0x13e   :  { %1443 = vmatpush2.bf16.msra.mxu0 %v2766_v29  ;;  %v2831_v29 = vld [vmem:[%s3850_s5 + $0xa4] ss:$8 sps:$4 sm:$0xff]  }
 0x13f   :  { %1484 = vmatpush2.bf16.msra.mxu1 %v2769_v30  ;;  %1444 = vmatprep.subr.bf16.mxu0 %v2774_v31  ;;  %v2865_v30 = vld [vmem:[%s3850_s5 + $0x1e0] ss:$8 sps:$4 sm:$0xff]   ;;  %v2870_v31 = vld [vmem:[%s3850_s5 + $0x1d4] ss:$8 sps:$4 sm:$0xff]  }
 0x140   :  { %1485 = vmatprep.subr.bf16.mxu1 %v2777_v32  ;;  %v2829_v32 = vld [vmem:[%s3850_s5 + $0xa0] ss:$8 sps:$4 sm:$0xff]  }
 0x142   :  { %1445 = vmatpush2.bf16.msra.mxu0 %v2772_v33  ;;  %v2834_v33 = vld [vmem:[%s3850_s5 + $0x94] ss:$8 sps:$4 sm:$0xff]  }
 0x143   :  { %1486 = vmatpush2.bf16.msra.mxu1 %v2775_v34  ;;  %1446 = vmatprep.subr.bf16.mxu0 %v2780_v35  ;;  %v2868_v34 = vld [vmem:[%s3850_s5 + $0x1d0] ss:$8 sps:$4 sm:$0xff]   ;;  %v2873_v35 = vld [vmem:[%s3850_s5 + $0x1c4] ss:$8 sps:$4 sm:$0xff]  }
 0x144   :  { %1487 = vmatprep.subr.bf16.mxu1 %v2783_v36  ;;  %v2832_v36 = vld [vmem:[%s3850_s5 + $0x90] ss:$8 sps:$4 sm:$0xff]  }
 0x146   :  { %1447 = vmatpush2.bf16.msra.mxu0 %v2778_v37  ;;  %v2837_v37 = vld [vmem:[%s3850_s5 + $0x84] ss:$8 sps:$4 sm:$0xff]  }
 0x147   :  { %1488 = vmatpush2.bf16.msra.mxu1 %v2781_v39  ;;  %1448 = vmatprep.subr.bf16.mxu0 %v2786_v40  ;;  %v2871_v39 = vld [vmem:[%s3850_s5 + $0x1c0] ss:$8 sps:$4 sm:$0xff]   ;;  %v2876_v40 = vld [vmem:[%s3850_s5 + $0x1b4] ss:$8 sps:$4 sm:$0xff]  }
 0x148   :  { %1489 = vmatprep.subr.bf16.mxu1 %v2789_v42  ;;  %v2835_v42 = vld [vmem:[%s3850_s5 + $0x80] ss:$8 sps:$4 sm:$0xff]  }
 0x14a   :  { %1449 = vmatpush2.bf16.msra.mxu0 %v2784_v43  ;;  %v2874_v43 = vld [vmem:[%s3850_s5 + $0x1b0] ss:$8 sps:$4 sm:$0xff]  }
 0x14b   :  { %1490 = vmatpush2.bf16.msra.mxu1 %v2787_v44  ;;  %1912 = vmatprep.subr.bf16.mxu0 %v2792_v45  ;;  %v2879_v44 = vld [vmem:[%s3850_s5 + $0x1a4] ss:$8 sps:$4 sm:$0xff]   ;;  %v2877_v45 = vld [vmem:[%s3850_s5 + $0x1a0] ss:$8 sps:$4 sm:$0xff]  }
 0x14c   :  { %1953 = vmatprep.subr.bf16.mxu1 %v2840_v53 }
 0x14d   :  { %1451 = vmatmul.mubr.bf16.vlgmr.msra.gmra.mxu0 %v3394_v38  ;;  %v2801_v38 = vld [vmem:[%s3850_s5 + $0x44] ss:$8 sps:$4 sm:$0xff]  }
 0x14e   :  { %1492 = vmatmul.mubr.bf16.vlgmr.msra.gmra.mxu1 %v3399_v41  ;;  %1913 = vmatpush1.bf16.msra.mxu0 %v2790_v46  ;;  %v2799_v41 = vld [vmem:[%s3850_s5 + $0x40] ss:$8 sps:$4 sm:$0xff]   ;;  %v2882_v46 = vld [vmem:[%s3850_s5 + $0x194] ss:$8 sps:$4 sm:$0xff]  }
 0x14f   :  { %1914 = vmatprep.subr.bf16.mxu0 %v2795_v47  ;;  %1954 = vmatpush1.bf16.msra.mxu1 %v2838_v52  ;;  %v2880_v47 = vld [vmem:[%s3850_s5 + $0x190] ss:$8 sps:$4 sm:$0xff]  }
 0x150   :  { %1955 = vmatprep.subr.bf16.mxu1 %v2843_v55 }
 0x152   :  { %1915 = vmatpush1.bf16.msra.mxu0 %v2793_v48  ;;  %v2883_v48 = vld [vmem:[%s3850_s5 + $0x180] ss:$8 sps:$4 sm:$0xff]  }
 0x153   :  { %1916 = vmatprep.subr.bf16.mxu0 %v2798_v49  ;;  %1956 = vmatpush1.bf16.msra.mxu1 %v2841_v57  ;;  %v2885_v49 = vld [vmem:[%s3850_s5 + $0x184] ss:$8 sps:$4 sm:$0xff]  }
 0x154   :  { %1957 = vmatprep.subr.bf16.mxu1 %v2846_v58 }
 0x156   :  { %1917 = vmatpush1.bf16.msra.mxu0 %v2796_v50  ;;  %v674_v50 = vld [vmem:[%s3849_s4] sm:$0xf] }
 0x157   :  { %1918 = vmatprep.subr.bf16.mxu0 %v2801_v38  ;;  %1958 = vmatpush1.bf16.msra.mxu1 %v2844_v61  ;;  %v679_v38 = vrot.slane %v674_v50, %v3375_v7 }
 0x158   :  { %1959 = vmatprep.subr.bf16.mxu1 %v2849_v62 }
 0x15a   :  { %1919 = vmatpush1.bf16.msra.mxu0 %v2799_v41  ;;  %v683_v41 = vrot.slane %v674_v50, %v3382_v10 }
 0x15b   :  { %1920 = vmatprep.subr.bf16.mxu0 %v2804_v51  ;;  %1960 = vmatpush1.bf16.msra.mxu1 %v2847_v1 }
 0x15c   :  { %1961 = vmatprep.subr.bf16.mxu1 %v2852_v2 }
 0x15e   :  { %1921 = vmatpush1.bf16.msra.mxu0 %v2802_v54 }
 0x15f   :  { %1922 = vmatprep.subr.bf16.mxu0 %v2807_v56  ;;  %1962 = vmatpush1.bf16.msra.mxu1 %v2850_v5  ;;  %v687_v5 = vrot.slane %v674_v50, %v111_v8 }
 0x160   :  { %1963 = vmatprep.subr.bf16.mxu1 %v2855_v9  ;;  %v691_v9 = vrot.slane %v674_v50, %v115_v11 }
 0x162   :  { %1923 = vmatpush1.bf16.msra.mxu0 %v2805_v59 }
 0x163   :  { %1924 = vmatprep.subr.bf16.mxu0 %v2810_v60  ;;  %1964 = vmatpush1.bf16.msra.mxu1 %v2853_v14 }
 0x164   :  { %1965 = vmatprep.subr.bf16.mxu1 %v2858_v15 }
 0x166   :  { %1925 = vmatpush1.bf16.msra.mxu0 %v2808_v63 }
 0x167   :  { %1926 = vmatprep.subr.bf16.mxu0 %v2813_v0  ;;  %1966 = vmatpush1.bf16.msra.mxu1 %v2856_v18 }
 0x168   :  { %1967 = vmatprep.subr.bf16.mxu1 %v2861_v19 }
 0x16a   :  { %1927 = vmatpush1.bf16.msra.mxu0 %v2811_v3 }
 0x16b   :  { %1928 = vmatprep.subr.bf16.mxu0 %v2816_v4  ;;  %1968 = vmatpush1.bf16.msra.mxu1 %v2859_v22 }
 0x16c   :  { %1969 = vmatprep.subr.bf16.mxu1 %v2864_v23 }
 0x16e   :  { %1929 = vmatpush2.bf16.msra.mxu0 %v2814_v12 }
 0x16f   :  { %1930 = vmatprep.subr.bf16.mxu0 %v2819_v13  ;;  %1970 = vmatpush2.bf16.msra.mxu1 %v2862_v26 }
 0x170   :  { %1971 = vmatprep.subr.bf16.mxu1 %v2867_v27  ;;  %v2886_v27 = vld [vmem:[%s3852_s7 + $0x78] sm:$0xff]  }
 0x172   :  { %1931 = vmatpush2.bf16.msra.mxu0 %v2817_v16 }
 0x173   :  { %1932 = vmatprep.subr.bf16.mxu0 %v2822_v17  ;;  %1972 = vmatpush2.bf16.msra.mxu1 %v2865_v30  ;;  %v2889_v30 = vld [vmem:[%s3852_s7 + $0x30] sm:$0xff]  }
 0x174   :  { %1973 = vmatprep.subr.bf16.mxu1 %v2870_v31  ;;  %v2890_v31 = vld [vmem:[%s3852_s7 + $0x68] sm:$0xff]  }
 0x176   :  { %1933 = vmatpush2.bf16.msra.mxu0 %v2820_v20 }
 0x177   :  { %1934 = vmatprep.subr.bf16.mxu0 %v2825_v21  ;;  %1974 = vmatpush2.bf16.msra.mxu1 %v2868_v34  ;;  %v2893_v34 = vld [vmem:[%s3852_s7 + $0x20] sm:$0xff]  }
 0x178   :  { %1975 = vmatprep.subr.bf16.mxu1 %v2873_v35  ;;  %v2894_v35 = vld [vmem:[%s3852_s7 + $0x58] sm:$0xff]  }
 0x17a   :  { %1935 = vmatpush2.bf16.msra.mxu0 %v2823_v24 }
 0x17b   :  { %1936 = vmatprep.subr.bf16.mxu0 %v2828_v25  ;;  %1976 = vmatpush2.bf16.msra.mxu1 %v2871_v39  ;;  %v2897_v39 = vld [vmem:[%s3852_s7 + $0x10] sm:$0xff]  }
 0x17c   :  { %1977 = vmatprep.subr.bf16.mxu1 %v2876_v40  ;;  %v2898_v40 = vld [vmem:[%s3852_s7 + $0x48] sm:$0xff]  }
 0x17e   :  { %1937 = vmatpush2.bf16.msra.mxu0 %v2826_v28  ;;  %v2887_v28 = vld [vmem:[%s3852_s7 + $0x38] sm:$0xff]  }
 0x17f   :  { %1938 = vmatprep.subr.bf16.mxu0 %v2831_v29  ;;  %1978 = vmatpush2.bf16.msra.mxu1 %v2874_v43  ;;  %v2888_v29 = vld [vmem:[%s3852_s7 + $0x70] sm:$0xff]   ;;  %v2900_v43 = vld [vmem:[%s3852_s7 + $0x40] sm:$0xff]  }
 0x180   :  { %1979 = vmatprep.subr.bf16.mxu1 %v2879_v44  ;;  %v2901_v44 = vld [vmem:[%s3852_s7] sm:$0xff]  }
 0x182   :  { %1939 = vmatpush2.bf16.msra.mxu0 %v2829_v32  ;;  %v2891_v32 = vld [vmem:[%s3852_s7 + $0x28] sm:$0xff]  }
 0x183   :  { %1940 = vmatprep.subr.bf16.mxu0 %v2834_v33  ;;  %1980 = vmatpush2.bf16.msra.mxu1 %v2877_v45  ;;  %v2892_v33 = vld [vmem:[%s3852_s7 + $0x60] sm:$0xff]  }
 0x184   :  { %1981 = vmatprep.subr.bf16.mxu1 %v2882_v46 }
 0x186   :  { %1941 = vmatpush2.bf16.msra.mxu0 %v2832_v36  ;;  %v2895_v36 = vld [vmem:[%s3852_s7 + $0x18] sm:$0xff]  }
 0x187   :  { %1942 = vmatprep.subr.bf16.mxu0 %v2837_v37  ;;  %1982 = vmatpush2.bf16.msra.mxu1 %v2880_v47  ;;  %v2896_v37 = vld [vmem:[%s3852_s7 + $0x50] sm:$0xff]  }
 0x188   :  { %1983 = vmatprep.subr.bf16.mxu1 %v2885_v49  ;;  %v1580_v49 = vld [vmem:[%s3851_s6] sm:$0x3] }
 0x189   :  { %v1585_v50 = vrot.slane %v1580_v49, %v3375_v7 }
 0x18a   :  { %1943 = vmatpush2.bf16.msra.mxu0 %v2835_v42  ;;  %v2899_v42 = vld [vmem:[%s3852_s7 + $0x8] sm:$0xff]  }
 0x18b   :  { %1984 = vmatpush2.bf16.msra.mxu1 %v2883_v48  ;;  %2477 = vmatprep.subr.bf16.mxu0 %v2886_v27 }
 0x1cd   :  { %v1370_v51 = vpop.f32.mrf.mxu0 }
 0x1ce   :  { %v1371_v52 = vadd.f32 %v1370_v51, %v679_v38  ;;  %v1411_v53 = vpop.f32.mrf.mxu1  ;;  %v1589_v38 = vrot.slane %v1580_v49, %v3382_v10 }
 0x1cf   :  { %v1372_v54 = vpop.f32.mrf.mxu0 }
 0x1d0   :  { %v1412_v55 = vadd.f32 %v1411_v53, %v1371_v52  ;;  %v1373_v56 = vadd.f32 %v1372_v54, %v683_v41  ;;  %v1413_v57 = vpop.f32.mrf.mxu1 }
 0x1d1   :  { %v1374_v58 = vpop.f32.mrf.mxu0 }
 0x1d2   :  { %vm1500_vm4 = vcmp.ge.f32.partialorder %v1412_v55, 0.0  ;;  %v1504_v59 = vmul.f32 0.1, %v1412_v55  ;;  %v1414_v60 = vadd.f32 %v1413_v57, %v1373_v56  ;;  %v1415_v61 = vpop.f32.mrf.mxu1 }
 0x1d3   :  { %v1375_v62 = vpop.f32.mrf.mxu0 }
 0x1d4   :  { %vm1501_vm5 = vcmp.ge.f32.partialorder %v1414_v60, 0.0  ;;  %v1505_v63 = vmul.f32 0.1, %v1414_v60  ;;  %v1416_v0 = vpop.f32.mrf.mxu1  ;;  %v1508_v1 = vsel %vm1500_vm4, %v1412_v55, %v1504_v59 }
 0x1d5   :  { %v1512_v4 = vpack.c.bf16 %v1508_v1, %v1508_v1  ;;  %v2460_v0 = vld [vmem:[%s3853_s8] ss:$0 sm:$0xff]  ;;  %s2906_s8 = scalar_lea.vmem %s2195_s19, 128 }
 0x1d6   :  { %v1509_v2 = vsel %vm1501_vm5, %v1414_v60, %v1505_v63  ;;  %p2907_p0 = scmp.ne.s32.totalorder %s2195_s19, %s2906_s8  ;;  %p2912_p2 = scmp.lt.s32.totalorder %s2906_s8, %s2906_s8 }
 0x1d7   :  { %v1513_v3 = vpack.c.bf16 %v1509_v2, %v1509_v2 }
 0x1d8   :  { %p2913_p3 = por %p2912_p2, %p2911_p1 }
 0x1d9   :  { %1944 = vmatprep.mubr.bf16.mxu0 %v1513_v3 }
 0x1da   :  { %1945 = vmatmul.mubr.bf16.vlgmr.msra.gmra.mxu0 %v1512_v4  ;;  %p2914_p4 = pnand %p2913_p3, %p2907_p0 }
 0x1db   :  { %2478 = vmatpush3.bf16.msra.mxu0 %v2887_v28 }
 0x1dc   :  { %2479 = vmatprep.subr.bf16.mxu0 %v2888_v29 }
 0x1df   :  { %2480 = vmatpush3.bf16.msra.mxu0 %v2889_v30 }
 0x1e0   :  { %2481 = vmatprep.subr.bf16.mxu0 %v2890_v31 }
 0x1e3   :  { %2482 = vmatpush3.bf16.msra.mxu0 %v2891_v32 }
 0x1e4   :  { %2483 = vmatprep.subr.bf16.mxu0 %v2892_v33 }
 0x1e7   :  { %2484 = vmatpush3.bf16.msra.mxu0 %v2893_v34 }
 0x1e8   :  { %2485 = vmatprep.subr.bf16.mxu0 %v2894_v35 }
 0x1eb   :  { %2486 = vmatpush3.bf16.msra.mxu0 %v2895_v36 }
 0x1ec   :  { %2487 = vmatprep.subr.bf16.mxu0 %v2896_v37 }
 0x1ef   :  { %2488 = vmatpush3.bf16.msra.mxu0 %v2897_v39 }
 0x1f0   :  { %2489 = vmatprep.subr.bf16.mxu0 %v2898_v40 }
 0x1f3   :  { %2490 = vmatpush3.bf16.msra.mxu0 %v2899_v42 }
 0x1f4   :  { %2491 = vmatprep.subr.bf16.mxu0 %v2900_v43 }
 0x1f7   :  { %2492 = vmatpush3.bf16.msra.mxu0 %v2901_v44 }
 0x20d   :  { %v1452_v12 = vpop.f32.mrf.mxu0 }
 0x20e   :  { %v1453_v13 = vadd.f32 %v1452_v12, %v687_v5  ;;  %v1493_v14 = vpop.f32.mrf.mxu1 }
 0x20f   :  { %v1454_v15 = vpop.f32.mrf.mxu0 }
 0x210   :  { %v1494_v16 = vadd.f32 %v1493_v14, %v1453_v13  ;;  %v1455_v17 = vadd.f32 %v1454_v15, %v691_v9  ;;  %v1495_v18 = vpop.f32.mrf.mxu1 }
 0x211   :  { %v1456_v19 = vpop.f32.mrf.mxu0 }
 0x212   :  { %vm1502_vm6 = vcmp.ge.f32.partialorder %v1494_v16, 0.0  ;;  %v1506_v20 = vmul.f32 0.1, %v1494_v16  ;;  %v1496_v21 = vadd.f32 %v1495_v18, %v1455_v17  ;;  %v1497_v22 = vpop.f32.mrf.mxu1 }
 0x213   :  { %v1457_v23 = vpop.f32.mrf.mxu0 }
 0x214   :  { %vm1503_vm7 = vcmp.ge.f32.partialorder %v1496_v21, 0.0  ;;  %v1507_v24 = vmul.f32 0.1, %v1496_v21  ;;  %v1498_v25 = vpop.f32.mrf.mxu1  ;;  %v1510_v8 = vsel %vm1502_vm6, %v1494_v16, %v1506_v20 }
 0x215   :  { %v1514_v11 = vpack.c.bf16 %v1510_v8, %v1510_v8 }
 0x216   :  { %v1511_v26 = vsel %vm1503_vm7, %v1496_v21, %v1507_v24 }
 0x217   :  { %v1515_v6 = vpack.c.bf16 %v1511_v26, %v1511_v26 }
 0x219   :  { %1985 = vmatprep.mubr.bf16.mxu1 %v1515_v6 }
 0x21a   :  { %1986 = vmatmul.mubr.bf16.vlgmr.msra.gmra.mxu1 %v1514_v11 }
 0x29a   :  { %v1946_v45 = vpop.f32.mrf.mxu0 }
 0x29b   :  { %v1947_v41 = vadd.f32 %v1946_v45, %v1585_v50 }
 0x29c   :  { %v1948_v46 = vpop.f32.mrf.mxu0 }
 0x29d   :  { %v1949_v52 = vadd.f32 %v1948_v46, %v1589_v38 }
 0x29e   :  { %v1950_v47 = vpop.f32.mrf.mxu0 }
 0x2a0   :  { %v1951_v48 = vpop.f32.mrf.mxu0 }
 0x2da   :  { %v1987_v51 = vpop.f32.mrf.mxu1 }
 0x2db   :  { %v1988_v53 = vadd.f32 %v1987_v51, %v1947_v41 }
 0x2dc   :  { %v1989_v54 = vpop.f32.mrf.mxu1 }
 0x2dd   :  { %vm1994_vm8 = vcmp.ge.f32.partialorder %v1988_v53, 0.0  ;;  %v1996_v55 = vmul.f32 0.1, %v1988_v53  ;;  %v1990_v56 = vadd.f32 %v1989_v54, %v1949_v52 }
 0x2de   :  { %v1991_v57 = vpop.f32.mrf.mxu1 }
 0x2df   :  { %vm1995_vm9 = vcmp.ge.f32.partialorder %v1990_v56, 0.0  ;;  %v1997_v58 = vmul.f32 0.1, %v1990_v56  ;;  %v1998_v59 = vsel %vm1994_vm8, %v1988_v53, %v1996_v55 }
 0x2e0   :  { %v1992_v60 = vpop.f32.mrf.mxu1  ;;  %v2000_v63 = vpack.c.bf16 %v1998_v59, %v1998_v59 }
 0x2e1   :  { %v1999_v61 = vsel %vm1995_vm9, %v1990_v56, %v1997_v58 }
 0x2e2   :  { %v2001_v62 = vpack.c.bf16 %v1999_v61, %v1999_v61 }
 0x2e4   :  { %2169 = vmatprep.mubr.bf16.mxu0 %v2001_v62 }
 0x2e5   :  { %2170 = vmatmul.mubr.bf16.vlgmr.msra.gmra.mxu0 %v2000_v63 }
 0x3a5   :  { %v2493_v7 = vpop.f32.mrf.mxu0 }
 0x3a7   :  { %v2494_v10 = vpop.f32.mrf.mxu0 }
 0x3a8   :  { %v2495_v1 = vadd.f32 %v2494_v10, %v2493_v7 }
 0x3a9   :  { %v2496_v2 = vpop.f32.mrf.mxu0 }
 0x3aa   :  { %v2172_v3 = vadd.f32 %v2495_v1, %v2460_v0 }
 0x3ab   :  { %v2497_v4 = vpop.f32.mrf.mxu0 }
 0x3ac   :  { %2177 = vmax.xlane.f32.xlu0 %v2172_v3 }
 0x435   :  { %v2178_v5 = vpop.xlane.xlu0 %2177 }
 0x436   :  { %v2179_v9 = vsub.f32 %v2172_v3, %v2178_v5 }
 0x438   :  { %v2180_v12 = vmul.f32 1.442695, %v2179_v9 }
 0x43a   :  { %2902 = vpow2.f32 %v2180_v12 }
 0x447   :  { %v2903_v13 = vpop.eup %2902 }
 0x448   :  { %2182 = vadd.xlane.f32.xlu0 %v2903_v13 }
 0x4d1   :  { %v2183_v14 = vpop.xlane.xlu0 %2182 }
 0x4d2   :  { %2904 = vlog2.f32 %v2183_v14 }
 0x4df   :  { %v2905_v15 = vpop.eup %2904 }
 0x4e0   :  { %v2185_v16 = vmul.f32 0.6931472, %v2905_v15 }
 0x4e2   :  { %v2186_v17 = vsub.f32 %v2179_v9, %v2185_v16 }
 0x4e4   :  { %2187 = vst [vmem:[#allocation2] sm:$0xff] %v2186_v17 }
 0x4e5   :  { %2917 = shalt.err (!%p2914_p4)
}
 0x4e6   :  { %2197 = dma.vmem_to_hbm [thread:$0]  %s2195_s19, 128, %s3854_s9, [#allocation3]  }
 0x4e7   :  { %2926 = dma.done.wait [#allocation3], 128  }
 0x4e8   :  { %2927 = vsyncadd [#allocation3], 4294967168 }
 0x4e9   :  { %2201 = vsyncpa [#allocation3], 1 }

// kernel: model_forward.6
= control target key start
LH: loop header
LB: loop body
LE: loop exit
PB: predicated region body
PF: predicated region fallthrough
CT: control target
= control target key end

     0   :  { %s5230_s1 = inlined_call_operand.vmem [shape: bf16[256,1024], index: 1, kind: input, shape index: {}]   ;;  %s5231_s0 = inlined_call_operand.vmem [shape: bf16[8,256], index: 0, kind: input, shape index: {}]   ;;  %s5232_s3 = inlined_call_operand.vmem [shape: bf16[256,512], index: 3, kind: input, shape index: {}]   ;;  %s5233_s4 = inlined_call_operand.vmem [shape: f32[4,256], index: 4, kind: input, shape index: {}]   ;;  %s5234_s2 = inlined_call_operand.vmem [shape: f32[1,1024], index: 2, kind: input, shape index: {}]   ;;  %s5235_s5 = inlined_call_operand.vmem [shape: f32[4,128], index: 5, kind: input, shape index: {}]   ;;  %s5236_s6 = inlined_call_operand.vmem [shape: bf16[8,256], index: 6, kind: output, shape index: {}]  }
   0x1   :  { %v80_v0 = vld [vmem:[%s5230_s1 + $0x1c0] sm:$0xff]  ;;  %v81_v2 = vld [vmem:[%s5230_s1 + $0x1c8] sm:$0xff] }
   0x2   :  { %v84_v1 = vld [vmem:[%s5230_s1 + $0x1e0] sm:$0xff]  ;;  %v85_v4 = vld [vmem:[%s5230_s1 + $0x1e8] sm:$0xff] }
   0x3   :  { %v3241_v3 = vcombine.high %v80_v0, %v84_v1  ;;  %v3240_v5 = vcombine.low %v80_v0, %v84_v1  ;;  %v72_v6 = vld [vmem:[%s5230_s1 + $0x180] sm:$0xff]  ;;  %v3243_v8 = vcombine.high %v81_v2, %v85_v4  ;;  %v3242_v9 = vcombine.low %v81_v2, %v85_v4  ;;  %v73_v11 = vld [vmem:[%s5230_s1 + $0x188] sm:$0xff] }
   0x4   :  { %v76_v7 = vld [vmem:[%s5230_s1 + $0x1a0] sm:$0xff]  ;;  %v77_v12 = vld [vmem:[%s5230_s1 + $0x1a8] sm:$0xff] }
   0x5   :  { %v3233_v10 = vcombine.high %v72_v6, %v76_v7  ;;  %v64_v13 = vld [vmem:[%s5230_s1 + $0x140] sm:$0xff]  ;;  %841 = vmatprep.subr.bf16.mxu0 %v3241_v3  ;;  %v3235_v14 = vcombine.high %v73_v11, %v77_v12  ;;  %v65_v16 = vld [vmem:[%s5230_s1 + $0x148] sm:$0xff]  ;;  %882 = vmatprep.subr.bf16.mxu1 %v3243_v8  ;;  %v3232_v18 = vcombine.low %v72_v6, %v76_v7 }
   0x6   :  { %v68_v15 = vld [vmem:[%s5230_s1 + $0x160] sm:$0xff]  ;;  %v69_v17 = vld [vmem:[%s5230_s1 + $0x168] sm:$0xff]  ;;  %842 = vmatpush1.bf16.msra.mxu0 %v3240_v5  ;;  %883 = vmatpush1.bf16.msra.mxu1 %v3242_v9  ;;  %v3234_v19 = vcombine.low %v73_v11, %v77_v12 }
   0x7   :  { %843 = vmatprep.subr.bf16.mxu0 %v3233_v10  ;;  %v3225_v20 = vcombine.high %v64_v13, %v68_v15  ;;  %884 = vmatprep.subr.bf16.mxu1 %v3235_v14  ;;  %v3227_v21 = vcombine.high %v65_v16, %v69_v17  ;;  %v56_v22 = vld [vmem:[%s5230_s1 + $0x100] sm:$0xff]  ;;  %v57_v24 = vld [vmem:[%s5230_s1 + $0x108] sm:$0xff]  ;;  %v3224_v26 = vcombine.low %v64_v13, %v68_v15 }
   0x8   :  { %v60_v23 = vld [vmem:[%s5230_s1 + $0x120] sm:$0xff]  ;;  %v61_v25 = vld [vmem:[%s5230_s1 + $0x128] sm:$0xff]  ;;  %v3226_v27 = vcombine.low %v65_v16, %v69_v17 }
   0x9   :  { %v3217_v28 = vcombine.high %v56_v22, %v60_v23  ;;  %v3219_v29 = vcombine.high %v57_v24, %v61_v25  ;;  %v48_v30 = vld [vmem:[%s5230_s1 + $0xc0] sm:$0xff]  ;;  %v49_v32 = vld [vmem:[%s5230_s1 + $0xc8] sm:$0xff]  ;;  %v3216_v34 = vcombine.low %v56_v22, %v60_v23  ;;  %v3218_v35 = vcombine.low %v57_v24, %v61_v25 }
   0xa   :  { %844 = vmatpush1.bf16.msra.mxu0 %v3232_v18  ;;  %885 = vmatpush1.bf16.msra.mxu1 %v3234_v19  ;;  %v52_v31 = vld [vmem:[%s5230_s1 + $0xe0] sm:$0xff]  ;;  %v53_v33 = vld [vmem:[%s5230_s1 + $0xe8] sm:$0xff] }
   0xb   :  { %845 = vmatprep.subr.bf16.mxu0 %v3225_v20  ;;  %886 = vmatprep.subr.bf16.mxu1 %v3227_v21  ;;  %v3209_v36 = vcombine.high %v48_v30, %v52_v31  ;;  %v3211_v37 = vcombine.high %v49_v32, %v53_v33  ;;  %v40_v38 = vld [vmem:[%s5230_s1 + $0x80] sm:$0xff]  ;;  %v41_v40 = vld [vmem:[%s5230_s1 + $0x88] sm:$0xff]  ;;  %v3208_v42 = vcombine.low %v48_v30, %v52_v31 }
   0xc   :  { %v44_v39 = vld [vmem:[%s5230_s1 + $0xa0] sm:$0xff]  ;;  %v45_v41 = vld [vmem:[%s5230_s1 + $0xa8] sm:$0xff]  ;;  %v3210_v43 = vcombine.low %v49_v32, %v53_v33 }
   0xd   :  { %v3201_v44 = vcombine.high %v40_v38, %v44_v39  ;;  %v3203_v45 = vcombine.high %v41_v40, %v45_v41  ;;  %v32_v46 = vld [vmem:[%s5230_s1 + $0x40] sm:$0xff]  ;;  %v33_v48 = vld [vmem:[%s5230_s1 + $0x48] sm:$0xff]  ;;  %v3200_v50 = vcombine.low %v40_v38, %v44_v39  ;;  %v3202_v51 = vcombine.low %v41_v40, %v45_v41 }
   0xe   :  { %846 = vmatpush1.bf16.msra.mxu0 %v3224_v26  ;;  %887 = vmatpush1.bf16.msra.mxu1 %v3226_v27  ;;  %v36_v47 = vld [vmem:[%s5230_s1 + $0x60] sm:$0xff]  ;;  %v37_v49 = vld [vmem:[%s5230_s1 + $0x68] sm:$0xff] }
   0xf   :  { %847 = vmatprep.subr.bf16.mxu0 %v3217_v28  ;;  %888 = vmatprep.subr.bf16.mxu1 %v3219_v29  ;;  %v3193_v52 = vcombine.high %v32_v46, %v36_v47  ;;  %v3976_v53 = vld [vmem:[%s5231_s0] sm:$0xff]  ;;  %v3195_v54 = vcombine.high %v33_v48, %v37_v49  ;;  %v25_v58 = vld [vmem:[%s5230_s1 + $0x8] sm:$0xff]  ;;  %v3192_v60 = vcombine.low %v32_v46, %v36_v47 }
  0x10   :  { %v24_v55 = vld [vmem:[%s5230_s1] sm:$0xff]  ;;  %v3986_v57 = vcombine.high %v3976_v53, %v3976_v53  ;;  %v29_v59 = vld [vmem:[%s5230_s1 + $0x28] sm:$0xff]  ;;  %v3194_v61 = vcombine.low %v33_v48, %v37_v49 }
  0x11   :  { %v28_v56 = vld [vmem:[%s5230_s1 + $0x20] sm:$0xff]  ;;  %v3187_v63 = vcombine.high %v25_v58, %v29_v59  ;;  %v145_v2 = vld [vmem:[%s5230_s1 + $0x3c8] sm:$0xff]  ;;  %v3186_v5 = vcombine.low %v25_v58, %v29_v59 }
  0x12   :  { %848 = vmatpush1.bf16.msra.mxu0 %v3216_v34  ;;  %889 = vmatpush1.bf16.msra.mxu1 %v3218_v35  ;;  %v3185_v62 = vcombine.high %v24_v55, %v28_v56  ;;  %v144_v0 = vld [vmem:[%s5230_s1 + $0x3c0] sm:$0xff]  ;;  %v149_v3 = vld [vmem:[%s5230_s1 + $0x3e8] sm:$0xff]  ;;  %v3184_v4 = vcombine.low %v24_v55, %v28_v56 }
  0x13   :  { %849 = vmatprep.subr.bf16.mxu0 %v3209_v36  ;;  %890 = vmatprep.subr.bf16.mxu1 %v3211_v37  ;;  %v148_v1 = vld [vmem:[%s5230_s1 + $0x3e0] sm:$0xff]  ;;  %v3307_v7 = vcombine.high %v145_v2, %v149_v3  ;;  %v137_v10 = vld [vmem:[%s5230_s1 + $0x388] sm:$0xff]  ;;  %v3306_v13 = vcombine.low %v145_v2, %v149_v3  ;;  %v86_v3 = vld [vmem:[%s5230_s1 + $0x1f0] sm:$0xff] }
  0x14   :  { %873 = vmatprep.mubr.bf16.mxu0 %v3986_v57  ;;  %914 = vmatprep.mubr.bf16.mxu1 %v3986_v57  ;;  %v3305_v6 = vcombine.high %v144_v0, %v148_v1  ;;  %v136_v8 = vld [vmem:[%s5230_s1 + $0x380] sm:$0xff]  ;;  %v141_v11 = vld [vmem:[%s5230_s1 + $0x3a8] sm:$0xff]  ;;  %v3304_v12 = vcombine.low %v144_v0, %v148_v1  ;;  %v82_v1 = vld [vmem:[%s5230_s1 + $0x1d0] sm:$0xff] }
  0x15   :  { %v140_v9 = vld [vmem:[%s5230_s1 + $0x3a0] sm:$0xff]  ;;  %v3299_v15 = vcombine.high %v137_v10, %v141_v11  ;;  %v129_v18 = vld [vmem:[%s5230_s1 + $0x348] sm:$0xff]  ;;  %v3298_v21 = vcombine.low %v137_v10, %v141_v11  ;;  %v78_v11 = vld [vmem:[%s5230_s1 + $0x1b0] sm:$0xff] }
  0x16   :  { %850 = vmatpush1.bf16.msra.mxu0 %v3208_v42  ;;  %891 = vmatpush1.bf16.msra.mxu1 %v3210_v43  ;;  %v3297_v14 = vcombine.high %v136_v8, %v140_v9  ;;  %v128_v16 = vld [vmem:[%s5230_s1 + $0x340] sm:$0xff]  ;;  %v133_v19 = vld [vmem:[%s5230_s1 + $0x368] sm:$0xff]  ;;  %v3296_v20 = vcombine.low %v136_v8, %v140_v9  ;;  %v3245_v8 = vcombine.high %v82_v1, %v86_v3  ;;  %v74_v9 = vld [vmem:[%s5230_s1 + $0x190] sm:$0xff] }
  0x17   :  { %851 = vmatprep.subr.bf16.mxu0 %v3201_v44  ;;  %892 = vmatprep.subr.bf16.mxu1 %v3203_v45  ;;  %v132_v17 = vld [vmem:[%s5230_s1 + $0x360] sm:$0xff]  ;;  %v3291_v23 = vcombine.high %v129_v18, %v133_v19  ;;  %v121_v26 = vld [vmem:[%s5230_s1 + $0x308] sm:$0xff]  ;;  %v3290_v29 = vcombine.low %v129_v18, %v133_v19  ;;  %v66_v18 = vld [vmem:[%s5230_s1 + $0x150] sm:$0xff] }
  0x18   :  { %v3289_v22 = vcombine.high %v128_v16, %v132_v17  ;;  %v120_v24 = vld [vmem:[%s5230_s1 + $0x300] sm:$0xff]  ;;  %v125_v27 = vld [vmem:[%s5230_s1 + $0x328] sm:$0xff]  ;;  %v3288_v28 = vcombine.low %v128_v16, %v132_v17  ;;  %v3237_v17 = vcombine.high %v74_v9, %v78_v11 }
  0x19   :  { %v124_v25 = vld [vmem:[%s5230_s1 + $0x320] sm:$0xff]  ;;  %v3283_v31 = vcombine.high %v121_v26, %v125_v27  ;;  %v113_v34 = vld [vmem:[%s5230_s1 + $0x2c8] sm:$0xff]  ;;  %v3282_v37 = vcombine.low %v121_v26, %v125_v27  ;;  %v62_v27 = vld [vmem:[%s5230_s1 + $0x130] sm:$0xff] }
  0x1a   :  { %852 = vmatpush1.bf16.msra.mxu0 %v3200_v50  ;;  %893 = vmatpush1.bf16.msra.mxu1 %v3202_v51  ;;  %v3281_v30 = vcombine.high %v120_v24, %v124_v25  ;;  %v112_v32 = vld [vmem:[%s5230_s1 + $0x2c0] sm:$0xff]  ;;  %v117_v35 = vld [vmem:[%s5230_s1 + $0x2e8] sm:$0xff]  ;;  %v3280_v36 = vcombine.low %v120_v24, %v124_v25  ;;  %v58_v25 = vld [vmem:[%s5230_s1 + $0x110] sm:$0xff] }
  0x1b   :  { %853 = vmatprep.subr.bf16.mxu0 %v3193_v52  ;;  %894 = vmatprep.subr.bf16.mxu1 %v3195_v54  ;;  %v116_v33 = vld [vmem:[%s5230_s1 + $0x2e0] sm:$0xff]  ;;  %v3275_v40 = vcombine.high %v113_v34, %v117_v35  ;;  %v105_v42 = vld [vmem:[%s5230_s1 + $0x288] sm:$0xff]  ;;  %v3274_v45 = vcombine.low %v113_v34, %v117_v35  ;;  %v54_v35 = vld [vmem:[%s5230_s1 + $0xf0] sm:$0xff] }
  0x1c   :  { %v3273_v38 = vcombine.high %v112_v32, %v116_v33  ;;  %v104_v39 = vld [vmem:[%s5230_s1 + $0x280] sm:$0xff]  ;;  %v109_v43 = vld [vmem:[%s5230_s1 + $0x2a8] sm:$0xff]  ;;  %v3272_v44 = vcombine.low %v112_v32, %v116_v33  ;;  %v3221_v32 = vcombine.high %v58_v25, %v62_v27  ;;  %v50_v33 = vld [vmem:[%s5230_s1 + $0xd0] sm:$0xff] }
  0x1d   :  { %v108_v41 = vld [vmem:[%s5230_s1 + $0x2a0] sm:$0xff]  ;;  %v3267_v48 = vcombine.high %v105_v42, %v109_v43  ;;  %v97_v50 = vld [vmem:[%s5230_s1 + $0x248] sm:$0xff]  ;;  %v3266_v54 = vcombine.low %v105_v42, %v109_v43  ;;  %v46_v42 = vld [vmem:[%s5230_s1 + $0xb0] sm:$0xff] }
  0x1e   :  { %854 = vmatpush1.bf16.msra.mxu0 %v3192_v60  ;;  %895 = vmatpush1.bf16.msra.mxu1 %v3194_v61  ;;  %v3265_v46 = vcombine.high %v104_v39, %v108_v41  ;;  %v96_v47 = vld [vmem:[%s5230_s1 + $0x240] sm:$0xff]  ;;  %v101_v51 = vld [vmem:[%s5230_s1 + $0x268] sm:$0xff]  ;;  %v3264_v52 = vcombine.low %v104_v39, %v108_v41  ;;  %v3213_v39 = vcombine.high %v50_v33, %v54_v35  ;;  %v43_v43 = vld [vmem:[%s5230_s1 + $0x98] sm:$0xff] }
  0x1f   :  { %855 = vmatprep.subr.bf16.mxu0 %v3185_v62  ;;  %896 = vmatprep.subr.bf16.mxu1 %v3187_v63  ;;  %v100_v49 = vld [vmem:[%s5230_s1 + $0x260] sm:$0xff]  ;;  %v3259_v58 = vcombine.high %v97_v50, %v101_v51  ;;  %v89_v60 = vld [vmem:[%s5230_s1 + $0x208] sm:$0xff]  ;;  %v3258_v63 = vcombine.low %v97_v50, %v101_v51  ;;  %v38_v50 = vld [vmem:[%s5230_s1 + $0x70] sm:$0xff] }
  0x20   :  { %v3257_v55 = vcombine.high %v96_v47, %v100_v49  ;;  %v88_v56 = vld [vmem:[%s5230_s1 + $0x200] sm:$0xff]  ;;  %v93_v61 = vld [vmem:[%s5230_s1 + $0x228] sm:$0xff]  ;;  %v3256_v62 = vcombine.low %v96_v47, %v100_v49  ;;  %v35_v51 = vld [vmem:[%s5230_s1 + $0x58] sm:$0xff] }
  0x21   :  { %v92_v59 = vld [vmem:[%s5230_s1 + $0x220] sm:$0xff]  ;;  %v3251_v2 = vcombine.high %v89_v60, %v93_v61 }
  0x22   :  { %856 = vmatpush1.bf16.msra.mxu0 %v3184_v4  ;;  %897 = vmatpush1.bf16.msra.mxu1 %v3186_v5  ;;  %v3249_v0 = vcombine.high %v88_v56, %v92_v59  ;;  %v83_v4 = vld [vmem:[%s5230_s1 + $0x1d8] sm:$0xff] }
  0x23   :  { %857 = vmatprep.subr.bf16.mxu0 %v3305_v6  ;;  %898 = vmatprep.subr.bf16.mxu1 %v3307_v7  ;;  %v87_v5 = vld [vmem:[%s5230_s1 + $0x1f8] sm:$0xff]  ;;  %v3248_v6 = vcombine.low %v88_v56, %v92_v59  ;;  %v3250_v7 = vcombine.low %v89_v60, %v93_v61  ;;  %v30_v59 = vld [vmem:[%s5230_s1 + $0x30] sm:$0xff]  ;;  %v4196_v61 = vld [vmem:[%s5233_s4] sm:$0xff] }
  0x24   :  { %v3247_v10 = vcombine.high %v83_v4, %v87_v5  ;;  %v3246_v16 = vcombine.low %v83_v4, %v87_v5  ;;  %v27_v60 = vld [vmem:[%s5230_s1 + $0x18] sm:$0xff]  ;;  %1069 = vst [vmem:[#allocation3] sm:$0xff] %v4196_v61 }
  0x25   :  { %v147_v5 = vld [vmem:[%s5230_s1 + $0x3d8] sm:$0xff] }
  0x26   :  { %858 = vmatpush2.bf16.msra.mxu0 %v3304_v12  ;;  %899 = vmatpush2.bf16.msra.mxu1 %v3306_v13  ;;  %v75_v12 = vld [vmem:[%s5230_s1 + $0x198] sm:$0xff]  ;;  %v4115_v13 = vcombine.low %v3976_v53, %v3976_v53  ;;  %v70_v53 = vld [vmem:[%s5230_s1 + $0x170] sm:$0xff] }
  0x27   :  { %859 = vmatprep.subr.bf16.mxu0 %v3297_v14  ;;  %900 = vmatprep.subr.bf16.mxu1 %v3299_v15  ;;  %v79_v14 = vld [vmem:[%s5230_s1 + $0x1b8] sm:$0xff]  ;;  %v3244_v15 = vcombine.low %v82_v1, %v86_v3  ;;  %v3229_v24 = vcombine.high %v66_v18, %v70_v53  ;;  %v146_v1 = vld [vmem:[%s5230_s1 + $0x3d0] sm:$0xff] }
  0x28   :  { %v3239_v19 = vcombine.high %v75_v12, %v79_v14 }
  0x2a   :  { %860 = vmatpush2.bf16.msra.mxu0 %v3296_v20  ;;  %901 = vmatpush2.bf16.msra.mxu1 %v3298_v21  ;;  %v67_v20 = vld [vmem:[%s5230_s1 + $0x158] sm:$0xff] }
  0x2b   :  { %861 = vmatprep.subr.bf16.mxu0 %v3289_v22  ;;  %902 = vmatprep.subr.bf16.mxu1 %v3291_v23  ;;  %v71_v21 = vld [vmem:[%s5230_s1 + $0x178] sm:$0xff]  ;;  %v3236_v22 = vcombine.low %v74_v9, %v78_v11  ;;  %v3238_v23 = vcombine.low %v75_v12, %v79_v14  ;;  %v138_v9 = vld [vmem:[%s5230_s1 + $0x390] sm:$0xff] }
  0x2c   :  { %v3231_v26 = vcombine.high %v67_v20, %v71_v21  ;;  %v139_v14 = vld [vmem:[%s5230_s1 + $0x398] sm:$0xff] }
  0x2e   :  { %862 = vmatpush2.bf16.msra.mxu0 %v3288_v28  ;;  %903 = vmatpush2.bf16.msra.mxu1 %v3290_v29  ;;  %v59_v28 = vld [vmem:[%s5230_s1 + $0x118] sm:$0xff] }
  0x2f   :  { %863 = vmatprep.subr.bf16.mxu0 %v3281_v30  ;;  %904 = vmatprep.subr.bf16.mxu1 %v3283_v31  ;;  %v63_v29 = vld [vmem:[%s5230_s1 + $0x138] sm:$0xff]  ;;  %v3228_v30 = vcombine.low %v66_v18, %v70_v53  ;;  %v3230_v31 = vcombine.low %v67_v20, %v71_v21  ;;  %v130_v18 = vld [vmem:[%s5230_s1 + $0x350] sm:$0xff] }
  0x30   :  { %v3223_v34 = vcombine.high %v59_v28, %v63_v29  ;;  %v131_v21 = vld [vmem:[%s5230_s1 + $0x358] sm:$0xff] }
  0x32   :  { %864 = vmatpush2.bf16.msra.mxu0 %v3280_v36  ;;  %905 = vmatpush2.bf16.msra.mxu1 %v3282_v37  ;;  %v55_v36 = vld [vmem:[%s5230_s1 + $0xf8] sm:$0xff]  ;;  %v3220_v37 = vcombine.low %v58_v25, %v62_v27  ;;  %v122_v25 = vld [vmem:[%s5230_s1 + $0x310] sm:$0xff] }
  0x33   :  { %865 = vmatprep.subr.bf16.mxu0 %v3273_v38  ;;  %906 = vmatprep.subr.bf16.mxu1 %v3275_v40  ;;  %v3222_v38 = vcombine.low %v59_v28, %v63_v29  ;;  %v42_v40 = vld [vmem:[%s5230_s1 + $0x90] sm:$0xff]  ;;  %v123_v29 = vld [vmem:[%s5230_s1 + $0x318] sm:$0xff] }
  0x34   :  { %v3205_v47 = vcombine.high %v42_v40, %v46_v42 }
  0x36   :  { %866 = vmatpush2.bf16.msra.mxu0 %v3272_v44  ;;  %907 = vmatpush2.bf16.msra.mxu1 %v3274_v45  ;;  %v47_v44 = vld [vmem:[%s5230_s1 + $0xb8] sm:$0xff]  ;;  %v3212_v45 = vcombine.low %v50_v33, %v54_v35  ;;  %v114_v33 = vld [vmem:[%s5230_s1 + $0x2d0] sm:$0xff] }
  0x37   :  { %867 = vmatprep.subr.bf16.mxu0 %v3265_v46  ;;  %908 = vmatprep.subr.bf16.mxu1 %v3267_v48  ;;  %v34_v48 = vld [vmem:[%s5230_s1 + $0x50] sm:$0xff]  ;;  %v3207_v49 = vcombine.high %v43_v43, %v47_v44  ;;  %v3206_v56 = vcombine.low %v43_v43, %v47_v44 }
  0x38   :  { %v106_v43 = vld [vmem:[%s5230_s1 + $0x290] sm:$0xff] }
  0x39   :  { %v110_v44 = vld [vmem:[%s5230_s1 + $0x2b0] sm:$0xff] }
  0x3a   :  { %868 = vmatpush2.bf16.msra.mxu0 %v3264_v52  ;;  %909 = vmatpush2.bf16.msra.mxu1 %v3266_v54  ;;  %v39_v52 = vld [vmem:[%s5230_s1 + $0x78] sm:$0xff]  ;;  %v3204_v54 = vcombine.low %v42_v40, %v46_v42 }
  0x3b   :  { %869 = vmatprep.subr.bf16.mxu0 %v3257_v55  ;;  %910 = vmatprep.subr.bf16.mxu1 %v3259_v58  ;;  %v26_v55 = vld [vmem:[%s5230_s1 + $0x10] sm:$0xff]  ;;  %v3197_v58 = vcombine.high %v34_v48, %v38_v50  ;;  %v3198_v3 = vcombine.low %v35_v51, %v39_v52 }
  0x3c   :  { %v3189_v4 = vcombine.high %v26_v55, %v30_v59 }
  0x3e   :  { %870 = vmatpush2.bf16.msra.mxu0 %v3256_v62  ;;  %911 = vmatpush2.bf16.msra.mxu1 %v3258_v63  ;;  %v3199_v62 = vcombine.high %v35_v51, %v39_v52  ;;  %v31_v63 = vld [vmem:[%s5230_s1 + $0x38] sm:$0xff]  ;;  %v98_v51 = vld [vmem:[%s5230_s1 + $0x250] sm:$0xff] }
  0x3f   :  { %871 = vmatprep.subr.bf16.mxu0 %v3249_v0  ;;  %912 = vmatprep.subr.bf16.mxu1 %v3251_v2  ;;  %v3196_v0 = vcombine.low %v34_v48, %v38_v50  ;;  %v150_v2 = vld [vmem:[%s5230_s1 + $0x3f0] sm:$0xff]  ;;  %v3190_v11 = vcombine.low %v27_v60, %v31_v63 }
  0x40   :  { %v3309_v12 = vcombine.high %v146_v1, %v150_v2  ;;  %v102_v52 = vld [vmem:[%s5230_s1 + $0x270] sm:$0xff] }
  0x42   :  { %872 = vmatpush2.bf16.msra.mxu0 %v3248_v6  ;;  %913 = vmatpush2.bf16.msra.mxu1 %v3250_v7  ;;  %v151_v6 = vld [vmem:[%s5230_s1 + $0x3f8] sm:$0xff]  ;;  %v3191_v7 = vcombine.high %v27_v60, %v31_v63  ;;  %v94_v63 = vld [vmem:[%s5230_s1 + $0x230] sm:$0xff] }
  0x43   :  { %923 = vmatprep.subr.bf16.mxu0 %v3245_v8  ;;  %964 = vmatprep.subr.bf16.mxu1 %v3247_v10  ;;  %v3188_v8 = vcombine.low %v26_v55, %v30_v59  ;;  %v142_v10 = vld [vmem:[%s5230_s1 + $0x3b0] sm:$0xff]  ;;  %v3310_v53 = vcombine.low %v147_v5, %v151_v6  ;;  %v103_v55 = vld [vmem:[%s5230_s1 + $0x278] sm:$0xff]  ;;  %v3261_v59 = vcombine.high %v98_v51, %v102_v52 }
  0x44   :  { %v3301_v20 = vcombine.high %v138_v9, %v142_v10 }
  0x45   :  { %874 = vmatmul.mubr.bf16.vlgmr.msra.gmra.mxu0 %v4115_v13  ;;  %915 = vmatmul.mubr.bf16.vlgmr.msra.gmra.mxu1 %v4115_v13 }
  0x46   :  { %924 = vmatpush1.bf16.msra.mxu0 %v3244_v15  ;;  %965 = vmatpush1.bf16.msra.mxu1 %v3246_v16  ;;  %v143_v15 = vld [vmem:[%s5230_s1 + $0x3b8] sm:$0xff]  ;;  %v3311_v16 = vcombine.high %v147_v5, %v151_v6 }
  0x47   :  { %925 = vmatprep.subr.bf16.mxu0 %v3237_v17  ;;  %966 = vmatprep.subr.bf16.mxu1 %v3239_v19  ;;  %v3308_v17 = vcombine.low %v146_v1, %v150_v2  ;;  %v134_v19 = vld [vmem:[%s5230_s1 + $0x370] sm:$0xff]  ;;  %v3302_v27 = vcombine.low %v139_v14, %v143_v15  ;;  %v95_v1 = vld [vmem:[%s5230_s1 + $0x238] sm:$0xff]  ;;  %v3260_v2 = vcombine.low %v98_v51, %v102_v52 }
  0x48   :  { %955 = vmatprep.mubr.bf16.mxu0 %v3986_v57  ;;  %996 = vmatprep.mubr.bf16.mxu1 %v3986_v57  ;;  %v51_v57 = vld [vmem:[%s5230_s1 + $0xd8] sm:$0xff]  ;;  %v3293_v28 = vcombine.high %v130_v18, %v134_v19  ;;  %v4566_v52 = vld [vmem:[%s5232_s3 + $0x184] ss:$16 sps:$4 sm:$0xff]  }
  0x49   :  { %v3215_v41 = vcombine.high %v51_v57, %v55_v36  ;;  %v3214_v46 = vcombine.low %v51_v57, %v55_v36  ;;  %v115_v36 = vld [vmem:[%s5230_s1 + $0x2d8] sm:$0xff] }
  0x4a   :  { %926 = vmatpush1.bf16.msra.mxu0 %v3236_v22  ;;  %967 = vmatpush1.bf16.msra.mxu1 %v3238_v23  ;;  %v135_v22 = vld [vmem:[%s5230_s1 + $0x378] sm:$0xff]  ;;  %v3303_v23 = vcombine.high %v139_v14, %v143_v15  ;;  %v4324_v14 = vld [vmem:[%s5232_s3 + $0xc4] ss:$16 sps:$4 sm:$0xff]  }
  0x4b   :  { %927 = vmatprep.subr.bf16.mxu0 %v3229_v24  ;;  %968 = vmatprep.subr.bf16.mxu1 %v3231_v26  ;;  %v3300_v24 = vcombine.low %v138_v9, %v142_v10  ;;  %v126_v26 = vld [vmem:[%s5230_s1 + $0x330] sm:$0xff]  ;;  %v3294_v35 = vcombine.low %v131_v21, %v135_v22  ;;  %v4306_v9 = vld [vmem:[%s5232_s3 + $0xec] ss:$16 sps:$4 sm:$0xff]   ;;  %v1076_v10 = vcombine.high %v4196_v61, %v4196_v61  ;;  %v4561_v51 = vld [vmem:[%s5232_s3 + $0x1a8] ss:$16 sps:$4 sm:$0xff]  }
  0x4c   :  { %v3285_v57 = vcombine.high %v122_v25, %v126_v26  ;;  %v4330_v15 = vld [vmem:[%s5232_s3 + $0xcc] ss:$16 sps:$4 sm:$0xff]  }
  0x4e   :  { %928 = vmatpush1.bf16.msra.mxu0 %v3228_v30  ;;  %969 = vmatpush1.bf16.msra.mxu1 %v3230_v31  ;;  %v127_v30 = vld [vmem:[%s5230_s1 + $0x338] sm:$0xff]  ;;  %v3295_v31 = vcombine.high %v131_v21, %v135_v22  ;;  %v4374_v21 = vld [vmem:[%s5232_s3 + $0x84] ss:$16 sps:$4 sm:$0xff]  }
  0x4f   :  { %929 = vmatprep.subr.bf16.mxu0 %v3221_v32  ;;  %970 = vmatprep.subr.bf16.mxu1 %v3223_v34  ;;  %v3292_v32 = vcombine.low %v130_v18, %v134_v19  ;;  %v118_v34 = vld [vmem:[%s5230_s1 + $0x2f0] sm:$0xff]  ;;  %v3286_v40 = vcombine.low %v123_v29, %v127_v30  ;;  %v4345_v18 = vld [vmem:[%s5232_s3 + $0xc8] ss:$16 sps:$4 sm:$0xff]   ;;  %v4356_v19 = vld [vmem:[%s5232_s3 + $0xac] ss:$16 sps:$4 sm:$0xff]  }
  0x50   :  { %v4380_v22 = vld [vmem:[%s5232_s3 + $0x8c] ss:$16 sps:$4 sm:$0xff]  }
  0x52   :  { %930 = vmatpush1.bf16.msra.mxu0 %v3220_v37  ;;  %971 = vmatpush1.bf16.msra.mxu1 %v3222_v38  ;;  %v3287_v37 = vcombine.high %v123_v29, %v127_v30  ;;  %v119_v38 = vld [vmem:[%s5230_s1 + $0x2f8] sm:$0xff]  ;;  %v4422_v29 = vld [vmem:[%s5232_s3 + $0x44] ss:$16 sps:$4 sm:$0xff]  }
  0x53   :  { %931 = vmatprep.subr.bf16.mxu0 %v3213_v39  ;;  %972 = vmatprep.subr.bf16.mxu1 %v3215_v41  ;;  %v3284_v39 = vcombine.low %v122_v25, %v126_v26  ;;  %v3277_v41 = vcombine.high %v114_v33, %v118_v34  ;;  %v3279_v42 = vcombine.high %v115_v36, %v119_v38  ;;  %v4398_v25 = vld [vmem:[%s5232_s3 + $0x64] ss:$16 sps:$4 sm:$0xff]   ;;  %v4404_v26 = vld [vmem:[%s5232_s3 + $0x6c] ss:$16 sps:$4 sm:$0xff]  }
  0x54   :  { %v3278_v48 = vcombine.low %v115_v36, %v119_v38  ;;  %v4428_v30 = vld [vmem:[%s5232_s3 + $0x4c] ss:$16 sps:$4 sm:$0xff]   ;;  %v4470_v36 = vld [vmem:[%s5232_s3 + $0x4] ss:$16 sps:$4 sm:$0xff]   ;;  %v4482_v38 = vld [vmem:[%s5232_s3] ss:$16 sps:$4 sm:$0xff]  }
  0x56   :  { %932 = vmatpush1.bf16.msra.mxu0 %v3212_v45  ;;  %973 = vmatpush1.bf16.msra.mxu1 %v3214_v46  ;;  %v107_v45 = vld [vmem:[%s5230_s1 + $0x298] sm:$0xff] }
  0x57   :  { %933 = vmatprep.subr.bf16.mxu0 %v3205_v47  ;;  %974 = vmatprep.subr.bf16.mxu1 %v3207_v49  ;;  %v111_v46 = vld [vmem:[%s5230_s1 + $0x2b8] sm:$0xff]  ;;  %v3276_v47 = vcombine.low %v114_v33, %v118_v34  ;;  %v3269_v49 = vcombine.high %v106_v43, %v110_v44  ;;  %v4446_v33 = vld [vmem:[%s5232_s3 + $0x24] ss:$16 sps:$4 sm:$0xff]  }
  0x58   :  { %v3271_v50 = vcombine.high %v107_v45, %v111_v46  ;;  %v4452_v34 = vld [vmem:[%s5232_s3 + $0x2c] ss:$16 sps:$4 sm:$0xff]  }
  0x5a   :  { %934 = vmatpush1.bf16.msra.mxu0 %v3204_v54  ;;  %975 = vmatpush1.bf16.msra.mxu1 %v3206_v56  ;;  %v99_v54 = vld [vmem:[%s5230_s1 + $0x258] sm:$0xff]  ;;  %v3268_v56 = vcombine.low %v106_v43, %v110_v44  ;;  %v4518_v44 = vld [vmem:[%s5232_s3 + $0x1c4] ss:$16 sps:$4 sm:$0xff]  }
  0x5b   :  { %935 = vmatprep.subr.bf16.mxu0 %v3197_v58  ;;  %976 = vmatprep.subr.bf16.mxu1 %v3199_v62  ;;  %v3270_v58 = vcombine.low %v107_v45, %v111_v46  ;;  %v3263_v60 = vcombine.high %v99_v54, %v103_v55  ;;  %v90_v62 = vld [vmem:[%s5230_s1 + $0x210] sm:$0xff]  ;;  %v4513_v43 = vld [vmem:[%s5232_s3 + $0x1e8] ss:$16 sps:$4 sm:$0xff]   ;;  %v4524_v45 = vld [vmem:[%s5232_s3 + $0x1cc] ss:$16 sps:$4 sm:$0xff]  }
  0x5c   :  { %v3252_v6 = vcombine.low %v90_v62, %v94_v63  ;;  %v4530_v46 = vld [vmem:[%s5232_s3 + $0x1c0] ss:$16 sps:$4 sm:$0xff]  }
  0x5e   :  { %936 = vmatpush1.bf16.msra.mxu0 %v3196_v0  ;;  %977 = vmatpush1.bf16.msra.mxu1 %v3198_v3  ;;  %v91_v0 = vld [vmem:[%s5230_s1 + $0x218] sm:$0xff]  ;;  %v3262_v3 = vcombine.low %v99_v54, %v103_v55  ;;  %v4578_v55 = vld [vmem:[%s5232_s3 + $0x180] ss:$16 sps:$4 sm:$0xff]  }
  0x5f   :  { %937 = vmatprep.subr.bf16.mxu0 %v3189_v4  ;;  %978 = vmatprep.subr.bf16.mxu1 %v3191_v7  ;;  %v3253_v4 = vcombine.high %v90_v62, %v94_v63  ;;  %v3255_v5 = vcombine.high %v91_v0, %v95_v1  ;;  %v3254_v7 = vcombine.low %v91_v0, %v95_v1  ;;  %v4572_v54 = vld [vmem:[%s5232_s3 + $0x18c] ss:$16 sps:$4 sm:$0xff]   ;;  %v4609_v62 = vld [vmem:[%s5232_s3 + $0x168] ss:$16 sps:$4 sm:$0xff]   ;;  %v4614_v63 = vld [vmem:[%s5232_s3 + $0x144] ss:$16 sps:$4 sm:$0xff]  }
  0x60   :  { %v4620_v0 = vld [vmem:[%s5232_s3 + $0x14c] ss:$16 sps:$4 sm:$0xff]   ;;  %v4626_v1 = vld [vmem:[%s5232_s3 + $0x140] ss:$16 sps:$4 sm:$0xff]  }
  0x62   :  { %938 = vmatpush1.bf16.msra.mxu0 %v3188_v8  ;;  %979 = vmatpush1.bf16.msra.mxu1 %v3190_v11  ;;  %v4301_v8 = vld [vmem:[%s5232_s3 + $0xe4] ss:$16 sps:$4 sm:$0xff]   ;;  %v4313_v11 = vld [vmem:[%s5232_s3 + $0xe0] ss:$16 sps:$4 sm:$0xff]  }
  0x63   :  { %939 = vmatprep.subr.bf16.mxu0 %v3309_v12  ;;  %980 = vmatprep.subr.bf16.mxu1 %v3311_v16  ;;  %v4319_v12 = vld [vmem:[%s5232_s3 + $0xe8] ss:$16 sps:$4 sm:$0xff]   ;;  %v1079_v16 = vpack.c.bf16 %v1076_v10, %v1076_v10  ;;  %v4668_v10 = vld [vmem:[%s5232_s3 + $0x10c] ss:$16 sps:$4 sm:$0xff]  }
  0x66   :  { %940 = vmatpush2.bf16.msra.mxu0 %v3308_v17  ;;  %981 = vmatpush2.bf16.msra.mxu1 %v3310_v53  ;;  %v4338_v17 = vld [vmem:[%s5232_s3 + $0xc0] ss:$16 sps:$4 sm:$0xff]  }
  0x67   :  { %941 = vmatprep.subr.bf16.mxu0 %v3301_v20  ;;  %982 = vmatprep.subr.bf16.mxu1 %v3303_v23  ;;  %v4362_v53 = vld [vmem:[%s5232_s3 + $0xa0] ss:$16 sps:$4 sm:$0xff]   ;;  %v4369_v20 = vld [vmem:[%s5232_s3 + $0xa8] ss:$16 sps:$4 sm:$0xff]  }
  0x68   :  { %v4386_v23 = vld [vmem:[%s5232_s3 + $0x80] ss:$16 sps:$4 sm:$0xff]  }
  0x6a   :  { %942 = vmatpush2.bf16.msra.mxu0 %v3300_v24  ;;  %983 = vmatpush2.bf16.msra.mxu1 %v3302_v27  ;;  %v4393_v24 = vld [vmem:[%s5232_s3 + $0x88] ss:$16 sps:$4 sm:$0xff]   ;;  %v4410_v27 = vld [vmem:[%s5232_s3 + $0x60] ss:$16 sps:$4 sm:$0xff]  }
  0x6b   :  { %943 = vmatprep.subr.bf16.mxu0 %v3293_v28  ;;  %984 = vmatprep.subr.bf16.mxu1 %v3295_v31  ;;  %v4417_v28 = vld [vmem:[%s5232_s3 + $0x68] ss:$16 sps:$4 sm:$0xff]   ;;  %v4434_v31 = vld [vmem:[%s5232_s3 + $0x40] ss:$16 sps:$4 sm:$0xff]  }
  0x6e   :  { %944 = vmatpush2.bf16.msra.mxu0 %v3292_v32  ;;  %985 = vmatpush2.bf16.msra.mxu1 %v3294_v35  ;;  %v4441_v32 = vld [vmem:[%s5232_s3 + $0x48] ss:$16 sps:$4 sm:$0xff]   ;;  %v4458_v35 = vld [vmem:[%s5232_s3 + $0x20] ss:$16 sps:$4 sm:$0xff]  }
  0x6f   :  { %945 = vmatprep.subr.bf16.mxu0 %v3285_v57  ;;  %986 = vmatprep.subr.bf16.mxu1 %v3287_v37  ;;  %v4465_v57 = vld [vmem:[%s5232_s3 + $0x28] ss:$16 sps:$4 sm:$0xff]   ;;  %v4476_v37 = vld [vmem:[%s5232_s3 + $0xc] ss:$16 sps:$4 sm:$0xff]  }
  0x72   :  { %946 = vmatpush2.bf16.msra.mxu0 %v3284_v39  ;;  %987 = vmatpush2.bf16.msra.mxu1 %v3286_v40  ;;  %v4489_v39 = vld [vmem:[%s5232_s3 + $0x8] ss:$16 sps:$4 sm:$0xff]   ;;  %v4494_v40 = vld [vmem:[%s5232_s3 + $0x1e4] ss:$16 sps:$4 sm:$0xff]  }
  0x73   :  { %947 = vmatprep.subr.bf16.mxu0 %v3277_v41  ;;  %988 = vmatprep.subr.bf16.mxu1 %v3279_v42  ;;  %v4500_v41 = vld [vmem:[%s5232_s3 + $0x1ec] ss:$16 sps:$4 sm:$0xff]   ;;  %v4506_v42 = vld [vmem:[%s5232_s3 + $0x1e0] ss:$16 sps:$4 sm:$0xff]  }
  0x76   :  { %948 = vmatpush2.bf16.msra.mxu0 %v3276_v47  ;;  %989 = vmatpush2.bf16.msra.mxu1 %v3278_v48  ;;  %v4537_v47 = vld [vmem:[%s5232_s3 + $0x1c8] ss:$16 sps:$4 sm:$0xff]   ;;  %v4542_v48 = vld [vmem:[%s5232_s3 + $0x1a4] ss:$16 sps:$4 sm:$0xff]  }
  0x77   :  { %949 = vmatprep.subr.bf16.mxu0 %v3269_v49  ;;  %990 = vmatprep.subr.bf16.mxu1 %v3271_v50  ;;  %v4548_v49 = vld [vmem:[%s5232_s3 + $0x1ac] ss:$16 sps:$4 sm:$0xff]   ;;  %v4554_v50 = vld [vmem:[%s5232_s3 + $0x1a0] ss:$16 sps:$4 sm:$0xff]  }
  0x7a   :  { %950 = vmatpush2.bf16.msra.mxu0 %v3268_v56  ;;  %991 = vmatpush2.bf16.msra.mxu1 %v3270_v58  ;;  %v4585_v56 = vld [vmem:[%s5232_s3 + $0x188] ss:$16 sps:$4 sm:$0xff]   ;;  %v4590_v58 = vld [vmem:[%s5232_s3 + $0x164] ss:$16 sps:$4 sm:$0xff]  }
  0x7b   :  { %951 = vmatprep.subr.bf16.mxu0 %v3261_v59  ;;  %992 = vmatprep.subr.bf16.mxu1 %v3263_v60  ;;  %v4596_v59 = vld [vmem:[%s5232_s3 + $0x16c] ss:$16 sps:$4 sm:$0xff]   ;;  %v4602_v60 = vld [vmem:[%s5232_s3 + $0x160] ss:$16 sps:$4 sm:$0xff]  }
  0x7e   :  { %952 = vmatpush2.bf16.msra.mxu0 %v3260_v2  ;;  %993 = vmatpush2.bf16.msra.mxu1 %v3262_v3  ;;  %v4633_v2 = vld [vmem:[%s5232_s3 + $0x148] ss:$16 sps:$4 sm:$0xff]   ;;  %v4638_v3 = vld [vmem:[%s5232_s3 + $0x124] ss:$16 sps:$4 sm:$0xff]  }
  0x7f   :  { %953 = vmatprep.subr.bf16.mxu0 %v3253_v4  ;;  %994 = vmatprep.subr.bf16.mxu1 %v3255_v5  ;;  %5259 = vst [vmem:[#allocation5_spill] sm:$0xff] %v4638_v3  ;;  %v4644_v4 = vld [vmem:[%s5232_s3 + $0x12c] ss:$16 sps:$4 sm:$0xff]   ;;  %v4650_v5 = vld [vmem:[%s5232_s3 + $0x120] ss:$16 sps:$4 sm:$0xff]  }
  0x80   :  { %5260 = vst [vmem:[#allocation6_spill] sm:$0xff] %v4644_v4 }
  0x82   :  { %954 = vmatpush2.bf16.msra.mxu0 %v3252_v6  ;;  %995 = vmatpush2.bf16.msra.mxu1 %v3254_v7  ;;  %v4657_v6 = vld [vmem:[%s5232_s3 + $0x128] ss:$16 sps:$4 sm:$0xff]   ;;  %v4662_v7 = vld [vmem:[%s5232_s3 + $0x104] ss:$16 sps:$4 sm:$0xff]  }
  0x83   :  { %1464 = vmatprep.subr.bf16.mxu0 %v4301_v8  ;;  %1505 = vmatprep.subr.bf16.mxu1 %v4306_v9 }
  0x85   :  { %956 = vmatmul.mubr.bf16.vlgmr.msra.gmra.mxu0 %v4115_v13  ;;  %997 = vmatmul.mubr.bf16.vlgmr.msra.gmra.mxu1 %v4115_v13  ;;  %v4350_v13 = vld [vmem:[%s5232_s3 + $0xa4] ss:$16 sps:$4 sm:$0xff]  }
  0x86   :  { %1465 = vmatpush1.bf16.msra.mxu0 %v4313_v11  ;;  %1506 = vmatpush1.bf16.msra.mxu1 %v4319_v12 }
  0x87   :  { %1466 = vmatprep.subr.bf16.mxu0 %v4324_v14  ;;  %1507 = vmatprep.subr.bf16.mxu1 %v4330_v15 }
  0x88   :  { %1496 = vmatprep.mubr.bf16.mxu0 %v1079_v16  ;;  %1537 = vmatprep.mubr.bf16.mxu1 %v1079_v16  ;;  %v4674_v16 = vld [vmem:[%s5232_s3 + $0x100] ss:$16 sps:$4 sm:$0xff]  }
  0x8a   :  { %1467 = vmatpush1.bf16.msra.mxu0 %v4338_v17  ;;  %1508 = vmatpush1.bf16.msra.mxu1 %v4345_v18 }
  0x8b   :  { %1468 = vmatprep.subr.bf16.mxu0 %v4350_v13  ;;  %1509 = vmatprep.subr.bf16.mxu1 %v4356_v19 }
  0x8e   :  { %1469 = vmatpush1.bf16.msra.mxu0 %v4362_v53  ;;  %1510 = vmatpush1.bf16.msra.mxu1 %v4369_v20 }
  0x8f   :  { %1470 = vmatprep.subr.bf16.mxu0 %v4374_v21  ;;  %1511 = vmatprep.subr.bf16.mxu1 %v4380_v22 }
  0x92   :  { %1471 = vmatpush1.bf16.msra.mxu0 %v4386_v23  ;;  %1512 = vmatpush1.bf16.msra.mxu1 %v4393_v24 }
  0x93   :  { %1472 = vmatprep.subr.bf16.mxu0 %v4398_v25  ;;  %1513 = vmatprep.subr.bf16.mxu1 %v4404_v26 }
  0x96   :  { %1473 = vmatpush1.bf16.msra.mxu0 %v4410_v27  ;;  %1514 = vmatpush1.bf16.msra.mxu1 %v4417_v28 }
  0x97   :  { %1474 = vmatprep.subr.bf16.mxu0 %v4422_v29  ;;  %1515 = vmatprep.subr.bf16.mxu1 %v4428_v30 }
  0x9a   :  { %1475 = vmatpush1.bf16.msra.mxu0 %v4434_v31  ;;  %1516 = vmatpush1.bf16.msra.mxu1 %v4441_v32 }
  0x9b   :  { %1476 = vmatprep.subr.bf16.mxu0 %v4446_v33  ;;  %1517 = vmatprep.subr.bf16.mxu1 %v4452_v34 }
  0x9e   :  { %1477 = vmatpush1.bf16.msra.mxu0 %v4458_v35  ;;  %1518 = vmatpush1.bf16.msra.mxu1 %v4465_v57 }
  0x9f   :  { %1478 = vmatprep.subr.bf16.mxu0 %v4470_v36  ;;  %1519 = vmatprep.subr.bf16.mxu1 %v4476_v37 }
  0xa2   :  { %1479 = vmatpush1.bf16.msra.mxu0 %v4482_v38  ;;  %1520 = vmatpush1.bf16.msra.mxu1 %v4489_v39 }
  0xa3   :  { %1480 = vmatprep.subr.bf16.mxu0 %v4494_v40  ;;  %1521 = vmatprep.subr.bf16.mxu1 %v4500_v41 }
  0xa6   :  { %1481 = vmatpush2.bf16.msra.mxu0 %v4506_v42  ;;  %1522 = vmatpush2.bf16.msra.mxu1 %v4513_v43 }
  0xa7   :  { %1482 = vmatprep.subr.bf16.mxu0 %v4518_v44  ;;  %1523 = vmatprep.subr.bf16.mxu1 %v4524_v45 }
  0xaa   :  { %1483 = vmatpush2.bf16.msra.mxu0 %v4530_v46  ;;  %1524 = vmatpush2.bf16.msra.mxu1 %v4537_v47 }
  0xab   :  { %1484 = vmatprep.subr.bf16.mxu0 %v4542_v48  ;;  %1525 = vmatprep.subr.bf16.mxu1 %v4548_v49 }
  0xae   :  { %1485 = vmatpush2.bf16.msra.mxu0 %v4554_v50  ;;  %1526 = vmatpush2.bf16.msra.mxu1 %v4561_v51 }
  0xaf   :  { %1486 = vmatprep.subr.bf16.mxu0 %v4566_v52  ;;  %1527 = vmatprep.subr.bf16.mxu1 %v4572_v54 }
  0xb2   :  { %1487 = vmatpush2.bf16.msra.mxu0 %v4578_v55  ;;  %1528 = vmatpush2.bf16.msra.mxu1 %v4585_v56 }
  0xb3   :  { %1488 = vmatprep.subr.bf16.mxu0 %v4590_v58  ;;  %1529 = vmatprep.subr.bf16.mxu1 %v4596_v59 }
  0xb6   :  { %1489 = vmatpush2.bf16.msra.mxu0 %v4602_v60  ;;  %1530 = vmatpush2.bf16.msra.mxu1 %v4609_v62 }
  0xb7   :  { %1490 = vmatprep.subr.bf16.mxu0 %v4614_v63  ;;  %1531 = vmatprep.subr.bf16.mxu1 %v4620_v0 }
  0xba   :  { %1491 = vmatpush2.bf16.msra.mxu0 %v4626_v1  ;;  %1532 = vmatpush2.bf16.msra.mxu1 %v4633_v2 }
  0xbb   :  { %1492 = vmatprep.subr.bf16.mxu0 %v4638_v3  ;;  %1533 = vmatprep.subr.bf16.mxu1 %v4644_v4  ;;  %v4681_v4 = vld [vmem:[%s5232_s3 + $0x108] ss:$16 sps:$4 sm:$0xff]   ;;  %v1078_v3 = vpack.c.bf16 %v4196_v61, %v4196_v61  ;;  %v154_v61 = vlaneseq }
  0xbe   :  { %1493 = vmatpush2.bf16.msra.mxu0 %v4650_v5  ;;  %1534 = vmatpush2.bf16.msra.mxu1 %v4657_v6 }
  0xbf   :  { %1494 = vmatprep.subr.bf16.mxu0 %v4662_v7  ;;  %1535 = vmatprep.subr.bf16.mxu1 %v4668_v10 }
  0xc2   :  { %1495 = vmatpush2.bf16.msra.mxu0 %v4674_v16  ;;  %1536 = vmatpush2.bf16.msra.mxu1 %v4681_v4 }
  0xc3   :  { %1990 = vmatprep.subr.bf16.mxu0 %v4301_v8  ;;  %2031 = vmatprep.subr.bf16.mxu1 %v4306_v9  ;;  %v155_v8 = vshrl.u32 %v154_v61, 7  ;;  %v5261_v9 = vld [vmem:[#allocation5_spill] sm:$0xff] }
  0xc5   :  { %1497 = vmatmul.mubr.bf16.vlgmr.msra.gmra.mxu0 %v1078_v3  ;;  %1538 = vmatmul.mubr.bf16.vlgmr.msra.gmra.mxu1 %v1078_v3 }
  0xc6   :  { %1991 = vmatpush1.bf16.msra.mxu0 %v4313_v11  ;;  %2032 = vmatpush1.bf16.msra.mxu1 %v4319_v12  ;;  %v5262_v11 = vld [vmem:[#allocation6_spill] sm:$0xff]  ;;  %v156_v12 = vsub.s32 0, %v155_v8 }
  0xc7   :  { %1992 = vmatprep.subr.bf16.mxu0 %v4324_v14  ;;  %2033 = vmatprep.subr.bf16.mxu1 %v4330_v15  ;;  %v152_v14 = vld [vmem:[%s5234_s2] sm:$0xff]  ;;  %v164_v15 = vsub.s32 2, %v155_v8 }
  0xca   :  { %1993 = vmatpush1.bf16.msra.mxu0 %v4338_v17  ;;  %2034 = vmatpush1.bf16.msra.mxu1 %v4345_v18  ;;  %v160_v17 = vsub.s32 1, %v155_v8  ;;  %v168_v18 = vsub.s32 3, %v155_v8 }
  0xcb   :  { %1994 = vmatprep.subr.bf16.mxu0 %v4350_v13  ;;  %2035 = vmatprep.subr.bf16.mxu1 %v4356_v19  ;;  %v157_v13 = vrot.slane %v152_v14, %v156_v12  ;;  %v165_v19 = vrot.slane %v152_v14, %v164_v15 }
  0xce   :  { %1995 = vmatpush1.bf16.msra.mxu0 %v4362_v53  ;;  %2036 = vmatpush1.bf16.msra.mxu1 %v4369_v20  ;;  %v161_v53 = vrot.slane %v152_v14, %v160_v17 }
  0xcf   :  { %1996 = vmatprep.subr.bf16.mxu0 %v4374_v21  ;;  %2037 = vmatprep.subr.bf16.mxu1 %v4380_v22  ;;  %v169_v21 = vrot.slane %v152_v14, %v168_v18 }
  0xd2   :  { %1997 = vmatpush1.bf16.msra.mxu0 %v4386_v23  ;;  %2038 = vmatpush1.bf16.msra.mxu1 %v4393_v24 }
  0xd3   :  { %1998 = vmatprep.subr.bf16.mxu0 %v4398_v25  ;;  %2039 = vmatprep.subr.bf16.mxu1 %v4404_v26 }
  0xd6   :  { %1999 = vmatpush1.bf16.msra.mxu0 %v4410_v27  ;;  %2040 = vmatpush1.bf16.msra.mxu1 %v4417_v28 }
  0xd7   :  { %2000 = vmatprep.subr.bf16.mxu0 %v4422_v29  ;;  %2041 = vmatprep.subr.bf16.mxu1 %v4428_v30 }
  0xda   :  { %2001 = vmatpush1.bf16.msra.mxu0 %v4434_v31  ;;  %2042 = vmatpush1.bf16.msra.mxu1 %v4441_v32 }
  0xdb   :  { %2002 = vmatprep.subr.bf16.mxu0 %v4446_v33  ;;  %2043 = vmatprep.subr.bf16.mxu1 %v4452_v34 }
  0xde   :  { %2003 = vmatpush1.bf16.msra.mxu0 %v4458_v35  ;;  %2044 = vmatpush1.bf16.msra.mxu1 %v4465_v57 }
  0xdf   :  { %2004 = vmatprep.subr.bf16.mxu0 %v4470_v36  ;;  %2045 = vmatprep.subr.bf16.mxu1 %v4476_v37 }
  0xe2   :  { %2005 = vmatpush1.bf16.msra.mxu0 %v4482_v38  ;;  %2046 = vmatpush1.bf16.msra.mxu1 %v4489_v39 }
  0xe3   :  { %2006 = vmatprep.subr.bf16.mxu0 %v4494_v40  ;;  %2047 = vmatprep.subr.bf16.mxu1 %v4500_v41  ;;  %v1070_v40 = vld [vmem:[%s5235_s5] sm:$0xf]  ;;  %v172_v41 = vsub.s32 4, %v155_v8 }
  0xe4   :  { %1071 = vst [vmem:[#allocation4] sm:$0xf] %v1070_v40 }
  0xe6   :  { %2007 = vmatpush2.bf16.msra.mxu0 %v4506_v42  ;;  %2048 = vmatpush2.bf16.msra.mxu1 %v4513_v43  ;;  %v180_v42 = vsub.s32 6, %v155_v8  ;;  %v176_v43 = vsub.s32 5, %v155_v8 }
  0xe7   :  { %2008 = vmatprep.subr.bf16.mxu0 %v4518_v44  ;;  %2049 = vmatprep.subr.bf16.mxu1 %v4524_v45  ;;  %v184_v44 = vsub.s32 7, %v155_v8  ;;  %v173_v45 = vrot.slane %v152_v14, %v172_v41 }
  0xea   :  { %2009 = vmatpush2.bf16.msra.mxu0 %v4530_v46  ;;  %2050 = vmatpush2.bf16.msra.mxu1 %v4537_v47  ;;  %v181_v46 = vrot.slane %v152_v14, %v180_v42  ;;  %v177_v47 = vrot.slane %v152_v14, %v176_v43 }
  0xeb   :  { %2010 = vmatprep.subr.bf16.mxu0 %v4542_v48  ;;  %2051 = vmatprep.subr.bf16.mxu1 %v4548_v49  ;;  %v185_v49 = vrot.slane %v152_v14, %v184_v44 }
  0xee   :  { %2011 = vmatpush2.bf16.msra.mxu0 %v4554_v50  ;;  %2052 = vmatpush2.bf16.msra.mxu1 %v4561_v51 }
  0xef   :  { %2012 = vmatprep.subr.bf16.mxu0 %v4566_v52  ;;  %2053 = vmatprep.subr.bf16.mxu1 %v4572_v54 }
  0xf2   :  { %2013 = vmatpush2.bf16.msra.mxu0 %v4578_v55  ;;  %2054 = vmatpush2.bf16.msra.mxu1 %v4585_v56 }
  0xf3   :  { %2014 = vmatprep.subr.bf16.mxu0 %v4590_v58  ;;  %2055 = vmatprep.subr.bf16.mxu1 %v4596_v59 }
  0xf6   :  { %2015 = vmatpush2.bf16.msra.mxu0 %v4602_v60  ;;  %2056 = vmatpush2.bf16.msra.mxu1 %v4609_v62 }
  0xf7   :  { %2016 = vmatprep.subr.bf16.mxu0 %v4614_v63  ;;  %2057 = vmatprep.subr.bf16.mxu1 %v4620_v0 }
  0xfa   :  { %2017 = vmatpush2.bf16.msra.mxu0 %v4626_v1  ;;  %2058 = vmatpush2.bf16.msra.mxu1 %v4633_v2 }
  0xfb   :  { %2018 = vmatprep.subr.bf16.mxu0 %v5261_v9  ;;  %2059 = vmatprep.subr.bf16.mxu1 %v5262_v11 }
  0xfe   :  { %2019 = vmatpush2.bf16.msra.mxu0 %v4650_v5  ;;  %2060 = vmatpush2.bf16.msra.mxu1 %v4657_v6 }
  0xff   :  { %2020 = vmatprep.subr.bf16.mxu0 %v4662_v7  ;;  %2061 = vmatprep.subr.bf16.mxu1 %v4668_v10 }
 0x102   :  { %2021 = vmatpush2.bf16.msra.mxu0 %v4674_v16  ;;  %2062 = vmatpush2.bf16.msra.mxu1 %v4681_v4 }
 0x105   :  { %v875_v20 = vpop.f32.mrf.mxu0  ;;  %v916_v23 = vpop.f32.mrf.mxu1 }
 0x106   :  { %v876_v22 = vadd.f32 %v875_v20, %v157_v13  ;;  %v917_v25 = vadd.f32 %v916_v23, %v165_v19 }
 0x107   :  { %v877_v24 = vpop.f32.mrf.mxu0  ;;  %v918_v27 = vpop.f32.mrf.mxu1 }
 0x108   :  { %v878_v26 = vadd.f32 %v877_v24, %v161_v53  ;;  %v919_v29 = vadd.f32 %v918_v27, %v169_v21 }
 0x109   :  { %v879_v28 = vpop.f32.mrf.mxu0  ;;  %v920_v32 = vpop.f32.mrf.mxu1 }
 0x10a   :  { %v1009_v30 = vcombine.low %v876_v22, %v878_v26  ;;  %v1042_v31 = vcombine.high %v876_v22, %v878_v26  ;;  %v1010_v34 = vcombine.low %v917_v25, %v919_v29  ;;  %v1043_v35 = vcombine.high %v917_v25, %v919_v29 }
 0x10b   :  { %v880_v33 = vpop.f32.mrf.mxu0  ;;  %v921_v37 = vpop.f32.mrf.mxu1 }
 0x10c   :  { %1013 = vst [vmem:[#allocation2 + $0x20] sm:$0x33] %v1009_v30  ;;  %v3312_v57 = vrot.slane %v1009_v30, 10  ;;  %1046 = vst [vmem:[#allocation2 + $0x18] sm:$0x33] %v1042_v31  ;;  %v3314_v36 = vrot.slane %v1042_v31, 10 }
 0x10d   :  { %1014 = vst [vmem:[#allocation2] sm:$0x33] %v1010_v34  ;;  %v3313_v38 = vrot.slane %v1010_v34, 10  ;;  %1047 = vst [vmem:[#allocation2 + $0x28] sm:$0x33] %v1043_v35  ;;  %v3315_v39 = vrot.slane %v1043_v35, 10 }
 0x10e   :  { %1035 = vst [vmem:[#allocation2 + $0x8] sm:$0x33] %v3312_v57  ;;  %1062 = vst [vmem:[#allocation2 + $0x38] sm:$0x33] %v3314_v36  ;;  %v1581_v31 = vld [vmem:[#allocation4] sm:$0xf] }
 0x10f   :  { %1036 = vst [vmem:[#allocation2 + $0x10] sm:$0x33] %v3313_v38  ;;  %1063 = vst [vmem:[#allocation2 + $0x30] sm:$0x33] %v3315_v39 }
 0x145   :  { %v957_v48 = vpop.f32.mrf.mxu0  ;;  %v998_v51 = vpop.f32.mrf.mxu1 }
 0x146   :  { %v958_v50 = vadd.f32 %v957_v48, %v173_v45  ;;  %v999_v52 = vadd.f32 %v998_v51, %v181_v46  ;;  %v4767_v46 = vld [vmem:[%s5232_s3 + $0xe4] ss:$16 sps:$4 sm:$0xff]   ;;  %v4777_v48 = vld [vmem:[%s5232_s3 + $0xe0] ss:$16 sps:$4 sm:$0xff]   ;;  %v4796_v51 = vld [vmem:[%s5232_s3 + $0xcc] ss:$16 sps:$4 sm:$0xff]  }
 0x147   :  { %v959_v54 = vpop.f32.mrf.mxu0  ;;  %v1000_v56 = vpop.f32.mrf.mxu1  ;;  %2516 = vmatprep.subr.bf16.mxu0 %v4767_v46 }
 0x148   :  { %v960_v55 = vadd.f32 %v959_v54, %v177_v47  ;;  %v1001_v58 = vadd.f32 %v1000_v56, %v185_v49  ;;  %v4772_v47 = vld [vmem:[%s5232_s3 + $0xec] ss:$16 sps:$4 sm:$0xff]   ;;  %v4782_v49 = vld [vmem:[%s5232_s3 + $0xe8] ss:$16 sps:$4 sm:$0xff]  }
 0x149   :  { %v961_v59 = vpop.f32.mrf.mxu0  ;;  %v1002_v63 = vpop.f32.mrf.mxu1  ;;  %2557 = vmatprep.subr.bf16.mxu1 %v4772_v47  ;;  %v4806_v54 = vld [vmem:[%s5232_s3 + $0xc8] ss:$16 sps:$4 sm:$0xff]   ;;  %v4820_v56 = vld [vmem:[%s5232_s3 + $0xac] ss:$16 sps:$4 sm:$0xff]  }
 0x14a   :  { %v1019_v60 = vcombine.low %v958_v50, %v960_v55  ;;  %v1048_v62 = vcombine.high %v958_v50, %v960_v55  ;;  %v1020_v0 = vcombine.low %v999_v52, %v1001_v58  ;;  %v1049_v1 = vcombine.high %v999_v52, %v1001_v58  ;;  %v4791_v50 = vld [vmem:[%s5232_s3 + $0xc4] ss:$16 sps:$4 sm:$0xff]   ;;  %v4801_v52 = vld [vmem:[%s5232_s3 + $0xc0] ss:$16 sps:$4 sm:$0xff]   ;;  %v4830_v59 = vld [vmem:[%s5232_s3 + $0xa8] ss:$16 sps:$4 sm:$0xff]  }
 0x14b   :  { %v962_v2 = vpop.f32.mrf.mxu0  ;;  %v1003_v5 = vpop.f32.mrf.mxu1  ;;  %v4815_v55 = vld [vmem:[%s5232_s3 + $0xa4] ss:$16 sps:$4 sm:$0xff]   ;;  %v4825_v58 = vld [vmem:[%s5232_s3 + $0xa0] ss:$16 sps:$4 sm:$0xff]  }
 0x14c   :  { %v1021_v3 = vrot.slane %v1019_v60, 6  ;;  %1040 = vst [vmem:[#allocation2 + $0x18] sm:$0xcc] %v1019_v60  ;;  %v1050_v4 = vrot.slane %v1048_v62, 6  ;;  %1066 = vst [vmem:[#allocation2 + $0x20] sm:$0xcc] %v1048_v62 }
 0x14d   :  { %v1022_v6 = vrot.slane %v1020_v0, 6  ;;  %1041 = vst [vmem:[#allocation2 + $0x28] sm:$0xcc] %v1020_v0  ;;  %v1051_v7 = vrot.slane %v1049_v1, 6  ;;  %1067 = vst [vmem:[#allocation2] sm:$0xcc] %v1049_v1 }
 0x14e   :  { %1026 = vst [vmem:[#allocation2 + $0x38] sm:$0xcc] %v1021_v3  ;;  %1054 = vst [vmem:[#allocation2 + $0x8] sm:$0xcc] %v1050_v4  ;;  %v4839_v60 = vld [vmem:[%s5232_s3 + $0x84] ss:$16 sps:$4 sm:$0xff]  }
 0x14f   :  { %1027 = vst [vmem:[#allocation2 + $0x30] sm:$0xcc] %v1022_v6  ;;  %1055 = vst [vmem:[#allocation2 + $0x10] sm:$0xcc] %v1051_v7  ;;  %v4844_v62 = vld [vmem:[%s5232_s3 + $0x8c] ss:$16 sps:$4 sm:$0xff]  }
 0x150   :  { %v4849_v63 = vld [vmem:[%s5232_s3 + $0x80] ss:$16 sps:$4 sm:$0xff]   ;;  %v4854_v0 = vld [vmem:[%s5232_s3 + $0x88] ss:$16 sps:$4 sm:$0xff]   ;;  %v4863_v1 = vld [vmem:[%s5232_s3 + $0x64] ss:$16 sps:$4 sm:$0xff]  }
 0x151   :  { %v4868_v2 = vld [vmem:[%s5232_s3 + $0x6c] ss:$16 sps:$4 sm:$0xff]   ;;  %v4873_v3 = vld [vmem:[%s5232_s3 + $0x60] ss:$16 sps:$4 sm:$0xff]   ;;  %v4878_v4 = vld [vmem:[%s5232_s3 + $0x68] ss:$16 sps:$4 sm:$0xff]  }
 0x152   :  { %v4887_v5 = vld [vmem:[%s5232_s3 + $0x44] ss:$16 sps:$4 sm:$0xff]   ;;  %v4892_v6 = vld [vmem:[%s5232_s3 + $0x4c] ss:$16 sps:$4 sm:$0xff]   ;;  %v4897_v7 = vld [vmem:[%s5232_s3 + $0x40] ss:$16 sps:$4 sm:$0xff]  }
 0x153   :  { %v1072_v11 = vld [vmem:[#allocation2 + $0x20] sm:$0xff] }
 0x154   :  { %v1073_v21 = vld [vmem:[#allocation2] sm:$0xff] }
 0x185   :  { %v1498_v10 = vpop.f32.mrf.mxu0  ;;  %v1539_v16 = vpop.f32.mrf.mxu1 }
 0x187   :  { %v1500_v61 = vpop.f32.mrf.mxu0  ;;  %v1541_v9 = vpop.f32.mrf.mxu1 }
 0x188   :  { %v1550_v8 = vcombine.low %v1498_v10, %v1500_v61  ;;  %v1551_v53 = vcombine.low %v1539_v16, %v1541_v9  ;;  %v4902_v10 = vld [vmem:[%s5232_s3 + $0x48] ss:$16 sps:$4 sm:$0xff]   ;;  %v4911_v16 = vld [vmem:[%s5232_s3 + $0x24] ss:$16 sps:$4 sm:$0xff]   ;;  %v4916_v61 = vld [vmem:[%s5232_s3 + $0x2c] ss:$16 sps:$4 sm:$0xff]  }
 0x189   :  { %v1502_v12 = vpop.f32.mrf.mxu0  ;;  %v1543_v15 = vpop.f32.mrf.mxu1  ;;  %v4926_v9 = vld [vmem:[%s5232_s3 + $0x28] ss:$16 sps:$4 sm:$0xff]  }
 0x18a   :  { %v1554_v14 = vadd.f32 %v1550_v8, %v1072_v11  ;;  %v1555_v22 = vadd.f32 %v1551_v53, %v1073_v21  ;;  %v4921_v8 = vld [vmem:[%s5232_s3 + $0x20] ss:$16 sps:$4 sm:$0xff]   ;;  %v4935_v11 = vld [vmem:[%s5232_s3 + $0x4] ss:$16 sps:$4 sm:$0xff]   ;;  %v4940_v12 = vld [vmem:[%s5232_s3 + $0xc] ss:$16 sps:$4 sm:$0xff]  }
 0x18b   :  { %v1503_v17 = vpop.f32.mrf.mxu0  ;;  %v1544_v19 = vpop.f32.mrf.mxu1  ;;  %v4950_v15 = vld [vmem:[%s5232_s3 + $0x8] ss:$16 sps:$4 sm:$0xff]   ;;  %v4983_v53 = vld [vmem:[%s5232_s3 + $0x1c4] ss:$16 sps:$4 sm:$0xff]   ;;  %v4993_v21 = vld [vmem:[%s5232_s3 + $0x1c0] ss:$16 sps:$4 sm:$0xff]  }
 0x18c   :  { %v3380_v18 = vmul.f32 -1.442695, %v1554_v14  ;;  %v1563_v13 = vrot.slane %v1554_v14, 4  ;;  %v1573_v23 = vrot.slane %v1555_v22, 4  ;;  %v4945_v14 = vld [vmem:[%s5232_s3] ss:$16 sps:$4 sm:$0xff]  }
 0x18d   :  { %v4959_v17 = vld [vmem:[%s5232_s3 + $0x1e4] ss:$16 sps:$4 sm:$0xff]   ;;  %v4974_v19 = vld [vmem:[%s5232_s3 + $0x1e8] ss:$16 sps:$4 sm:$0xff]  }
 0x18e   :  { %3790 = vpow2.f32 %v3380_v18  ;;  %v3381_v20 = vmul.f32 -1.442695, %v1563_v13  ;;  %v3382_v24 = vmul.f32 -1.442695, %v1573_v23  ;;  %v4964_v18 = vld [vmem:[%s5232_s3 + $0x1ec] ss:$16 sps:$4 sm:$0xff]  }
 0x18f   :  { %v4969_v13 = vld [vmem:[%s5232_s3 + $0x1e0] ss:$16 sps:$4 sm:$0xff]   ;;  %v5007_v23 = vld [vmem:[%s5232_s3 + $0x1a4] ss:$16 sps:$4 sm:$0xff]  }
 0x190   :  { %3792 = vpow2.f32 %v3381_v20  ;;  %v4988_v20 = vld [vmem:[%s5232_s3 + $0x1cc] ss:$16 sps:$4 sm:$0xff]  }
 0x191   :  { %3794 = vpow2.f32 %v3382_v24  ;;  %v5012_v24 = vld [vmem:[%s5232_s3 + $0x1ac] ss:$16 sps:$4 sm:$0xff]  }
 0x19b   :  { %v3791_v25 = vpop.eup %3790 }
 0x19c   :  { %v1559_v26 = vadd.f32 1.0, %v3791_v25  ;;  %v5017_v25 = vld [vmem:[%s5232_s3 + $0x1a0] ss:$16 sps:$4 sm:$0xff]  }
 0x19d   :  { %v3793_v27 = vpop.eup %3792 }
 0x19e   :  { %3796 = vrcp.f32 %v1559_v26  ;;  %v1568_v28 = vadd.f32 1.0, %v3793_v27  ;;  %v3795_v29 = vpop.eup %3794  ;;  %v5022_v26 = vld [vmem:[%s5232_s3 + $0x1a8] ss:$16 sps:$4 sm:$0xff]   ;;  %v5031_v27 = vld [vmem:[%s5232_s3 + $0x184] ss:$16 sps:$4 sm:$0xff]  }
 0x19f   :  { %3798 = vtanh.f32 %v1555_v22  ;;  %v1578_v34 = vadd.f32 1.0, %v3795_v29  ;;  %v4998_v22 = vld [vmem:[%s5232_s3 + $0x1c8] ss:$16 sps:$4 sm:$0xff]   ;;  %5263 = vst [vmem:[#allocation5_spill] sm:$0xff] %v5031_v27  ;;  %v5041_v29 = vld [vmem:[%s5232_s3 + $0x180] ss:$16 sps:$4 sm:$0xff]  }
 0x1a0   :  { %3800 = vrcp.f32 %v1568_v28  ;;  %v5036_v28 = vld [vmem:[%s5232_s3 + $0x18c] ss:$16 sps:$4 sm:$0xff]   ;;  %5265 = vst [vmem:[#allocation7_spill] sm:$0xff] %v5041_v29 }
 0x1a1   :  { %3802 = vrcp.f32 %v1578_v34  ;;  %5264 = vst [vmem:[#allocation6_spill] sm:$0xff] %v5036_v28  ;;  %v5070_v34 = vld [vmem:[%s5232_s3 + $0x168] ss:$16 sps:$4 sm:$0xff]  }
 0x1a2   :  { %5270 = vst [vmem:[#allocation12_spill] sm:$0xff] %v5070_v34 }
 0x1ab   :  { %v3797_v30 = vpop.eup %3796 }
 0x1ac   :  { %v3799_v32 = vpop.eup %3798 }
 0x1ad   :  { %v3801_v33 = vpop.eup %3800  ;;  %v1583_v57 = vmul.f32 %v3799_v32, %v3797_v30  ;;  %v5046_v30 = vld [vmem:[%s5232_s3 + $0x188] ss:$16 sps:$4 sm:$0xff]   ;;  %v5060_v32 = vld [vmem:[%s5232_s3 + $0x16c] ss:$16 sps:$4 sm:$0xff]  }
 0x1ae   :  { %v1582_v35 = vmul.f32 %v3801_v33, %v1581_v31  ;;  %v3803_v37 = vpop.eup %3802  ;;  %5266 = vst [vmem:[#allocation8_spill] sm:$0xff] %v5046_v30  ;;  %v5055_v31 = vld [vmem:[%s5232_s3 + $0x164] ss:$16 sps:$4 sm:$0xff]   ;;  %5268 = vst [vmem:[#allocation10_spill] sm:$0xff] %v5060_v32  ;;  %v5065_v33 = vld [vmem:[%s5232_s3 + $0x160] ss:$16 sps:$4 sm:$0xff]  }
 0x1af   :  { %5267 = vst [vmem:[#allocation9_spill] sm:$0xff] %v5055_v31  ;;  %5269 = vst [vmem:[#allocation11_spill] sm:$0xff] %v5065_v33 }
 0x1b0   :  { %v1584_v36 = vadd.f32 %v1583_v57, %v1582_v35  ;;  %v5079_v35 = vld [vmem:[%s5232_s3 + $0x144] ss:$16 sps:$4 sm:$0xff]   ;;  %v5084_v57 = vld [vmem:[%s5232_s3 + $0x14c] ss:$16 sps:$4 sm:$0xff]  }
 0x1b1   :  { %5271 = vst [vmem:[#allocation13_spill] sm:$0xff] %v5079_v35  ;;  %5272 = vst [vmem:[#allocation14_spill] sm:$0xff] %v5084_v57 }
 0x1b2   :  { %3804 = vtanh.f32 %v1584_v36  ;;  %1587 = vst [vmem:[#allocation4] sm:$0xf] %v1584_v36  ;;  %v5089_v36 = vld [vmem:[%s5232_s3 + $0x140] ss:$16 sps:$4 sm:$0xff]  }
 0x1b3   :  { %5273 = vst [vmem:[#allocation15_spill] sm:$0xff] %v5089_v36 }
 0x1bf   :  { %v3805_v38 = vpop.eup %3804 }
 0x1c0   :  { %v1586_v39 = vmul.f32 %v3805_v38, %v3803_v37  ;;  %v5094_v37 = vld [vmem:[%s5232_s3 + $0x148] ss:$16 sps:$4 sm:$0xff]   ;;  %v5103_v38 = vld [vmem:[%s5232_s3 + $0x120] ss:$16 sps:$4 sm:$0xff]  }
 0x1c1   :  { %5274 = vst [vmem:[#allocation16_spill] sm:$0xff] %v5094_v37  ;;  %5275 = vst [vmem:[#allocation17_spill] sm:$0xff] %v5103_v38 }
 0x1c2   :  { %1588 = vst [vmem:[#allocation3] sm:$0x3] %v1586_v39  ;;  %1589 = vst [vmem:[#allocation3 + $0x4] sm:$0xc] %v1586_v39  ;;  %v1590_v40 = vpack.c.bf16 %v1586_v39, %v1586_v39  ;;  %v5108_v39 = vld [vmem:[%s5232_s3 + $0x124] ss:$16 sps:$4 sm:$0xff]  }
 0x1c3   :  { %5276 = vst [vmem:[#allocation18_spill] sm:$0xff] %v5108_v39 }
 0x1c4   :  { %1591 = vst [vmem:[%s5236_s6] sm:$0x1] %v1590_v40  ;;  %v1595_v41 = vrot.slane %v1590_v40, 6  ;;  %v5113_v40 = vld [vmem:[%s5232_s3 + $0x128] ss:$16 sps:$4 sm:$0xff]  }
 0x1c5   :  { %5277 = vst [vmem:[#allocation19_spill] sm:$0xff] %v5113_v40 }
 0x1c6   :  { %1597 = vst [vmem:[%s5236_s6 + $0x4] sm:$0x8] %v1595_v41  ;;  %v5118_v41 = vld [vmem:[%s5232_s3 + $0x12c] ss:$16 sps:$4 sm:$0xff]  }
 0x1c7   :  { %5278 = vst [vmem:[#allocation20_spill] sm:$0xff] %v5118_v41 }
 0x1c9   :  { %v1600_v42 = vld [vmem:[#allocation3] sm:$0xff] }
 0x1ca   :  { %v1602_v43 = vcombine.high %v1600_v42, %v1600_v42  ;;  %v1604_v45 = vpack.c.bf16 %v1600_v42, %v1600_v42  ;;  %v5123_v42 = vld [vmem:[%s5232_s3 + $0x104] ss:$16 sps:$4 sm:$0xff]  }
 0x1cb   :  { %5279 = vst [vmem:[#allocation21_spill] sm:$0xff] %v5123_v42 }
 0x1cc   :  { %v1605_v44 = vpack.c.bf16 %v1602_v43, %v1602_v43  ;;  %v5129_v43 = vld [vmem:[%s5232_s3 + $0x10c] ss:$16 sps:$4 sm:$0xff]  }
 0x1cd   :  { %5280 = vst [vmem:[#allocation22_spill] sm:$0xff] %v5129_v43 }
 0x1ce   :  { %2022 = vmatprep.mubr.bf16.mxu0 %v1605_v44  ;;  %2063 = vmatprep.mubr.bf16.mxu1 %v1605_v44  ;;  %v5136_v44 = vld [vmem:[%s5232_s3 + $0x100] ss:$16 sps:$4 sm:$0xff]  }
 0x1cf   :  { %2023 = vmatmul.mubr.bf16.vlgmr.msra.gmra.mxu0 %v1604_v45  ;;  %2064 = vmatmul.mubr.bf16.vlgmr.msra.gmra.mxu1 %v1604_v45  ;;  %5281 = vst [vmem:[#allocation23_spill] sm:$0xff] %v5136_v44  ;;  %v5143_v45 = vld [vmem:[%s5232_s3 + $0x108] ss:$16 sps:$4 sm:$0xff]  }
 0x1d0   :  { %2517 = vmatpush1.bf16.msra.mxu0 %v4777_v48  ;;  %2558 = vmatpush1.bf16.msra.mxu1 %v4782_v49  ;;  %5282 = vst [vmem:[#allocation24_spill] sm:$0xff] %v5143_v45 }
 0x1d1   :  { %2518 = vmatprep.subr.bf16.mxu0 %v4791_v50  ;;  %2559 = vmatprep.subr.bf16.mxu1 %v4796_v51 }
 0x1d4   :  { %2519 = vmatpush1.bf16.msra.mxu0 %v4801_v52  ;;  %2560 = vmatpush1.bf16.msra.mxu1 %v4806_v54 }
 0x1d5   :  { %2520 = vmatprep.subr.bf16.mxu0 %v4815_v55  ;;  %2561 = vmatprep.subr.bf16.mxu1 %v4820_v56 }
 0x1d8   :  { %2521 = vmatpush1.bf16.msra.mxu0 %v4825_v58  ;;  %2562 = vmatpush1.bf16.msra.mxu1 %v4830_v59 }
 0x1d9   :  { %2522 = vmatprep.subr.bf16.mxu0 %v4839_v60  ;;  %2563 = vmatprep.subr.bf16.mxu1 %v4844_v62 }
 0x1dc   :  { %2523 = vmatpush1.bf16.msra.mxu0 %v4849_v63  ;;  %2564 = vmatpush1.bf16.msra.mxu1 %v4854_v0 }
 0x1dd   :  { %2524 = vmatprep.subr.bf16.mxu0 %v4863_v1  ;;  %2565 = vmatprep.subr.bf16.mxu1 %v4868_v2 }
 0x1e0   :  { %2525 = vmatpush1.bf16.msra.mxu0 %v4873_v3  ;;  %2566 = vmatpush1.bf16.msra.mxu1 %v4878_v4 }
 0x1e1   :  { %2526 = vmatprep.subr.bf16.mxu0 %v4887_v5  ;;  %2567 = vmatprep.subr.bf16.mxu1 %v4892_v6 }
 0x1e4   :  { %2527 = vmatpush1.bf16.msra.mxu0 %v4897_v7  ;;  %2568 = vmatpush1.bf16.msra.mxu1 %v4902_v10 }
 0x1e5   :  { %2528 = vmatprep.subr.bf16.mxu0 %v4911_v16  ;;  %2569 = vmatprep.subr.bf16.mxu1 %v4916_v61 }
 0x1e8   :  { %2529 = vmatpush1.bf16.msra.mxu0 %v4921_v8  ;;  %2570 = vmatpush1.bf16.msra.mxu1 %v4926_v9 }
 0x1e9   :  { %2530 = vmatprep.subr.bf16.mxu0 %v4935_v11  ;;  %2571 = vmatprep.subr.bf16.mxu1 %v4940_v12 }
 0x1ec   :  { %2531 = vmatpush1.bf16.msra.mxu0 %v4945_v14  ;;  %2572 = vmatpush1.bf16.msra.mxu1 %v4950_v15 }
 0x1ed   :  { %2532 = vmatprep.subr.bf16.mxu0 %v4959_v17  ;;  %2573 = vmatprep.subr.bf16.mxu1 %v4964_v18 }
 0x1f0   :  { %2533 = vmatpush2.bf16.msra.mxu0 %v4969_v13  ;;  %2574 = vmatpush2.bf16.msra.mxu1 %v4974_v19 }
 0x1f1   :  { %2534 = vmatprep.subr.bf16.mxu0 %v4983_v53  ;;  %2575 = vmatprep.subr.bf16.mxu1 %v4988_v20 }
 0x1f4   :  { %2535 = vmatpush2.bf16.msra.mxu0 %v4993_v21  ;;  %2576 = vmatpush2.bf16.msra.mxu1 %v4998_v22 }
 0x1f5   :  { %2536 = vmatprep.subr.bf16.mxu0 %v5007_v23  ;;  %2577 = vmatprep.subr.bf16.mxu1 %v5012_v24 }
 0x1f8   :  { %2537 = vmatpush2.bf16.msra.mxu0 %v5017_v25  ;;  %2578 = vmatpush2.bf16.msra.mxu1 %v5022_v26 }
 0x1f9   :  { %2538 = vmatprep.subr.bf16.mxu0 %v5031_v27  ;;  %2579 = vmatprep.subr.bf16.mxu1 %v5036_v28 }
 0x1fc   :  { %2539 = vmatpush2.bf16.msra.mxu0 %v5041_v29  ;;  %2580 = vmatpush2.bf16.msra.mxu1 %v5046_v30 }
 0x1fd   :  { %2540 = vmatprep.subr.bf16.mxu0 %v5055_v31  ;;  %2581 = vmatprep.subr.bf16.mxu1 %v5060_v32 }
 0x200   :  { %2541 = vmatpush2.bf16.msra.mxu0 %v5065_v33  ;;  %2582 = vmatpush2.bf16.msra.mxu1 %v5070_v34 }
 0x201   :  { %2542 = vmatprep.subr.bf16.mxu0 %v5079_v35  ;;  %2583 = vmatprep.subr.bf16.mxu1 %v5084_v57 }
 0x204   :  { %2543 = vmatpush2.bf16.msra.mxu0 %v5089_v36  ;;  %2584 = vmatpush2.bf16.msra.mxu1 %v5094_v37  ;;  %v1598_v37 = vld [vmem:[#allocation2 + $0x8] sm:$0xff] }
 0x205   :  { %2544 = vmatprep.subr.bf16.mxu0 %v5108_v39  ;;  %2585 = vmatprep.subr.bf16.mxu1 %v5118_v41 }
 0x208   :  { %2545 = vmatpush2.bf16.msra.mxu0 %v5103_v38  ;;  %2586 = vmatpush2.bf16.msra.mxu1 %v5113_v40 }
 0x209   :  { %2546 = vmatprep.subr.bf16.mxu0 %v5123_v42  ;;  %2587 = vmatprep.subr.bf16.mxu1 %v5129_v43 }
 0x20c   :  { %2547 = vmatpush2.bf16.msra.mxu0 %v5136_v44  ;;  %2588 = vmatpush2.bf16.msra.mxu1 %v5143_v45 }
 0x20d   :  { %3042 = vmatprep.subr.bf16.mxu0 %v4767_v46  ;;  %3083 = vmatprep.subr.bf16.mxu1 %v4772_v47  ;;  %v1599_v46 = vld [vmem:[#allocation2 + $0x10] sm:$0xff] }
 0x28f   :  { %v2024_v38 = vpop.f32.mrf.mxu0  ;;  %v2065_v41 = vpop.f32.mrf.mxu1 }
 0x291   :  { %v2026_v40 = vpop.f32.mrf.mxu0  ;;  %v2067_v39 = vpop.f32.mrf.mxu1 }
 0x292   :  { %v2076_v42 = vcombine.low %v2024_v38, %v2026_v40  ;;  %v2077_v44 = vcombine.low %v2065_v41, %v2067_v39  ;;  %v2107_v38 = vld [vmem:[#allocation4] sm:$0xf] }
 0x293   :  { %v2028_v36 = vpop.f32.mrf.mxu0  ;;  %v2069_v57 = vpop.f32.mrf.mxu1 }
 0x294   :  { %v2080_v35 = vadd.f32 %v2076_v42, %v1598_v37  ;;  %v2081_v31 = vadd.f32 %v2077_v44, %v1599_v46 }
 0x295   :  { %v2029_v34 = vpop.f32.mrf.mxu0  ;;  %v2070_v33 = vpop.f32.mrf.mxu1 }
 0x296   :  { %v3448_v43 = vmul.f32 -1.442695, %v2080_v35  ;;  %v2089_v32 = vrot.slane %v2080_v35, 4  ;;  %v2099_v47 = vrot.slane %v2081_v31, 4 }
 0x298   :  { %3806 = vpow2.f32 %v3448_v43  ;;  %v3449_v45 = vmul.f32 -1.442695, %v2089_v32  ;;  %v3450_v30 = vmul.f32 -1.442695, %v2099_v47 }
 0x29a   :  { %3808 = vpow2.f32 %v3449_v45 }
 0x29b   :  { %3810 = vpow2.f32 %v3450_v30 }
 0x2a5   :  { %v3807_v29 = vpop.eup %3806 }
 0x2a6   :  { %v2085_v28 = vadd.f32 1.0, %v3807_v29 }
 0x2a7   :  { %v3809_v27 = vpop.eup %3808 }
 0x2a8   :  { %3812 = vrcp.f32 %v2085_v28  ;;  %v2094_v36 = vadd.f32 1.0, %v3809_v27  ;;  %v3811_v34 = vpop.eup %3810 }
 0x2a9   :  { %3814 = vtanh.f32 %v2081_v31  ;;  %v2104_v37 = vadd.f32 1.0, %v3811_v34 }
 0x2aa   :  { %3816 = vrcp.f32 %v2094_v36 }
 0x2ab   :  { %3818 = vrcp.f32 %v2104_v37 }
 0x2b5   :  { %v3813_v33 = vpop.eup %3812 }
 0x2b6   :  { %v3815_v57 = vpop.eup %3814 }
 0x2b7   :  { %v3817_v35 = vpop.eup %3816  ;;  %v2109_v39 = vmul.f32 %v3815_v57, %v3813_v33 }
 0x2b8   :  { %v2108_v32 = vmul.f32 %v3817_v35, %v2107_v38  ;;  %v3819_v41 = vpop.eup %3818 }
 0x2ba   :  { %v2110_v40 = vadd.f32 %v2109_v39, %v2108_v32 }
 0x2bc   :  { %3820 = vtanh.f32 %v2110_v40  ;;  %2113 = vst [vmem:[#allocation4] sm:$0xf] %v2110_v40 }
 0x2c3   :  { %v2633_v57 = vld [vmem:[#allocation4] sm:$0xf] }
 0x2c9   :  { %v3821_v29 = vpop.eup %3820 }
 0x2ca   :  { %v2112_v42 = vmul.f32 %v3821_v29, %v3819_v41 }
 0x2cc   :  { %2114 = vst [vmem:[#allocation3] sm:$0x3] %v2112_v42  ;;  %2115 = vst [vmem:[#allocation3 + $0x4] sm:$0xc] %v2112_v42  ;;  %v3589_v27 = vpack.c.bf16 %v2112_v42, %v2112_v42 }
 0x2ce   :  { %v2120_v28 = vrot.slane %v3589_v27, 7 }
 0x2d0   :  { %2122 = vst [vmem:[%s5236_s6] sm:$0x2] %v2120_v28  ;;  %2123 = vst [vmem:[%s5236_s6 + $0x4] sm:$0x4] %v2120_v28 }
 0x2d3   :  { %v2126_v30 = vld [vmem:[#allocation3] sm:$0xff] }
 0x2d4   :  { %v2128_v31 = vcombine.high %v2126_v30, %v2126_v30  ;;  %v2130_v44 = vpack.c.bf16 %v2126_v30, %v2126_v30 }
 0x2d6   :  { %v2131_v43 = vpack.c.bf16 %v2128_v31, %v2128_v31 }
 0x2d8   :  { %2548 = vmatprep.mubr.bf16.mxu0 %v2131_v43  ;;  %2589 = vmatprep.mubr.bf16.mxu1 %v2131_v43 }
 0x2d9   :  { %2549 = vmatmul.mubr.bf16.vlgmr.msra.gmra.mxu0 %v2130_v44  ;;  %2590 = vmatmul.mubr.bf16.vlgmr.msra.gmra.mxu1 %v2130_v44 }
 0x2da   :  { %3043 = vmatpush1.bf16.msra.mxu0 %v4777_v48  ;;  %3084 = vmatpush1.bf16.msra.mxu1 %v4782_v49  ;;  %v5283_v48 = vld [vmem:[#allocation5_spill] sm:$0xff]  ;;  %v5284_v49 = vld [vmem:[#allocation6_spill] sm:$0xff] }
 0x2db   :  { %3044 = vmatprep.subr.bf16.mxu0 %v4791_v50  ;;  %3085 = vmatprep.subr.bf16.mxu1 %v4796_v51  ;;  %v5285_v50 = vld [vmem:[#allocation7_spill] sm:$0xff]  ;;  %v5286_v51 = vld [vmem:[#allocation8_spill] sm:$0xff] }
 0x2de   :  { %3045 = vmatpush1.bf16.msra.mxu0 %v4801_v52  ;;  %3086 = vmatpush1.bf16.msra.mxu1 %v4806_v54  ;;  %v5287_v52 = vld [vmem:[#allocation9_spill] sm:$0xff]  ;;  %v5288_v54 = vld [vmem:[#allocation10_spill] sm:$0xff] }
 0x2df   :  { %3046 = vmatprep.subr.bf16.mxu0 %v4815_v55  ;;  %3087 = vmatprep.subr.bf16.mxu1 %v4820_v56  ;;  %v5289_v55 = vld [vmem:[#allocation11_spill] sm:$0xff]  ;;  %v5290_v56 = vld [vmem:[#allocation12_spill] sm:$0xff] }
 0x2e2   :  { %3047 = vmatpush1.bf16.msra.mxu0 %v4825_v58  ;;  %3088 = vmatpush1.bf16.msra.mxu1 %v4830_v59  ;;  %v5291_v58 = vld [vmem:[#allocation13_spill] sm:$0xff]  ;;  %v5292_v59 = vld [vmem:[#allocation14_spill] sm:$0xff] }
 0x2e3   :  { %3048 = vmatprep.subr.bf16.mxu0 %v4839_v60  ;;  %3089 = vmatprep.subr.bf16.mxu1 %v4844_v62  ;;  %v5293_v60 = vld [vmem:[#allocation15_spill] sm:$0xff]  ;;  %v5294_v62 = vld [vmem:[#allocation16_spill] sm:$0xff] }
 0x2e6   :  { %3049 = vmatpush1.bf16.msra.mxu0 %v4849_v63  ;;  %3090 = vmatpush1.bf16.msra.mxu1 %v4854_v0  ;;  %v5295_v63 = vld [vmem:[#allocation18_spill] sm:$0xff]  ;;  %v5296_v0 = vld [vmem:[#allocation20_spill] sm:$0xff] }
 0x2e7   :  { %3050 = vmatprep.subr.bf16.mxu0 %v4863_v1  ;;  %3091 = vmatprep.subr.bf16.mxu1 %v4868_v2  ;;  %v5297_v1 = vld [vmem:[#allocation17_spill] sm:$0xff]  ;;  %v5298_v2 = vld [vmem:[#allocation19_spill] sm:$0xff] }
 0x2ea   :  { %3051 = vmatpush1.bf16.msra.mxu0 %v4873_v3  ;;  %3092 = vmatpush1.bf16.msra.mxu1 %v4878_v4  ;;  %v5299_v3 = vld [vmem:[#allocation21_spill] sm:$0xff]  ;;  %v5300_v4 = vld [vmem:[#allocation22_spill] sm:$0xff] }
 0x2eb   :  { %3052 = vmatprep.subr.bf16.mxu0 %v4887_v5  ;;  %3093 = vmatprep.subr.bf16.mxu1 %v4892_v6  ;;  %v5301_v5 = vld [vmem:[#allocation23_spill] sm:$0xff]  ;;  %v5302_v6 = vld [vmem:[#allocation24_spill] sm:$0xff] }
 0x2ee   :  { %3053 = vmatpush1.bf16.msra.mxu0 %v4897_v7  ;;  %3094 = vmatpush1.bf16.msra.mxu1 %v4902_v10 }
 0x2ef   :  { %3054 = vmatprep.subr.bf16.mxu0 %v4911_v16  ;;  %3095 = vmatprep.subr.bf16.mxu1 %v4916_v61 }
 0x2f2   :  { %3055 = vmatpush1.bf16.msra.mxu0 %v4921_v8  ;;  %3096 = vmatpush1.bf16.msra.mxu1 %v4926_v9  ;;  %v2124_v9 = vld [vmem:[#allocation2 + $0x18] sm:$0xff] }
 0x2f3   :  { %3056 = vmatprep.subr.bf16.mxu0 %v4935_v11  ;;  %3097 = vmatprep.subr.bf16.mxu1 %v4940_v12 }
 0x2f6   :  { %3057 = vmatpush1.bf16.msra.mxu0 %v4945_v14  ;;  %3098 = vmatpush1.bf16.msra.mxu1 %v4950_v15 }
 0x2f7   :  { %3058 = vmatprep.subr.bf16.mxu0 %v4959_v17  ;;  %3099 = vmatprep.subr.bf16.mxu1 %v4964_v18 }
 0x2fa   :  { %3059 = vmatpush2.bf16.msra.mxu0 %v4969_v13  ;;  %3100 = vmatpush2.bf16.msra.mxu1 %v4974_v19 }
 0x2fb   :  { %3060 = vmatprep.subr.bf16.mxu0 %v4983_v53  ;;  %3101 = vmatprep.subr.bf16.mxu1 %v4988_v20  ;;  %v2125_v20 = vld [vmem:[#allocation2 + $0x28] sm:$0xff] }
 0x2fe   :  { %3061 = vmatpush2.bf16.msra.mxu0 %v4993_v21  ;;  %3102 = vmatpush2.bf16.msra.mxu1 %v4998_v22 }
 0x2ff   :  { %3062 = vmatprep.subr.bf16.mxu0 %v5007_v23  ;;  %3103 = vmatprep.subr.bf16.mxu1 %v5012_v24 }
 0x302   :  { %3063 = vmatpush2.bf16.msra.mxu0 %v5017_v25  ;;  %3104 = vmatpush2.bf16.msra.mxu1 %v5022_v26 }
 0x303   :  { %3064 = vmatprep.subr.bf16.mxu0 %v5283_v48  ;;  %3105 = vmatprep.subr.bf16.mxu1 %v5284_v49 }
 0x306   :  { %3065 = vmatpush2.bf16.msra.mxu0 %v5285_v50  ;;  %3106 = vmatpush2.bf16.msra.mxu1 %v5286_v51  ;;  %v2650_v50 = vld [vmem:[#allocation2 + $0x38] sm:$0xff] }
 0x307   :  { %3066 = vmatprep.subr.bf16.mxu0 %v5287_v52  ;;  %3107 = vmatprep.subr.bf16.mxu1 %v5288_v54 }
 0x30a   :  { %3067 = vmatpush2.bf16.msra.mxu0 %v5289_v55  ;;  %3108 = vmatpush2.bf16.msra.mxu1 %v5290_v56 }
 0x30b   :  { %3068 = vmatprep.subr.bf16.mxu0 %v5291_v58  ;;  %3109 = vmatprep.subr.bf16.mxu1 %v5292_v59 }
 0x30e   :  { %3069 = vmatpush2.bf16.msra.mxu0 %v5293_v60  ;;  %3110 = vmatpush2.bf16.msra.mxu1 %v5294_v62 }
 0x30f   :  { %3070 = vmatprep.subr.bf16.mxu0 %v5295_v63  ;;  %3111 = vmatprep.subr.bf16.mxu1 %v5296_v0  ;;  %v2651_v63 = vld [vmem:[#allocation2 + $0x30] sm:$0xff] }
 0x312   :  { %3071 = vmatpush2.bf16.msra.mxu0 %v5297_v1  ;;  %3112 = vmatpush2.bf16.msra.mxu1 %v5298_v2 }
 0x313   :  { %3072 = vmatprep.subr.bf16.mxu0 %v5299_v3  ;;  %3113 = vmatprep.subr.bf16.mxu1 %v5300_v4 }
 0x316   :  { %3073 = vmatpush2.bf16.msra.mxu0 %v5301_v5  ;;  %3114 = vmatpush2.bf16.msra.mxu1 %v5302_v6 }
 0x399   :  { %v2550_v7 = vpop.f32.mrf.mxu0  ;;  %v2591_v10 = vpop.f32.mrf.mxu1 }
 0x39b   :  { %v2552_v16 = vpop.f32.mrf.mxu0  ;;  %v2593_v61 = vpop.f32.mrf.mxu1 }
 0x39c   :  { %v2602_v8 = vcombine.low %v2550_v7, %v2552_v16  ;;  %v2603_v19 = vcombine.low %v2591_v10, %v2593_v61 }
 0x39d   :  { %v2554_v11 = vpop.f32.mrf.mxu0  ;;  %v2595_v12 = vpop.f32.mrf.mxu1 }
 0x39e   :  { %v2606_v14 = vadd.f32 %v2602_v8, %v2124_v9  ;;  %v2607_v21 = vadd.f32 %v2603_v19, %v2125_v20 }
 0x39f   :  { %v2555_v15 = vpop.f32.mrf.mxu0  ;;  %v2596_v17 = vpop.f32.mrf.mxu1 }
 0x3a0   :  { %v3516_v18 = vmul.f32 -1.442695, %v2606_v14  ;;  %v2615_v13 = vrot.slane %v2606_v14, 4  ;;  %v2625_v22 = vrot.slane %v2607_v21, 4 }
 0x3a2   :  { %3822 = vpow2.f32 %v3516_v18  ;;  %v3517_v53 = vmul.f32 -1.442695, %v2615_v13  ;;  %v3518_v23 = vmul.f32 -1.442695, %v2625_v22 }
 0x3a4   :  { %3824 = vpow2.f32 %v3517_v53 }
 0x3a5   :  { %3826 = vpow2.f32 %v3518_v23 }
 0x3af   :  { %v3823_v24 = vpop.eup %3822 }
 0x3b0   :  { %v2611_v25 = vadd.f32 1.0, %v3823_v24 }
 0x3b1   :  { %v3825_v26 = vpop.eup %3824 }
 0x3b2   :  { %3828 = vrcp.f32 %v2611_v25  ;;  %v2620_v45 = vadd.f32 1.0, %v3825_v26  ;;  %v3827_v46 = vpop.eup %3826 }
 0x3b3   :  { %3830 = vtanh.f32 %v2607_v21  ;;  %v2630_v33 = vadd.f32 1.0, %v3827_v46 }
 0x3b4   :  { %3832 = vrcp.f32 %v2620_v45 }
 0x3b5   :  { %3834 = vrcp.f32 %v2630_v33 }
 0x3bf   :  { %v3829_v47 = vpop.eup %3828 }
 0x3c0   :  { %v3831_v36 = vpop.eup %3830 }
 0x3c1   :  { %v3833_v34 = vpop.eup %3832  ;;  %v2635_v37 = vmul.f32 %v3831_v36, %v3829_v47 }
 0x3c2   :  { %v2634_v35 = vmul.f32 %v3833_v34, %v2633_v57  ;;  %v3835_v32 = vpop.eup %3834 }
 0x3c4   :  { %v2636_v38 = vadd.f32 %v2635_v37, %v2634_v35 }
 0x3c6   :  { %3836 = vtanh.f32 %v2636_v38  ;;  %2639 = vst [vmem:[#allocation4] sm:$0xf] %v2636_v38 }
 0x3cd   :  { %v3159_v9 = vld [vmem:[#allocation4] sm:$0xf] }
 0x3d3   :  { %v3837_v39 = vpop.eup %3836 }
 0x3d4   :  { %v2638_v40 = vmul.f32 %v3837_v39, %v3835_v32 }
 0x3d6   :  { %2640 = vst [vmem:[#allocation3] sm:$0x3] %v2638_v40  ;;  %2641 = vst [vmem:[#allocation3 + $0x4] sm:$0xc] %v2638_v40  ;;  %v2642_v41 = vpack.c.bf16 %v2638_v40, %v2638_v40 }
 0x3d8   :  { %v2646_v29 = vrot.slane %v2642_v41, 6  ;;  %2649 = vst [vmem:[%s5236_s6 + $0x4] sm:$0x2] %v2642_v41 }
 0x3da   :  { %2648 = vst [vmem:[%s5236_s6] sm:$0x4] %v2646_v29 }
 0x3dd   :  { %v2652_v42 = vld [vmem:[#allocation3] sm:$0xff] }
 0x3de   :  { %v2654_v27 = vcombine.high %v2652_v42, %v2652_v42  ;;  %v2656_v30 = vpack.c.bf16 %v2652_v42, %v2652_v42 }
 0x3e0   :  { %v2657_v28 = vpack.c.bf16 %v2654_v27, %v2654_v27 }
 0x3e2   :  { %3074 = vmatprep.mubr.bf16.mxu0 %v2657_v28  ;;  %3115 = vmatprep.mubr.bf16.mxu1 %v2657_v28 }
 0x3e3   :  { %3075 = vmatmul.mubr.bf16.vlgmr.msra.gmra.mxu0 %v2656_v30  ;;  %3116 = vmatmul.mubr.bf16.vlgmr.msra.gmra.mxu1 %v2656_v30 }
 0x4a3   :  { %v3076_v31 = vpop.f32.mrf.mxu0  ;;  %v3117_v43 = vpop.f32.mrf.mxu1 }
 0x4a5   :  { %v3078_v44 = vpop.f32.mrf.mxu0  ;;  %v3119_v48 = vpop.f32.mrf.mxu1 }
 0x4a6   :  { %v3128_v49 = vcombine.low %v3076_v31, %v3078_v44  ;;  %v3129_v60 = vcombine.low %v3117_v43, %v3119_v48 }
 0x4a7   :  { %v3080_v51 = vpop.f32.mrf.mxu0  ;;  %v3121_v52 = vpop.f32.mrf.mxu1 }
 0x4a8   :  { %v3132_v54 = vadd.f32 %v3128_v49, %v2650_v50  ;;  %v3133_v0 = vadd.f32 %v3129_v60, %v2651_v63 }
 0x4a9   :  { %v3081_v55 = vpop.f32.mrf.mxu0  ;;  %v3122_v56 = vpop.f32.mrf.mxu1 }
 0x4aa   :  { %v3584_v58 = vmul.f32 -1.442695, %v3132_v54  ;;  %v3141_v59 = vrot.slane %v3132_v54, 4  ;;  %v3151_v1 = vrot.slane %v3133_v0, 4 }
 0x4ac   :  { %3838 = vpow2.f32 %v3584_v58  ;;  %v3585_v62 = vmul.f32 -1.442695, %v3141_v59  ;;  %v3586_v2 = vmul.f32 -1.442695, %v3151_v1 }
 0x4ae   :  { %3840 = vpow2.f32 %v3585_v62 }
 0x4af   :  { %3842 = vpow2.f32 %v3586_v2 }
 0x4b9   :  { %v3839_v3 = vpop.eup %3838 }
 0x4ba   :  { %v3137_v4 = vadd.f32 1.0, %v3839_v3 }
 0x4bb   :  { %v3841_v5 = vpop.eup %3840 }
 0x4bc   :  { %3844 = vrcp.f32 %v3137_v4  ;;  %v3146_v6 = vadd.f32 1.0, %v3841_v5  ;;  %v3843_v7 = vpop.eup %3842 }
 0x4bd   :  { %3846 = vtanh.f32 %v3133_v0  ;;  %v3156_v8 = vadd.f32 1.0, %v3843_v7 }
 0x4be   :  { %3848 = vrcp.f32 %v3146_v6 }
 0x4bf   :  { %3850 = vrcp.f32 %v3156_v8 }
 0x4c9   :  { %v3845_v10 = vpop.eup %3844 }
 0x4ca   :  { %v3847_v16 = vpop.eup %3846 }
 0x4cb   :  { %v3849_v61 = vpop.eup %3848  ;;  %v3161_v12 = vmul.f32 %v3847_v16, %v3845_v10 }
 0x4cc   :  { %v3160_v11 = vmul.f32 %v3849_v61, %v3159_v9  ;;  %v3851_v15 = vpop.eup %3850 }
 0x4ce   :  { %v3162_v14 = vadd.f32 %v3161_v12, %v3160_v11 }
 0x4d0   :  { %3852 = vtanh.f32 %v3162_v14  ;;  %3165 = vst [vmem:[#allocation4] sm:$0xf] %v3162_v14 }
 0x4dd   :  { %v3853_v17 = vpop.eup %3852 }
 0x4de   :  { %v3164_v18 = vmul.f32 %v3853_v17, %v3851_v15 }
 0x4e0   :  { %3166 = vst [vmem:[#allocation3] sm:$0x3] %v3164_v18  ;;  %3167 = vst [vmem:[#allocation3 + $0x4] sm:$0xc] %v3164_v18  ;;  %v3591_v13 = vpack.c.bf16 %v3164_v18, %v3164_v18 }
 0x4e2   :  { %v3172_v19 = vrot.slane %v3591_v13, 5 }
 0x4e4   :  { %3174 = vst [vmem:[%s5236_s6] sm:$0x8] %v3172_v19  ;;  %v3175_v53 = vrot.slane %v3172_v19, 4 }
 0x4e6   :  { %3177 = vst [vmem:[%s5236_s6 + $0x4] sm:$0x1] %v3175_v53 }

</bundles_post_ra>
